<compile_context>
chip_gen: v7x
topology: tpu7x:2x2x1
jax: 0.10.0
libtpu: 0.0.40
codegen_flags: <defaults>
</compile_context>

<pallas_src>
import numpy as np

import jax
import jax.numpy as jnp
from jax.experimental import pallas as pl
from jax.experimental.pallas import tpu as pltpu

# ------------------------- scaled-down config -------------------------------
B = 2            # batch
T = 512          # time samples (t in forward)
CH = 4           # in_channels
SR = 200
N_FFT = 128
WIN_LENGTH = 64
HOP = 32         # hop_length
N_MELS = 16
FMIN, FMAX = 0.0, 100.0
OUT_H, OUT_W = 16, 32          # output_size
IN_EPS = 1e-5                  # nn.InstanceNorm1d default eps

N_FREQ = N_FFT // 2 + 1        # 65
N_FRAMES = 1 + T // HOP        # 17  (torch.stft / nnAudio with center=True)
NFP = 128                      # freq bins zero-padded to full lane width
HALF = N_FRAMES * NFP          # 2176  (columns per cos / sin half)
OUT_HW = OUT_H * OUT_W         # 512   (lane-dense output row)


# ------------------------- deterministic "parameters" -----------------------
def _hz_to_mel(f):
    f = np.asarray(f, dtype=np.float64)
    f_sp = 200.0 / 3.0
    mels = f / f_sp
    min_log_hz = 1000.0
    min_log_mel = min_log_hz / f_sp
    logstep = np.log(6.4) / 27.0
    mels = np.where(f >= min_log_hz,
                    min_log_mel + np.log(np.maximum(f, 1e-12) / min_log_hz) / logstep,
                    mels)
    return mels


def _mel_to_hz(m):
    m = np.asarray(m, dtype=np.float64)
    f_sp = 200.0 / 3.0
    freqs = m * f_sp
    min_log_hz = 1000.0
    min_log_mel = min_log_hz / f_sp
    logstep = np.log(6.4) / 27.0
    freqs = np.where(m >= min_log_mel,
                     min_log_hz * np.exp(logstep * (m - min_log_mel)),
                     freqs)
    return freqs


def mel_filterbank(sr, n_fft, n_mels, fmin, fmax):
    """Slaney-normalized triangular mel filterbank (librosa/nnAudio default)."""
    n_freq = n_fft // 2 + 1
    fftfreqs = np.linspace(0.0, sr / 2.0, n_freq)
    mel_pts = np.linspace(_hz_to_mel(fmin), _hz_to_mel(fmax), n_mels + 2)
    mel_f = _mel_to_hz(mel_pts)
    fdiff = np.diff(mel_f)
    ramps = mel_f[:, None] - fftfreqs[None, :]
    lower = -ramps[:-2] / fdiff[:-1, None]
    upper = ramps[2:] / fdiff[1:, None]
    weights = np.maximum(0.0, np.minimum(lower, upper))
    enorm = 2.0 / (mel_f[2:n_mels + 2] - mel_f[:n_mels])
    weights = weights * enorm[:, None]
    return weights                                   # (n_mels, n_freq), float64


def build_constants():
    """Build the two fused constant matrices (host-side, exact in f64, cast bf16).

    Bri  (T, 2*HALF): reflect-pad + framing + centered periodic-Hann window +
                      real-DFT (cos block | sin block), freq padded to 128.
    C    (HALF, OUT_H*OUT_W): mel filterbank (Slaney) + nearest-neighbor
                      interpolation to (OUT_H, OUT_W) + the mel/time transpose,
                      so power @ C is already the flattened NCHW output row.
    """
    pad = N_FFT // 2

    # periodic Hann window (torch.hann_window default), centered inside n_fft
    n = np.arange(WIN_LENGTH)
    win = 0.5 - 0.5 * np.cos(2.0 * np.pi * n / WIN_LENGTH)
    win_full = np.zeros(N_FFT, dtype=np.float64)
    lp = (N_FFT - WIN_LENGTH) // 2
    win_full[lp:lp + WIN_LENGTH] = win

    # real-DFT basis with the window folded in (sign of sin irrelevant for power)
    k = np.arange(N_FREQ)
    nn_ = np.arange(N_FFT)
    ang = 2.0 * np.pi * np.outer(nn_, k) / N_FFT          # (N_FFT, N_FREQ)
    cosb = win_full[:, None] * np.cos(ang)
    sinb = win_full[:, None] * np.sin(ang)

    # reflect-pad index map: padded position p -> original sample index
    q = np.arange(T + 2 * pad) - pad
    orig = np.where(q < 0, -q, np.where(q < T, q, 2 * T - 2 - q))

    # Fused pad/frame/window/DFT basis
    Bri = np.zeros((T, 2 * HALF), dtype=np.float64)
    col_k = np.arange(N_FFT)
    for f in range(N_FRAMES):
        src = orig[f * HOP: f * HOP + N_FFT]               # (N_FFT,) orig indices
        R = np.zeros((T, N_FFT), dtype=np.float64)
        np.add.at(R, (src, col_k), 1.0)                    # accumulate (reflection
                                                           # can hit a sample twice)
        Bri[:, f * NFP: f * NFP + N_FREQ] = R @ cosb
        Bri[:, HALF + f * NFP: HALF + f * NFP + N_FREQ] = R @ sinb

    # Fused mel-filterbank + nearest interp + transpose
    # NOTE: Slaney-normalized mel basis (librosa/nnAudio convention), matching
    # the previous (validated) implementation.
    mel_fb = mel_filterbank(SR, N_FFT, N_MELS, FMIN, FMAX)   # (N_MELS, N_FREQ)
    # F.interpolate(mode='nearest'): src = floor(dst * in / out)
    hi = np.clip(np.floor(np.arange(OUT_H) * (N_MELS / OUT_H)).astype(np.int64),
                 0, N_MELS - 1)
    wi = np.clip(np.floor(np.arange(OUT_W) * (N_FRAMES / OUT_W)).astype(np.int64),
                 0, N_FRAMES - 1)
    C = np.zeros((HALF, OUT_HW), dtype=np.float64)
    for i in range(OUT_H):
        for j in range(OUT_W):
            f = wi[j]
            C[f * NFP: f * NFP + N_FREQ, i * OUT_W + j] = mel_fb[hi[i], :]

    # bf16 constants for the MXU (f32 accumulation is kept in-kernel).
    return (jnp.asarray(Bri, dtype=jnp.bfloat16),
            jnp.asarray(C, dtype=jnp.bfloat16))


BRI, CMAT = build_constants()


# ------------------------- fused Pallas kernel -------------------------------
def fused_kernel(x_ref, bri_ref, c_ref, o_ref):
    # 1) InstanceNorm1d(affine=False): per-(b,ch) normalization over T,
    #    biased variance, eps=1e-5, computed in f32.
    x = x_ref[...]                                         # (BC, T) f32
    mean = jnp.mean(x, axis=1, keepdims=True)
    var = jnp.mean((x - mean) ** 2, axis=1, keepdims=True)
    xn = (x - mean) * jax.lax.rsqrt(var + IN_EPS)

    # 2) Whole windowed STFT (reflect pad + framing + window + rDFT) as ONE
    #    bf16 matmul with f32 accumulation.  Columns: [cos | sin] x frame x freq.
    xb = xn.astype(jnp.bfloat16)
    ri = jnp.dot(xb, bri_ref[...], preferred_element_type=jnp.float32)  # (BC, 2*HALF)

    # 3) Power spectrum in f32 (lane-aligned static slices; HALF % 128 == 0).
    re = ri[:, :HALF]
    im = ri[:, HALF:]
    power = re * re + im * im                              # (BC, HALF) f32

    # 4) Mel filterbank + nearest-neighbor interpolate + NCHW transpose as one
    #    bf16 matmul with f32 accumulation -> lane-dense (BC, OUT_H*OUT_W) store.
    out = jnp.dot(power.astype(jnp.bfloat16), c_ref[...],
                  preferred_element_type=jnp.float32)
    o_ref[...] = out


def melspec_fused_pallas(x_bc_t, bri, cmat):
    bc, t = x_bc_t.shape
    return pl.pallas_call(
        fused_kernel,
        out_shape=jax.ShapeDtypeStruct((bc, OUT_HW), jnp.float32),
        grid_spec=pltpu.PrefetchScalarGridSpec(
            num_scalar_prefetch=0,
            grid=(1,),                                     # single step: no per-bc
            in_specs=[                                     # grid overhead
                pl.BlockSpec((bc, t), lambda i: (0, 0)),
                pl.BlockSpec(bri.shape, lambda i: (0, 0)),
                pl.BlockSpec(cmat.shape, lambda i: (0, 0)),
            ],
            out_specs=pl.BlockSpec((bc, OUT_HW), lambda i: (0, 0)),
        ),
        compiler_params=pltpu.CompilerParams(
            dimension_semantics=("arbitrary",),
            vmem_limit_bytes=32 * 1024 * 1024,             # ~13 MB used; safe on
        ),                                                 # v5e/v6e/v7x
    )(x_bc_t, bri, cmat)


# ------------------------- wrapper (layout plumbing only) --------------------
@jax.jit
def melspec_encoder(x):
    b, t, ch = x.shape
    # permute (B,T,CH)->(B,CH,T) and fold batch*channel (pure layout plumbing)
    x_bc_t = jnp.transpose(x, (0, 2, 1)).reshape(b * ch, t)      # (BC, T)
    out_flat = melspec_fused_pallas(x_bc_t, BRI, CMAT)           # (BC, OUT_H*OUT_W)
    # downsampleH = nn.Identity() for downsample_method='bilinear' (default)
    return out_flat.reshape(b, ch, OUT_H, OUT_W)                 # contiguous reshape


if __name__ == "__main__":
    key = jax.random.PRNGKey(0)
    x = jax.random.normal(key, (B, T, CH), dtype=jnp.float32)
    y = melspec_encoder(x)
    jax.block_until_ready(y)
    assert y.shape == (B, CH, OUT_H, OUT_W), y.shape
    assert bool(jnp.all(jnp.isfinite(y)))
    print("KERNEL_OK")
</pallas_src>

<mosaic_0001>
module attributes {stable_mosaic.version = 11 : i64} {
  func.func @fused_kernel(%arg0: i32, %arg1: memref<8x512xf32, #tpu.memory_space<vmem>>, %arg2: memref<512x4352xbf16, #tpu.memory_space<vmem>>, %arg3: memref<2176x512xbf16, #tpu.memory_space<vmem>>, %arg4: memref<8x512xf32, #tpu.memory_space<vmem>>) attributes {dimension_semantics = [#tpu.dimension_semantics<arbitrary>], iteration_bounds = array<i64: 1>, scalar_prefetch = 0 : i64, scratch_operands = 0 : i64, tpu.core_type = #tpu.core_type<tc>, window_params = [{pipeline_mode = #tpu.pipeline_mode<synchronous>, transform_indices = @transform_0, window_bounds = array<i64: 8, 512>}, {pipeline_mode = #tpu.pipeline_mode<synchronous>, transform_indices = @transform_1, window_bounds = array<i64: 512, 4352>}, {pipeline_mode = #tpu.pipeline_mode<synchronous>, transform_indices = @transform_2, window_bounds = array<i64: 2176, 512>}, {pipeline_mode = #tpu.pipeline_mode<synchronous>, transform_indices = @transform_3, window_bounds = array<i64: 8, 512>}]} {
    %c0 = arith.constant 0 : index
    %c0_0 = arith.constant 0 : index
    %0 = vector.load %arg1[%c0, %c0_0] : memref<8x512xf32, #tpu.memory_space<vmem>>, vector<8x512xf32>
    %cst = arith.constant dense<0.000000e+00> : vector<8xf32>
    %1 = vector.multi_reduction <add>, %0, %cst [1] : vector<8x512xf32> to vector<8xf32>
    %2 = vector.shape_cast %1 : vector<8xf32> to vector<8x1xf32>
    %cst_1 = arith.constant 5.120000e+02 : f32
    %3 = vector.broadcast %cst_1 : f32 to vector<8x1xf32>
    %4 = arith.divf %2, %3 : vector<8x1xf32>
    %5 = vector.broadcast %4 : vector<8x1xf32> to vector<8x512xf32>
    %6 = arith.subf %0, %5 : vector<8x512xf32>
    %7 = arith.mulf %6, %6 : vector<8x512xf32>
    %cst_2 = arith.constant dense<0.000000e+00> : vector<8xf32>
    %8 = vector.multi_reduction <add>, %7, %cst_2 [1] : vector<8x512xf32> to vector<8xf32>
    %9 = vector.shape_cast %8 : vector<8xf32> to vector<8x1xf32>
    %cst_3 = arith.constant 5.120000e+02 : f32
    %10 = vector.broadcast %cst_3 : f32 to vector<8x1xf32>
    %11 = arith.divf %9, %10 : vector<8x1xf32>
    %12 = vector.broadcast %4 : vector<8x1xf32> to vector<8x512xf32>
    %13 = arith.subf %0, %12 : vector<8x512xf32>
    %cst_4 = arith.constant 9.99999974E-6 : f32
    %14 = vector.broadcast %cst_4 : f32 to vector<8x1xf32>
    %15 = arith.addf %11, %14 : vector<8x1xf32>
    %16 = math.rsqrt %15 : vector<8x1xf32>
    %17 = vector.broadcast %16 : vector<8x1xf32> to vector<8x512xf32>
    %18 = arith.mulf %13, %17 : vector<8x512xf32>
    %19 = arith.truncf %18 : vector<8x512xf32> to vector<8x512xbf16>
    %c0_5 = arith.constant 0 : index
    %c0_6 = arith.constant 0 : index
    %20 = vector.load %arg2[%c0_5, %c0_6] : memref<512x4352xbf16, #tpu.memory_space<vmem>>, vector<512x4352xbf16>
    %cst_7 = arith.constant dense<0.000000e+00> : vector<8x4352xf32>
    %21 = tpu.matmul %19, %20, %cst_7 {dimension_numbers = #tpu.dot_dimension_numbers<[1], [0], [0], [1], [0, 0, 1, 1], [], []>} : vector<8x512xbf16>, vector<512x4352xbf16>, vector<8x4352xf32> -> vector<8x4352xf32>
    %22 = vector.extract_strided_slice %21 {offsets = [0, 0], sizes = [8, 2176], strides = [1, 1]} : vector<8x4352xf32> to vector<8x2176xf32>
    %23 = vector.extract_strided_slice %21 {offsets = [0, 2176], sizes = [8, 2176], strides = [1, 1]} : vector<8x4352xf32> to vector<8x2176xf32>
    %24 = arith.mulf %22, %22 : vector<8x2176xf32>
    %25 = arith.mulf %23, %23 : vector<8x2176xf32>
    %26 = arith.addf %24, %25 : vector<8x2176xf32>
    %27 = arith.truncf %26 : vector<8x2176xf32> to vector<8x2176xbf16>
    %c0_8 = arith.constant 0 : index
    %c0_9 = arith.constant 0 : index
    %28 = vector.load %arg3[%c0_8, %c0_9] : memref<2176x512xbf16, #tpu.memory_space<vmem>>, vector<2176x512xbf16>
    %cst_10 = arith.constant dense<0.000000e+00> : vector<8x512xf32>
    %29 = tpu.matmul %27, %28, %cst_10 {dimension_numbers = #tpu.dot_dimension_numbers<[1], [0], [0], [1], [0, 0, 1, 1], [], []>} : vector<8x2176xbf16>, vector<2176x512xbf16>, vector<8x512xf32> -> vector<8x512xf32>
    %c0_11 = arith.constant 0 : index
    %c0_12 = arith.constant 0 : index
    %30 = vector.load %arg4[%c0_11, %c0_12] : memref<8x512xf32, #tpu.memory_space<vmem>>, vector<8x512xf32>
    tpu.vector_store %arg4[%c0_11, %c0_12], %29 {strides = array<i32>} : memref<8x512xf32, #tpu.memory_space<vmem>>, vector<8x512xf32>,
    return
  }
  func.func @transform_0(%arg0: i32) -> (i32, i32) {
    %c0_i32 = arith.constant 0 : i32
    %c0_i32_0 = arith.constant 0 : i32
    %c0_i32_1 = arith.constant 0 : i32
    return %c0_i32, %c0_i32_0 : i32, i32
  }
  func.func @transform_1(%arg0: i32) -> (i32, i32) {
    %c0_i32 = arith.constant 0 : i32
    %c0_i32_0 = arith.constant 0 : i32
    %c0_i32_1 = arith.constant 0 : i32
    return %c0_i32, %c0_i32_0 : i32, i32
  }
  func.func @transform_2(%arg0: i32) -> (i32, i32) {
    %c0_i32 = arith.constant 0 : i32
    %c0_i32_0 = arith.constant 0 : i32
    %c0_i32_1 = arith.constant 0 : i32
    return %c0_i32, %c0_i32_0 : i32, i32
  }
  func.func @transform_3(%arg0: i32) -> (i32, i32) {
    %c0_i32 = arith.constant 0 : i32
    %c0_i32_0 = arith.constant 0 : i32
    %c0_i32_1 = arith.constant 0 : i32
    return %c0_i32, %c0_i32_0 : i32, i32
  }
}

</mosaic_0001>

<bundles_post_ra>
// kernel: melspec_encoder.1
= control target key start
LH: loop header
LB: loop body
LE: loop exit
PB: predicated region body
PF: predicated region fallthrough
CT: control target
= control target key end

     0   :  { %s21432_s0 = inlined_call_operand.vmem [shape: f32[8,512], index: 0, kind: input, shape index: {}]   ;;  %s21433_s1 = inlined_call_operand.vmem [shape: bf16[512,4352], index: 1, kind: input, shape index: {}]   ;;  %s21434_s2 = inlined_call_operand.vmem [shape: bf16[2176,512], index: 2, kind: input, shape index: {}]   ;;  %s21435_s3 = inlined_call_operand.vmem [shape: f32[8,512], index: 3, kind: output, shape index: {}]  }
   0x1   :  { %v16287_v0 = vld [vmem:[%s21432_s0] sm:$0xff]  ;;  %v16292_v1 = vld [vmem:[%s21432_s0 + $0x8] sm:$0xff]  ;;  %v16297_v2 = vld [vmem:[%s21432_s0 + $0x10] sm:$0xff] }
   0x2   :  { %v19_v3 = vadd.f32 %v16292_v1, %v16287_v0  ;;  %v16304_v4 = vld [vmem:[%s21432_s0 + $0x18] sm:$0xff]  ;;  %v13813_v7 = vld [vmem:[%s21433_s1 + $0x4] ss:$136 sps:$4 sm:$0xff]   ;;  %v13817_v9 = vld [vmem:[%s21433_s1] ss:$136 sps:$4 sm:$0xff]  }
   0x3   :  { %v13815_v8 = vld [vmem:[%s21433_s1 + $0x1104] ss:$136 sps:$4 sm:$0xff]   ;;  %6578 = vmatprep.subr.bf16.mxu1 %v13813_v7  ;;  %v13818_v10 = vld [vmem:[%s21433_s1 + $0x1100] ss:$136 sps:$4 sm:$0xff]   ;;  %v13819_v11 = vld [vmem:[%s21433_s1 + $0x114] ss:$136 sps:$4 sm:$0xff]  }
   0x4   :  { %v20_v5 = vadd.f32 %v19_v3, %v16297_v2  ;;  %6619 = vmatprep.subr.bf16.mxu0 %v13815_v8  ;;  %6579 = vmatpush1.bf16.msra.mxu1 %v13817_v9  ;;  %v13821_v12 = vld [vmem:[%s21433_s1 + $0x1214] ss:$136 sps:$4 sm:$0xff]   ;;  %v13823_v13 = vld [vmem:[%s21433_s1 + $0x110] ss:$136 sps:$4 sm:$0xff]   ;;  %v13825_v15 = vld [vmem:[%s21433_s1 + $0x224] ss:$136 sps:$4 sm:$0xff]  }
   0x5   :  { %6620 = vmatpush1.bf16.msra.mxu0 %v13818_v10  ;;  %6580 = vmatprep.subr.bf16.mxu1 %v13819_v11  ;;  %v13824_v14 = vld [vmem:[%s21433_s1 + $0x1210] ss:$136 sps:$4 sm:$0xff]   ;;  %v13827_v16 = vld [vmem:[%s21433_s1 + $0x1324] ss:$136 sps:$4 sm:$0xff]   ;;  %v13829_v17 = vld [vmem:[%s21433_s1 + $0x220] ss:$136 sps:$4 sm:$0xff]  }
   0x6   :  { %v21_v6 = vadd.f32 %v20_v5, %v16304_v4  ;;  %6621 = vmatprep.subr.bf16.mxu0 %v13821_v12  ;;  %v13830_v18 = vld [vmem:[%s21433_s1 + $0x1320] ss:$136 sps:$4 sm:$0xff]   ;;  %v13831_v19 = vld [vmem:[%s21433_s1 + $0x334] ss:$136 sps:$4 sm:$0xff]   ;;  %v13835_v21 = vld [vmem:[%s21433_s1 + $0x330] ss:$136 sps:$4 sm:$0xff]  }
   0x7   :  { %v13833_v20 = vld [vmem:[%s21433_s1 + $0x1434] ss:$136 sps:$4 sm:$0xff]   ;;  %v13836_v22 = vld [vmem:[%s21433_s1 + $0x1430] ss:$136 sps:$4 sm:$0xff]   ;;  %v13837_v23 = vld [vmem:[%s21433_s1 + $0x444] ss:$136 sps:$4 sm:$0xff]  }
   0x8   :  { %22 = vadd.xlane.f32.xlu0 %v21_v6  ;;  %6581 = vmatpush1.bf16.msra.mxu1 %v13823_v13  ;;  %v13839_v24 = vld [vmem:[%s21433_s1 + $0x1544] ss:$136 sps:$4 sm:$0xff]   ;;  %v13841_v25 = vld [vmem:[%s21433_s1 + $0x440] ss:$136 sps:$4 sm:$0xff]   ;;  %v13843_v27 = vld [vmem:[%s21433_s1 + $0x554] ss:$136 sps:$4 sm:$0xff]  }
   0x9   :  { %6622 = vmatpush1.bf16.msra.mxu0 %v13824_v14  ;;  %6582 = vmatprep.subr.bf16.mxu1 %v13825_v15  ;;  %v13842_v26 = vld [vmem:[%s21433_s1 + $0x1540] ss:$136 sps:$4 sm:$0xff]   ;;  %v13845_v28 = vld [vmem:[%s21433_s1 + $0x1654] ss:$136 sps:$4 sm:$0xff]   ;;  %v13847_v29 = vld [vmem:[%s21433_s1 + $0x550] ss:$136 sps:$4 sm:$0xff]  }
   0xa   :  { %6623 = vmatprep.subr.bf16.mxu0 %v13827_v16  ;;  %v13848_v30 = vld [vmem:[%s21433_s1 + $0x1650] ss:$136 sps:$4 sm:$0xff]   ;;  %v13849_v31 = vld [vmem:[%s21433_s1 + $0x664] ss:$136 sps:$4 sm:$0xff]   ;;  %v13853_v33 = vld [vmem:[%s21433_s1 + $0x660] ss:$136 sps:$4 sm:$0xff]  }
   0xb   :  { %v13851_v32 = vld [vmem:[%s21433_s1 + $0x1764] ss:$136 sps:$4 sm:$0xff]   ;;  %v13854_v34 = vld [vmem:[%s21433_s1 + $0x1760] ss:$136 sps:$4 sm:$0xff]   ;;  %v13855_v35 = vld [vmem:[%s21433_s1 + $0x774] ss:$136 sps:$4 sm:$0xff]  }
   0xc   :  { %6583 = vmatpush1.bf16.msra.mxu1 %v13829_v17  ;;  %v13857_v36 = vld [vmem:[%s21433_s1 + $0x1874] ss:$136 sps:$4 sm:$0xff]   ;;  %v13859_v37 = vld [vmem:[%s21433_s1 + $0x770] ss:$136 sps:$4 sm:$0xff]   ;;  %v13861_v39 = vld [vmem:[%s21433_s1 + $0x884] ss:$136 sps:$4 sm:$0xff]  }
   0xd   :  { %6624 = vmatpush1.bf16.msra.mxu0 %v13830_v18  ;;  %6584 = vmatprep.subr.bf16.mxu1 %v13831_v19  ;;  %v13860_v38 = vld [vmem:[%s21433_s1 + $0x1870] ss:$136 sps:$4 sm:$0xff]   ;;  %v13863_v40 = vld [vmem:[%s21433_s1 + $0x1984] ss:$136 sps:$4 sm:$0xff]   ;;  %v13865_v41 = vld [vmem:[%s21433_s1 + $0x880] ss:$136 sps:$4 sm:$0xff]  }
   0xe   :  { %6625 = vmatprep.subr.bf16.mxu0 %v13833_v20  ;;  %v13866_v42 = vld [vmem:[%s21433_s1 + $0x1980] ss:$136 sps:$4 sm:$0xff]   ;;  %v13867_v43 = vld [vmem:[%s21433_s1 + $0x994] ss:$136 sps:$4 sm:$0xff]   ;;  %v13871_v45 = vld [vmem:[%s21433_s1 + $0x990] ss:$136 sps:$4 sm:$0xff]  }
   0xf   :  { %v13869_v44 = vld [vmem:[%s21433_s1 + $0x1a94] ss:$136 sps:$4 sm:$0xff]   ;;  %v13872_v46 = vld [vmem:[%s21433_s1 + $0x1a90] ss:$136 sps:$4 sm:$0xff]   ;;  %v13873_v47 = vld [vmem:[%s21433_s1 + $0xaa4] ss:$136 sps:$4 sm:$0xff]  }
  0x10   :  { %6585 = vmatpush1.bf16.msra.mxu1 %v13835_v21  ;;  %v13875_v48 = vld [vmem:[%s21433_s1 + $0x1ba4] ss:$136 sps:$4 sm:$0xff]   ;;  %v13877_v49 = vld [vmem:[%s21433_s1 + $0xaa0] ss:$136 sps:$4 sm:$0xff]   ;;  %v13879_v51 = vld [vmem:[%s21433_s1 + $0xbb4] ss:$136 sps:$4 sm:$0xff]  }
  0x11   :  { %6626 = vmatpush1.bf16.msra.mxu0 %v13836_v22  ;;  %6586 = vmatprep.subr.bf16.mxu1 %v13837_v23  ;;  %v13878_v50 = vld [vmem:[%s21433_s1 + $0x1ba0] ss:$136 sps:$4 sm:$0xff]   ;;  %v13881_v52 = vld [vmem:[%s21433_s1 + $0x1cb4] ss:$136 sps:$4 sm:$0xff]   ;;  %v13883_v6 = vld [vmem:[%s21433_s1 + $0xbb0] ss:$136 sps:$4 sm:$0xff]  }
  0x12   :  { %6627 = vmatprep.subr.bf16.mxu0 %v13839_v24  ;;  %v13890_v7 = vld [vmem:[%s21433_s1 + $0x1dc0] ss:$136 sps:$4 sm:$0xff]   ;;  %v13891_v8 = vld [vmem:[%s21433_s1 + $0xdd4] ss:$136 sps:$4 sm:$0xff]   ;;  %v13895_v10 = vld [vmem:[%s21433_s1 + $0xdd0] ss:$136 sps:$4 sm:$0xff]  }
  0x13   :  { %v13893_v9 = vld [vmem:[%s21433_s1 + $0x1ed4] ss:$136 sps:$4 sm:$0xff]   ;;  %v13896_v11 = vld [vmem:[%s21433_s1 + $0x1ed0] ss:$136 sps:$4 sm:$0xff]   ;;  %v13897_v12 = vld [vmem:[%s21433_s1 + $0xee4] ss:$136 sps:$4 sm:$0xff]  }
  0x14   :  { %6587 = vmatpush1.bf16.msra.mxu1 %v13841_v25  ;;  %v13899_v13 = vld [vmem:[%s21433_s1 + $0x1fe4] ss:$136 sps:$4 sm:$0xff]   ;;  %v13901_v14 = vld [vmem:[%s21433_s1 + $0xee0] ss:$136 sps:$4 sm:$0xff]   ;;  %v13903_v16 = vld [vmem:[%s21433_s1 + $0xff4] ss:$136 sps:$4 sm:$0xff]  }
  0x15   :  { %6628 = vmatpush1.bf16.msra.mxu0 %v13842_v26  ;;  %6588 = vmatprep.subr.bf16.mxu1 %v13843_v27  ;;  %v13902_v15 = vld [vmem:[%s21433_s1 + $0x1fe0] ss:$136 sps:$4 sm:$0xff]   ;;  %v13905_v17 = vld [vmem:[%s21433_s1 + $0x20f4] ss:$136 sps:$4 sm:$0xff]   ;;  %v13907_v18 = vld [vmem:[%s21433_s1 + $0xff0] ss:$136 sps:$4 sm:$0xff]  }
  0x16   :  { %6629 = vmatprep.subr.bf16.mxu0 %v13845_v28  ;;  %v13908_v19 = vld [vmem:[%s21433_s1 + $0x20f0] ss:$136 sps:$4 sm:$0xff]   ;;  %v13911_v20 = vld [vmem:[%s21433_s1 + $0xc] ss:$136 sps:$4 sm:$0xff]  }
  0x17   :  { %v13914_v21 = vld [vmem:[%s21433_s1 + $0x14] ss:$136 sps:$4 sm:$0xff]  }
  0x18   :  { %6589 = vmatpush1.bf16.msra.mxu1 %v13847_v29 }
  0x19   :  { %6630 = vmatpush1.bf16.msra.mxu0 %v13848_v30  ;;  %6590 = vmatprep.subr.bf16.mxu1 %v13849_v31  ;;  %v13909_v30 = vld [vmem:[%s21433_s1 + $0x8] ss:$136 sps:$4 sm:$0xff]  }
  0x1a   :  { %6631 = vmatprep.subr.bf16.mxu0 %v13851_v32  ;;  %v13912_v31 = vld [vmem:[%s21433_s1 + $0x10] ss:$136 sps:$4 sm:$0xff]  }
  0x1c   :  { %6591 = vmatpush1.bf16.msra.mxu1 %v13853_v33 }
  0x1d   :  { %6632 = vmatpush1.bf16.msra.mxu0 %v13854_v34  ;;  %6592 = vmatprep.subr.bf16.mxu1 %v13855_v35 }
  0x1e   :  { %6633 = vmatprep.subr.bf16.mxu0 %v13857_v36  ;;  %v13917_v36 = vld [vmem:[%s21433_s1 + $0x11c] ss:$136 sps:$4 sm:$0xff]  }
  0x20   :  { %6593 = vmatpush1.bf16.msra.mxu1 %v13859_v37  ;;  %v13915_v37 = vld [vmem:[%s21433_s1 + $0x118] ss:$136 sps:$4 sm:$0xff]  }
  0x21   :  { %6634 = vmatpush1.bf16.msra.mxu0 %v13860_v38  ;;  %6594 = vmatprep.subr.bf16.mxu1 %v13861_v39  ;;  %v13918_v38 = vld [vmem:[%s21433_s1 + $0x120] ss:$136 sps:$4 sm:$0xff]   ;;  %v13920_v39 = vld [vmem:[%s21433_s1 + $0x124] ss:$136 sps:$4 sm:$0xff]  }
  0x22   :  { %6635 = vmatprep.subr.bf16.mxu0 %v13863_v40  ;;  %v13923_v40 = vld [vmem:[%s21433_s1 + $0x22c] ss:$136 sps:$4 sm:$0xff]  }
  0x24   :  { %6595 = vmatpush1.bf16.msra.mxu1 %v13865_v41  ;;  %v13926_v41 = vld [vmem:[%s21433_s1 + $0x234] ss:$136 sps:$4 sm:$0xff]  }
  0x25   :  { %6636 = vmatpush1.bf16.msra.mxu0 %v13866_v42  ;;  %6596 = vmatprep.subr.bf16.mxu1 %v13867_v43  ;;  %v13921_v42 = vld [vmem:[%s21433_s1 + $0x228] ss:$136 sps:$4 sm:$0xff]  }
  0x26   :  { %6637 = vmatprep.subr.bf16.mxu0 %v13869_v44  ;;  %v13924_v43 = vld [vmem:[%s21433_s1 + $0x230] ss:$136 sps:$4 sm:$0xff]   ;;  %v13929_v44 = vld [vmem:[%s21433_s1 + $0x33c] ss:$136 sps:$4 sm:$0xff]  }
  0x28   :  { %6597 = vmatpush1.bf16.msra.mxu1 %v13871_v45  ;;  %v13932_v45 = vld [vmem:[%s21433_s1 + $0x344] ss:$136 sps:$4 sm:$0xff]  }
  0x29   :  { %6638 = vmatpush1.bf16.msra.mxu0 %v13872_v46  ;;  %6598 = vmatprep.subr.bf16.mxu1 %v13873_v47  ;;  %v13927_v46 = vld [vmem:[%s21433_s1 + $0x338] ss:$136 sps:$4 sm:$0xff]  }
  0x2a   :  { %6639 = vmatprep.subr.bf16.mxu0 %v13875_v48  ;;  %v13930_v47 = vld [vmem:[%s21433_s1 + $0x340] ss:$136 sps:$4 sm:$0xff]   ;;  %v13935_v48 = vld [vmem:[%s21433_s1 + $0x44c] ss:$136 sps:$4 sm:$0xff]  }
  0x2c   :  { %6599 = vmatpush1.bf16.msra.mxu1 %v13877_v49  ;;  %v13938_v49 = vld [vmem:[%s21433_s1 + $0x454] ss:$136 sps:$4 sm:$0xff]  }
  0x2d   :  { %6640 = vmatpush1.bf16.msra.mxu0 %v13878_v50  ;;  %6600 = vmatprep.subr.bf16.mxu1 %v13879_v51  ;;  %v13933_v50 = vld [vmem:[%s21433_s1 + $0x448] ss:$136 sps:$4 sm:$0xff]  }
  0x2e   :  { %6641 = vmatprep.subr.bf16.mxu0 %v13881_v52  ;;  %v13936_v51 = vld [vmem:[%s21433_s1 + $0x450] ss:$136 sps:$4 sm:$0xff]   ;;  %v13941_v52 = vld [vmem:[%s21433_s1 + $0x55c] ss:$136 sps:$4 sm:$0xff]  }
  0x30   :  { %6601 = vmatpush1.bf16.msra.mxu1 %v13883_v6  ;;  %v13957_v6 = vld [vmem:[%s21433_s1 + $0x888] ss:$136 sps:$4 sm:$0xff]  }
  0x95   :  { %v23_v53 = vpop.xlane.xlu0 %22 }
  0x96   :  { %v25_v54 = vmul.f32 0.001953125, %v23_v53  ;;  %v13944_v53 = vld [vmem:[%s21433_s1 + $0x564] ss:$136 sps:$4 sm:$0xff]  }
  0x98   :  { %v26_v55 = vsub.f32 %v16287_v0, %v25_v54  ;;  %v27_v56 = vsub.f32 %v16292_v1, %v25_v54  ;;  %v28_v57 = vsub.f32 %v16297_v2, %v25_v54  ;;  %v29_v58 = vsub.f32 %v16304_v4, %v25_v54  ;;  %v13884_v0 = vld [vmem:[%s21433_s1 + $0x1cb0] ss:$136 sps:$4 sm:$0xff]   ;;  %v13885_v1 = vld [vmem:[%s21433_s1 + $0xcc4] ss:$136 sps:$4 sm:$0xff]   ;;  %v13889_v4 = vld [vmem:[%s21433_s1 + $0xcc0] ss:$136 sps:$4 sm:$0xff]  }
  0x99   :  { %6642 = vmatpush1.bf16.msra.mxu0 %v13884_v0  ;;  %v13887_v2 = vld [vmem:[%s21433_s1 + $0x1dc4] ss:$136 sps:$4 sm:$0xff]   ;;  %6602 = vmatprep.subr.bf16.mxu1 %v13885_v1  ;;  %v13939_v54 = vld [vmem:[%s21433_s1 + $0x558] ss:$136 sps:$4 sm:$0xff]  }
  0x9a   :  { %v30_v59 = vmul.f32 %v26_v55, %v26_v55  ;;  %v31_v60 = vmul.f32 %v27_v56, %v27_v56  ;;  %v32_v61 = vmul.f32 %v28_v57, %v28_v57  ;;  %v33_v63 = vmul.f32 %v29_v58, %v29_v58  ;;  %6643 = vmatprep.subr.bf16.mxu0 %v13887_v2  ;;  %v13960_v0 = vld [vmem:[%s21433_s1 + $0x890] ss:$136 sps:$4 sm:$0xff]   ;;  %v13965_v1 = vld [vmem:[%s21433_s1 + $0x99c] ss:$136 sps:$4 sm:$0xff]  }
  0x9b   :  { %6603 = vmatpush1.bf16.msra.mxu1 %v13889_v4  ;;  %v13968_v2 = vld [vmem:[%s21433_s1 + $0x9a4] ss:$136 sps:$4 sm:$0xff]   ;;  %v13963_v4 = vld [vmem:[%s21433_s1 + $0x998] ss:$136 sps:$4 sm:$0xff]  }
  0x9c   :  { %v34_v62 = vadd.f32 %v31_v60, %v30_v59  ;;  %6604 = vmatprep.subr.bf16.mxu1 %v13891_v8  ;;  %v13948_v59 = vld [vmem:[%s21433_s1 + $0x670] ss:$136 sps:$4 sm:$0xff]   ;;  %v13953_v60 = vld [vmem:[%s21433_s1 + $0x77c] ss:$136 sps:$4 sm:$0xff]   ;;  %v13971_v8 = vld [vmem:[%s21433_s1 + $0xaac] ss:$136 sps:$4 sm:$0xff]  }
  0x9d   :  { %6644 = vmatpush1.bf16.msra.mxu0 %v13890_v7  ;;  %v13966_v7 = vld [vmem:[%s21433_s1 + $0x9a0] ss:$136 sps:$4 sm:$0xff]  }
  0x9e   :  { %v35_v3 = vadd.f32 %v34_v62, %v32_v61  ;;  %6645 = vmatprep.subr.bf16.mxu0 %v13893_v9  ;;  %v13956_v61 = vld [vmem:[%s21433_s1 + $0x784] ss:$136 sps:$4 sm:$0xff]   ;;  %v13951_v62 = vld [vmem:[%s21433_s1 + $0x778] ss:$136 sps:$4 sm:$0xff]   ;;  %v13974_v9 = vld [vmem:[%s21433_s1 + $0xab4] ss:$136 sps:$4 sm:$0xff]  }
  0x9f   :  { %6605 = vmatpush1.bf16.msra.mxu1 %v13895_v10  ;;  %v13969_v10 = vld [vmem:[%s21433_s1 + $0xaa8] ss:$136 sps:$4 sm:$0xff]  }
  0xa0   :  { %v36_v5 = vadd.f32 %v35_v3, %v33_v63  ;;  %6606 = vmatprep.subr.bf16.mxu1 %v13897_v12  ;;  %v13954_v63 = vld [vmem:[%s21433_s1 + $0x780] ss:$136 sps:$4 sm:$0xff]   ;;  %v13959_v3 = vld [vmem:[%s21433_s1 + $0x88c] ss:$136 sps:$4 sm:$0xff]   ;;  %v13977_v12 = vld [vmem:[%s21433_s1 + $0xbbc] ss:$136 sps:$4 sm:$0xff]  }
  0xa1   :  { %6646 = vmatpush1.bf16.msra.mxu0 %v13896_v11  ;;  %v13972_v11 = vld [vmem:[%s21433_s1 + $0xab0] ss:$136 sps:$4 sm:$0xff]  }
  0xa2   :  { %37 = vadd.xlane.f32.xlu0 %v36_v5  ;;  %6647 = vmatprep.subr.bf16.mxu0 %v13899_v13  ;;  %v13962_v5 = vld [vmem:[%s21433_s1 + $0x894] ss:$136 sps:$4 sm:$0xff]   ;;  %v13980_v13 = vld [vmem:[%s21433_s1 + $0xbc4] ss:$136 sps:$4 sm:$0xff]  }
  0xa3   :  { %6607 = vmatpush1.bf16.msra.mxu1 %v13901_v14  ;;  %v13975_v14 = vld [vmem:[%s21433_s1 + $0xbb8] ss:$136 sps:$4 sm:$0xff]  }
  0xa4   :  { %6608 = vmatprep.subr.bf16.mxu1 %v13903_v16  ;;  %v13983_v16 = vld [vmem:[%s21433_s1 + $0xccc] ss:$136 sps:$4 sm:$0xff]  }
  0xa5   :  { %6648 = vmatpush1.bf16.msra.mxu0 %v13902_v15  ;;  %v13978_v15 = vld [vmem:[%s21433_s1 + $0xbc0] ss:$136 sps:$4 sm:$0xff]  }
  0xa6   :  { %6649 = vmatprep.subr.bf16.mxu0 %v13905_v17  ;;  %v13986_v17 = vld [vmem:[%s21433_s1 + $0xcd4] ss:$136 sps:$4 sm:$0xff]  }
  0xa7   :  { %6609 = vmatpush1.bf16.msra.mxu1 %v13907_v18  ;;  %v13981_v18 = vld [vmem:[%s21433_s1 + $0xcc8] ss:$136 sps:$4 sm:$0xff]  }
  0xa8   :  { %6660 = vmatprep.subr.bf16.mxu1 %v13911_v20  ;;  %v13989_v20 = vld [vmem:[%s21433_s1 + $0xddc] ss:$136 sps:$4 sm:$0xff]  }
  0xa9   :  { %6650 = vmatpush1.bf16.msra.mxu0 %v13908_v19  ;;  %v13984_v19 = vld [vmem:[%s21433_s1 + $0xcd0] ss:$136 sps:$4 sm:$0xff]  }
  0xaa   :  { %6742 = vmatprep.subr.bf16.mxu0 %v13914_v21  ;;  %v13992_v21 = vld [vmem:[%s21433_s1 + $0xde4] ss:$136 sps:$4 sm:$0xff]  }
 0x12f   :  { %v38_v22 = vpop.xlane.xlu0 %37 }
 0x130   :  { %v39_v23 = vmul.f32 0.001953125, %v38_v22  ;;  %v13987_v22 = vld [vmem:[%s21433_s1 + $0xdd8] ss:$136 sps:$4 sm:$0xff]  }
 0x132   :  { %v40_v24 = vadd.f32 1e-05, %v39_v23  ;;  %v13990_v23 = vld [vmem:[%s21433_s1 + $0xde0] ss:$136 sps:$4 sm:$0xff]  }
 0x134   :  { %16261 = vrsqrt.f32 %v40_v24  ;;  %v13995_v24 = vld [vmem:[%s21433_s1 + $0xeec] ss:$136 sps:$4 sm:$0xff]  }
 0x13e   :  { %v16262_v25 = vpop.eup %16261 }
 0x13f   :  { %v42_v26 = vmul.f32 %v16262_v25, %v26_v55  ;;  %v43_v27 = vmul.f32 %v16262_v25, %v27_v56  ;;  %v44_v28 = vmul.f32 %v16262_v25, %v28_v57  ;;  %v45_v29 = vmul.f32 %v16262_v25, %v29_v58  ;;  %v13942_v55 = vld [vmem:[%s21433_s1 + $0x560] ss:$136 sps:$4 sm:$0xff]   ;;  %v13947_v56 = vld [vmem:[%s21433_s1 + $0x66c] ss:$136 sps:$4 sm:$0xff]  }
 0x140   :  { %v13950_v57 = vld [vmem:[%s21433_s1 + $0x674] ss:$136 sps:$4 sm:$0xff]   ;;  %v13945_v58 = vld [vmem:[%s21433_s1 + $0x668] ss:$136 sps:$4 sm:$0xff]  }
 0x141   :  { %v16516_v32 = vpack.c.bf16 %v42_v26, %v42_v26  ;;  %v16518_v33 = vpack.c.bf16 %v43_v27, %v43_v27  ;;  %v16520_v34 = vpack.c.bf16 %v44_v28, %v44_v28  ;;  %v16522_v35 = vpack.c.bf16 %v45_v29, %v45_v29  ;;  %v13998_v25 = vld [vmem:[%s21433_s1 + $0xef4] ss:$136 sps:$4 sm:$0xff]   ;;  %v13993_v26 = vld [vmem:[%s21433_s1 + $0xee8] ss:$136 sps:$4 sm:$0xff]   ;;  %v14004_v29 = vld [vmem:[%s21433_s1 + $0x1004] ss:$136 sps:$4 sm:$0xff]  }
 0x142   :  { %v13996_v27 = vld [vmem:[%s21433_s1 + $0xef0] ss:$136 sps:$4 sm:$0xff]   ;;  %v14001_v28 = vld [vmem:[%s21433_s1 + $0xffc] ss:$136 sps:$4 sm:$0xff]  }
 0x143   :  { %6610 = vmatprep.mubr.bf16.mxu1 %v16518_v33  ;;  %6651 = vmatprep.mubr.bf16.mxu0 %v16522_v35 }
 0x144   :  { %6611 = vmatmul.mubr.bf16.vlgmr.msra.gmra.mrb[0].mxu1 %v16516_v32  ;;  %6652 = vmatmul.mubr.bf16.vlgmr.msra.gmra.mrb[0].mxu0 %v16520_v34 }
 0x145   :  { %6661 = vmatpush1.bf16.msra.mxu1 %v13909_v30  ;;  %6743 = vmatpush1.bf16.msra.mxu0 %v13912_v31  ;;  %v13999_v30 = vld [vmem:[%s21433_s1 + $0xff8] ss:$136 sps:$4 sm:$0xff]  }
 0x146   :  { %6692 = vmatprep.mubr.bf16.mxu1 %v16518_v33  ;;  %6774 = vmatprep.mubr.bf16.mxu0 %v16518_v33  ;;  %v14002_v31 = vld [vmem:[%s21433_s1 + $0x1000] ss:$136 sps:$4 sm:$0xff]  }
 0x147   :  { %6662 = vmatprep.subr.bf16.mxu1 %v13917_v36  ;;  %6744 = vmatprep.subr.bf16.mxu0 %v13920_v39  ;;  %v14007_v36 = vld [vmem:[%s21433_s1 + $0x110c] ss:$136 sps:$4 sm:$0xff]   ;;  %v14008_v39 = vld [vmem:[%s21433_s1 + $0x1110] ss:$136 sps:$4 sm:$0xff]  }
 0x149   :  { %6663 = vmatpush1.bf16.msra.mxu1 %v13915_v37  ;;  %6745 = vmatpush1.bf16.msra.mxu0 %v13918_v38  ;;  %v14010_v37 = vld [vmem:[%s21433_s1 + $0x1114] ss:$136 sps:$4 sm:$0xff]   ;;  %v14005_v38 = vld [vmem:[%s21433_s1 + $0x1108] ss:$136 sps:$4 sm:$0xff]  }
 0x14a   :  { %6664 = vmatprep.subr.bf16.mxu1 %v13923_v40  ;;  %6746 = vmatprep.subr.bf16.mxu0 %v13926_v41  ;;  %v14013_v40 = vld [vmem:[%s21433_s1 + $0x121c] ss:$136 sps:$4 sm:$0xff]  }
 0x14b   :  { %v14016_v41 = vld [vmem:[%s21433_s1 + $0x1224] ss:$136 sps:$4 sm:$0xff]  }
 0x14d   :  { %6665 = vmatpush1.bf16.msra.mxu1 %v13921_v42  ;;  %6747 = vmatpush1.bf16.msra.mxu0 %v13924_v43  ;;  %v14011_v42 = vld [vmem:[%s21433_s1 + $0x1218] ss:$136 sps:$4 sm:$0xff]  }
 0x14e   :  { %6666 = vmatprep.subr.bf16.mxu1 %v13929_v44  ;;  %6748 = vmatprep.subr.bf16.mxu0 %v13932_v45  ;;  %v14014_v43 = vld [vmem:[%s21433_s1 + $0x1220] ss:$136 sps:$4 sm:$0xff]   ;;  %v14019_v44 = vld [vmem:[%s21433_s1 + $0x132c] ss:$136 sps:$4 sm:$0xff]  }
 0x14f   :  { %v14022_v45 = vld [vmem:[%s21433_s1 + $0x1334] ss:$136 sps:$4 sm:$0xff]  }
 0x151   :  { %6667 = vmatpush1.bf16.msra.mxu1 %v13927_v46  ;;  %6749 = vmatpush1.bf16.msra.mxu0 %v13930_v47  ;;  %v14017_v46 = vld [vmem:[%s21433_s1 + $0x1328] ss:$136 sps:$4 sm:$0xff]  }
 0x152   :  { %6668 = vmatprep.subr.bf16.mxu1 %v13935_v48  ;;  %6750 = vmatprep.subr.bf16.mxu0 %v13938_v49  ;;  %v14020_v47 = vld [vmem:[%s21433_s1 + $0x1330] ss:$136 sps:$4 sm:$0xff]   ;;  %v14025_v48 = vld [vmem:[%s21433_s1 + $0x143c] ss:$136 sps:$4 sm:$0xff]  }
 0x153   :  { %v14023_v49 = vld [vmem:[%s21433_s1 + $0x1438] ss:$136 sps:$4 sm:$0xff]  }
 0x155   :  { %6669 = vmatpush1.bf16.msra.mxu1 %v13933_v50  ;;  %6751 = vmatpush1.bf16.msra.mxu0 %v13936_v51  ;;  %v14028_v50 = vld [vmem:[%s21433_s1 + $0x1444] ss:$136 sps:$4 sm:$0xff]   ;;  %v14026_v51 = vld [vmem:[%s21433_s1 + $0x1440] ss:$136 sps:$4 sm:$0xff]  }
 0x156   :  { %6670 = vmatprep.subr.bf16.mxu1 %v13941_v52  ;;  %6752 = vmatprep.subr.bf16.mxu0 %v13944_v53  ;;  %v14031_v52 = vld [vmem:[%s21433_s1 + $0x154c] ss:$136 sps:$4 sm:$0xff]   ;;  %v14029_v53 = vld [vmem:[%s21433_s1 + $0x1548] ss:$136 sps:$4 sm:$0xff]  }
 0x159   :  { %6671 = vmatpush1.bf16.msra.mxu1 %v13939_v54  ;;  %6753 = vmatpush1.bf16.msra.mxu0 %v13942_v55  ;;  %v14034_v54 = vld [vmem:[%s21433_s1 + $0x1554] ss:$136 sps:$4 sm:$0xff]   ;;  %v14032_v55 = vld [vmem:[%s21433_s1 + $0x1550] ss:$136 sps:$4 sm:$0xff]  }
 0x15a   :  { %6672 = vmatprep.subr.bf16.mxu1 %v13947_v56  ;;  %6754 = vmatprep.subr.bf16.mxu0 %v13950_v57  ;;  %v14037_v56 = vld [vmem:[%s21433_s1 + $0x165c] ss:$136 sps:$4 sm:$0xff]   ;;  %v14035_v57 = vld [vmem:[%s21433_s1 + $0x1658] ss:$136 sps:$4 sm:$0xff]  }
 0x15d   :  { %6673 = vmatpush1.bf16.msra.mxu1 %v13945_v58  ;;  %6755 = vmatpush1.bf16.msra.mxu0 %v13948_v59  ;;  %v14040_v58 = vld [vmem:[%s21433_s1 + $0x1664] ss:$136 sps:$4 sm:$0xff]   ;;  %v14038_v59 = vld [vmem:[%s21433_s1 + $0x1660] ss:$136 sps:$4 sm:$0xff]  }
 0x15e   :  { %6674 = vmatprep.subr.bf16.mxu1 %v13953_v60  ;;  %6756 = vmatprep.subr.bf16.mxu0 %v13956_v61  ;;  %v14043_v60 = vld [vmem:[%s21433_s1 + $0x176c] ss:$136 sps:$4 sm:$0xff]  }
 0x15f   :  { %v14046_v61 = vld [vmem:[%s21433_s1 + $0x1774] ss:$136 sps:$4 sm:$0xff]  }
 0x161   :  { %6675 = vmatpush1.bf16.msra.mxu1 %v13951_v62  ;;  %6757 = vmatpush1.bf16.msra.mxu0 %v13954_v63  ;;  %v14041_v62 = vld [vmem:[%s21433_s1 + $0x1768] ss:$136 sps:$4 sm:$0xff]  }
 0x162   :  { %6676 = vmatprep.subr.bf16.mxu1 %v13959_v3  ;;  %6758 = vmatprep.subr.bf16.mxu0 %v13962_v5  ;;  %v14044_v63 = vld [vmem:[%s21433_s1 + $0x1770] ss:$136 sps:$4 sm:$0xff]   ;;  %v14049_v3 = vld [vmem:[%s21433_s1 + $0x187c] ss:$136 sps:$4 sm:$0xff]  }
 0x163   :  { %v14052_v5 = vld [vmem:[%s21433_s1 + $0x1884] ss:$136 sps:$4 sm:$0xff]  }
 0x165   :  { %6677 = vmatpush1.bf16.msra.mxu1 %v13957_v6  ;;  %6759 = vmatpush1.bf16.msra.mxu0 %v13960_v0  ;;  %v14047_v6 = vld [vmem:[%s21433_s1 + $0x1878] ss:$136 sps:$4 sm:$0xff]  }
 0x166   :  { %6678 = vmatprep.subr.bf16.mxu1 %v13965_v1  ;;  %6760 = vmatprep.subr.bf16.mxu0 %v13968_v2  ;;  %v14050_v0 = vld [vmem:[%s21433_s1 + $0x1880] ss:$136 sps:$4 sm:$0xff]   ;;  %v14055_v1 = vld [vmem:[%s21433_s1 + $0x198c] ss:$136 sps:$4 sm:$0xff]  }
 0x167   :  { %v14053_v2 = vld [vmem:[%s21433_s1 + $0x1988] ss:$136 sps:$4 sm:$0xff]  }
 0x169   :  { %6679 = vmatpush1.bf16.msra.mxu1 %v13963_v4  ;;  %6761 = vmatpush1.bf16.msra.mxu0 %v13966_v7  ;;  %v14058_v4 = vld [vmem:[%s21433_s1 + $0x1994] ss:$136 sps:$4 sm:$0xff]   ;;  %v14056_v7 = vld [vmem:[%s21433_s1 + $0x1990] ss:$136 sps:$4 sm:$0xff]  }
 0x16a   :  { %6680 = vmatprep.subr.bf16.mxu1 %v13971_v8  ;;  %6762 = vmatprep.subr.bf16.mxu0 %v13974_v9  ;;  %v14061_v8 = vld [vmem:[%s21433_s1 + $0x1a9c] ss:$136 sps:$4 sm:$0xff]   ;;  %v14059_v9 = vld [vmem:[%s21433_s1 + $0x1a98] ss:$136 sps:$4 sm:$0xff]  }
 0x16d   :  { %6681 = vmatpush1.bf16.msra.mxu1 %v13969_v10  ;;  %6763 = vmatpush1.bf16.msra.mxu0 %v13972_v11  ;;  %v14064_v10 = vld [vmem:[%s21433_s1 + $0x1aa4] ss:$136 sps:$4 sm:$0xff]   ;;  %v14062_v11 = vld [vmem:[%s21433_s1 + $0x1aa0] ss:$136 sps:$4 sm:$0xff]  }
 0x16e   :  { %6682 = vmatprep.subr.bf16.mxu1 %v13977_v12  ;;  %6764 = vmatprep.subr.bf16.mxu0 %v13980_v13  ;;  %v14067_v12 = vld [vmem:[%s21433_s1 + $0x1bac] ss:$136 sps:$4 sm:$0xff]   ;;  %v14065_v13 = vld [vmem:[%s21433_s1 + $0x1ba8] ss:$136 sps:$4 sm:$0xff]  }
 0x171   :  { %6683 = vmatpush1.bf16.msra.mxu1 %v13975_v14  ;;  %6765 = vmatpush1.bf16.msra.mxu0 %v13978_v15  ;;  %v14070_v14 = vld [vmem:[%s21433_s1 + $0x1bb4] ss:$136 sps:$4 sm:$0xff]   ;;  %v14068_v15 = vld [vmem:[%s21433_s1 + $0x1bb0] ss:$136 sps:$4 sm:$0xff]  }
 0x172   :  { %6684 = vmatprep.subr.bf16.mxu1 %v13983_v16  ;;  %6766 = vmatprep.subr.bf16.mxu0 %v13986_v17  ;;  %v14073_v16 = vld [vmem:[%s21433_s1 + $0x1cbc] ss:$136 sps:$4 sm:$0xff]   ;;  %v14071_v17 = vld [vmem:[%s21433_s1 + $0x1cb8] ss:$136 sps:$4 sm:$0xff]  }
 0x175   :  { %6685 = vmatpush1.bf16.msra.mxu1 %v13981_v18  ;;  %6767 = vmatpush1.bf16.msra.mxu0 %v13984_v19  ;;  %v14076_v18 = vld [vmem:[%s21433_s1 + $0x1cc4] ss:$136 sps:$4 sm:$0xff]   ;;  %v14074_v19 = vld [vmem:[%s21433_s1 + $0x1cc0] ss:$136 sps:$4 sm:$0xff]  }
 0x176   :  { %6686 = vmatprep.subr.bf16.mxu1 %v13989_v20  ;;  %6768 = vmatprep.subr.bf16.mxu0 %v13992_v21  ;;  %v14079_v20 = vld [vmem:[%s21433_s1 + $0x1dcc] ss:$136 sps:$4 sm:$0xff]   ;;  %v14077_v21 = vld [vmem:[%s21433_s1 + $0x1dc8] ss:$136 sps:$4 sm:$0xff]  }
 0x179   :  { %6687 = vmatpush1.bf16.msra.mxu1 %v13987_v22  ;;  %6769 = vmatpush1.bf16.msra.mxu0 %v13990_v23  ;;  %v14082_v22 = vld [vmem:[%s21433_s1 + $0x1dd4] ss:$136 sps:$4 sm:$0xff]   ;;  %v14080_v23 = vld [vmem:[%s21433_s1 + $0x1dd0] ss:$136 sps:$4 sm:$0xff]  }
 0x17a   :  { %6688 = vmatprep.subr.bf16.mxu1 %v13995_v24  ;;  %6770 = vmatprep.subr.bf16.mxu0 %v13998_v25  ;;  %v14085_v24 = vld [vmem:[%s21433_s1 + $0x1edc] ss:$136 sps:$4 sm:$0xff]   ;;  %v14083_v25 = vld [vmem:[%s21433_s1 + $0x1ed8] ss:$136 sps:$4 sm:$0xff]  }
 0x17d   :  { %6689 = vmatpush1.bf16.msra.mxu1 %v13993_v26  ;;  %6771 = vmatpush1.bf16.msra.mxu0 %v13996_v27  ;;  %v14088_v26 = vld [vmem:[%s21433_s1 + $0x1ee4] ss:$136 sps:$4 sm:$0xff]   ;;  %v14086_v27 = vld [vmem:[%s21433_s1 + $0x1ee0] ss:$136 sps:$4 sm:$0xff]  }
 0x17e   :  { %6690 = vmatprep.subr.bf16.mxu1 %v14001_v28  ;;  %6772 = vmatprep.subr.bf16.mxu0 %v14004_v29  ;;  %v14091_v28 = vld [vmem:[%s21433_s1 + $0x1fec] ss:$136 sps:$4 sm:$0xff]   ;;  %v14089_v29 = vld [vmem:[%s21433_s1 + $0x1fe8] ss:$136 sps:$4 sm:$0xff]  }
 0x181   :  { %6691 = vmatpush1.bf16.msra.mxu1 %v13999_v30  ;;  %6773 = vmatpush1.bf16.msra.mxu0 %v14002_v31  ;;  %v14094_v30 = vld [vmem:[%s21433_s1 + $0x1ff4] ss:$136 sps:$4 sm:$0xff]   ;;  %v14092_v31 = vld [vmem:[%s21433_s1 + $0x1ff0] ss:$136 sps:$4 sm:$0xff]  }
 0x182   :  { %6701 = vmatprep.subr.bf16.mxu1 %v14007_v36  ;;  %6783 = vmatprep.subr.bf16.mxu0 %v14010_v37  ;;  %v14097_v36 = vld [vmem:[%s21433_s1 + $0x20fc] ss:$136 sps:$4 sm:$0xff]   ;;  %v14095_v37 = vld [vmem:[%s21433_s1 + $0x20f8] ss:$136 sps:$4 sm:$0xff]  }
 0x184   :  { %6693 = vmatmul.mubr.bf16.vlgmr.msra.gmra.mrb[4].mxu1 %v16516_v32  ;;  %6775 = vmatmul.mubr.bf16.vlgmr.msra.gmra.mrb[4].mxu0 %v16516_v32 }
 0x185   :  { %6702 = vmatpush1.bf16.msra.mxu1 %v14005_v38  ;;  %6733 = vmatprep.mubr.bf16.mxu1 %v16522_v35  ;;  %v14100_v38 = vld [vmem:[%s21433_s1 + $0x2104] ss:$136 sps:$4 sm:$0xff]  }
 0x186   :  { %6784 = vmatpush1.bf16.msra.mxu0 %v14008_v39  ;;  %6815 = vmatprep.mubr.bf16.mxu0 %v16522_v35  ;;  %v14098_v39 = vld [vmem:[%s21433_s1 + $0x2100] ss:$136 sps:$4 sm:$0xff]  }
 0x187   :  { %6703 = vmatprep.subr.bf16.mxu1 %v14013_v40  ;;  %6785 = vmatprep.subr.bf16.mxu0 %v14016_v41  ;;  %v14103_v40 = vld [vmem:[%s21433_s1 + $0x1c] ss:$136 sps:$4 sm:$0xff]  }
 0x188   :  { %v14106_v41 = vld [vmem:[%s21433_s1 + $0x24] ss:$136 sps:$4 sm:$0xff]  }
 0x189   :  { %6704 = vmatpush1.bf16.msra.mxu1 %v14011_v42  ;;  %v14101_v42 = vld [vmem:[%s21433_s1 + $0x18] ss:$136 sps:$4 sm:$0xff]  }
 0x18a   :  { %6786 = vmatpush1.bf16.msra.mxu0 %v14014_v43  ;;  %6705 = vmatprep.subr.bf16.mxu1 %v14019_v44  ;;  %v14104_v43 = vld [vmem:[%s21433_s1 + $0x20] ss:$136 sps:$4 sm:$0xff]   ;;  %v14109_v44 = vld [vmem:[%s21433_s1 + $0x12c] ss:$136 sps:$4 sm:$0xff]  }
 0x18b   :  { %6787 = vmatprep.subr.bf16.mxu0 %v14022_v45  ;;  %v14107_v45 = vld [vmem:[%s21433_s1 + $0x128] ss:$136 sps:$4 sm:$0xff]  }
 0x18d   :  { %6706 = vmatpush1.bf16.msra.mxu1 %v14017_v46  ;;  %v14112_v46 = vld [vmem:[%s21433_s1 + $0x134] ss:$136 sps:$4 sm:$0xff]  }
 0x18e   :  { %6788 = vmatpush1.bf16.msra.mxu0 %v14020_v47  ;;  %6707 = vmatprep.subr.bf16.mxu1 %v14025_v48  ;;  %v14110_v47 = vld [vmem:[%s21433_s1 + $0x130] ss:$136 sps:$4 sm:$0xff]   ;;  %v14115_v48 = vld [vmem:[%s21433_s1 + $0x23c] ss:$136 sps:$4 sm:$0xff]  }
 0x18f   :  { %6789 = vmatprep.subr.bf16.mxu0 %v14028_v50  ;;  %v14113_v50 = vld [vmem:[%s21433_s1 + $0x238] ss:$136 sps:$4 sm:$0xff]  }
 0x191   :  { %6708 = vmatpush1.bf16.msra.mxu1 %v14023_v49  ;;  %v14118_v49 = vld [vmem:[%s21433_s1 + $0x244] ss:$136 sps:$4 sm:$0xff]  }
 0x192   :  { %6790 = vmatpush1.bf16.msra.mxu0 %v14026_v51  ;;  %6709 = vmatprep.subr.bf16.mxu1 %v14031_v52  ;;  %v14116_v51 = vld [vmem:[%s21433_s1 + $0x240] ss:$136 sps:$4 sm:$0xff]   ;;  %v14121_v52 = vld [vmem:[%s21433_s1 + $0x34c] ss:$136 sps:$4 sm:$0xff]  }
 0x193   :  { %6791 = vmatprep.subr.bf16.mxu0 %v14034_v54  ;;  %v14124_v54 = vld [vmem:[%s21433_s1 + $0x354] ss:$136 sps:$4 sm:$0xff]  }
 0x195   :  { %6710 = vmatpush1.bf16.msra.mxu1 %v14029_v53  ;;  %v14119_v53 = vld [vmem:[%s21433_s1 + $0x348] ss:$136 sps:$4 sm:$0xff]  }
 0x196   :  { %6792 = vmatpush1.bf16.msra.mxu0 %v14032_v55  ;;  %6711 = vmatprep.subr.bf16.mxu1 %v14037_v56  ;;  %v14122_v55 = vld [vmem:[%s21433_s1 + $0x350] ss:$136 sps:$4 sm:$0xff]   ;;  %v14127_v56 = vld [vmem:[%s21433_s1 + $0x45c] ss:$136 sps:$4 sm:$0xff]  }
 0x197   :  { %6793 = vmatprep.subr.bf16.mxu0 %v14040_v58  ;;  %v14130_v58 = vld [vmem:[%s21433_s1 + $0x464] ss:$136 sps:$4 sm:$0xff]  }
 0x199   :  { %6712 = vmatpush1.bf16.msra.mxu1 %v14035_v57  ;;  %v14125_v57 = vld [vmem:[%s21433_s1 + $0x458] ss:$136 sps:$4 sm:$0xff]  }
 0x19a   :  { %6794 = vmatpush1.bf16.msra.mxu0 %v14038_v59  ;;  %6713 = vmatprep.subr.bf16.mxu1 %v14043_v60  ;;  %v14128_v59 = vld [vmem:[%s21433_s1 + $0x460] ss:$136 sps:$4 sm:$0xff]   ;;  %v14133_v60 = vld [vmem:[%s21433_s1 + $0x56c] ss:$136 sps:$4 sm:$0xff]  }
 0x19b   :  { %6795 = vmatprep.subr.bf16.mxu0 %v14046_v61  ;;  %v14131_v61 = vld [vmem:[%s21433_s1 + $0x568] ss:$136 sps:$4 sm:$0xff]  }
 0x19d   :  { %6714 = vmatpush1.bf16.msra.mxu1 %v14041_v62  ;;  %v14136_v62 = vld [vmem:[%s21433_s1 + $0x574] ss:$136 sps:$4 sm:$0xff]  }
 0x19e   :  { %6796 = vmatpush1.bf16.msra.mxu0 %v14044_v63  ;;  %6715 = vmatprep.subr.bf16.mxu1 %v14049_v3  ;;  %v14134_v63 = vld [vmem:[%s21433_s1 + $0x570] ss:$136 sps:$4 sm:$0xff]   ;;  %v14139_v3 = vld [vmem:[%s21433_s1 + $0x67c] ss:$136 sps:$4 sm:$0xff]  }
 0x19f   :  { %6797 = vmatprep.subr.bf16.mxu0 %v14052_v5  ;;  %v14137_v5 = vld [vmem:[%s21433_s1 + $0x678] ss:$136 sps:$4 sm:$0xff]  }
 0x1a1   :  { %6716 = vmatpush1.bf16.msra.mxu1 %v14047_v6  ;;  %v14142_v6 = vld [vmem:[%s21433_s1 + $0x684] ss:$136 sps:$4 sm:$0xff]  }
 0x1a2   :  { %6798 = vmatpush1.bf16.msra.mxu0 %v14050_v0  ;;  %6717 = vmatprep.subr.bf16.mxu1 %v14055_v1  ;;  %v14140_v0 = vld [vmem:[%s21433_s1 + $0x680] ss:$136 sps:$4 sm:$0xff]   ;;  %v14145_v1 = vld [vmem:[%s21433_s1 + $0x78c] ss:$136 sps:$4 sm:$0xff]  }
 0x1a3   :  { %6799 = vmatprep.subr.bf16.mxu0 %v14058_v4  ;;  %v14148_v4 = vld [vmem:[%s21433_s1 + $0x794] ss:$136 sps:$4 sm:$0xff]  }
 0x1a5   :  { %6718 = vmatpush1.bf16.msra.mxu1 %v14053_v2  ;;  %v14143_v2 = vld [vmem:[%s21433_s1 + $0x788] ss:$136 sps:$4 sm:$0xff]  }
 0x1a6   :  { %6800 = vmatpush1.bf16.msra.mxu0 %v14056_v7  ;;  %6719 = vmatprep.subr.bf16.mxu1 %v14061_v8  ;;  %v14146_v7 = vld [vmem:[%s21433_s1 + $0x790] ss:$136 sps:$4 sm:$0xff]   ;;  %v14151_v8 = vld [vmem:[%s21433_s1 + $0x89c] ss:$136 sps:$4 sm:$0xff]  }
 0x1a7   :  { %6801 = vmatprep.subr.bf16.mxu0 %v14064_v10  ;;  %v14154_v10 = vld [vmem:[%s21433_s1 + $0x8a4] ss:$136 sps:$4 sm:$0xff]  }
 0x1a9   :  { %6720 = vmatpush1.bf16.msra.mxu1 %v14059_v9  ;;  %v14149_v9 = vld [vmem:[%s21433_s1 + $0x898] ss:$136 sps:$4 sm:$0xff]  }
 0x1aa   :  { %6802 = vmatpush1.bf16.msra.mxu0 %v14062_v11  ;;  %6721 = vmatprep.subr.bf16.mxu1 %v14067_v12  ;;  %v14152_v11 = vld [vmem:[%s21433_s1 + $0x8a0] ss:$136 sps:$4 sm:$0xff]   ;;  %v14157_v12 = vld [vmem:[%s21433_s1 + $0x9ac] ss:$136 sps:$4 sm:$0xff]  }
 0x1ab   :  { %6803 = vmatprep.subr.bf16.mxu0 %v14070_v14  ;;  %v14160_v14 = vld [vmem:[%s21433_s1 + $0x9b4] ss:$136 sps:$4 sm:$0xff]  }
 0x1ad   :  { %6722 = vmatpush1.bf16.msra.mxu1 %v14065_v13  ;;  %v14155_v13 = vld [vmem:[%s21433_s1 + $0x9a8] ss:$136 sps:$4 sm:$0xff]  }
 0x1ae   :  { %6804 = vmatpush1.bf16.msra.mxu0 %v14068_v15  ;;  %6723 = vmatprep.subr.bf16.mxu1 %v14073_v16  ;;  %v14158_v15 = vld [vmem:[%s21433_s1 + $0x9b0] ss:$136 sps:$4 sm:$0xff]   ;;  %v14163_v16 = vld [vmem:[%s21433_s1 + $0xabc] ss:$136 sps:$4 sm:$0xff]  }
 0x1af   :  { %6805 = vmatprep.subr.bf16.mxu0 %v14076_v18  ;;  %v14166_v18 = vld [vmem:[%s21433_s1 + $0xac4] ss:$136 sps:$4 sm:$0xff]  }
 0x1b1   :  { %6724 = vmatpush1.bf16.msra.mxu1 %v14071_v17  ;;  %v14161_v17 = vld [vmem:[%s21433_s1 + $0xab8] ss:$136 sps:$4 sm:$0xff]  }
 0x1b2   :  { %6806 = vmatpush1.bf16.msra.mxu0 %v14074_v19  ;;  %6725 = vmatprep.subr.bf16.mxu1 %v14079_v20  ;;  %v14164_v19 = vld [vmem:[%s21433_s1 + $0xac0] ss:$136 sps:$4 sm:$0xff]   ;;  %v14169_v20 = vld [vmem:[%s21433_s1 + $0xbcc] ss:$136 sps:$4 sm:$0xff]  }
 0x1b3   :  { %6807 = vmatprep.subr.bf16.mxu0 %v14082_v22  ;;  %v14172_v22 = vld [vmem:[%s21433_s1 + $0xbd4] ss:$136 sps:$4 sm:$0xff]  }
 0x1b5   :  { %6726 = vmatpush1.bf16.msra.mxu1 %v14077_v21  ;;  %v14167_v21 = vld [vmem:[%s21433_s1 + $0xbc8] ss:$136 sps:$4 sm:$0xff]  }
 0x1b6   :  { %6808 = vmatpush1.bf16.msra.mxu0 %v14080_v23  ;;  %6727 = vmatprep.subr.bf16.mxu1 %v14085_v24  ;;  %v14170_v23 = vld [vmem:[%s21433_s1 + $0xbd0] ss:$136 sps:$4 sm:$0xff]   ;;  %v14175_v24 = vld [vmem:[%s21433_s1 + $0xcdc] ss:$136 sps:$4 sm:$0xff]  }
 0x1b7   :  { %6809 = vmatprep.subr.bf16.mxu0 %v14088_v26  ;;  %v14178_v26 = vld [vmem:[%s21433_s1 + $0xce4] ss:$136 sps:$4 sm:$0xff]  }
 0x1b9   :  { %6728 = vmatpush1.bf16.msra.mxu1 %v14083_v25  ;;  %v14173_v25 = vld [vmem:[%s21433_s1 + $0xcd8] ss:$136 sps:$4 sm:$0xff]  }
 0x1ba   :  { %6810 = vmatpush1.bf16.msra.mxu0 %v14086_v27  ;;  %6729 = vmatprep.subr.bf16.mxu1 %v14091_v28  ;;  %v14176_v27 = vld [vmem:[%s21433_s1 + $0xce0] ss:$136 sps:$4 sm:$0xff]   ;;  %v14181_v28 = vld [vmem:[%s21433_s1 + $0xdec] ss:$136 sps:$4 sm:$0xff]  }
 0x1bb   :  { %6811 = vmatprep.subr.bf16.mxu0 %v14094_v30  ;;  %v14184_v30 = vld [vmem:[%s21433_s1 + $0xdf4] ss:$136 sps:$4 sm:$0xff]  }
 0x1bd   :  { %6730 = vmatpush1.bf16.msra.mxu1 %v14089_v29  ;;  %v14179_v29 = vld [vmem:[%s21433_s1 + $0xde8] ss:$136 sps:$4 sm:$0xff]  }
 0x1be   :  { %6812 = vmatpush1.bf16.msra.mxu0 %v14092_v31  ;;  %6731 = vmatprep.subr.bf16.mxu1 %v14097_v36  ;;  %v14182_v31 = vld [vmem:[%s21433_s1 + $0xdf0] ss:$136 sps:$4 sm:$0xff]   ;;  %v14187_v36 = vld [vmem:[%s21433_s1 + $0xefc] ss:$136 sps:$4 sm:$0xff]  }
 0x1bf   :  { %6813 = vmatprep.subr.bf16.mxu0 %v14100_v38  ;;  %v14190_v38 = vld [vmem:[%s21433_s1 + $0xf04] ss:$136 sps:$4 sm:$0xff]  }
 0x1c1   :  { %6732 = vmatpush1.bf16.msra.mxu1 %v14095_v37  ;;  %v14185_v37 = vld [vmem:[%s21433_s1 + $0xef8] ss:$136 sps:$4 sm:$0xff]  }
 0x1c2   :  { %6814 = vmatpush1.bf16.msra.mxu0 %v14098_v39  ;;  %6824 = vmatprep.subr.bf16.mxu1 %v14103_v40  ;;  %v14188_v39 = vld [vmem:[%s21433_s1 + $0xf00] ss:$136 sps:$4 sm:$0xff]   ;;  %v14193_v40 = vld [vmem:[%s21433_s1 + $0x100c] ss:$136 sps:$4 sm:$0xff]  }
 0x1c3   :  { %6906 = vmatprep.subr.bf16.mxu0 %v14106_v41  ;;  %v14191_v41 = vld [vmem:[%s21433_s1 + $0x1008] ss:$136 sps:$4 sm:$0xff]  }
 0x1c4   :  { %6734 = vmatmul.mubr.bf16.vlgmr.msra.gmra.mrb[4].mxu1 %v16520_v34 }
 0x1c5   :  { %6816 = vmatmul.mubr.bf16.vlgmr.msra.gmra.mrb[4].mxu0 %v16520_v34  ;;  %6825 = vmatpush1.bf16.msra.mxu1 %v14101_v42  ;;  %v14196_v42 = vld [vmem:[%s21433_s1 + $0x1014] ss:$136 sps:$4 sm:$0xff]  }
 0x1c6   :  { %6856 = vmatprep.mubr.bf16.mxu1 %v16518_v33  ;;  %6907 = vmatpush1.bf16.msra.mxu0 %v14104_v43  ;;  %v14194_v43 = vld [vmem:[%s21433_s1 + $0x1010] ss:$136 sps:$4 sm:$0xff]  }
 0x1c7   :  { %6938 = vmatprep.mubr.bf16.mxu0 %v16518_v33  ;;  %6826 = vmatprep.subr.bf16.mxu1 %v14109_v44  ;;  %v14199_v44 = vld [vmem:[%s21433_s1 + $0x111c] ss:$136 sps:$4 sm:$0xff]  }
 0x1c8   :  { %6908 = vmatprep.subr.bf16.mxu0 %v14112_v46  ;;  %v14202_v46 = vld [vmem:[%s21433_s1 + $0x1124] ss:$136 sps:$4 sm:$0xff]  }
 0x1c9   :  { %6827 = vmatpush1.bf16.msra.mxu1 %v14107_v45  ;;  %v14197_v45 = vld [vmem:[%s21433_s1 + $0x1118] ss:$136 sps:$4 sm:$0xff]  }
 0x1ca   :  { %6909 = vmatpush1.bf16.msra.mxu0 %v14110_v47  ;;  %6828 = vmatprep.subr.bf16.mxu1 %v14115_v48  ;;  %v14200_v47 = vld [vmem:[%s21433_s1 + $0x1120] ss:$136 sps:$4 sm:$0xff]   ;;  %v14205_v48 = vld [vmem:[%s21433_s1 + $0x122c] ss:$136 sps:$4 sm:$0xff]  }
 0x1cb   :  { %6910 = vmatprep.subr.bf16.mxu0 %v14118_v49  ;;  %v14203_v49 = vld [vmem:[%s21433_s1 + $0x1228] ss:$136 sps:$4 sm:$0xff]  }
 0x1cd   :  { %6829 = vmatpush1.bf16.msra.mxu1 %v14113_v50  ;;  %v14206_v50 = vld [vmem:[%s21433_s1 + $0x1230] ss:$136 sps:$4 sm:$0xff]  }
 0x1ce   :  { %6911 = vmatpush1.bf16.msra.mxu0 %v14116_v51  ;;  %6830 = vmatprep.subr.bf16.mxu1 %v14121_v52  ;;  %v14208_v51 = vld [vmem:[%s21433_s1 + $0x1234] ss:$136 sps:$4 sm:$0xff]  }
 0x1cf   :  { %6912 = vmatprep.subr.bf16.mxu0 %v14124_v54  ;;  %v14211_v52 = vld [vmem:[%s21433_s1 + $0x133c] ss:$136 sps:$4 sm:$0xff]   ;;  %v14209_v54 = vld [vmem:[%s21433_s1 + $0x1338] ss:$136 sps:$4 sm:$0xff]  }
 0x1d1   :  { %6831 = vmatpush1.bf16.msra.mxu1 %v14119_v53  ;;  %v14214_v53 = vld [vmem:[%s21433_s1 + $0x1344] ss:$136 sps:$4 sm:$0xff]  }
 0x1d2   :  { %6913 = vmatpush1.bf16.msra.mxu0 %v14122_v55  ;;  %6832 = vmatprep.subr.bf16.mxu1 %v14127_v56  ;;  %v14212_v55 = vld [vmem:[%s21433_s1 + $0x1340] ss:$136 sps:$4 sm:$0xff]   ;;  %v14217_v56 = vld [vmem:[%s21433_s1 + $0x144c] ss:$136 sps:$4 sm:$0xff]  }
 0x1d3   :  { %6914 = vmatprep.subr.bf16.mxu0 %v14130_v58  ;;  %v14220_v58 = vld [vmem:[%s21433_s1 + $0x1454] ss:$136 sps:$4 sm:$0xff]  }
 0x1d5   :  { %6833 = vmatpush1.bf16.msra.mxu1 %v14125_v57  ;;  %v14215_v57 = vld [vmem:[%s21433_s1 + $0x1448] ss:$136 sps:$4 sm:$0xff]  }
 0x1d6   :  { %6915 = vmatpush1.bf16.msra.mxu0 %v14128_v59  ;;  %6834 = vmatprep.subr.bf16.mxu1 %v14133_v60  ;;  %v14218_v59 = vld [vmem:[%s21433_s1 + $0x1450] ss:$136 sps:$4 sm:$0xff]   ;;  %v14223_v60 = vld [vmem:[%s21433_s1 + $0x155c] ss:$136 sps:$4 sm:$0xff]  }
 0x1d7   :  { %6916 = vmatprep.subr.bf16.mxu0 %v14136_v62  ;;  %v14226_v62 = vld [vmem:[%s21433_s1 + $0x1564] ss:$136 sps:$4 sm:$0xff]  }
 0x1d9   :  { %6835 = vmatpush1.bf16.msra.mxu1 %v14131_v61  ;;  %v14221_v61 = vld [vmem:[%s21433_s1 + $0x1558] ss:$136 sps:$4 sm:$0xff]  }
 0x1da   :  { %6917 = vmatpush1.bf16.msra.mxu0 %v14134_v63  ;;  %6836 = vmatprep.subr.bf16.mxu1 %v14139_v3  ;;  %v14224_v63 = vld [vmem:[%s21433_s1 + $0x1560] ss:$136 sps:$4 sm:$0xff]   ;;  %v14229_v3 = vld [vmem:[%s21433_s1 + $0x166c] ss:$136 sps:$4 sm:$0xff]  }
 0x1db   :  { %6918 = vmatprep.subr.bf16.mxu0 %v14142_v6  ;;  %v14227_v6 = vld [vmem:[%s21433_s1 + $0x1668] ss:$136 sps:$4 sm:$0xff]  }
 0x1dd   :  { %6837 = vmatpush1.bf16.msra.mxu1 %v14137_v5  ;;  %v14232_v5 = vld [vmem:[%s21433_s1 + $0x1674] ss:$136 sps:$4 sm:$0xff]  }
 0x1de   :  { %6919 = vmatpush1.bf16.msra.mxu0 %v14140_v0  ;;  %6838 = vmatprep.subr.bf16.mxu1 %v14145_v1  ;;  %v14230_v0 = vld [vmem:[%s21433_s1 + $0x1670] ss:$136 sps:$4 sm:$0xff]   ;;  %v14235_v1 = vld [vmem:[%s21433_s1 + $0x177c] ss:$136 sps:$4 sm:$0xff]  }
 0x1df   :  { %6920 = vmatprep.subr.bf16.mxu0 %v14148_v4 }
 0x1e1   :  { %6839 = vmatpush1.bf16.msra.mxu1 %v14143_v2 }
 0x1e2   :  { %6921 = vmatpush1.bf16.msra.mxu0 %v14146_v7  ;;  %6840 = vmatprep.subr.bf16.mxu1 %v14151_v8  ;;  %v14238_v7 = vld [vmem:[%s21433_s1 + $0x1784] ss:$136 sps:$4 sm:$0xff]  }
 0x1e3   :  { %6922 = vmatprep.subr.bf16.mxu0 %v14154_v10 }
 0x1e5   :  { %6841 = vmatpush1.bf16.msra.mxu1 %v14149_v9 }
 0x1e6   :  { %6923 = vmatpush1.bf16.msra.mxu0 %v14152_v11  ;;  %6842 = vmatprep.subr.bf16.mxu1 %v14157_v12 }
 0x1e7   :  { %6924 = vmatprep.subr.bf16.mxu0 %v14160_v14  ;;  %v14233_v14 = vld [vmem:[%s21433_s1 + $0x1778] ss:$136 sps:$4 sm:$0xff]  }
 0x1e9   :  { %6843 = vmatpush1.bf16.msra.mxu1 %v14155_v13 }
 0x1ea   :  { %6925 = vmatpush1.bf16.msra.mxu0 %v14158_v15  ;;  %6844 = vmatprep.subr.bf16.mxu1 %v14163_v16 }
 0x1eb   :  { %6926 = vmatprep.subr.bf16.mxu0 %v14166_v18  ;;  %v14241_v18 = vld [vmem:[%s21433_s1 + $0x188c] ss:$136 sps:$4 sm:$0xff]  }
 0x1ed   :  { %6845 = vmatpush1.bf16.msra.mxu1 %v14161_v17  ;;  %v14236_v17 = vld [vmem:[%s21433_s1 + $0x1780] ss:$136 sps:$4 sm:$0xff]  }
 0x1ee   :  { %6927 = vmatpush1.bf16.msra.mxu0 %v14164_v19  ;;  %6846 = vmatprep.subr.bf16.mxu1 %v14169_v20  ;;  %v14244_v19 = vld [vmem:[%s21433_s1 + $0x1894] ss:$136 sps:$4 sm:$0xff]   ;;  %v14239_v20 = vld [vmem:[%s21433_s1 + $0x1888] ss:$136 sps:$4 sm:$0xff]  }
 0x1ef   :  { %6928 = vmatprep.subr.bf16.mxu0 %v14172_v22  ;;  %v14247_v22 = vld [vmem:[%s21433_s1 + $0x199c] ss:$136 sps:$4 sm:$0xff]  }
 0x1f1   :  { %6847 = vmatpush1.bf16.msra.mxu1 %v14167_v21  ;;  %v14242_v21 = vld [vmem:[%s21433_s1 + $0x1890] ss:$136 sps:$4 sm:$0xff]  }
 0x1f2   :  { %6929 = vmatpush1.bf16.msra.mxu0 %v14170_v23  ;;  %6848 = vmatprep.subr.bf16.mxu1 %v14175_v24  ;;  %v14250_v23 = vld [vmem:[%s21433_s1 + $0x19a4] ss:$136 sps:$4 sm:$0xff]   ;;  %v14245_v24 = vld [vmem:[%s21433_s1 + $0x1998] ss:$136 sps:$4 sm:$0xff]  }
 0x1f3   :  { %6930 = vmatprep.subr.bf16.mxu0 %v14178_v26  ;;  %v14253_v26 = vld [vmem:[%s21433_s1 + $0x1aac] ss:$136 sps:$4 sm:$0xff]  }
 0x1f5   :  { %6849 = vmatpush1.bf16.msra.mxu1 %v14173_v25  ;;  %v14248_v25 = vld [vmem:[%s21433_s1 + $0x19a0] ss:$136 sps:$4 sm:$0xff]  }
 0x1f6   :  { %6931 = vmatpush1.bf16.msra.mxu0 %v14176_v27  ;;  %6850 = vmatprep.subr.bf16.mxu1 %v14181_v28  ;;  %v14256_v27 = vld [vmem:[%s21433_s1 + $0x1ab4] ss:$136 sps:$4 sm:$0xff]   ;;  %v14251_v28 = vld [vmem:[%s21433_s1 + $0x1aa8] ss:$136 sps:$4 sm:$0xff]  }
 0x1f7   :  { %6932 = vmatprep.subr.bf16.mxu0 %v14184_v30  ;;  %v14259_v30 = vld [vmem:[%s21433_s1 + $0x1bbc] ss:$136 sps:$4 sm:$0xff]  }
 0x1f9   :  { %6851 = vmatpush1.bf16.msra.mxu1 %v14179_v29  ;;  %v14254_v29 = vld [vmem:[%s21433_s1 + $0x1ab0] ss:$136 sps:$4 sm:$0xff]  }
 0x1fa   :  { %6933 = vmatpush1.bf16.msra.mxu0 %v14182_v31  ;;  %6852 = vmatprep.subr.bf16.mxu1 %v14187_v36  ;;  %v14262_v31 = vld [vmem:[%s21433_s1 + $0x1bc4] ss:$136 sps:$4 sm:$0xff]   ;;  %v14257_v36 = vld [vmem:[%s21433_s1 + $0x1bb8] ss:$136 sps:$4 sm:$0xff]  }
 0x1fb   :  { %6934 = vmatprep.subr.bf16.mxu0 %v14190_v38  ;;  %v14265_v38 = vld [vmem:[%s21433_s1 + $0x1ccc] ss:$136 sps:$4 sm:$0xff]  }
 0x1fd   :  { %6853 = vmatpush1.bf16.msra.mxu1 %v14185_v37  ;;  %v14260_v37 = vld [vmem:[%s21433_s1 + $0x1bc0] ss:$136 sps:$4 sm:$0xff]  }
 0x1fe   :  { %6935 = vmatpush1.bf16.msra.mxu0 %v14188_v39  ;;  %6854 = vmatprep.subr.bf16.mxu1 %v14193_v40  ;;  %v14268_v39 = vld [vmem:[%s21433_s1 + $0x1cd4] ss:$136 sps:$4 sm:$0xff]   ;;  %v14263_v40 = vld [vmem:[%s21433_s1 + $0x1cc8] ss:$136 sps:$4 sm:$0xff]  }
 0x1ff   :  { %6936 = vmatprep.subr.bf16.mxu0 %v14196_v42  ;;  %v14271_v42 = vld [vmem:[%s21433_s1 + $0x1ddc] ss:$136 sps:$4 sm:$0xff]  }
 0x201   :  { %6855 = vmatpush1.bf16.msra.mxu1 %v14191_v41  ;;  %v14266_v41 = vld [vmem:[%s21433_s1 + $0x1cd0] ss:$136 sps:$4 sm:$0xff]  }
 0x202   :  { %6937 = vmatpush1.bf16.msra.mxu0 %v14194_v43  ;;  %6865 = vmatprep.subr.bf16.mxu1 %v14199_v44  ;;  %v14274_v43 = vld [vmem:[%s21433_s1 + $0x1de4] ss:$136 sps:$4 sm:$0xff]   ;;  %v14269_v44 = vld [vmem:[%s21433_s1 + $0x1dd8] ss:$136 sps:$4 sm:$0xff]  }
 0x203   :  { %6947 = vmatprep.subr.bf16.mxu0 %v14202_v46  ;;  %v14277_v46 = vld [vmem:[%s21433_s1 + $0x1eec] ss:$136 sps:$4 sm:$0xff]  }
 0x204   :  { %6857 = vmatmul.mubr.bf16.vlgmr.msra.gmra.mrb[8].mxu1 %v16516_v32 }
 0x205   :  { %6939 = vmatmul.mubr.bf16.vlgmr.msra.gmra.mrb[8].mxu0 %v16516_v32  ;;  %6866 = vmatpush1.bf16.msra.mxu1 %v14197_v45  ;;  %v14272_v45 = vld [vmem:[%s21433_s1 + $0x1de0] ss:$136 sps:$4 sm:$0xff]  }
 0x206   :  { %6897 = vmatprep.mubr.bf16.mxu1 %v16522_v35  ;;  %6948 = vmatpush1.bf16.msra.mxu0 %v14200_v47  ;;  %v14280_v47 = vld [vmem:[%s21433_s1 + $0x1ef4] ss:$136 sps:$4 sm:$0xff]  }
 0x207   :  { %6979 = vmatprep.mubr.bf16.mxu0 %v16522_v35  ;;  %6867 = vmatprep.subr.bf16.mxu1 %v14205_v48  ;;  %v14275_v48 = vld [vmem:[%s21433_s1 + $0x1ee8] ss:$136 sps:$4 sm:$0xff]  }
 0x208   :  { %6949 = vmatprep.subr.bf16.mxu0 %v14208_v51  ;;  %v14286_v51 = vld [vmem:[%s21433_s1 + $0x2004] ss:$136 sps:$4 sm:$0xff]  }
 0x209   :  { %6868 = vmatpush1.bf16.msra.mxu1 %v14203_v49  ;;  %v14278_v49 = vld [vmem:[%s21433_s1 + $0x1ef0] ss:$136 sps:$4 sm:$0xff]  }
 0x20a   :  { %6950 = vmatpush1.bf16.msra.mxu0 %v14206_v50  ;;  %6869 = vmatprep.subr.bf16.mxu1 %v14211_v52  ;;  %v14283_v50 = vld [vmem:[%s21433_s1 + $0x1ffc] ss:$136 sps:$4 sm:$0xff]   ;;  %v14281_v52 = vld [vmem:[%s21433_s1 + $0x1ff8] ss:$136 sps:$4 sm:$0xff]  }
 0x20b   :  { %6951 = vmatprep.subr.bf16.mxu0 %v14214_v53  ;;  %v14284_v53 = vld [vmem:[%s21433_s1 + $0x2000] ss:$136 sps:$4 sm:$0xff]  }
 0x20d   :  { %6870 = vmatpush1.bf16.msra.mxu1 %v14209_v54  ;;  %v14289_v54 = vld [vmem:[%s21433_s1 + $0x210c] ss:$136 sps:$4 sm:$0xff]  }
 0x20e   :  { %6952 = vmatpush1.bf16.msra.mxu0 %v14212_v55  ;;  %6871 = vmatprep.subr.bf16.mxu1 %v14217_v56  ;;  %v14292_v55 = vld [vmem:[%s21433_s1 + $0x2114] ss:$136 sps:$4 sm:$0xff]   ;;  %v14287_v56 = vld [vmem:[%s21433_s1 + $0x2108] ss:$136 sps:$4 sm:$0xff]  }
 0x20f   :  { %6953 = vmatprep.subr.bf16.mxu0 %v14220_v58  ;;  %v14295_v58 = vld [vmem:[%s21433_s1 + $0x2c] ss:$136 sps:$4 sm:$0xff]  }
 0x211   :  { %6872 = vmatpush1.bf16.msra.mxu1 %v14215_v57  ;;  %v14290_v57 = vld [vmem:[%s21433_s1 + $0x2110] ss:$136 sps:$4 sm:$0xff]  }
 0x212   :  { %6954 = vmatpush1.bf16.msra.mxu0 %v14218_v59  ;;  %6873 = vmatprep.subr.bf16.mxu1 %v14223_v60  ;;  %v14298_v59 = vld [vmem:[%s21433_s1 + $0x34] ss:$136 sps:$4 sm:$0xff]   ;;  %v14293_v60 = vld [vmem:[%s21433_s1 + $0x28] ss:$136 sps:$4 sm:$0xff]  }
 0x213   :  { %6955 = vmatprep.subr.bf16.mxu0 %v14226_v62  ;;  %v14301_v62 = vld [vmem:[%s21433_s1 + $0x13c] ss:$136 sps:$4 sm:$0xff]  }
 0x215   :  { %6874 = vmatpush1.bf16.msra.mxu1 %v14221_v61  ;;  %v14296_v61 = vld [vmem:[%s21433_s1 + $0x30] ss:$136 sps:$4 sm:$0xff]  }
 0x216   :  { %6956 = vmatpush1.bf16.msra.mxu0 %v14224_v63  ;;  %6875 = vmatprep.subr.bf16.mxu1 %v14229_v3  ;;  %v14304_v63 = vld [vmem:[%s21433_s1 + $0x144] ss:$136 sps:$4 sm:$0xff]   ;;  %v14299_v3 = vld [vmem:[%s21433_s1 + $0x138] ss:$136 sps:$4 sm:$0xff]  }
 0x217   :  { %v6612_v2 = vpop.f32.mrb[0].mxu1  ;;  %v6653_v4 = vpop.f32.mrb[0].mxu0  ;;  %6957 = vmatprep.subr.bf16.mxu0 %v14232_v5  ;;  %v14302_v5 = vld [vmem:[%s21433_s1 + $0x140] ss:$136 sps:$4 sm:$0xff]  }
 0x218   :  { %v17184_v8 = vadd.f32 %v6653_v4, %v6612_v2  ;;  %v6614_v9 = vpop.f32.mrb[1].mxu1  ;;  %v6655_v10 = vpop.f32.mrb[1].mxu0  ;;  %v14308_v2 = vld [vmem:[%s21433_s1 + $0x250] ss:$136 sps:$4 sm:$0xff]   ;;  %v14313_v4 = vld [vmem:[%s21433_s1 + $0x35c] ss:$136 sps:$4 sm:$0xff]  }
 0x219   :  { %v17186_v11 = vadd.f32 %v6655_v10, %v6614_v9  ;;  %6876 = vmatpush1.bf16.msra.mxu1 %v14227_v6  ;;  %v6616_v12 = vpop.f32.mrb[2].mxu1  ;;  %v6657_v13 = vpop.f32.mrb[2].mxu0  ;;  %v14307_v6 = vld [vmem:[%s21433_s1 + $0x24c] ss:$136 sps:$4 sm:$0xff]   ;;  %v14311_v9 = vld [vmem:[%s21433_s1 + $0x358] ss:$136 sps:$4 sm:$0xff]  }
 0x21a   :  { %6958 = vmatpush1.bf16.msra.mxu0 %v14230_v0  ;;  %v6617_v15 = vpop.f32.mrb[3].mxu1  ;;  %v6658_v16 = vpop.f32.mrb[3].mxu0  ;;  %6877 = vmatprep.subr.bf16.mxu1 %v14235_v1  ;;  %v14310_v0 = vld [vmem:[%s21433_s1 + $0x254] ss:$136 sps:$4 sm:$0xff]   ;;  %v14305_v1 = vld [vmem:[%s21433_s1 + $0x248] ss:$136 sps:$4 sm:$0xff]  }
 0x21b   :  { %6959 = vmatprep.subr.bf16.mxu0 %v14238_v7  ;;  %v14316_v7 = vld [vmem:[%s21433_s1 + $0x364] ss:$136 sps:$4 sm:$0xff]   ;;  %v14314_v10 = vld [vmem:[%s21433_s1 + $0x360] ss:$136 sps:$4 sm:$0xff]   ;;  %v14322_v13 = vld [vmem:[%s21433_s1 + $0x474] ss:$136 sps:$4 sm:$0xff]  }
 0x21c   :  { %v14319_v12 = vld [vmem:[%s21433_s1 + $0x46c] ss:$136 sps:$4 sm:$0xff]   ;;  %v14320_v15 = vld [vmem:[%s21433_s1 + $0x470] ss:$136 sps:$4 sm:$0xff]   ;;  %v14325_v16 = vld [vmem:[%s21433_s1 + $0x57c] ss:$136 sps:$4 sm:$0xff]  }
 0x21d   :  { %6878 = vmatpush1.bf16.msra.mxu1 %v14233_v14  ;;  %v14317_v14 = vld [vmem:[%s21433_s1 + $0x468] ss:$136 sps:$4 sm:$0xff]  }
 0x21e   :  { %6960 = vmatpush1.bf16.msra.mxu0 %v14236_v17  ;;  %6879 = vmatprep.subr.bf16.mxu1 %v14241_v18  ;;  %v14328_v17 = vld [vmem:[%s21433_s1 + $0x584] ss:$136 sps:$4 sm:$0xff]   ;;  %v14323_v18 = vld [vmem:[%s21433_s1 + $0x578] ss:$136 sps:$4 sm:$0xff]  }
 0x21f   :  { %6961 = vmatprep.subr.bf16.mxu0 %v14244_v19  ;;  %v14326_v19 = vld [vmem:[%s21433_s1 + $0x580] ss:$136 sps:$4 sm:$0xff]  }
 0x221   :  { %6880 = vmatpush1.bf16.msra.mxu1 %v14239_v20  ;;  %v14331_v20 = vld [vmem:[%s21433_s1 + $0x68c] ss:$136 sps:$4 sm:$0xff]  }
 0x222   :  { %6962 = vmatpush1.bf16.msra.mxu0 %v14242_v21  ;;  %6881 = vmatprep.subr.bf16.mxu1 %v14247_v22  ;;  %v14334_v21 = vld [vmem:[%s21433_s1 + $0x694] ss:$136 sps:$4 sm:$0xff]   ;;  %v14329_v22 = vld [vmem:[%s21433_s1 + $0x688] ss:$136 sps:$4 sm:$0xff]  }
 0x223   :  { %6963 = vmatprep.subr.bf16.mxu0 %v14250_v23  ;;  %v14332_v23 = vld [vmem:[%s21433_s1 + $0x690] ss:$136 sps:$4 sm:$0xff]  }
 0x225   :  { %6882 = vmatpush1.bf16.msra.mxu1 %v14245_v24  ;;  %v14337_v24 = vld [vmem:[%s21433_s1 + $0x79c] ss:$136 sps:$4 sm:$0xff]  }
 0x226   :  { %6964 = vmatpush1.bf16.msra.mxu0 %v14248_v25  ;;  %6883 = vmatprep.subr.bf16.mxu1 %v14253_v26  ;;  %v14340_v25 = vld [vmem:[%s21433_s1 + $0x7a4] ss:$136 sps:$4 sm:$0xff]   ;;  %v14335_v26 = vld [vmem:[%s21433_s1 + $0x798] ss:$136 sps:$4 sm:$0xff]  }
 0x227   :  { %6965 = vmatprep.subr.bf16.mxu0 %v14256_v27  ;;  %v14338_v27 = vld [vmem:[%s21433_s1 + $0x7a0] ss:$136 sps:$4 sm:$0xff]  }
 0x229   :  { %6884 = vmatpush1.bf16.msra.mxu1 %v14251_v28  ;;  %v14343_v28 = vld [vmem:[%s21433_s1 + $0x8ac] ss:$136 sps:$4 sm:$0xff]  }
 0x22a   :  { %6966 = vmatpush1.bf16.msra.mxu0 %v14254_v29  ;;  %6885 = vmatprep.subr.bf16.mxu1 %v14259_v30  ;;  %v14346_v29 = vld [vmem:[%s21433_s1 + $0x8b4] ss:$136 sps:$4 sm:$0xff]   ;;  %v14341_v30 = vld [vmem:[%s21433_s1 + $0x8a8] ss:$136 sps:$4 sm:$0xff]  }
 0x22b   :  { %6967 = vmatprep.subr.bf16.mxu0 %v14262_v31  ;;  %v14344_v31 = vld [vmem:[%s21433_s1 + $0x8b0] ss:$136 sps:$4 sm:$0xff]  }
 0x22d   :  { %6886 = vmatpush1.bf16.msra.mxu1 %v14257_v36  ;;  %v14349_v36 = vld [vmem:[%s21433_s1 + $0x9bc] ss:$136 sps:$4 sm:$0xff]  }
 0x22e   :  { %6968 = vmatpush1.bf16.msra.mxu0 %v14260_v37  ;;  %6887 = vmatprep.subr.bf16.mxu1 %v14265_v38  ;;  %v14352_v37 = vld [vmem:[%s21433_s1 + $0x9c4] ss:$136 sps:$4 sm:$0xff]   ;;  %v14347_v38 = vld [vmem:[%s21433_s1 + $0x9b8] ss:$136 sps:$4 sm:$0xff]  }
 0x22f   :  { %6969 = vmatprep.subr.bf16.mxu0 %v14268_v39  ;;  %v14350_v39 = vld [vmem:[%s21433_s1 + $0x9c0] ss:$136 sps:$4 sm:$0xff]  }
 0x231   :  { %6888 = vmatpush1.bf16.msra.mxu1 %v14263_v40  ;;  %v14355_v40 = vld [vmem:[%s21433_s1 + $0xacc] ss:$136 sps:$4 sm:$0xff]  }
 0x232   :  { %6970 = vmatpush1.bf16.msra.mxu0 %v14266_v41  ;;  %6889 = vmatprep.subr.bf16.mxu1 %v14271_v42  ;;  %v14358_v41 = vld [vmem:[%s21433_s1 + $0xad4] ss:$136 sps:$4 sm:$0xff]   ;;  %v14353_v42 = vld [vmem:[%s21433_s1 + $0xac8] ss:$136 sps:$4 sm:$0xff]  }
 0x233   :  { %6971 = vmatprep.subr.bf16.mxu0 %v14274_v43  ;;  %v14356_v43 = vld [vmem:[%s21433_s1 + $0xad0] ss:$136 sps:$4 sm:$0xff]  }
 0x235   :  { %6890 = vmatpush1.bf16.msra.mxu1 %v14269_v44  ;;  %v14361_v44 = vld [vmem:[%s21433_s1 + $0xbdc] ss:$136 sps:$4 sm:$0xff]  }
 0x236   :  { %6972 = vmatpush1.bf16.msra.mxu0 %v14272_v45  ;;  %6891 = vmatprep.subr.bf16.mxu1 %v14277_v46  ;;  %v14364_v45 = vld [vmem:[%s21433_s1 + $0xbe4] ss:$136 sps:$4 sm:$0xff]   ;;  %v14359_v46 = vld [vmem:[%s21433_s1 + $0xbd8] ss:$136 sps:$4 sm:$0xff]  }
 0x237   :  { %6973 = vmatprep.subr.bf16.mxu0 %v14280_v47  ;;  %v14362_v47 = vld [vmem:[%s21433_s1 + $0xbe0] ss:$136 sps:$4 sm:$0xff]  }
 0x239   :  { %6892 = vmatpush1.bf16.msra.mxu1 %v14275_v48  ;;  %v14367_v48 = vld [vmem:[%s21433_s1 + $0xcec] ss:$136 sps:$4 sm:$0xff]  }
 0x23a   :  { %6974 = vmatpush1.bf16.msra.mxu0 %v14278_v49  ;;  %6893 = vmatprep.subr.bf16.mxu1 %v14283_v50  ;;  %v14370_v49 = vld [vmem:[%s21433_s1 + $0xcf4] ss:$136 sps:$4 sm:$0xff]   ;;  %v14365_v50 = vld [vmem:[%s21433_s1 + $0xce8] ss:$136 sps:$4 sm:$0xff]  }
 0x23b   :  { %6975 = vmatprep.subr.bf16.mxu0 %v14286_v51  ;;  %v14368_v51 = vld [vmem:[%s21433_s1 + $0xcf0] ss:$136 sps:$4 sm:$0xff]  }
 0x23d   :  { %6894 = vmatpush1.bf16.msra.mxu1 %v14281_v52  ;;  %v14373_v52 = vld [vmem:[%s21433_s1 + $0xdfc] ss:$136 sps:$4 sm:$0xff]  }
 0x23e   :  { %6976 = vmatpush1.bf16.msra.mxu0 %v14284_v53  ;;  %6895 = vmatprep.subr.bf16.mxu1 %v14289_v54  ;;  %v14376_v53 = vld [vmem:[%s21433_s1 + $0xe04] ss:$136 sps:$4 sm:$0xff]   ;;  %v14371_v54 = vld [vmem:[%s21433_s1 + $0xdf8] ss:$136 sps:$4 sm:$0xff]  }
 0x23f   :  { %6977 = vmatprep.subr.bf16.mxu0 %v14292_v55  ;;  %v14374_v55 = vld [vmem:[%s21433_s1 + $0xe00] ss:$136 sps:$4 sm:$0xff]  }
 0x241   :  { %6896 = vmatpush1.bf16.msra.mxu1 %v14287_v56  ;;  %v14379_v56 = vld [vmem:[%s21433_s1 + $0xf0c] ss:$136 sps:$4 sm:$0xff]  }
 0x242   :  { %6978 = vmatpush1.bf16.msra.mxu0 %v14290_v57  ;;  %6988 = vmatprep.subr.bf16.mxu1 %v14295_v58  ;;  %v14382_v57 = vld [vmem:[%s21433_s1 + $0xf14] ss:$136 sps:$4 sm:$0xff]   ;;  %v14377_v58 = vld [vmem:[%s21433_s1 + $0xf08] ss:$136 sps:$4 sm:$0xff]  }
 0x243   :  { %7070 = vmatprep.subr.bf16.mxu0 %v14298_v59  ;;  %v14380_v59 = vld [vmem:[%s21433_s1 + $0xf10] ss:$136 sps:$4 sm:$0xff]  }
 0x244   :  { %6898 = vmatmul.mubr.bf16.vlgmr.msra.gmra.mrb[8].mxu1 %v16520_v34 }
 0x245   :  { %6980 = vmatmul.mubr.bf16.vlgmr.msra.gmra.mrb[8].mxu0 %v16520_v34  ;;  %6989 = vmatpush1.bf16.msra.mxu1 %v14293_v60  ;;  %v14385_v60 = vld [vmem:[%s21433_s1 + $0x101c] ss:$136 sps:$4 sm:$0xff]  }
 0x246   :  { %7020 = vmatprep.mubr.bf16.mxu1 %v16518_v33  ;;  %7071 = vmatpush1.bf16.msra.mxu0 %v14296_v61  ;;  %v14388_v61 = vld [vmem:[%s21433_s1 + $0x1024] ss:$136 sps:$4 sm:$0xff]  }
 0x247   :  { %7102 = vmatprep.mubr.bf16.mxu0 %v16518_v33  ;;  %6990 = vmatprep.subr.bf16.mxu1 %v14301_v62  ;;  %v14383_v62 = vld [vmem:[%s21433_s1 + $0x1018] ss:$136 sps:$4 sm:$0xff]  }
 0x248   :  { %7072 = vmatprep.subr.bf16.mxu0 %v14304_v63  ;;  %v14386_v63 = vld [vmem:[%s21433_s1 + $0x1020] ss:$136 sps:$4 sm:$0xff]  }
 0x249   :  { %6991 = vmatpush1.bf16.msra.mxu1 %v14299_v3  ;;  %v14391_v3 = vld [vmem:[%s21433_s1 + $0x112c] ss:$136 sps:$4 sm:$0xff]  }
 0x24a   :  { %7073 = vmatpush1.bf16.msra.mxu0 %v14302_v5  ;;  %6992 = vmatprep.subr.bf16.mxu1 %v14307_v6  ;;  %v14394_v5 = vld [vmem:[%s21433_s1 + $0x1134] ss:$136 sps:$4 sm:$0xff]   ;;  %v14389_v6 = vld [vmem:[%s21433_s1 + $0x1128] ss:$136 sps:$4 sm:$0xff]  }
 0x24b   :  { %7074 = vmatprep.subr.bf16.mxu0 %v14310_v0  ;;  %v14392_v0 = vld [vmem:[%s21433_s1 + $0x1130] ss:$136 sps:$4 sm:$0xff]  }
 0x24d   :  { %6993 = vmatpush1.bf16.msra.mxu1 %v14305_v1  ;;  %v14397_v1 = vld [vmem:[%s21433_s1 + $0x123c] ss:$136 sps:$4 sm:$0xff]  }
 0x24e   :  { %7075 = vmatpush1.bf16.msra.mxu0 %v14308_v2  ;;  %6994 = vmatprep.subr.bf16.mxu1 %v14313_v4  ;;  %v14400_v2 = vld [vmem:[%s21433_s1 + $0x1244] ss:$136 sps:$4 sm:$0xff]   ;;  %v14395_v4 = vld [vmem:[%s21433_s1 + $0x1238] ss:$136 sps:$4 sm:$0xff]  }
 0x24f   :  { %7076 = vmatprep.subr.bf16.mxu0 %v14316_v7  ;;  %v14398_v7 = vld [vmem:[%s21433_s1 + $0x1240] ss:$136 sps:$4 sm:$0xff]  }
 0x251   :  { %6995 = vmatpush1.bf16.msra.mxu1 %v14311_v9  ;;  %v14403_v9 = vld [vmem:[%s21433_s1 + $0x134c] ss:$136 sps:$4 sm:$0xff]  }
 0x252   :  { %7077 = vmatpush1.bf16.msra.mxu0 %v14314_v10  ;;  %6996 = vmatprep.subr.bf16.mxu1 %v14319_v12  ;;  %v14406_v10 = vld [vmem:[%s21433_s1 + $0x1354] ss:$136 sps:$4 sm:$0xff]   ;;  %v14401_v12 = vld [vmem:[%s21433_s1 + $0x1348] ss:$136 sps:$4 sm:$0xff]  }
 0x253   :  { %7078 = vmatprep.subr.bf16.mxu0 %v14322_v13  ;;  %v14404_v13 = vld [vmem:[%s21433_s1 + $0x1350] ss:$136 sps:$4 sm:$0xff]  }
 0x255   :  { %6997 = vmatpush1.bf16.msra.mxu1 %v14317_v14  ;;  %v14409_v14 = vld [vmem:[%s21433_s1 + $0x145c] ss:$136 sps:$4 sm:$0xff]  }
 0x256   :  { %7079 = vmatpush1.bf16.msra.mxu0 %v14320_v15  ;;  %6998 = vmatprep.subr.bf16.mxu1 %v14325_v16  ;;  %v14412_v15 = vld [vmem:[%s21433_s1 + $0x1464] ss:$136 sps:$4 sm:$0xff]   ;;  %v14407_v16 = vld [vmem:[%s21433_s1 + $0x1458] ss:$136 sps:$4 sm:$0xff]  }
 0x257   :  { %7080 = vmatprep.subr.bf16.mxu0 %v14328_v17  ;;  %v14410_v17 = vld [vmem:[%s21433_s1 + $0x1460] ss:$136 sps:$4 sm:$0xff]  }
 0x259   :  { %6999 = vmatpush1.bf16.msra.mxu1 %v14323_v18  ;;  %v14415_v18 = vld [vmem:[%s21433_s1 + $0x156c] ss:$136 sps:$4 sm:$0xff]  }
 0x25a   :  { %7081 = vmatpush1.bf16.msra.mxu0 %v14326_v19  ;;  %7000 = vmatprep.subr.bf16.mxu1 %v14331_v20  ;;  %v14418_v19 = vld [vmem:[%s21433_s1 + $0x1574] ss:$136 sps:$4 sm:$0xff]   ;;  %v14413_v20 = vld [vmem:[%s21433_s1 + $0x1568] ss:$136 sps:$4 sm:$0xff]  }
 0x25b   :  { %7082 = vmatprep.subr.bf16.mxu0 %v14334_v21  ;;  %v14416_v21 = vld [vmem:[%s21433_s1 + $0x1570] ss:$136 sps:$4 sm:$0xff]  }
 0x25d   :  { %7001 = vmatpush1.bf16.msra.mxu1 %v14329_v22  ;;  %v14421_v22 = vld [vmem:[%s21433_s1 + $0x167c] ss:$136 sps:$4 sm:$0xff]  }
 0x25e   :  { %7083 = vmatpush1.bf16.msra.mxu0 %v14332_v23  ;;  %7002 = vmatprep.subr.bf16.mxu1 %v14337_v24  ;;  %v14424_v23 = vld [vmem:[%s21433_s1 + $0x1684] ss:$136 sps:$4 sm:$0xff]   ;;  %v14419_v24 = vld [vmem:[%s21433_s1 + $0x1678] ss:$136 sps:$4 sm:$0xff]  }
 0x25f   :  { %7084 = vmatprep.subr.bf16.mxu0 %v14340_v25  ;;  %v14422_v25 = vld [vmem:[%s21433_s1 + $0x1680] ss:$136 sps:$4 sm:$0xff]  }
 0x261   :  { %7003 = vmatpush1.bf16.msra.mxu1 %v14335_v26  ;;  %v14427_v26 = vld [vmem:[%s21433_s1 + $0x178c] ss:$136 sps:$4 sm:$0xff]  }
 0x262   :  { %7085 = vmatpush1.bf16.msra.mxu0 %v14338_v27  ;;  %7004 = vmatprep.subr.bf16.mxu1 %v14343_v28  ;;  %v14430_v28 = vld [vmem:[%s21433_s1 + $0x1794] ss:$136 sps:$4 sm:$0xff]  }
 0x263   :  { %7086 = vmatprep.subr.bf16.mxu0 %v14346_v29 }
 0x265   :  { %7005 = vmatpush1.bf16.msra.mxu1 %v14341_v30 }
 0x266   :  { %7087 = vmatpush1.bf16.msra.mxu0 %v14344_v31  ;;  %7006 = vmatprep.subr.bf16.mxu1 %v14349_v36 }
 0x267   :  { %7088 = vmatprep.subr.bf16.mxu0 %v14352_v37  ;;  %v14425_v37 = vld [vmem:[%s21433_s1 + $0x1788] ss:$136 sps:$4 sm:$0xff]  }
 0x269   :  { %7007 = vmatpush1.bf16.msra.mxu1 %v14347_v38 }
 0x26a   :  { %7089 = vmatpush1.bf16.msra.mxu0 %v14350_v39  ;;  %7008 = vmatprep.subr.bf16.mxu1 %v14355_v40  ;;  %v14428_v40 = vld [vmem:[%s21433_s1 + $0x1790] ss:$136 sps:$4 sm:$0xff]  }
 0x26b   :  { %7090 = vmatprep.subr.bf16.mxu0 %v14358_v41  ;;  %v14433_v41 = vld [vmem:[%s21433_s1 + $0x189c] ss:$136 sps:$4 sm:$0xff]  }
 0x26d   :  { %7009 = vmatpush1.bf16.msra.mxu1 %v14353_v42 }
 0x26e   :  { %7091 = vmatpush1.bf16.msra.mxu0 %v14356_v43  ;;  %7010 = vmatprep.subr.bf16.mxu1 %v14361_v44  ;;  %v14436_v43 = vld [vmem:[%s21433_s1 + $0x18a4] ss:$136 sps:$4 sm:$0xff]   ;;  %v14431_v44 = vld [vmem:[%s21433_s1 + $0x1898] ss:$136 sps:$4 sm:$0xff]  }
 0x26f   :  { %7092 = vmatprep.subr.bf16.mxu0 %v14364_v45  ;;  %v14434_v45 = vld [vmem:[%s21433_s1 + $0x18a0] ss:$136 sps:$4 sm:$0xff]  }
 0x271   :  { %7011 = vmatpush1.bf16.msra.mxu1 %v14359_v46  ;;  %v14439_v46 = vld [vmem:[%s21433_s1 + $0x19ac] ss:$136 sps:$4 sm:$0xff]  }
 0x272   :  { %7093 = vmatpush1.bf16.msra.mxu0 %v14362_v47  ;;  %7012 = vmatprep.subr.bf16.mxu1 %v14367_v48  ;;  %v14442_v47 = vld [vmem:[%s21433_s1 + $0x19b4] ss:$136 sps:$4 sm:$0xff]   ;;  %v14437_v48 = vld [vmem:[%s21433_s1 + $0x19a8] ss:$136 sps:$4 sm:$0xff]  }
 0x273   :  { %7094 = vmatprep.subr.bf16.mxu0 %v14370_v49  ;;  %v14440_v49 = vld [vmem:[%s21433_s1 + $0x19b0] ss:$136 sps:$4 sm:$0xff]  }
 0x275   :  { %7013 = vmatpush1.bf16.msra.mxu1 %v14365_v50  ;;  %v14445_v50 = vld [vmem:[%s21433_s1 + $0x1abc] ss:$136 sps:$4 sm:$0xff]  }
 0x276   :  { %7095 = vmatpush1.bf16.msra.mxu0 %v14368_v51  ;;  %7014 = vmatprep.subr.bf16.mxu1 %v14373_v52  ;;  %v14448_v51 = vld [vmem:[%s21433_s1 + $0x1ac4] ss:$136 sps:$4 sm:$0xff]   ;;  %v14443_v52 = vld [vmem:[%s21433_s1 + $0x1ab8] ss:$136 sps:$4 sm:$0xff]  }
 0x277   :  { %7096 = vmatprep.subr.bf16.mxu0 %v14376_v53  ;;  %v14446_v53 = vld [vmem:[%s21433_s1 + $0x1ac0] ss:$136 sps:$4 sm:$0xff]  }
 0x279   :  { %7015 = vmatpush1.bf16.msra.mxu1 %v14371_v54  ;;  %v14451_v54 = vld [vmem:[%s21433_s1 + $0x1bcc] ss:$136 sps:$4 sm:$0xff]  }
 0x27a   :  { %7097 = vmatpush1.bf16.msra.mxu0 %v14374_v55  ;;  %7016 = vmatprep.subr.bf16.mxu1 %v14379_v56  ;;  %v14454_v55 = vld [vmem:[%s21433_s1 + $0x1bd4] ss:$136 sps:$4 sm:$0xff]   ;;  %v14449_v56 = vld [vmem:[%s21433_s1 + $0x1bc8] ss:$136 sps:$4 sm:$0xff]  }
 0x27b   :  { %7098 = vmatprep.subr.bf16.mxu0 %v14382_v57  ;;  %v14452_v57 = vld [vmem:[%s21433_s1 + $0x1bd0] ss:$136 sps:$4 sm:$0xff]  }
 0x27d   :  { %7017 = vmatpush1.bf16.msra.mxu1 %v14377_v58  ;;  %v14457_v58 = vld [vmem:[%s21433_s1 + $0x1cdc] ss:$136 sps:$4 sm:$0xff]  }
 0x27e   :  { %7099 = vmatpush1.bf16.msra.mxu0 %v14380_v59  ;;  %7018 = vmatprep.subr.bf16.mxu1 %v14385_v60  ;;  %v14460_v59 = vld [vmem:[%s21433_s1 + $0x1ce4] ss:$136 sps:$4 sm:$0xff]   ;;  %v14455_v60 = vld [vmem:[%s21433_s1 + $0x1cd8] ss:$136 sps:$4 sm:$0xff]  }
 0x27f   :  { %7100 = vmatprep.subr.bf16.mxu0 %v14388_v61  ;;  %v14458_v61 = vld [vmem:[%s21433_s1 + $0x1ce0] ss:$136 sps:$4 sm:$0xff]  }
 0x281   :  { %7019 = vmatpush1.bf16.msra.mxu1 %v14383_v62  ;;  %v14463_v62 = vld [vmem:[%s21433_s1 + $0x1dec] ss:$136 sps:$4 sm:$0xff]  }
 0x282   :  { %7101 = vmatpush1.bf16.msra.mxu0 %v14386_v63  ;;  %7029 = vmatprep.subr.bf16.mxu1 %v14391_v3  ;;  %v14466_v63 = vld [vmem:[%s21433_s1 + $0x1df4] ss:$136 sps:$4 sm:$0xff]   ;;  %v14461_v3 = vld [vmem:[%s21433_s1 + $0x1de8] ss:$136 sps:$4 sm:$0xff]  }
 0x283   :  { %7111 = vmatprep.subr.bf16.mxu0 %v14394_v5  ;;  %v14464_v5 = vld [vmem:[%s21433_s1 + $0x1df0] ss:$136 sps:$4 sm:$0xff]  }
 0x284   :  { %7021 = vmatmul.mubr.bf16.vlgmr.msra.gmra.mrb[12].mxu1 %v16516_v32 }
 0x285   :  { %7103 = vmatmul.mubr.bf16.vlgmr.msra.gmra.mrb[12].mxu0 %v16516_v32  ;;  %7030 = vmatpush1.bf16.msra.mxu1 %v14389_v6  ;;  %v14469_v6 = vld [vmem:[%s21433_s1 + $0x1efc] ss:$136 sps:$4 sm:$0xff]  }
 0x286   :  { %7061 = vmatprep.mubr.bf16.mxu1 %v16522_v35  ;;  %7112 = vmatpush1.bf16.msra.mxu0 %v14392_v0  ;;  %v14472_v0 = vld [vmem:[%s21433_s1 + $0x1f04] ss:$136 sps:$4 sm:$0xff]  }
 0x287   :  { %7143 = vmatprep.mubr.bf16.mxu0 %v16522_v35  ;;  %7031 = vmatprep.subr.bf16.mxu1 %v14397_v1  ;;  %v14467_v1 = vld [vmem:[%s21433_s1 + $0x1ef8] ss:$136 sps:$4 sm:$0xff]  }
 0x288   :  { %7113 = vmatprep.subr.bf16.mxu0 %v14400_v2  ;;  %v14470_v2 = vld [vmem:[%s21433_s1 + $0x1f00] ss:$136 sps:$4 sm:$0xff]  }
 0x289   :  { %7032 = vmatpush1.bf16.msra.mxu1 %v14395_v4  ;;  %v14475_v4 = vld [vmem:[%s21433_s1 + $0x200c] ss:$136 sps:$4 sm:$0xff]  }
 0x28a   :  { %7114 = vmatpush1.bf16.msra.mxu0 %v14398_v7  ;;  %7033 = vmatprep.subr.bf16.mxu1 %v14403_v9  ;;  %v14478_v7 = vld [vmem:[%s21433_s1 + $0x2014] ss:$136 sps:$4 sm:$0xff]   ;;  %v14473_v9 = vld [vmem:[%s21433_s1 + $0x2008] ss:$136 sps:$4 sm:$0xff]  }
 0x28b   :  { %7115 = vmatprep.subr.bf16.mxu0 %v14406_v10  ;;  %v14476_v10 = vld [vmem:[%s21433_s1 + $0x2010] ss:$136 sps:$4 sm:$0xff]  }
 0x28d   :  { %7034 = vmatpush1.bf16.msra.mxu1 %v14401_v12  ;;  %v14481_v12 = vld [vmem:[%s21433_s1 + $0x211c] ss:$136 sps:$4 sm:$0xff]  }
 0x28e   :  { %7116 = vmatpush1.bf16.msra.mxu0 %v14404_v13  ;;  %7035 = vmatprep.subr.bf16.mxu1 %v14409_v14  ;;  %v14484_v13 = vld [vmem:[%s21433_s1 + $0x2124] ss:$136 sps:$4 sm:$0xff]   ;;  %v14479_v14 = vld [vmem:[%s21433_s1 + $0x2118] ss:$136 sps:$4 sm:$0xff]  }
 0x28f   :  { %7117 = vmatprep.subr.bf16.mxu0 %v14412_v15  ;;  %v14482_v15 = vld [vmem:[%s21433_s1 + $0x2120] ss:$136 sps:$4 sm:$0xff]  }
 0x291   :  { %7036 = vmatpush1.bf16.msra.mxu1 %v14407_v16  ;;  %v14487_v16 = vld [vmem:[%s21433_s1 + $0x3c] ss:$136 sps:$4 sm:$0xff]  }
 0x292   :  { %7118 = vmatpush1.bf16.msra.mxu0 %v14410_v17  ;;  %7037 = vmatprep.subr.bf16.mxu1 %v14415_v18  ;;  %v14490_v17 = vld [vmem:[%s21433_s1 + $0x44] ss:$136 sps:$4 sm:$0xff]   ;;  %v14485_v18 = vld [vmem:[%s21433_s1 + $0x38] ss:$136 sps:$4 sm:$0xff]  }
 0x293   :  { %7119 = vmatprep.subr.bf16.mxu0 %v14418_v19  ;;  %v14488_v19 = vld [vmem:[%s21433_s1 + $0x40] ss:$136 sps:$4 sm:$0xff]  }
 0x295   :  { %7038 = vmatpush1.bf16.msra.mxu1 %v14413_v20  ;;  %v14493_v20 = vld [vmem:[%s21433_s1 + $0x14c] ss:$136 sps:$4 sm:$0xff]  }
 0x296   :  { %7120 = vmatpush1.bf16.msra.mxu0 %v14416_v21  ;;  %7039 = vmatprep.subr.bf16.mxu1 %v14421_v22  ;;  %v14496_v21 = vld [vmem:[%s21433_s1 + $0x154] ss:$136 sps:$4 sm:$0xff]   ;;  %v14491_v22 = vld [vmem:[%s21433_s1 + $0x148] ss:$136 sps:$4 sm:$0xff]  }
 0x297   :  { %v17577_v27 = vpop.f32.mrb[4].mxu1  ;;  %7121 = vmatprep.subr.bf16.mxu0 %v14424_v23  ;;  %v14494_v23 = vld [vmem:[%s21433_s1 + $0x150] ss:$136 sps:$4 sm:$0xff]  }
 0x298   :  { %v17582_v29 = vpop.f32.mrb[4].mxu0  ;;  %v17584_v30 = vpop.f32.mrb[5].mxu1 }
 0x299   :  { %v17586_v31 = vpop.f32.mrb[5].mxu0  ;;  %v6739_v36 = vpop.f32.mrb[6].mxu1  ;;  %7040 = vmatpush1.bf16.msra.mxu1 %v14419_v24  ;;  %v14499_v24 = vld [vmem:[%s21433_s1 + $0x25c] ss:$136 sps:$4 sm:$0xff]  }
 0x29a   :  { %v6821_v38 = vpop.f32.mrb[6].mxu0  ;;  %7122 = vmatpush1.bf16.msra.mxu0 %v14422_v25  ;;  %v6740_v39 = vpop.f32.mrb[7].mxu1  ;;  %7041 = vmatprep.subr.bf16.mxu1 %v14427_v26  ;;  %v14502_v25 = vld [vmem:[%s21433_s1 + $0x264] ss:$136 sps:$4 sm:$0xff]   ;;  %v14497_v26 = vld [vmem:[%s21433_s1 + $0x258] ss:$136 sps:$4 sm:$0xff]  }
 0x29b   :  { %v6822_v42 = vpop.f32.mrb[7].mxu0  ;;  %7123 = vmatprep.subr.bf16.mxu0 %v14430_v28  ;;  %v14500_v28 = vld [vmem:[%s21433_s1 + $0x260] ss:$136 sps:$4 sm:$0xff]   ;;  %v14505_v36 = vld [vmem:[%s21433_s1 + $0x36c] ss:$136 sps:$4 sm:$0xff]  }
 0x29c   :  { %v14503_v38 = vld [vmem:[%s21433_s1 + $0x368] ss:$136 sps:$4 sm:$0xff]   ;;  %v14509_v42 = vld [vmem:[%s21433_s1 + $0x478] ss:$136 sps:$4 sm:$0xff]  }
 0x29d   :  { %7042 = vmatpush1.bf16.msra.mxu1 %v14425_v37  ;;  %v14508_v37 = vld [vmem:[%s21433_s1 + $0x374] ss:$136 sps:$4 sm:$0xff]   ;;  %v14506_v39 = vld [vmem:[%s21433_s1 + $0x370] ss:$136 sps:$4 sm:$0xff]  }
 0x29e   :  { %7124 = vmatpush1.bf16.msra.mxu0 %v14428_v40  ;;  %7043 = vmatprep.subr.bf16.mxu1 %v14433_v41  ;;  %v14511_v40 = vld [vmem:[%s21433_s1 + $0x47c] ss:$136 sps:$4 sm:$0xff]  }
 0x29f   :  { %7125 = vmatprep.subr.bf16.mxu0 %v14436_v43  ;;  %v14514_v41 = vld [vmem:[%s21433_s1 + $0x484] ss:$136 sps:$4 sm:$0xff]   ;;  %v14512_v43 = vld [vmem:[%s21433_s1 + $0x480] ss:$136 sps:$4 sm:$0xff]  }
 0x2a1   :  { %7044 = vmatpush1.bf16.msra.mxu1 %v14431_v44  ;;  %v14517_v44 = vld [vmem:[%s21433_s1 + $0x58c] ss:$136 sps:$4 sm:$0xff]  }
 0x2a2   :  { %7126 = vmatpush1.bf16.msra.mxu0 %v14434_v45  ;;  %7045 = vmatprep.subr.bf16.mxu1 %v14439_v46  ;;  %v14520_v45 = vld [vmem:[%s21433_s1 + $0x594] ss:$136 sps:$4 sm:$0xff]   ;;  %v14515_v46 = vld [vmem:[%s21433_s1 + $0x588] ss:$136 sps:$4 sm:$0xff]  }
 0x2a3   :  { %7127 = vmatprep.subr.bf16.mxu0 %v14442_v47  ;;  %v14518_v47 = vld [vmem:[%s21433_s1 + $0x590] ss:$136 sps:$4 sm:$0xff]  }
 0x2a5   :  { %7046 = vmatpush1.bf16.msra.mxu1 %v14437_v48  ;;  %v14523_v48 = vld [vmem:[%s21433_s1 + $0x69c] ss:$136 sps:$4 sm:$0xff]  }
 0x2a6   :  { %7128 = vmatpush1.bf16.msra.mxu0 %v14440_v49  ;;  %7047 = vmatprep.subr.bf16.mxu1 %v14445_v50  ;;  %v14526_v49 = vld [vmem:[%s21433_s1 + $0x6a4] ss:$136 sps:$4 sm:$0xff]   ;;  %v14521_v50 = vld [vmem:[%s21433_s1 + $0x698] ss:$136 sps:$4 sm:$0xff]  }
 0x2a7   :  { %7129 = vmatprep.subr.bf16.mxu0 %v14448_v51  ;;  %v14524_v51 = vld [vmem:[%s21433_s1 + $0x6a0] ss:$136 sps:$4 sm:$0xff]  }
 0x2a9   :  { %7048 = vmatpush1.bf16.msra.mxu1 %v14443_v52  ;;  %v14529_v52 = vld [vmem:[%s21433_s1 + $0x7ac] ss:$136 sps:$4 sm:$0xff]  }
 0x2aa   :  { %7130 = vmatpush1.bf16.msra.mxu0 %v14446_v53  ;;  %7049 = vmatprep.subr.bf16.mxu1 %v14451_v54  ;;  %v14532_v53 = vld [vmem:[%s21433_s1 + $0x7b4] ss:$136 sps:$4 sm:$0xff]   ;;  %v14527_v54 = vld [vmem:[%s21433_s1 + $0x7a8] ss:$136 sps:$4 sm:$0xff]  }
 0x2ab   :  { %7131 = vmatprep.subr.bf16.mxu0 %v14454_v55  ;;  %v14530_v55 = vld [vmem:[%s21433_s1 + $0x7b0] ss:$136 sps:$4 sm:$0xff]  }
 0x2ad   :  { %7050 = vmatpush1.bf16.msra.mxu1 %v14449_v56  ;;  %v14535_v56 = vld [vmem:[%s21433_s1 + $0x8bc] ss:$136 sps:$4 sm:$0xff]  }
 0x2ae   :  { %7132 = vmatpush1.bf16.msra.mxu0 %v14452_v57  ;;  %7051 = vmatprep.subr.bf16.mxu1 %v14457_v58  ;;  %v14538_v57 = vld [vmem:[%s21433_s1 + $0x8c4] ss:$136 sps:$4 sm:$0xff]   ;;  %v14533_v58 = vld [vmem:[%s21433_s1 + $0x8b8] ss:$136 sps:$4 sm:$0xff]  }
 0x2af   :  { %7133 = vmatprep.subr.bf16.mxu0 %v14460_v59  ;;  %v14536_v59 = vld [vmem:[%s21433_s1 + $0x8c0] ss:$136 sps:$4 sm:$0xff]  }
 0x2b1   :  { %7052 = vmatpush1.bf16.msra.mxu1 %v14455_v60  ;;  %v14541_v60 = vld [vmem:[%s21433_s1 + $0x9cc] ss:$136 sps:$4 sm:$0xff]  }
 0x2b2   :  { %7134 = vmatpush1.bf16.msra.mxu0 %v14458_v61  ;;  %7053 = vmatprep.subr.bf16.mxu1 %v14463_v62  ;;  %v14544_v61 = vld [vmem:[%s21433_s1 + $0x9d4] ss:$136 sps:$4 sm:$0xff]   ;;  %v14539_v62 = vld [vmem:[%s21433_s1 + $0x9c8] ss:$136 sps:$4 sm:$0xff]  }
 0x2b3   :  { %7135 = vmatprep.subr.bf16.mxu0 %v14466_v63  ;;  %v14542_v63 = vld [vmem:[%s21433_s1 + $0x9d0] ss:$136 sps:$4 sm:$0xff]  }
 0x2b5   :  { %7054 = vmatpush1.bf16.msra.mxu1 %v14461_v3  ;;  %v14547_v3 = vld [vmem:[%s21433_s1 + $0xadc] ss:$136 sps:$4 sm:$0xff]  }
 0x2b6   :  { %7136 = vmatpush1.bf16.msra.mxu0 %v14464_v5  ;;  %7055 = vmatprep.subr.bf16.mxu1 %v14469_v6  ;;  %v14550_v5 = vld [vmem:[%s21433_s1 + $0xae4] ss:$136 sps:$4 sm:$0xff]   ;;  %v14545_v6 = vld [vmem:[%s21433_s1 + $0xad8] ss:$136 sps:$4 sm:$0xff]  }
 0x2b7   :  { %7137 = vmatprep.subr.bf16.mxu0 %v14472_v0  ;;  %v14548_v0 = vld [vmem:[%s21433_s1 + $0xae0] ss:$136 sps:$4 sm:$0xff]  }
 0x2b9   :  { %7056 = vmatpush1.bf16.msra.mxu1 %v14467_v1  ;;  %v14553_v1 = vld [vmem:[%s21433_s1 + $0xbec] ss:$136 sps:$4 sm:$0xff]  }
 0x2ba   :  { %7138 = vmatpush1.bf16.msra.mxu0 %v14470_v2  ;;  %7057 = vmatprep.subr.bf16.mxu1 %v14475_v4  ;;  %v14556_v2 = vld [vmem:[%s21433_s1 + $0xbf4] ss:$136 sps:$4 sm:$0xff]   ;;  %v14551_v4 = vld [vmem:[%s21433_s1 + $0xbe8] ss:$136 sps:$4 sm:$0xff]  }
 0x2bb   :  { %7139 = vmatprep.subr.bf16.mxu0 %v14478_v7  ;;  %v14554_v7 = vld [vmem:[%s21433_s1 + $0xbf0] ss:$136 sps:$4 sm:$0xff]  }
 0x2bd   :  { %7058 = vmatpush1.bf16.msra.mxu1 %v14473_v9  ;;  %v14559_v9 = vld [vmem:[%s21433_s1 + $0xcfc] ss:$136 sps:$4 sm:$0xff]  }
 0x2be   :  { %7140 = vmatpush1.bf16.msra.mxu0 %v14476_v10  ;;  %7059 = vmatprep.subr.bf16.mxu1 %v14481_v12  ;;  %v14562_v10 = vld [vmem:[%s21433_s1 + $0xd04] ss:$136 sps:$4 sm:$0xff]   ;;  %v14557_v12 = vld [vmem:[%s21433_s1 + $0xcf8] ss:$136 sps:$4 sm:$0xff]  }
 0x2bf   :  { %7141 = vmatprep.subr.bf16.mxu0 %v14484_v13  ;;  %v14560_v13 = vld [vmem:[%s21433_s1 + $0xd00] ss:$136 sps:$4 sm:$0xff]  }
 0x2c1   :  { %7060 = vmatpush1.bf16.msra.mxu1 %v14479_v14  ;;  %v14565_v14 = vld [vmem:[%s21433_s1 + $0xe0c] ss:$136 sps:$4 sm:$0xff]  }
 0x2c2   :  { %7142 = vmatpush1.bf16.msra.mxu0 %v14482_v15  ;;  %7152 = vmatprep.subr.bf16.mxu1 %v14487_v16  ;;  %v14568_v15 = vld [vmem:[%s21433_s1 + $0xe14] ss:$136 sps:$4 sm:$0xff]   ;;  %v14563_v16 = vld [vmem:[%s21433_s1 + $0xe08] ss:$136 sps:$4 sm:$0xff]  }
 0x2c3   :  { %7234 = vmatprep.subr.bf16.mxu0 %v14490_v17  ;;  %v14566_v17 = vld [vmem:[%s21433_s1 + $0xe10] ss:$136 sps:$4 sm:$0xff]  }
 0x2c4   :  { %7062 = vmatmul.mubr.bf16.vlgmr.msra.gmra.mrb[12].mxu1 %v16520_v34 }
 0x2c5   :  { %7144 = vmatmul.mubr.bf16.vlgmr.msra.gmra.mrb[12].mxu0 %v16520_v34  ;;  %7153 = vmatpush1.bf16.msra.mxu1 %v14485_v18  ;;  %v14571_v18 = vld [vmem:[%s21433_s1 + $0xf1c] ss:$136 sps:$4 sm:$0xff]  }
 0x2c6   :  { %7184 = vmatprep.mubr.bf16.mxu1 %v16518_v33  ;;  %7235 = vmatpush1.bf16.msra.mxu0 %v14488_v19  ;;  %v14574_v19 = vld [vmem:[%s21433_s1 + $0xf24] ss:$136 sps:$4 sm:$0xff]  }
 0x2c7   :  { %7266 = vmatprep.mubr.bf16.mxu0 %v16518_v33  ;;  %7154 = vmatprep.subr.bf16.mxu1 %v14493_v20  ;;  %v14569_v20 = vld [vmem:[%s21433_s1 + $0xf18] ss:$136 sps:$4 sm:$0xff]  }
 0x2c8   :  { %7236 = vmatprep.subr.bf16.mxu0 %v14496_v21  ;;  %v14572_v21 = vld [vmem:[%s21433_s1 + $0xf20] ss:$136 sps:$4 sm:$0xff]  }
 0x2c9   :  { %7155 = vmatpush1.bf16.msra.mxu1 %v14491_v22  ;;  %v14577_v22 = vld [vmem:[%s21433_s1 + $0x102c] ss:$136 sps:$4 sm:$0xff]  }
 0x2ca   :  { %7237 = vmatpush1.bf16.msra.mxu0 %v14494_v23  ;;  %7156 = vmatprep.subr.bf16.mxu1 %v14499_v24  ;;  %v14580_v23 = vld [vmem:[%s21433_s1 + $0x1034] ss:$136 sps:$4 sm:$0xff]   ;;  %v14575_v24 = vld [vmem:[%s21433_s1 + $0x1028] ss:$136 sps:$4 sm:$0xff]  }
 0x2cb   :  { %7238 = vmatprep.subr.bf16.mxu0 %v14502_v25  ;;  %v14578_v25 = vld [vmem:[%s21433_s1 + $0x1030] ss:$136 sps:$4 sm:$0xff]  }
 0x2cd   :  { %7157 = vmatpush1.bf16.msra.mxu1 %v14497_v26  ;;  %v14583_v26 = vld [vmem:[%s21433_s1 + $0x113c] ss:$136 sps:$4 sm:$0xff]  }
 0x2ce   :  { %7239 = vmatpush1.bf16.msra.mxu0 %v14500_v28  ;;  %7158 = vmatprep.subr.bf16.mxu1 %v14505_v36  ;;  %v14586_v28 = vld [vmem:[%s21433_s1 + $0x1144] ss:$136 sps:$4 sm:$0xff]   ;;  %v14581_v36 = vld [vmem:[%s21433_s1 + $0x1138] ss:$136 sps:$4 sm:$0xff]  }
 0x2cf   :  { %7240 = vmatprep.subr.bf16.mxu0 %v14508_v37  ;;  %v14584_v37 = vld [vmem:[%s21433_s1 + $0x1140] ss:$136 sps:$4 sm:$0xff]  }
 0x2d1   :  { %7159 = vmatpush1.bf16.msra.mxu1 %v14503_v38  ;;  %v14589_v38 = vld [vmem:[%s21433_s1 + $0x124c] ss:$136 sps:$4 sm:$0xff]  }
 0x2d2   :  { %7241 = vmatpush1.bf16.msra.mxu0 %v14506_v39  ;;  %7160 = vmatprep.subr.bf16.mxu1 %v14511_v40  ;;  %v14592_v39 = vld [vmem:[%s21433_s1 + $0x1254] ss:$136 sps:$4 sm:$0xff]   ;;  %v14587_v40 = vld [vmem:[%s21433_s1 + $0x1248] ss:$136 sps:$4 sm:$0xff]  }
 0x2d3   :  { %7242 = vmatprep.subr.bf16.mxu0 %v14514_v41  ;;  %v14590_v41 = vld [vmem:[%s21433_s1 + $0x1250] ss:$136 sps:$4 sm:$0xff]  }
 0x2d5   :  { %7161 = vmatpush1.bf16.msra.mxu1 %v14509_v42  ;;  %v14595_v42 = vld [vmem:[%s21433_s1 + $0x135c] ss:$136 sps:$4 sm:$0xff]  }
 0x2d6   :  { %7243 = vmatpush1.bf16.msra.mxu0 %v14512_v43  ;;  %7162 = vmatprep.subr.bf16.mxu1 %v14517_v44  ;;  %v14598_v43 = vld [vmem:[%s21433_s1 + $0x1364] ss:$136 sps:$4 sm:$0xff]   ;;  %v14593_v44 = vld [vmem:[%s21433_s1 + $0x1358] ss:$136 sps:$4 sm:$0xff]  }
 0x2d7   :  { %7244 = vmatprep.subr.bf16.mxu0 %v14520_v45  ;;  %v14596_v45 = vld [vmem:[%s21433_s1 + $0x1360] ss:$136 sps:$4 sm:$0xff]  }
 0x2d9   :  { %7163 = vmatpush1.bf16.msra.mxu1 %v14515_v46  ;;  %v14601_v46 = vld [vmem:[%s21433_s1 + $0x146c] ss:$136 sps:$4 sm:$0xff]  }
 0x2da   :  { %7245 = vmatpush1.bf16.msra.mxu0 %v14518_v47  ;;  %7164 = vmatprep.subr.bf16.mxu1 %v14523_v48  ;;  %v14604_v47 = vld [vmem:[%s21433_s1 + $0x1474] ss:$136 sps:$4 sm:$0xff]   ;;  %v14599_v48 = vld [vmem:[%s21433_s1 + $0x1468] ss:$136 sps:$4 sm:$0xff]  }
 0x2db   :  { %7246 = vmatprep.subr.bf16.mxu0 %v14526_v49  ;;  %v14602_v49 = vld [vmem:[%s21433_s1 + $0x1470] ss:$136 sps:$4 sm:$0xff]  }
 0x2dd   :  { %7165 = vmatpush1.bf16.msra.mxu1 %v14521_v50  ;;  %v14607_v50 = vld [vmem:[%s21433_s1 + $0x157c] ss:$136 sps:$4 sm:$0xff]  }
 0x2de   :  { %7247 = vmatpush1.bf16.msra.mxu0 %v14524_v51  ;;  %7166 = vmatprep.subr.bf16.mxu1 %v14529_v52  ;;  %v14610_v51 = vld [vmem:[%s21433_s1 + $0x1584] ss:$136 sps:$4 sm:$0xff]   ;;  %v14605_v52 = vld [vmem:[%s21433_s1 + $0x1578] ss:$136 sps:$4 sm:$0xff]  }
 0x2df   :  { %7248 = vmatprep.subr.bf16.mxu0 %v14532_v53  ;;  %v14608_v53 = vld [vmem:[%s21433_s1 + $0x1580] ss:$136 sps:$4 sm:$0xff]  }
 0x2e1   :  { %7167 = vmatpush1.bf16.msra.mxu1 %v14527_v54  ;;  %v14613_v54 = vld [vmem:[%s21433_s1 + $0x168c] ss:$136 sps:$4 sm:$0xff]  }
 0x2e2   :  { %7249 = vmatpush1.bf16.msra.mxu0 %v14530_v55  ;;  %7168 = vmatprep.subr.bf16.mxu1 %v14535_v56  ;;  %v14616_v55 = vld [vmem:[%s21433_s1 + $0x1694] ss:$136 sps:$4 sm:$0xff]   ;;  %v14611_v56 = vld [vmem:[%s21433_s1 + $0x1688] ss:$136 sps:$4 sm:$0xff]  }
 0x2e3   :  { %7250 = vmatprep.subr.bf16.mxu0 %v14538_v57  ;;  %v14614_v57 = vld [vmem:[%s21433_s1 + $0x1690] ss:$136 sps:$4 sm:$0xff]  }
 0x2e5   :  { %7169 = vmatpush1.bf16.msra.mxu1 %v14533_v58  ;;  %v14619_v58 = vld [vmem:[%s21433_s1 + $0x179c] ss:$136 sps:$4 sm:$0xff]  }
 0x2e6   :  { %7251 = vmatpush1.bf16.msra.mxu0 %v14536_v59  ;;  %7170 = vmatprep.subr.bf16.mxu1 %v14541_v60  ;;  %v14622_v60 = vld [vmem:[%s21433_s1 + $0x17a4] ss:$136 sps:$4 sm:$0xff]  }
 0x2e7   :  { %7252 = vmatprep.subr.bf16.mxu0 %v14544_v61 }
 0x2e9   :  { %7171 = vmatpush1.bf16.msra.mxu1 %v14539_v62 }
 0x2ea   :  { %7253 = vmatpush1.bf16.msra.mxu0 %v14542_v63  ;;  %7172 = vmatprep.subr.bf16.mxu1 %v14547_v3 }
 0x2eb   :  { %7254 = vmatprep.subr.bf16.mxu0 %v14550_v5  ;;  %v14617_v5 = vld [vmem:[%s21433_s1 + $0x1798] ss:$136 sps:$4 sm:$0xff]  }
 0x2ed   :  { %7173 = vmatpush1.bf16.msra.mxu1 %v14545_v6 }
 0x2ee   :  { %7255 = vmatpush1.bf16.msra.mxu0 %v14548_v0  ;;  %7174 = vmatprep.subr.bf16.mxu1 %v14553_v1  ;;  %v14620_v1 = vld [vmem:[%s21433_s1 + $0x17a0] ss:$136 sps:$4 sm:$0xff]  }
 0x2ef   :  { %7256 = vmatprep.subr.bf16.mxu0 %v14556_v2  ;;  %v14625_v2 = vld [vmem:[%s21433_s1 + $0x18ac] ss:$136 sps:$4 sm:$0xff]  }
 0x2f1   :  { %7175 = vmatpush1.bf16.msra.mxu1 %v14551_v4 }
 0x2f2   :  { %7257 = vmatpush1.bf16.msra.mxu0 %v14554_v7  ;;  %7176 = vmatprep.subr.bf16.mxu1 %v14559_v9  ;;  %v14628_v7 = vld [vmem:[%s21433_s1 + $0x18b4] ss:$136 sps:$4 sm:$0xff]   ;;  %v14623_v9 = vld [vmem:[%s21433_s1 + $0x18a8] ss:$136 sps:$4 sm:$0xff]  }
 0x2f3   :  { %7258 = vmatprep.subr.bf16.mxu0 %v14562_v10  ;;  %v14626_v10 = vld [vmem:[%s21433_s1 + $0x18b0] ss:$136 sps:$4 sm:$0xff]  }
 0x2f5   :  { %7177 = vmatpush1.bf16.msra.mxu1 %v14557_v12  ;;  %v14631_v12 = vld [vmem:[%s21433_s1 + $0x19bc] ss:$136 sps:$4 sm:$0xff]  }
 0x2f6   :  { %7259 = vmatpush1.bf16.msra.mxu0 %v14560_v13  ;;  %7178 = vmatprep.subr.bf16.mxu1 %v14565_v14  ;;  %v14634_v13 = vld [vmem:[%s21433_s1 + $0x19c4] ss:$136 sps:$4 sm:$0xff]   ;;  %v14629_v14 = vld [vmem:[%s21433_s1 + $0x19b8] ss:$136 sps:$4 sm:$0xff]  }
 0x2f7   :  { %7260 = vmatprep.subr.bf16.mxu0 %v14568_v15  ;;  %v14632_v15 = vld [vmem:[%s21433_s1 + $0x19c0] ss:$136 sps:$4 sm:$0xff]  }
 0x2f9   :  { %7179 = vmatpush1.bf16.msra.mxu1 %v14563_v16  ;;  %v14637_v16 = vld [vmem:[%s21433_s1 + $0x1acc] ss:$136 sps:$4 sm:$0xff]  }
 0x2fa   :  { %7261 = vmatpush1.bf16.msra.mxu0 %v14566_v17  ;;  %7180 = vmatprep.subr.bf16.mxu1 %v14571_v18  ;;  %v14640_v17 = vld [vmem:[%s21433_s1 + $0x1ad4] ss:$136 sps:$4 sm:$0xff]   ;;  %v14635_v18 = vld [vmem:[%s21433_s1 + $0x1ac8] ss:$136 sps:$4 sm:$0xff]  }
 0x2fb   :  { %7262 = vmatprep.subr.bf16.mxu0 %v14574_v19  ;;  %v14638_v19 = vld [vmem:[%s21433_s1 + $0x1ad0] ss:$136 sps:$4 sm:$0xff]  }
 0x2fd   :  { %7181 = vmatpush1.bf16.msra.mxu1 %v14569_v20  ;;  %v14643_v20 = vld [vmem:[%s21433_s1 + $0x1bdc] ss:$136 sps:$4 sm:$0xff]  }
 0x2fe   :  { %7263 = vmatpush1.bf16.msra.mxu0 %v14572_v21  ;;  %7182 = vmatprep.subr.bf16.mxu1 %v14577_v22  ;;  %v14646_v21 = vld [vmem:[%s21433_s1 + $0x1be4] ss:$136 sps:$4 sm:$0xff]   ;;  %v14641_v22 = vld [vmem:[%s21433_s1 + $0x1bd8] ss:$136 sps:$4 sm:$0xff]  }
 0x2ff   :  { %7264 = vmatprep.subr.bf16.mxu0 %v14580_v23  ;;  %v14644_v23 = vld [vmem:[%s21433_s1 + $0x1be0] ss:$136 sps:$4 sm:$0xff]  }
 0x301   :  { %7183 = vmatpush1.bf16.msra.mxu1 %v14575_v24  ;;  %v14649_v24 = vld [vmem:[%s21433_s1 + $0x1cec] ss:$136 sps:$4 sm:$0xff]  }
 0x302   :  { %7265 = vmatpush1.bf16.msra.mxu0 %v14578_v25  ;;  %7193 = vmatprep.subr.bf16.mxu1 %v14583_v26  ;;  %v14652_v25 = vld [vmem:[%s21433_s1 + $0x1cf4] ss:$136 sps:$4 sm:$0xff]   ;;  %v14647_v26 = vld [vmem:[%s21433_s1 + $0x1ce8] ss:$136 sps:$4 sm:$0xff]  }
 0x303   :  { %7275 = vmatprep.subr.bf16.mxu0 %v14586_v28  ;;  %v14650_v28 = vld [vmem:[%s21433_s1 + $0x1cf0] ss:$136 sps:$4 sm:$0xff]  }
 0x304   :  { %7185 = vmatmul.mubr.bf16.vlgmr.msra.gmra.mrb[16].mxu1 %v16516_v32 }
 0x305   :  { %7267 = vmatmul.mubr.bf16.vlgmr.msra.gmra.mrb[16].mxu0 %v16516_v32  ;;  %7194 = vmatpush1.bf16.msra.mxu1 %v14581_v36  ;;  %v14655_v36 = vld [vmem:[%s21433_s1 + $0x1dfc] ss:$136 sps:$4 sm:$0xff]  }
 0x306   :  { %7225 = vmatprep.mubr.bf16.mxu1 %v16522_v35  ;;  %7276 = vmatpush1.bf16.msra.mxu0 %v14584_v37  ;;  %v14658_v37 = vld [vmem:[%s21433_s1 + $0x1e04] ss:$136 sps:$4 sm:$0xff]  }
 0x307   :  { %7307 = vmatprep.mubr.bf16.mxu0 %v16522_v35  ;;  %7195 = vmatprep.subr.bf16.mxu1 %v14589_v38  ;;  %v14653_v38 = vld [vmem:[%s21433_s1 + $0x1df8] ss:$136 sps:$4 sm:$0xff]  }
 0x308   :  { %7277 = vmatprep.subr.bf16.mxu0 %v14592_v39  ;;  %v14656_v39 = vld [vmem:[%s21433_s1 + $0x1e00] ss:$136 sps:$4 sm:$0xff]  }
 0x309   :  { %7196 = vmatpush1.bf16.msra.mxu1 %v14587_v40  ;;  %v14661_v40 = vld [vmem:[%s21433_s1 + $0x1f0c] ss:$136 sps:$4 sm:$0xff]  }
 0x30a   :  { %7278 = vmatpush1.bf16.msra.mxu0 %v14590_v41  ;;  %7197 = vmatprep.subr.bf16.mxu1 %v14595_v42  ;;  %v14664_v41 = vld [vmem:[%s21433_s1 + $0x1f14] ss:$136 sps:$4 sm:$0xff]   ;;  %v14659_v42 = vld [vmem:[%s21433_s1 + $0x1f08] ss:$136 sps:$4 sm:$0xff]  }
 0x30b   :  { %7279 = vmatprep.subr.bf16.mxu0 %v14598_v43  ;;  %v14662_v43 = vld [vmem:[%s21433_s1 + $0x1f10] ss:$136 sps:$4 sm:$0xff]  }
 0x30d   :  { %7198 = vmatpush1.bf16.msra.mxu1 %v14593_v44  ;;  %v14667_v44 = vld [vmem:[%s21433_s1 + $0x201c] ss:$136 sps:$4 sm:$0xff]  }
 0x30e   :  { %7280 = vmatpush1.bf16.msra.mxu0 %v14596_v45  ;;  %7199 = vmatprep.subr.bf16.mxu1 %v14601_v46  ;;  %v14670_v45 = vld [vmem:[%s21433_s1 + $0x2024] ss:$136 sps:$4 sm:$0xff]   ;;  %v14665_v46 = vld [vmem:[%s21433_s1 + $0x2018] ss:$136 sps:$4 sm:$0xff]  }
 0x30f   :  { %7281 = vmatprep.subr.bf16.mxu0 %v14604_v47  ;;  %v14668_v47 = vld [vmem:[%s21433_s1 + $0x2020] ss:$136 sps:$4 sm:$0xff]  }
 0x311   :  { %7200 = vmatpush1.bf16.msra.mxu1 %v14599_v48  ;;  %v14673_v48 = vld [vmem:[%s21433_s1 + $0x212c] ss:$136 sps:$4 sm:$0xff]  }
 0x312   :  { %7282 = vmatpush1.bf16.msra.mxu0 %v14602_v49  ;;  %7201 = vmatprep.subr.bf16.mxu1 %v14607_v50  ;;  %v14676_v49 = vld [vmem:[%s21433_s1 + $0x2134] ss:$136 sps:$4 sm:$0xff]   ;;  %v14671_v50 = vld [vmem:[%s21433_s1 + $0x2128] ss:$136 sps:$4 sm:$0xff]  }
 0x313   :  { %7283 = vmatprep.subr.bf16.mxu0 %v14610_v51  ;;  %v14674_v51 = vld [vmem:[%s21433_s1 + $0x2130] ss:$136 sps:$4 sm:$0xff]  }
 0x315   :  { %7202 = vmatpush1.bf16.msra.mxu1 %v14605_v52  ;;  %v14679_v52 = vld [vmem:[%s21433_s1 + $0x4c] ss:$136 sps:$4 sm:$0xff]  }
 0x316   :  { %7284 = vmatpush1.bf16.msra.mxu0 %v14608_v53  ;;  %7203 = vmatprep.subr.bf16.mxu1 %v14613_v54  ;;  %v14682_v53 = vld [vmem:[%s21433_s1 + $0x54] ss:$136 sps:$4 sm:$0xff]   ;;  %v14677_v54 = vld [vmem:[%s21433_s1 + $0x48] ss:$136 sps:$4 sm:$0xff]  }
 0x317   :  { %v17977_v59 = vpop.f32.mrb[8].mxu1  ;;  %7285 = vmatprep.subr.bf16.mxu0 %v14616_v55  ;;  %v14680_v55 = vld [vmem:[%s21433_s1 + $0x50] ss:$136 sps:$4 sm:$0xff]  }
 0x318   :  { %v17982_v61 = vpop.f32.mrb[8].mxu0  ;;  %v17984_v62 = vpop.f32.mrb[9].mxu1 }
 0x319   :  { %v17986_v63 = vpop.f32.mrb[9].mxu0  ;;  %v6903_v3 = vpop.f32.mrb[10].mxu1  ;;  %7204 = vmatpush1.bf16.msra.mxu1 %v14611_v56  ;;  %v14685_v56 = vld [vmem:[%s21433_s1 + $0x15c] ss:$136 sps:$4 sm:$0xff]  }
 0x31a   :  { %v6985_v6 = vpop.f32.mrb[10].mxu0  ;;  %7286 = vmatpush1.bf16.msra.mxu0 %v14614_v57  ;;  %v6904_v0 = vpop.f32.mrb[11].mxu1  ;;  %7205 = vmatprep.subr.bf16.mxu1 %v14619_v58  ;;  %v14688_v57 = vld [vmem:[%s21433_s1 + $0x164] ss:$136 sps:$4 sm:$0xff]   ;;  %v14683_v58 = vld [vmem:[%s21433_s1 + $0x158] ss:$136 sps:$4 sm:$0xff]  }
 0x31b   :  { %v6986_v4 = vpop.f32.mrb[11].mxu0  ;;  %7287 = vmatprep.subr.bf16.mxu0 %v14622_v60  ;;  %v14686_v60 = vld [vmem:[%s21433_s1 + $0x160] ss:$136 sps:$4 sm:$0xff]   ;;  %v14691_v3 = vld [vmem:[%s21433_s1 + $0x26c] ss:$136 sps:$4 sm:$0xff]  }
 0x31c   :  { %v14689_v6 = vld [vmem:[%s21433_s1 + $0x268] ss:$136 sps:$4 sm:$0xff]   ;;  %v14695_v4 = vld [vmem:[%s21433_s1 + $0x378] ss:$136 sps:$4 sm:$0xff]  }
 0x31d   :  { %7206 = vmatpush1.bf16.msra.mxu1 %v14617_v5  ;;  %v14694_v5 = vld [vmem:[%s21433_s1 + $0x274] ss:$136 sps:$4 sm:$0xff]   ;;  %v14692_v0 = vld [vmem:[%s21433_s1 + $0x270] ss:$136 sps:$4 sm:$0xff]  }
 0x31e   :  { %7288 = vmatpush1.bf16.msra.mxu0 %v14620_v1  ;;  %7207 = vmatprep.subr.bf16.mxu1 %v14625_v2  ;;  %v14697_v1 = vld [vmem:[%s21433_s1 + $0x37c] ss:$136 sps:$4 sm:$0xff]  }
 0x31f   :  { %7289 = vmatprep.subr.bf16.mxu0 %v14628_v7  ;;  %v14700_v2 = vld [vmem:[%s21433_s1 + $0x384] ss:$136 sps:$4 sm:$0xff]   ;;  %v14698_v7 = vld [vmem:[%s21433_s1 + $0x380] ss:$136 sps:$4 sm:$0xff]  }
 0x321   :  { %7208 = vmatpush1.bf16.msra.mxu1 %v14623_v9  ;;  %v14703_v9 = vld [vmem:[%s21433_s1 + $0x48c] ss:$136 sps:$4 sm:$0xff]  }
 0x322   :  { %7290 = vmatpush1.bf16.msra.mxu0 %v14626_v10  ;;  %7209 = vmatprep.subr.bf16.mxu1 %v14631_v12  ;;  %v14706_v10 = vld [vmem:[%s21433_s1 + $0x494] ss:$136 sps:$4 sm:$0xff]   ;;  %v14701_v12 = vld [vmem:[%s21433_s1 + $0x488] ss:$136 sps:$4 sm:$0xff]  }
 0x323   :  { %7291 = vmatprep.subr.bf16.mxu0 %v14634_v13  ;;  %v14704_v13 = vld [vmem:[%s21433_s1 + $0x490] ss:$136 sps:$4 sm:$0xff]  }
 0x325   :  { %7210 = vmatpush1.bf16.msra.mxu1 %v14629_v14  ;;  %v14709_v14 = vld [vmem:[%s21433_s1 + $0x59c] ss:$136 sps:$4 sm:$0xff]  }
 0x326   :  { %7292 = vmatpush1.bf16.msra.mxu0 %v14632_v15  ;;  %7211 = vmatprep.subr.bf16.mxu1 %v14637_v16  ;;  %v14712_v15 = vld [vmem:[%s21433_s1 + $0x5a4] ss:$136 sps:$4 sm:$0xff]   ;;  %v14707_v16 = vld [vmem:[%s21433_s1 + $0x598] ss:$136 sps:$4 sm:$0xff]  }
 0x327   :  { %7293 = vmatprep.subr.bf16.mxu0 %v14640_v17  ;;  %v14710_v17 = vld [vmem:[%s21433_s1 + $0x5a0] ss:$136 sps:$4 sm:$0xff]  }
 0x329   :  { %7212 = vmatpush1.bf16.msra.mxu1 %v14635_v18  ;;  %v14715_v18 = vld [vmem:[%s21433_s1 + $0x6ac] ss:$136 sps:$4 sm:$0xff]  }
 0x32a   :  { %7294 = vmatpush1.bf16.msra.mxu0 %v14638_v19  ;;  %7213 = vmatprep.subr.bf16.mxu1 %v14643_v20  ;;  %v14718_v19 = vld [vmem:[%s21433_s1 + $0x6b4] ss:$136 sps:$4 sm:$0xff]   ;;  %v14713_v20 = vld [vmem:[%s21433_s1 + $0x6a8] ss:$136 sps:$4 sm:$0xff]  }
 0x32b   :  { %7295 = vmatprep.subr.bf16.mxu0 %v14646_v21  ;;  %v14716_v21 = vld [vmem:[%s21433_s1 + $0x6b0] ss:$136 sps:$4 sm:$0xff]  }
 0x32d   :  { %7214 = vmatpush1.bf16.msra.mxu1 %v14641_v22  ;;  %v14721_v22 = vld [vmem:[%s21433_s1 + $0x7bc] ss:$136 sps:$4 sm:$0xff]  }
 0x32e   :  { %7296 = vmatpush1.bf16.msra.mxu0 %v14644_v23  ;;  %7215 = vmatprep.subr.bf16.mxu1 %v14649_v24  ;;  %v14724_v23 = vld [vmem:[%s21433_s1 + $0x7c4] ss:$136 sps:$4 sm:$0xff]   ;;  %v14719_v24 = vld [vmem:[%s21433_s1 + $0x7b8] ss:$136 sps:$4 sm:$0xff]  }
 0x32f   :  { %7297 = vmatprep.subr.bf16.mxu0 %v14652_v25  ;;  %v14722_v25 = vld [vmem:[%s21433_s1 + $0x7c0] ss:$136 sps:$4 sm:$0xff]  }
 0x331   :  { %7216 = vmatpush1.bf16.msra.mxu1 %v14647_v26  ;;  %v14727_v26 = vld [vmem:[%s21433_s1 + $0x8cc] ss:$136 sps:$4 sm:$0xff]  }
 0x332   :  { %7298 = vmatpush1.bf16.msra.mxu0 %v14650_v28  ;;  %7217 = vmatprep.subr.bf16.mxu1 %v14655_v36  ;;  %v14730_v28 = vld [vmem:[%s21433_s1 + $0x8d4] ss:$136 sps:$4 sm:$0xff]   ;;  %v14725_v36 = vld [vmem:[%s21433_s1 + $0x8c8] ss:$136 sps:$4 sm:$0xff]  }
 0x333   :  { %7299 = vmatprep.subr.bf16.mxu0 %v14658_v37  ;;  %v14728_v37 = vld [vmem:[%s21433_s1 + $0x8d0] ss:$136 sps:$4 sm:$0xff]  }
 0x335   :  { %7218 = vmatpush1.bf16.msra.mxu1 %v14653_v38  ;;  %v14733_v38 = vld [vmem:[%s21433_s1 + $0x9dc] ss:$136 sps:$4 sm:$0xff]  }
 0x336   :  { %7300 = vmatpush1.bf16.msra.mxu0 %v14656_v39  ;;  %7219 = vmatprep.subr.bf16.mxu1 %v14661_v40  ;;  %v14736_v39 = vld [vmem:[%s21433_s1 + $0x9e4] ss:$136 sps:$4 sm:$0xff]   ;;  %v14731_v40 = vld [vmem:[%s21433_s1 + $0x9d8] ss:$136 sps:$4 sm:$0xff]  }
 0x337   :  { %7301 = vmatprep.subr.bf16.mxu0 %v14664_v41  ;;  %v14734_v41 = vld [vmem:[%s21433_s1 + $0x9e0] ss:$136 sps:$4 sm:$0xff]  }
 0x339   :  { %7220 = vmatpush1.bf16.msra.mxu1 %v14659_v42  ;;  %v14739_v42 = vld [vmem:[%s21433_s1 + $0xaec] ss:$136 sps:$4 sm:$0xff]  }
 0x33a   :  { %7302 = vmatpush1.bf16.msra.mxu0 %v14662_v43  ;;  %7221 = vmatprep.subr.bf16.mxu1 %v14667_v44  ;;  %v14742_v43 = vld [vmem:[%s21433_s1 + $0xaf4] ss:$136 sps:$4 sm:$0xff]   ;;  %v14737_v44 = vld [vmem:[%s21433_s1 + $0xae8] ss:$136 sps:$4 sm:$0xff]  }
 0x33b   :  { %7303 = vmatprep.subr.bf16.mxu0 %v14670_v45  ;;  %v14740_v45 = vld [vmem:[%s21433_s1 + $0xaf0] ss:$136 sps:$4 sm:$0xff]  }
 0x33d   :  { %7222 = vmatpush1.bf16.msra.mxu1 %v14665_v46  ;;  %v14745_v46 = vld [vmem:[%s21433_s1 + $0xbfc] ss:$136 sps:$4 sm:$0xff]  }
 0x33e   :  { %7304 = vmatpush1.bf16.msra.mxu0 %v14668_v47  ;;  %7223 = vmatprep.subr.bf16.mxu1 %v14673_v48  ;;  %v14748_v47 = vld [vmem:[%s21433_s1 + $0xc04] ss:$136 sps:$4 sm:$0xff]   ;;  %v14743_v48 = vld [vmem:[%s21433_s1 + $0xbf8] ss:$136 sps:$4 sm:$0xff]  }
 0x33f   :  { %7305 = vmatprep.subr.bf16.mxu0 %v14676_v49  ;;  %v14746_v49 = vld [vmem:[%s21433_s1 + $0xc00] ss:$136 sps:$4 sm:$0xff]  }
 0x341   :  { %7224 = vmatpush1.bf16.msra.mxu1 %v14671_v50  ;;  %v14751_v50 = vld [vmem:[%s21433_s1 + $0xd0c] ss:$136 sps:$4 sm:$0xff]  }
 0x342   :  { %7306 = vmatpush1.bf16.msra.mxu0 %v14674_v51  ;;  %7316 = vmatprep.subr.bf16.mxu1 %v14679_v52  ;;  %v14754_v51 = vld [vmem:[%s21433_s1 + $0xd14] ss:$136 sps:$4 sm:$0xff]   ;;  %v14749_v52 = vld [vmem:[%s21433_s1 + $0xd08] ss:$136 sps:$4 sm:$0xff]  }
 0x343   :  { %7398 = vmatprep.subr.bf16.mxu0 %v14682_v53  ;;  %v14752_v53 = vld [vmem:[%s21433_s1 + $0xd10] ss:$136 sps:$4 sm:$0xff]  }
 0x344   :  { %7226 = vmatmul.mubr.bf16.vlgmr.msra.gmra.mrb[16].mxu1 %v16520_v34 }
 0x345   :  { %7308 = vmatmul.mubr.bf16.vlgmr.msra.gmra.mrb[16].mxu0 %v16520_v34  ;;  %7317 = vmatpush1.bf16.msra.mxu1 %v14677_v54  ;;  %v14757_v54 = vld [vmem:[%s21433_s1 + $0xe1c] ss:$136 sps:$4 sm:$0xff]  }
 0x346   :  { %7348 = vmatprep.mubr.bf16.mxu1 %v16518_v33  ;;  %7399 = vmatpush1.bf16.msra.mxu0 %v14680_v55  ;;  %v14760_v55 = vld [vmem:[%s21433_s1 + $0xe24] ss:$136 sps:$4 sm:$0xff]  }
 0x347   :  { %7430 = vmatprep.mubr.bf16.mxu0 %v16518_v33  ;;  %7318 = vmatprep.subr.bf16.mxu1 %v14685_v56  ;;  %v14755_v56 = vld [vmem:[%s21433_s1 + $0xe18] ss:$136 sps:$4 sm:$0xff]  }
 0x348   :  { %7400 = vmatprep.subr.bf16.mxu0 %v14688_v57  ;;  %v14758_v57 = vld [vmem:[%s21433_s1 + $0xe20] ss:$136 sps:$4 sm:$0xff]  }
 0x349   :  { %7319 = vmatpush1.bf16.msra.mxu1 %v14683_v58  ;;  %v14763_v58 = vld [vmem:[%s21433_s1 + $0xf2c] ss:$136 sps:$4 sm:$0xff]  }
 0x34a   :  { %7401 = vmatpush1.bf16.msra.mxu0 %v14686_v60  ;;  %7320 = vmatprep.subr.bf16.mxu1 %v14691_v3  ;;  %v14766_v60 = vld [vmem:[%s21433_s1 + $0xf34] ss:$136 sps:$4 sm:$0xff]   ;;  %v14761_v3 = vld [vmem:[%s21433_s1 + $0xf28] ss:$136 sps:$4 sm:$0xff]  }
 0x34b   :  { %7402 = vmatprep.subr.bf16.mxu0 %v14694_v5  ;;  %v14764_v5 = vld [vmem:[%s21433_s1 + $0xf30] ss:$136 sps:$4 sm:$0xff]  }
 0x34d   :  { %7321 = vmatpush1.bf16.msra.mxu1 %v14689_v6  ;;  %v14769_v6 = vld [vmem:[%s21433_s1 + $0x103c] ss:$136 sps:$4 sm:$0xff]  }
 0x34e   :  { %7403 = vmatpush1.bf16.msra.mxu0 %v14692_v0  ;;  %7322 = vmatprep.subr.bf16.mxu1 %v14697_v1  ;;  %v14772_v0 = vld [vmem:[%s21433_s1 + $0x1044] ss:$136 sps:$4 sm:$0xff]   ;;  %v14767_v1 = vld [vmem:[%s21433_s1 + $0x1038] ss:$136 sps:$4 sm:$0xff]  }
 0x34f   :  { %7404 = vmatprep.subr.bf16.mxu0 %v14700_v2  ;;  %v14770_v2 = vld [vmem:[%s21433_s1 + $0x1040] ss:$136 sps:$4 sm:$0xff]  }
 0x351   :  { %7323 = vmatpush1.bf16.msra.mxu1 %v14695_v4  ;;  %v14775_v4 = vld [vmem:[%s21433_s1 + $0x114c] ss:$136 sps:$4 sm:$0xff]  }
 0x352   :  { %7405 = vmatpush1.bf16.msra.mxu0 %v14698_v7  ;;  %7324 = vmatprep.subr.bf16.mxu1 %v14703_v9  ;;  %v14778_v7 = vld [vmem:[%s21433_s1 + $0x1154] ss:$136 sps:$4 sm:$0xff]   ;;  %v14773_v9 = vld [vmem:[%s21433_s1 + $0x1148] ss:$136 sps:$4 sm:$0xff]  }
 0x353   :  { %7406 = vmatprep.subr.bf16.mxu0 %v14706_v10  ;;  %v14776_v10 = vld [vmem:[%s21433_s1 + $0x1150] ss:$136 sps:$4 sm:$0xff]  }
 0x355   :  { %7325 = vmatpush1.bf16.msra.mxu1 %v14701_v12  ;;  %v14781_v12 = vld [vmem:[%s21433_s1 + $0x125c] ss:$136 sps:$4 sm:$0xff]  }
 0x356   :  { %7407 = vmatpush1.bf16.msra.mxu0 %v14704_v13  ;;  %7326 = vmatprep.subr.bf16.mxu1 %v14709_v14  ;;  %v14784_v13 = vld [vmem:[%s21433_s1 + $0x1264] ss:$136 sps:$4 sm:$0xff]   ;;  %v14779_v14 = vld [vmem:[%s21433_s1 + $0x1258] ss:$136 sps:$4 sm:$0xff]  }
 0x357   :  { %7408 = vmatprep.subr.bf16.mxu0 %v14712_v15  ;;  %v14782_v15 = vld [vmem:[%s21433_s1 + $0x1260] ss:$136 sps:$4 sm:$0xff]  }
 0x359   :  { %7327 = vmatpush1.bf16.msra.mxu1 %v14707_v16  ;;  %v14787_v16 = vld [vmem:[%s21433_s1 + $0x136c] ss:$136 sps:$4 sm:$0xff]  }
 0x35a   :  { %7409 = vmatpush1.bf16.msra.mxu0 %v14710_v17  ;;  %7328 = vmatprep.subr.bf16.mxu1 %v14715_v18  ;;  %v14790_v17 = vld [vmem:[%s21433_s1 + $0x1374] ss:$136 sps:$4 sm:$0xff]   ;;  %v14785_v18 = vld [vmem:[%s21433_s1 + $0x1368] ss:$136 sps:$4 sm:$0xff]  }
 0x35b   :  { %7410 = vmatprep.subr.bf16.mxu0 %v14718_v19  ;;  %v14788_v19 = vld [vmem:[%s21433_s1 + $0x1370] ss:$136 sps:$4 sm:$0xff]  }
 0x35d   :  { %7329 = vmatpush1.bf16.msra.mxu1 %v14713_v20  ;;  %v14793_v20 = vld [vmem:[%s21433_s1 + $0x147c] ss:$136 sps:$4 sm:$0xff]  }
 0x35e   :  { %7411 = vmatpush1.bf16.msra.mxu0 %v14716_v21  ;;  %7330 = vmatprep.subr.bf16.mxu1 %v14721_v22  ;;  %v14796_v21 = vld [vmem:[%s21433_s1 + $0x1484] ss:$136 sps:$4 sm:$0xff]   ;;  %v14791_v22 = vld [vmem:[%s21433_s1 + $0x1478] ss:$136 sps:$4 sm:$0xff]  }
 0x35f   :  { %7412 = vmatprep.subr.bf16.mxu0 %v14724_v23  ;;  %v14794_v23 = vld [vmem:[%s21433_s1 + $0x1480] ss:$136 sps:$4 sm:$0xff]  }
 0x361   :  { %7331 = vmatpush1.bf16.msra.mxu1 %v14719_v24  ;;  %v14799_v24 = vld [vmem:[%s21433_s1 + $0x158c] ss:$136 sps:$4 sm:$0xff]  }
 0x362   :  { %7413 = vmatpush1.bf16.msra.mxu0 %v14722_v25  ;;  %7332 = vmatprep.subr.bf16.mxu1 %v14727_v26  ;;  %v14802_v25 = vld [vmem:[%s21433_s1 + $0x1594] ss:$136 sps:$4 sm:$0xff]   ;;  %v14797_v26 = vld [vmem:[%s21433_s1 + $0x1588] ss:$136 sps:$4 sm:$0xff]  }
 0x363   :  { %7414 = vmatprep.subr.bf16.mxu0 %v14730_v28  ;;  %v14800_v28 = vld [vmem:[%s21433_s1 + $0x1590] ss:$136 sps:$4 sm:$0xff]  }
 0x365   :  { %7333 = vmatpush1.bf16.msra.mxu1 %v14725_v36  ;;  %v14805_v36 = vld [vmem:[%s21433_s1 + $0x169c] ss:$136 sps:$4 sm:$0xff]  }
 0x366   :  { %7415 = vmatpush1.bf16.msra.mxu0 %v14728_v37  ;;  %7334 = vmatprep.subr.bf16.mxu1 %v14733_v38  ;;  %v14808_v37 = vld [vmem:[%s21433_s1 + $0x16a4] ss:$136 sps:$4 sm:$0xff]   ;;  %v14803_v38 = vld [vmem:[%s21433_s1 + $0x1698] ss:$136 sps:$4 sm:$0xff]  }
 0x367   :  { %7416 = vmatprep.subr.bf16.mxu0 %v14736_v39  ;;  %v14806_v39 = vld [vmem:[%s21433_s1 + $0x16a0] ss:$136 sps:$4 sm:$0xff]  }
 0x369   :  { %7335 = vmatpush1.bf16.msra.mxu1 %v14731_v40  ;;  %v14811_v40 = vld [vmem:[%s21433_s1 + $0x17ac] ss:$136 sps:$4 sm:$0xff]  }
 0x36a   :  { %7417 = vmatpush1.bf16.msra.mxu0 %v14734_v41  ;;  %7336 = vmatprep.subr.bf16.mxu1 %v14739_v42  ;;  %v14814_v42 = vld [vmem:[%s21433_s1 + $0x17b4] ss:$136 sps:$4 sm:$0xff]  }
 0x36b   :  { %7418 = vmatprep.subr.bf16.mxu0 %v14742_v43 }
 0x36d   :  { %7337 = vmatpush1.bf16.msra.mxu1 %v14737_v44 }
 0x36e   :  { %7419 = vmatpush1.bf16.msra.mxu0 %v14740_v45  ;;  %7338 = vmatprep.subr.bf16.mxu1 %v14745_v46 }
 0x36f   :  { %7420 = vmatprep.subr.bf16.mxu0 %v14748_v47  ;;  %v14809_v47 = vld [vmem:[%s21433_s1 + $0x17a8] ss:$136 sps:$4 sm:$0xff]  }
 0x371   :  { %7339 = vmatpush1.bf16.msra.mxu1 %v14743_v48 }
 0x372   :  { %7421 = vmatpush1.bf16.msra.mxu0 %v14746_v49  ;;  %7340 = vmatprep.subr.bf16.mxu1 %v14751_v50  ;;  %v14812_v50 = vld [vmem:[%s21433_s1 + $0x17b0] ss:$136 sps:$4 sm:$0xff]  }
 0x373   :  { %7422 = vmatprep.subr.bf16.mxu0 %v14754_v51  ;;  %v14817_v51 = vld [vmem:[%s21433_s1 + $0x18bc] ss:$136 sps:$4 sm:$0xff]  }
 0x375   :  { %7341 = vmatpush1.bf16.msra.mxu1 %v14749_v52 }
 0x376   :  { %7423 = vmatpush1.bf16.msra.mxu0 %v14752_v53  ;;  %7342 = vmatprep.subr.bf16.mxu1 %v14757_v54  ;;  %v14820_v53 = vld [vmem:[%s21433_s1 + $0x18c4] ss:$136 sps:$4 sm:$0xff]   ;;  %v14815_v54 = vld [vmem:[%s21433_s1 + $0x18b8] ss:$136 sps:$4 sm:$0xff]  }
 0x377   :  { %7424 = vmatprep.subr.bf16.mxu0 %v14760_v55  ;;  %v14818_v55 = vld [vmem:[%s21433_s1 + $0x18c0] ss:$136 sps:$4 sm:$0xff]  }
 0x379   :  { %7343 = vmatpush1.bf16.msra.mxu1 %v14755_v56  ;;  %v14823_v56 = vld [vmem:[%s21433_s1 + $0x19cc] ss:$136 sps:$4 sm:$0xff]  }
 0x37a   :  { %7425 = vmatpush1.bf16.msra.mxu0 %v14758_v57  ;;  %7344 = vmatprep.subr.bf16.mxu1 %v14763_v58  ;;  %v14826_v57 = vld [vmem:[%s21433_s1 + $0x19d4] ss:$136 sps:$4 sm:$0xff]   ;;  %v14821_v58 = vld [vmem:[%s21433_s1 + $0x19c8] ss:$136 sps:$4 sm:$0xff]  }
 0x37b   :  { %7426 = vmatprep.subr.bf16.mxu0 %v14766_v60  ;;  %v14824_v60 = vld [vmem:[%s21433_s1 + $0x19d0] ss:$136 sps:$4 sm:$0xff]  }
 0x37d   :  { %7345 = vmatpush1.bf16.msra.mxu1 %v14761_v3  ;;  %v14829_v3 = vld [vmem:[%s21433_s1 + $0x1adc] ss:$136 sps:$4 sm:$0xff]  }
 0x37e   :  { %7427 = vmatpush1.bf16.msra.mxu0 %v14764_v5  ;;  %7346 = vmatprep.subr.bf16.mxu1 %v14769_v6  ;;  %v14832_v5 = vld [vmem:[%s21433_s1 + $0x1ae4] ss:$136 sps:$4 sm:$0xff]   ;;  %v14827_v6 = vld [vmem:[%s21433_s1 + $0x1ad8] ss:$136 sps:$4 sm:$0xff]  }
 0x37f   :  { %7428 = vmatprep.subr.bf16.mxu0 %v14772_v0  ;;  %v14830_v0 = vld [vmem:[%s21433_s1 + $0x1ae0] ss:$136 sps:$4 sm:$0xff]  }
 0x381   :  { %7347 = vmatpush1.bf16.msra.mxu1 %v14767_v1  ;;  %v14835_v1 = vld [vmem:[%s21433_s1 + $0x1bec] ss:$136 sps:$4 sm:$0xff]  }
 0x382   :  { %7429 = vmatpush1.bf16.msra.mxu0 %v14770_v2  ;;  %7357 = vmatprep.subr.bf16.mxu1 %v14775_v4  ;;  %v14838_v2 = vld [vmem:[%s21433_s1 + $0x1bf4] ss:$136 sps:$4 sm:$0xff]   ;;  %v14833_v4 = vld [vmem:[%s21433_s1 + $0x1be8] ss:$136 sps:$4 sm:$0xff]  }
 0x383   :  { %7439 = vmatprep.subr.bf16.mxu0 %v14778_v7  ;;  %v14836_v7 = vld [vmem:[%s21433_s1 + $0x1bf0] ss:$136 sps:$4 sm:$0xff]  }
 0x384   :  { %7349 = vmatmul.mubr.bf16.vlgmr.msra.gmra.mrb[20].mxu1 %v16516_v32 }
 0x385   :  { %7431 = vmatmul.mubr.bf16.vlgmr.msra.gmra.mrb[20].mxu0 %v16516_v32  ;;  %7358 = vmatpush1.bf16.msra.mxu1 %v14773_v9  ;;  %v14841_v9 = vld [vmem:[%s21433_s1 + $0x1cfc] ss:$136 sps:$4 sm:$0xff]  }
 0x386   :  { %7389 = vmatprep.mubr.bf16.mxu1 %v16522_v35  ;;  %7440 = vmatpush1.bf16.msra.mxu0 %v14776_v10  ;;  %v14844_v10 = vld [vmem:[%s21433_s1 + $0x1d04] ss:$136 sps:$4 sm:$0xff]  }
 0x387   :  { %7471 = vmatprep.mubr.bf16.mxu0 %v16522_v35  ;;  %7359 = vmatprep.subr.bf16.mxu1 %v14781_v12  ;;  %v14839_v12 = vld [vmem:[%s21433_s1 + $0x1cf8] ss:$136 sps:$4 sm:$0xff]  }
 0x388   :  { %7441 = vmatprep.subr.bf16.mxu0 %v14784_v13  ;;  %v14842_v13 = vld [vmem:[%s21433_s1 + $0x1d00] ss:$136 sps:$4 sm:$0xff]  }
 0x389   :  { %7360 = vmatpush1.bf16.msra.mxu1 %v14779_v14  ;;  %v14847_v14 = vld [vmem:[%s21433_s1 + $0x1e0c] ss:$136 sps:$4 sm:$0xff]  }
 0x38a   :  { %7442 = vmatpush1.bf16.msra.mxu0 %v14782_v15  ;;  %7361 = vmatprep.subr.bf16.mxu1 %v14787_v16  ;;  %v14850_v15 = vld [vmem:[%s21433_s1 + $0x1e14] ss:$136 sps:$4 sm:$0xff]   ;;  %v14845_v16 = vld [vmem:[%s21433_s1 + $0x1e08] ss:$136 sps:$4 sm:$0xff]  }
 0x38b   :  { %7443 = vmatprep.subr.bf16.mxu0 %v14790_v17  ;;  %v14848_v17 = vld [vmem:[%s21433_s1 + $0x1e10] ss:$136 sps:$4 sm:$0xff]  }
 0x38d   :  { %7362 = vmatpush1.bf16.msra.mxu1 %v14785_v18  ;;  %v14853_v18 = vld [vmem:[%s21433_s1 + $0x1f1c] ss:$136 sps:$4 sm:$0xff]  }
 0x38e   :  { %7444 = vmatpush1.bf16.msra.mxu0 %v14788_v19  ;;  %7363 = vmatprep.subr.bf16.mxu1 %v14793_v20  ;;  %v14856_v19 = vld [vmem:[%s21433_s1 + $0x1f24] ss:$136 sps:$4 sm:$0xff]   ;;  %v14851_v20 = vld [vmem:[%s21433_s1 + $0x1f18] ss:$136 sps:$4 sm:$0xff]  }
 0x38f   :  { %7445 = vmatprep.subr.bf16.mxu0 %v14796_v21  ;;  %v14854_v21 = vld [vmem:[%s21433_s1 + $0x1f20] ss:$136 sps:$4 sm:$0xff]  }
 0x391   :  { %7364 = vmatpush1.bf16.msra.mxu1 %v14791_v22  ;;  %v14859_v22 = vld [vmem:[%s21433_s1 + $0x202c] ss:$136 sps:$4 sm:$0xff]  }
 0x392   :  { %7446 = vmatpush1.bf16.msra.mxu0 %v14794_v23  ;;  %7365 = vmatprep.subr.bf16.mxu1 %v14799_v24  ;;  %v14862_v23 = vld [vmem:[%s21433_s1 + $0x2034] ss:$136 sps:$4 sm:$0xff]   ;;  %v14857_v24 = vld [vmem:[%s21433_s1 + $0x2028] ss:$136 sps:$4 sm:$0xff]  }
 0x393   :  { %7447 = vmatprep.subr.bf16.mxu0 %v14802_v25  ;;  %v14860_v25 = vld [vmem:[%s21433_s1 + $0x2030] ss:$136 sps:$4 sm:$0xff]  }
 0x395   :  { %7366 = vmatpush1.bf16.msra.mxu1 %v14797_v26  ;;  %v14865_v26 = vld [vmem:[%s21433_s1 + $0x213c] ss:$136 sps:$4 sm:$0xff]  }
 0x396   :  { %7448 = vmatpush1.bf16.msra.mxu0 %v14800_v28  ;;  %7367 = vmatprep.subr.bf16.mxu1 %v14805_v36  ;;  %v14868_v28 = vld [vmem:[%s21433_s1 + $0x2144] ss:$136 sps:$4 sm:$0xff]   ;;  %v14863_v36 = vld [vmem:[%s21433_s1 + $0x2138] ss:$136 sps:$4 sm:$0xff]  }
 0x397   :  { %v18377_v41 = vpop.f32.mrb[12].mxu1  ;;  %7449 = vmatprep.subr.bf16.mxu0 %v14808_v37  ;;  %v14866_v37 = vld [vmem:[%s21433_s1 + $0x2140] ss:$136 sps:$4 sm:$0xff]  }
 0x398   :  { %v18382_v43 = vpop.f32.mrb[12].mxu0  ;;  %v18384_v44 = vpop.f32.mrb[13].mxu1 }
 0x399   :  { %v18386_v45 = vpop.f32.mrb[13].mxu0  ;;  %v7067_v46 = vpop.f32.mrb[14].mxu1  ;;  %7368 = vmatpush1.bf16.msra.mxu1 %v14803_v38  ;;  %v14871_v38 = vld [vmem:[%s21433_s1 + $0x5c] ss:$136 sps:$4 sm:$0xff]  }
 0x39a   :  { %v7149_v48 = vpop.f32.mrb[14].mxu0  ;;  %7450 = vmatpush1.bf16.msra.mxu0 %v14806_v39  ;;  %v7068_v49 = vpop.f32.mrb[15].mxu1  ;;  %7369 = vmatprep.subr.bf16.mxu1 %v14811_v40  ;;  %v14874_v39 = vld [vmem:[%s21433_s1 + $0x64] ss:$136 sps:$4 sm:$0xff]   ;;  %v14869_v40 = vld [vmem:[%s21433_s1 + $0x58] ss:$136 sps:$4 sm:$0xff]  }
 0x39b   :  { %v7150_v52 = vpop.f32.mrb[15].mxu0  ;;  %7451 = vmatprep.subr.bf16.mxu0 %v14814_v42  ;;  %v14872_v42 = vld [vmem:[%s21433_s1 + $0x60] ss:$136 sps:$4 sm:$0xff]   ;;  %v14877_v46 = vld [vmem:[%s21433_s1 + $0x16c] ss:$136 sps:$4 sm:$0xff]  }
 0x39c   :  { %v14875_v48 = vld [vmem:[%s21433_s1 + $0x168] ss:$136 sps:$4 sm:$0xff]   ;;  %v14881_v52 = vld [vmem:[%s21433_s1 + $0x278] ss:$136 sps:$4 sm:$0xff]  }
 0x39d   :  { %7370 = vmatpush1.bf16.msra.mxu1 %v14809_v47  ;;  %v14880_v47 = vld [vmem:[%s21433_s1 + $0x174] ss:$136 sps:$4 sm:$0xff]   ;;  %v14878_v49 = vld [vmem:[%s21433_s1 + $0x170] ss:$136 sps:$4 sm:$0xff]  }
 0x39e   :  { %7452 = vmatpush1.bf16.msra.mxu0 %v14812_v50  ;;  %7371 = vmatprep.subr.bf16.mxu1 %v14817_v51  ;;  %v14883_v50 = vld [vmem:[%s21433_s1 + $0x27c] ss:$136 sps:$4 sm:$0xff]  }
 0x39f   :  { %7453 = vmatprep.subr.bf16.mxu0 %v14820_v53  ;;  %v14886_v51 = vld [vmem:[%s21433_s1 + $0x284] ss:$136 sps:$4 sm:$0xff]   ;;  %v14884_v53 = vld [vmem:[%s21433_s1 + $0x280] ss:$136 sps:$4 sm:$0xff]  }
 0x3a1   :  { %7372 = vmatpush1.bf16.msra.mxu1 %v14815_v54  ;;  %v14889_v54 = vld [vmem:[%s21433_s1 + $0x38c] ss:$136 sps:$4 sm:$0xff]  }
 0x3a2   :  { %7454 = vmatpush1.bf16.msra.mxu0 %v14818_v55  ;;  %7373 = vmatprep.subr.bf16.mxu1 %v14823_v56  ;;  %v14892_v55 = vld [vmem:[%s21433_s1 + $0x394] ss:$136 sps:$4 sm:$0xff]   ;;  %v14887_v56 = vld [vmem:[%s21433_s1 + $0x388] ss:$136 sps:$4 sm:$0xff]  }
 0x3a3   :  { %7455 = vmatprep.subr.bf16.mxu0 %v14826_v57  ;;  %v14890_v57 = vld [vmem:[%s21433_s1 + $0x390] ss:$136 sps:$4 sm:$0xff]  }
 0x3a5   :  { %7374 = vmatpush1.bf16.msra.mxu1 %v14821_v58  ;;  %v14895_v58 = vld [vmem:[%s21433_s1 + $0x49c] ss:$136 sps:$4 sm:$0xff]  }
 0x3a6   :  { %7456 = vmatpush1.bf16.msra.mxu0 %v14824_v60  ;;  %7375 = vmatprep.subr.bf16.mxu1 %v14829_v3  ;;  %v14898_v60 = vld [vmem:[%s21433_s1 + $0x4a4] ss:$136 sps:$4 sm:$0xff]   ;;  %v14893_v3 = vld [vmem:[%s21433_s1 + $0x498] ss:$136 sps:$4 sm:$0xff]  }
 0x3a7   :  { %7457 = vmatprep.subr.bf16.mxu0 %v14832_v5  ;;  %v14896_v5 = vld [vmem:[%s21433_s1 + $0x4a0] ss:$136 sps:$4 sm:$0xff]  }
 0x3a9   :  { %7376 = vmatpush1.bf16.msra.mxu1 %v14827_v6  ;;  %v14901_v6 = vld [vmem:[%s21433_s1 + $0x5ac] ss:$136 sps:$4 sm:$0xff]  }
 0x3aa   :  { %7458 = vmatpush1.bf16.msra.mxu0 %v14830_v0  ;;  %7377 = vmatprep.subr.bf16.mxu1 %v14835_v1  ;;  %v14904_v0 = vld [vmem:[%s21433_s1 + $0x5b4] ss:$136 sps:$4 sm:$0xff]   ;;  %v14899_v1 = vld [vmem:[%s21433_s1 + $0x5a8] ss:$136 sps:$4 sm:$0xff]  }
 0x3ab   :  { %7459 = vmatprep.subr.bf16.mxu0 %v14838_v2  ;;  %v14902_v2 = vld [vmem:[%s21433_s1 + $0x5b0] ss:$136 sps:$4 sm:$0xff]  }
 0x3ad   :  { %7378 = vmatpush1.bf16.msra.mxu1 %v14833_v4  ;;  %v14907_v4 = vld [vmem:[%s21433_s1 + $0x6bc] ss:$136 sps:$4 sm:$0xff]  }
 0x3ae   :  { %7460 = vmatpush1.bf16.msra.mxu0 %v14836_v7  ;;  %7379 = vmatprep.subr.bf16.mxu1 %v14841_v9  ;;  %v14910_v7 = vld [vmem:[%s21433_s1 + $0x6c4] ss:$136 sps:$4 sm:$0xff]   ;;  %v14905_v9 = vld [vmem:[%s21433_s1 + $0x6b8] ss:$136 sps:$4 sm:$0xff]  }
 0x3af   :  { %7461 = vmatprep.subr.bf16.mxu0 %v14844_v10  ;;  %v14908_v10 = vld [vmem:[%s21433_s1 + $0x6c0] ss:$136 sps:$4 sm:$0xff]  }
 0x3b1   :  { %7380 = vmatpush1.bf16.msra.mxu1 %v14839_v12  ;;  %v14913_v12 = vld [vmem:[%s21433_s1 + $0x7cc] ss:$136 sps:$4 sm:$0xff]  }
 0x3b2   :  { %7462 = vmatpush1.bf16.msra.mxu0 %v14842_v13  ;;  %7381 = vmatprep.subr.bf16.mxu1 %v14847_v14  ;;  %v14916_v13 = vld [vmem:[%s21433_s1 + $0x7d4] ss:$136 sps:$4 sm:$0xff]   ;;  %v14911_v14 = vld [vmem:[%s21433_s1 + $0x7c8] ss:$136 sps:$4 sm:$0xff]  }
 0x3b3   :  { %7463 = vmatprep.subr.bf16.mxu0 %v14850_v15  ;;  %v14914_v15 = vld [vmem:[%s21433_s1 + $0x7d0] ss:$136 sps:$4 sm:$0xff]  }
 0x3b5   :  { %7382 = vmatpush1.bf16.msra.mxu1 %v14845_v16  ;;  %v14919_v16 = vld [vmem:[%s21433_s1 + $0x8dc] ss:$136 sps:$4 sm:$0xff]  }
 0x3b6   :  { %7464 = vmatpush1.bf16.msra.mxu0 %v14848_v17  ;;  %7383 = vmatprep.subr.bf16.mxu1 %v14853_v18  ;;  %v14922_v17 = vld [vmem:[%s21433_s1 + $0x8e4] ss:$136 sps:$4 sm:$0xff]   ;;  %v14917_v18 = vld [vmem:[%s21433_s1 + $0x8d8] ss:$136 sps:$4 sm:$0xff]  }
 0x3b7   :  { %7465 = vmatprep.subr.bf16.mxu0 %v14856_v19  ;;  %v14920_v19 = vld [vmem:[%s21433_s1 + $0x8e0] ss:$136 sps:$4 sm:$0xff]  }
 0x3b9   :  { %7384 = vmatpush1.bf16.msra.mxu1 %v14851_v20  ;;  %v14925_v20 = vld [vmem:[%s21433_s1 + $0x9ec] ss:$136 sps:$4 sm:$0xff]  }
 0x3ba   :  { %7466 = vmatpush1.bf16.msra.mxu0 %v14854_v21  ;;  %7385 = vmatprep.subr.bf16.mxu1 %v14859_v22  ;;  %v14928_v21 = vld [vmem:[%s21433_s1 + $0x9f4] ss:$136 sps:$4 sm:$0xff]   ;;  %v14923_v22 = vld [vmem:[%s21433_s1 + $0x9e8] ss:$136 sps:$4 sm:$0xff]  }
 0x3bb   :  { %7467 = vmatprep.subr.bf16.mxu0 %v14862_v23  ;;  %v14926_v23 = vld [vmem:[%s21433_s1 + $0x9f0] ss:$136 sps:$4 sm:$0xff]  }
 0x3bd   :  { %7386 = vmatpush1.bf16.msra.mxu1 %v14857_v24  ;;  %v14931_v24 = vld [vmem:[%s21433_s1 + $0xafc] ss:$136 sps:$4 sm:$0xff]  }
 0x3be   :  { %7468 = vmatpush1.bf16.msra.mxu0 %v14860_v25  ;;  %7387 = vmatprep.subr.bf16.mxu1 %v14865_v26  ;;  %v14934_v25 = vld [vmem:[%s21433_s1 + $0xb04] ss:$136 sps:$4 sm:$0xff]   ;;  %v14929_v26 = vld [vmem:[%s21433_s1 + $0xaf8] ss:$136 sps:$4 sm:$0xff]  }
 0x3bf   :  { %7469 = vmatprep.subr.bf16.mxu0 %v14868_v28  ;;  %v14932_v28 = vld [vmem:[%s21433_s1 + $0xb00] ss:$136 sps:$4 sm:$0xff]  }
 0x3c1   :  { %7388 = vmatpush1.bf16.msra.mxu1 %v14863_v36  ;;  %v14937_v36 = vld [vmem:[%s21433_s1 + $0xc0c] ss:$136 sps:$4 sm:$0xff]  }
 0x3c2   :  { %7470 = vmatpush1.bf16.msra.mxu0 %v14866_v37  ;;  %7480 = vmatprep.subr.bf16.mxu1 %v14871_v38  ;;  %v14940_v37 = vld [vmem:[%s21433_s1 + $0xc14] ss:$136 sps:$4 sm:$0xff]   ;;  %v14935_v38 = vld [vmem:[%s21433_s1 + $0xc08] ss:$136 sps:$4 sm:$0xff]  }
 0x3c3   :  { %7562 = vmatprep.subr.bf16.mxu0 %v14874_v39  ;;  %v14938_v39 = vld [vmem:[%s21433_s1 + $0xc10] ss:$136 sps:$4 sm:$0xff]  }
 0x3c4   :  { %7390 = vmatmul.mubr.bf16.vlgmr.msra.gmra.mrb[20].mxu1 %v16520_v34 }
 0x3c5   :  { %7472 = vmatmul.mubr.bf16.vlgmr.msra.gmra.mrb[20].mxu0 %v16520_v34  ;;  %7481 = vmatpush1.bf16.msra.mxu1 %v14869_v40  ;;  %v14943_v40 = vld [vmem:[%s21433_s1 + $0xd1c] ss:$136 sps:$4 sm:$0xff]  }
 0x3c6   :  { %7512 = vmatprep.mubr.bf16.mxu1 %v16518_v33  ;;  %7563 = vmatpush1.bf16.msra.mxu0 %v14872_v42  ;;  %v14946_v42 = vld [vmem:[%s21433_s1 + $0xd24] ss:$136 sps:$4 sm:$0xff]  }
 0x3c7   :  { %7594 = vmatprep.mubr.bf16.mxu0 %v16518_v33  ;;  %7482 = vmatprep.subr.bf16.mxu1 %v14877_v46  ;;  %v14941_v46 = vld [vmem:[%s21433_s1 + $0xd18] ss:$136 sps:$4 sm:$0xff]  }
 0x3c8   :  { %7564 = vmatprep.subr.bf16.mxu0 %v14880_v47  ;;  %v14944_v47 = vld [vmem:[%s21433_s1 + $0xd20] ss:$136 sps:$4 sm:$0xff]  }
 0x3c9   :  { %7483 = vmatpush1.bf16.msra.mxu1 %v14875_v48  ;;  %v14949_v48 = vld [vmem:[%s21433_s1 + $0xe2c] ss:$136 sps:$4 sm:$0xff]  }
 0x3ca   :  { %7565 = vmatpush1.bf16.msra.mxu0 %v14878_v49  ;;  %7484 = vmatprep.subr.bf16.mxu1 %v14883_v50  ;;  %v14952_v49 = vld [vmem:[%s21433_s1 + $0xe34] ss:$136 sps:$4 sm:$0xff]   ;;  %v14947_v50 = vld [vmem:[%s21433_s1 + $0xe28] ss:$136 sps:$4 sm:$0xff]  }
 0x3cb   :  { %7566 = vmatprep.subr.bf16.mxu0 %v14886_v51  ;;  %v14950_v51 = vld [vmem:[%s21433_s1 + $0xe30] ss:$136 sps:$4 sm:$0xff]  }
 0x3cd   :  { %7485 = vmatpush1.bf16.msra.mxu1 %v14881_v52  ;;  %v14955_v52 = vld [vmem:[%s21433_s1 + $0xf3c] ss:$136 sps:$4 sm:$0xff]  }
 0x3ce   :  { %7567 = vmatpush1.bf16.msra.mxu0 %v14884_v53  ;;  %7486 = vmatprep.subr.bf16.mxu1 %v14889_v54  ;;  %v14958_v53 = vld [vmem:[%s21433_s1 + $0xf44] ss:$136 sps:$4 sm:$0xff]   ;;  %v14953_v54 = vld [vmem:[%s21433_s1 + $0xf38] ss:$136 sps:$4 sm:$0xff]  }
 0x3cf   :  { %7568 = vmatprep.subr.bf16.mxu0 %v14892_v55  ;;  %v14956_v55 = vld [vmem:[%s21433_s1 + $0xf40] ss:$136 sps:$4 sm:$0xff]  }
 0x3d1   :  { %7487 = vmatpush1.bf16.msra.mxu1 %v14887_v56  ;;  %v14961_v56 = vld [vmem:[%s21433_s1 + $0x104c] ss:$136 sps:$4 sm:$0xff]  }
 0x3d2   :  { %7569 = vmatpush1.bf16.msra.mxu0 %v14890_v57  ;;  %7488 = vmatprep.subr.bf16.mxu1 %v14895_v58  ;;  %v14964_v57 = vld [vmem:[%s21433_s1 + $0x1054] ss:$136 sps:$4 sm:$0xff]   ;;  %v14959_v58 = vld [vmem:[%s21433_s1 + $0x1048] ss:$136 sps:$4 sm:$0xff]  }
 0x3d3   :  { %7570 = vmatprep.subr.bf16.mxu0 %v14898_v60  ;;  %v14962_v60 = vld [vmem:[%s21433_s1 + $0x1050] ss:$136 sps:$4 sm:$0xff]  }
 0x3d5   :  { %7489 = vmatpush1.bf16.msra.mxu1 %v14893_v3  ;;  %v14967_v3 = vld [vmem:[%s21433_s1 + $0x115c] ss:$136 sps:$4 sm:$0xff]  }
 0x3d6   :  { %7571 = vmatpush1.bf16.msra.mxu0 %v14896_v5  ;;  %7490 = vmatprep.subr.bf16.mxu1 %v14901_v6  ;;  %v14970_v5 = vld [vmem:[%s21433_s1 + $0x1164] ss:$136 sps:$4 sm:$0xff]   ;;  %v14965_v6 = vld [vmem:[%s21433_s1 + $0x1158] ss:$136 sps:$4 sm:$0xff]  }
 0x3d7   :  { %7572 = vmatprep.subr.bf16.mxu0 %v14904_v0  ;;  %v14968_v0 = vld [vmem:[%s21433_s1 + $0x1160] ss:$136 sps:$4 sm:$0xff]  }
 0x3d9   :  { %7491 = vmatpush1.bf16.msra.mxu1 %v14899_v1  ;;  %v14973_v1 = vld [vmem:[%s21433_s1 + $0x126c] ss:$136 sps:$4 sm:$0xff]  }
 0x3da   :  { %7573 = vmatpush1.bf16.msra.mxu0 %v14902_v2  ;;  %7492 = vmatprep.subr.bf16.mxu1 %v14907_v4  ;;  %v14976_v2 = vld [vmem:[%s21433_s1 + $0x1274] ss:$136 sps:$4 sm:$0xff]   ;;  %v14971_v4 = vld [vmem:[%s21433_s1 + $0x1268] ss:$136 sps:$4 sm:$0xff]  }
 0x3db   :  { %7574 = vmatprep.subr.bf16.mxu0 %v14910_v7  ;;  %v14974_v7 = vld [vmem:[%s21433_s1 + $0x1270] ss:$136 sps:$4 sm:$0xff]  }
 0x3dd   :  { %7493 = vmatpush1.bf16.msra.mxu1 %v14905_v9  ;;  %v14979_v9 = vld [vmem:[%s21433_s1 + $0x137c] ss:$136 sps:$4 sm:$0xff]  }
 0x3de   :  { %7575 = vmatpush1.bf16.msra.mxu0 %v14908_v10  ;;  %7494 = vmatprep.subr.bf16.mxu1 %v14913_v12  ;;  %v14982_v10 = vld [vmem:[%s21433_s1 + $0x1384] ss:$136 sps:$4 sm:$0xff]   ;;  %v14977_v12 = vld [vmem:[%s21433_s1 + $0x1378] ss:$136 sps:$4 sm:$0xff]  }
 0x3df   :  { %7576 = vmatprep.subr.bf16.mxu0 %v14916_v13  ;;  %v14980_v13 = vld [vmem:[%s21433_s1 + $0x1380] ss:$136 sps:$4 sm:$0xff]  }
 0x3e1   :  { %7495 = vmatpush1.bf16.msra.mxu1 %v14911_v14  ;;  %v14985_v14 = vld [vmem:[%s21433_s1 + $0x148c] ss:$136 sps:$4 sm:$0xff]  }
 0x3e2   :  { %7577 = vmatpush1.bf16.msra.mxu0 %v14914_v15  ;;  %7496 = vmatprep.subr.bf16.mxu1 %v14919_v16  ;;  %v14988_v15 = vld [vmem:[%s21433_s1 + $0x1494] ss:$136 sps:$4 sm:$0xff]   ;;  %v14983_v16 = vld [vmem:[%s21433_s1 + $0x1488] ss:$136 sps:$4 sm:$0xff]  }
 0x3e3   :  { %7578 = vmatprep.subr.bf16.mxu0 %v14922_v17  ;;  %v14986_v17 = vld [vmem:[%s21433_s1 + $0x1490] ss:$136 sps:$4 sm:$0xff]  }
 0x3e5   :  { %7497 = vmatpush1.bf16.msra.mxu1 %v14917_v18  ;;  %v14991_v18 = vld [vmem:[%s21433_s1 + $0x159c] ss:$136 sps:$4 sm:$0xff]  }
 0x3e6   :  { %7579 = vmatpush1.bf16.msra.mxu0 %v14920_v19  ;;  %7498 = vmatprep.subr.bf16.mxu1 %v14925_v20  ;;  %v14994_v19 = vld [vmem:[%s21433_s1 + $0x15a4] ss:$136 sps:$4 sm:$0xff]   ;;  %v14989_v20 = vld [vmem:[%s21433_s1 + $0x1598] ss:$136 sps:$4 sm:$0xff]  }
 0x3e7   :  { %7580 = vmatprep.subr.bf16.mxu0 %v14928_v21  ;;  %v14992_v21 = vld [vmem:[%s21433_s1 + $0x15a0] ss:$136 sps:$4 sm:$0xff]  }
 0x3e9   :  { %7499 = vmatpush1.bf16.msra.mxu1 %v14923_v22  ;;  %v14997_v22 = vld [vmem:[%s21433_s1 + $0x16ac] ss:$136 sps:$4 sm:$0xff]  }
 0x3ea   :  { %7581 = vmatpush1.bf16.msra.mxu0 %v14926_v23  ;;  %7500 = vmatprep.subr.bf16.mxu1 %v14931_v24  ;;  %v15000_v23 = vld [vmem:[%s21433_s1 + $0x16b4] ss:$136 sps:$4 sm:$0xff]   ;;  %v14995_v24 = vld [vmem:[%s21433_s1 + $0x16a8] ss:$136 sps:$4 sm:$0xff]  }
 0x3eb   :  { %7582 = vmatprep.subr.bf16.mxu0 %v14934_v25  ;;  %v14998_v25 = vld [vmem:[%s21433_s1 + $0x16b0] ss:$136 sps:$4 sm:$0xff]  }
 0x3ed   :  { %7501 = vmatpush1.bf16.msra.mxu1 %v14929_v26  ;;  %v15003_v26 = vld [vmem:[%s21433_s1 + $0x17bc] ss:$136 sps:$4 sm:$0xff]  }
 0x3ee   :  { %7583 = vmatpush1.bf16.msra.mxu0 %v14932_v28  ;;  %7502 = vmatprep.subr.bf16.mxu1 %v14937_v36  ;;  %v15006_v36 = vld [vmem:[%s21433_s1 + $0x17c4] ss:$136 sps:$4 sm:$0xff]  }
 0x3ef   :  { %7584 = vmatprep.subr.bf16.mxu0 %v14940_v37 }
 0x3f1   :  { %7503 = vmatpush1.bf16.msra.mxu1 %v14935_v38 }
 0x3f2   :  { %7585 = vmatpush1.bf16.msra.mxu0 %v14938_v39  ;;  %7504 = vmatprep.subr.bf16.mxu1 %v14943_v40 }
 0x3f3   :  { %7586 = vmatprep.subr.bf16.mxu0 %v14946_v42  ;;  %v15001_v42 = vld [vmem:[%s21433_s1 + $0x17b8] ss:$136 sps:$4 sm:$0xff]  }
 0x3f5   :  { %7505 = vmatpush1.bf16.msra.mxu1 %v14941_v46  ;;  %v7972_v46 = vmul.f32 %v17184_v8, %v17184_v8 }
 0x3f6   :  { %7587 = vmatpush1.bf16.msra.mxu0 %v14944_v47  ;;  %7506 = vmatprep.subr.bf16.mxu1 %v14949_v48 }
 0x3f7   :  { %7588 = vmatprep.subr.bf16.mxu0 %v14952_v49 }
 0x3f9   :  { %7507 = vmatpush1.bf16.msra.mxu1 %v14947_v50  ;;  %v15004_v50 = vld [vmem:[%s21433_s1 + $0x17c0] ss:$136 sps:$4 sm:$0xff]  }
 0x3fa   :  { %7589 = vmatpush1.bf16.msra.mxu0 %v14950_v51  ;;  %7508 = vmatprep.subr.bf16.mxu1 %v14955_v52  ;;  %v15009_v51 = vld [vmem:[%s21433_s1 + $0x18cc] ss:$136 sps:$4 sm:$0xff]  }
 0x3fb   :  { %7590 = vmatprep.subr.bf16.mxu0 %v14958_v53  ;;  %v15012_v53 = vld [vmem:[%s21433_s1 + $0x18d4] ss:$136 sps:$4 sm:$0xff]  }
 0x3fd   :  { %7509 = vmatpush1.bf16.msra.mxu1 %v14953_v54  ;;  %v15007_v54 = vld [vmem:[%s21433_s1 + $0x18c8] ss:$136 sps:$4 sm:$0xff]  }
 0x3fe   :  { %7591 = vmatpush1.bf16.msra.mxu0 %v14956_v55  ;;  %7510 = vmatprep.subr.bf16.mxu1 %v14961_v56  ;;  %v15010_v55 = vld [vmem:[%s21433_s1 + $0x18d0] ss:$136 sps:$4 sm:$0xff]   ;;  %v15015_v56 = vld [vmem:[%s21433_s1 + $0x19dc] ss:$136 sps:$4 sm:$0xff]  }
 0x3ff   :  { %7592 = vmatprep.subr.bf16.mxu0 %v14964_v57  ;;  %v15018_v57 = vld [vmem:[%s21433_s1 + $0x19e4] ss:$136 sps:$4 sm:$0xff]  }
 0x401   :  { %7511 = vmatpush1.bf16.msra.mxu1 %v14959_v58  ;;  %v15013_v58 = vld [vmem:[%s21433_s1 + $0x19d8] ss:$136 sps:$4 sm:$0xff]  }
 0x402   :  { %7593 = vmatpush1.bf16.msra.mxu0 %v14962_v60  ;;  %7521 = vmatprep.subr.bf16.mxu1 %v14967_v3  ;;  %v15016_v60 = vld [vmem:[%s21433_s1 + $0x19e0] ss:$136 sps:$4 sm:$0xff]   ;;  %v15021_v3 = vld [vmem:[%s21433_s1 + $0x1aec] ss:$136 sps:$4 sm:$0xff]  }
 0x403   :  { %7603 = vmatprep.subr.bf16.mxu0 %v14970_v5  ;;  %v15024_v5 = vld [vmem:[%s21433_s1 + $0x1af4] ss:$136 sps:$4 sm:$0xff]  }
 0x404   :  { %7513 = vmatmul.mubr.bf16.vlgmr.msra.gmra.mrb[24].mxu1 %v16516_v32 }
 0x405   :  { %7595 = vmatmul.mubr.bf16.vlgmr.msra.gmra.mrb[24].mxu0 %v16516_v32  ;;  %7522 = vmatpush1.bf16.msra.mxu1 %v14965_v6  ;;  %v15019_v6 = vld [vmem:[%s21433_s1 + $0x1ae8] ss:$136 sps:$4 sm:$0xff]  }
 0x406   :  { %7553 = vmatprep.mubr.bf16.mxu1 %v16522_v35  ;;  %7604 = vmatpush1.bf16.msra.mxu0 %v14968_v0  ;;  %v15022_v0 = vld [vmem:[%s21433_s1 + $0x1af0] ss:$136 sps:$4 sm:$0xff]  }
 0x407   :  { %7635 = vmatprep.mubr.bf16.mxu0 %v16522_v35  ;;  %7523 = vmatprep.subr.bf16.mxu1 %v14973_v1  ;;  %v15027_v1 = vld [vmem:[%s21433_s1 + $0x1bfc] ss:$136 sps:$4 sm:$0xff]  }
 0x408   :  { %7605 = vmatprep.subr.bf16.mxu0 %v14976_v2  ;;  %v15030_v2 = vld [vmem:[%s21433_s1 + $0x1c04] ss:$136 sps:$4 sm:$0xff]  }
 0x409   :  { %7524 = vmatpush1.bf16.msra.mxu1 %v14971_v4  ;;  %v15025_v4 = vld [vmem:[%s21433_s1 + $0x1bf8] ss:$136 sps:$4 sm:$0xff]  }
 0x40a   :  { %7606 = vmatpush1.bf16.msra.mxu0 %v14974_v7  ;;  %7525 = vmatprep.subr.bf16.mxu1 %v14979_v9  ;;  %v15028_v7 = vld [vmem:[%s21433_s1 + $0x1c00] ss:$136 sps:$4 sm:$0xff]   ;;  %v15033_v9 = vld [vmem:[%s21433_s1 + $0x1d0c] ss:$136 sps:$4 sm:$0xff]  }
 0x40b   :  { %7607 = vmatprep.subr.bf16.mxu0 %v14982_v10  ;;  %v15036_v10 = vld [vmem:[%s21433_s1 + $0x1d14] ss:$136 sps:$4 sm:$0xff]  }
 0x40d   :  { %7526 = vmatpush1.bf16.msra.mxu1 %v14977_v12  ;;  %v15031_v12 = vld [vmem:[%s21433_s1 + $0x1d08] ss:$136 sps:$4 sm:$0xff]  }
 0x40e   :  { %7608 = vmatpush1.bf16.msra.mxu0 %v14980_v13  ;;  %7527 = vmatprep.subr.bf16.mxu1 %v14985_v14  ;;  %v15034_v13 = vld [vmem:[%s21433_s1 + $0x1d10] ss:$136 sps:$4 sm:$0xff]   ;;  %v15039_v14 = vld [vmem:[%s21433_s1 + $0x1e1c] ss:$136 sps:$4 sm:$0xff]  }
 0x40f   :  { %7609 = vmatprep.subr.bf16.mxu0 %v14988_v15  ;;  %v15042_v15 = vld [vmem:[%s21433_s1 + $0x1e24] ss:$136 sps:$4 sm:$0xff]  }
 0x411   :  { %7528 = vmatpush1.bf16.msra.mxu1 %v14983_v16  ;;  %v15037_v16 = vld [vmem:[%s21433_s1 + $0x1e18] ss:$136 sps:$4 sm:$0xff]  }
 0x412   :  { %7610 = vmatpush1.bf16.msra.mxu0 %v14986_v17  ;;  %7529 = vmatprep.subr.bf16.mxu1 %v14991_v18  ;;  %v15040_v17 = vld [vmem:[%s21433_s1 + $0x1e20] ss:$136 sps:$4 sm:$0xff]   ;;  %v15045_v18 = vld [vmem:[%s21433_s1 + $0x1f2c] ss:$136 sps:$4 sm:$0xff]  }
 0x413   :  { %7611 = vmatprep.subr.bf16.mxu0 %v14994_v19  ;;  %v15048_v19 = vld [vmem:[%s21433_s1 + $0x1f34] ss:$136 sps:$4 sm:$0xff]  }
 0x415   :  { %7530 = vmatpush1.bf16.msra.mxu1 %v14989_v20  ;;  %v15043_v20 = vld [vmem:[%s21433_s1 + $0x1f28] ss:$136 sps:$4 sm:$0xff]  }
 0x416   :  { %7612 = vmatpush1.bf16.msra.mxu0 %v14992_v21  ;;  %7531 = vmatprep.subr.bf16.mxu1 %v14997_v22  ;;  %v15046_v21 = vld [vmem:[%s21433_s1 + $0x1f30] ss:$136 sps:$4 sm:$0xff]   ;;  %v15051_v22 = vld [vmem:[%s21433_s1 + $0x203c] ss:$136 sps:$4 sm:$0xff]  }
 0x417   :  { %v18777_v28 = vpop.f32.mrb[16].mxu1  ;;  %7613 = vmatprep.subr.bf16.mxu0 %v15000_v23  ;;  %v15054_v23 = vld [vmem:[%s21433_s1 + $0x2044] ss:$136 sps:$4 sm:$0xff]  }
 0x418   :  { %v18782_v37 = vpop.f32.mrb[16].mxu0  ;;  %v18784_v38 = vpop.f32.mrb[17].mxu1 }
 0x419   :  { %v7311_v39 = vpop.f32.mrb[17].mxu0  ;;  %v7231_v40 = vpop.f32.mrb[18].mxu1  ;;  %7532 = vmatpush1.bf16.msra.mxu1 %v14995_v24  ;;  %v15049_v24 = vld [vmem:[%s21433_s1 + $0x2038] ss:$136 sps:$4 sm:$0xff]  }
 0x41a   :  { %v7989_v47 = vmul.f32 %v7311_v39, %v7311_v39  ;;  %v7313_v48 = vpop.f32.mrb[18].mxu0  ;;  %7614 = vmatpush1.bf16.msra.mxu0 %v14998_v25  ;;  %v7232_v49 = vpop.f32.mrb[19].mxu1  ;;  %7533 = vmatprep.subr.bf16.mxu1 %v15003_v26  ;;  %v15052_v25 = vld [vmem:[%s21433_s1 + $0x2040] ss:$136 sps:$4 sm:$0xff]   ;;  %v15057_v26 = vld [vmem:[%s21433_s1 + $0x214c] ss:$136 sps:$4 sm:$0xff]  }
 0x41b   :  { %v7314_v52 = vpop.f32.mrb[19].mxu0  ;;  %7615 = vmatprep.subr.bf16.mxu0 %v15006_v36  ;;  %v15060_v36 = vld [vmem:[%s21433_s1 + $0x2154] ss:$136 sps:$4 sm:$0xff]   ;;  %v15055_v39 = vld [vmem:[%s21433_s1 + $0x2148] ss:$136 sps:$4 sm:$0xff]  }
 0x41c   :  { %v18800_v8 = vadd.f32 %v7989_v47, %v7972_v46  ;;  %v15058_v40 = vld [vmem:[%s21433_s1 + $0x2150] ss:$136 sps:$4 sm:$0xff]   ;;  %v15066_v46 = vld [vmem:[%s21433_s1 + $0x74] ss:$136 sps:$4 sm:$0xff]   ;;  %v15070_v52 = vld [vmem:[%s21433_s1 + $0x180] ss:$136 sps:$4 sm:$0xff]  }
 0x41d   :  { %7534 = vmatpush1.bf16.msra.mxu1 %v15001_v42  ;;  %v15063_v42 = vld [vmem:[%s21433_s1 + $0x6c] ss:$136 sps:$4 sm:$0xff]   ;;  %v15061_v47 = vld [vmem:[%s21433_s1 + $0x68] ss:$136 sps:$4 sm:$0xff]   ;;  %v15069_v49 = vld [vmem:[%s21433_s1 + $0x17c] ss:$136 sps:$4 sm:$0xff]  }
 0x41e   :  { %7616 = vmatpush1.bf16.msra.mxu0 %v15004_v50  ;;  %7535 = vmatprep.subr.bf16.mxu1 %v15009_v51  ;;  %v15064_v48 = vld [vmem:[%s21433_s1 + $0x70] ss:$136 sps:$4 sm:$0xff]   ;;  %v15072_v50 = vld [vmem:[%s21433_s1 + $0x184] ss:$136 sps:$4 sm:$0xff]  }
 0x41f   :  { %7617 = vmatprep.subr.bf16.mxu0 %v15012_v53  ;;  %v15067_v51 = vld [vmem:[%s21433_s1 + $0x178] ss:$136 sps:$4 sm:$0xff]   ;;  %v15075_v53 = vld [vmem:[%s21433_s1 + $0x28c] ss:$136 sps:$4 sm:$0xff]  }
 0x421   :  { %7536 = vmatpush1.bf16.msra.mxu1 %v15007_v54  ;;  %v15078_v54 = vld [vmem:[%s21433_s1 + $0x294] ss:$136 sps:$4 sm:$0xff]  }
 0x422   :  { %7618 = vmatpush1.bf16.msra.mxu0 %v15010_v55  ;;  %7537 = vmatprep.subr.bf16.mxu1 %v15015_v56  ;;  %v15073_v55 = vld [vmem:[%s21433_s1 + $0x288] ss:$136 sps:$4 sm:$0xff]  }
 0x423   :  { %7619 = vmatprep.subr.bf16.mxu0 %v15018_v57  ;;  %v15076_v56 = vld [vmem:[%s21433_s1 + $0x290] ss:$136 sps:$4 sm:$0xff]   ;;  %v15081_v57 = vld [vmem:[%s21433_s1 + $0x39c] ss:$136 sps:$4 sm:$0xff]  }
 0x425   :  { %7538 = vmatpush1.bf16.msra.mxu1 %v15013_v58  ;;  %v15084_v58 = vld [vmem:[%s21433_s1 + $0x3a4] ss:$136 sps:$4 sm:$0xff]  }
 0x426   :  { %7620 = vmatpush1.bf16.msra.mxu0 %v15016_v60  ;;  %7539 = vmatprep.subr.bf16.mxu1 %v15021_v3  ;;  %v15079_v60 = vld [vmem:[%s21433_s1 + $0x398] ss:$136 sps:$4 sm:$0xff]  }
 0x427   :  { %7621 = vmatprep.subr.bf16.mxu0 %v15024_v5  ;;  %v15082_v3 = vld [vmem:[%s21433_s1 + $0x3a0] ss:$136 sps:$4 sm:$0xff]   ;;  %v15087_v5 = vld [vmem:[%s21433_s1 + $0x4ac] ss:$136 sps:$4 sm:$0xff]  }
 0x429   :  { %7540 = vmatpush1.bf16.msra.mxu1 %v15019_v6  ;;  %v15090_v6 = vld [vmem:[%s21433_s1 + $0x4b4] ss:$136 sps:$4 sm:$0xff]  }
 0x42a   :  { %7622 = vmatpush1.bf16.msra.mxu0 %v15022_v0  ;;  %7541 = vmatprep.subr.bf16.mxu1 %v15027_v1  ;;  %v15085_v0 = vld [vmem:[%s21433_s1 + $0x4a8] ss:$136 sps:$4 sm:$0xff]  }
 0x42b   :  { %7623 = vmatprep.subr.bf16.mxu0 %v15030_v2  ;;  %v15088_v1 = vld [vmem:[%s21433_s1 + $0x4b0] ss:$136 sps:$4 sm:$0xff]   ;;  %v15093_v2 = vld [vmem:[%s21433_s1 + $0x5bc] ss:$136 sps:$4 sm:$0xff]  }
 0x42d   :  { %7542 = vmatpush1.bf16.msra.mxu1 %v15025_v4  ;;  %v15096_v4 = vld [vmem:[%s21433_s1 + $0x5c4] ss:$136 sps:$4 sm:$0xff]  }
 0x42e   :  { %7624 = vmatpush1.bf16.msra.mxu0 %v15028_v7  ;;  %7543 = vmatprep.subr.bf16.mxu1 %v15033_v9  ;;  %v15091_v7 = vld [vmem:[%s21433_s1 + $0x5b8] ss:$136 sps:$4 sm:$0xff]  }
 0x42f   :  { %7625 = vmatprep.subr.bf16.mxu0 %v15036_v10  ;;  %v15094_v9 = vld [vmem:[%s21433_s1 + $0x5c0] ss:$136 sps:$4 sm:$0xff]   ;;  %v15099_v10 = vld [vmem:[%s21433_s1 + $0x6cc] ss:$136 sps:$4 sm:$0xff]  }
 0x431   :  { %7544 = vmatpush1.bf16.msra.mxu1 %v15031_v12  ;;  %v15102_v12 = vld [vmem:[%s21433_s1 + $0x6d4] ss:$136 sps:$4 sm:$0xff]  }
 0x432   :  { %7626 = vmatpush1.bf16.msra.mxu0 %v15034_v13  ;;  %7545 = vmatprep.subr.bf16.mxu1 %v15039_v14  ;;  %v15097_v13 = vld [vmem:[%s21433_s1 + $0x6c8] ss:$136 sps:$4 sm:$0xff]  }
 0x433   :  { %7627 = vmatprep.subr.bf16.mxu0 %v15042_v15  ;;  %v15100_v14 = vld [vmem:[%s21433_s1 + $0x6d0] ss:$136 sps:$4 sm:$0xff]   ;;  %v15105_v15 = vld [vmem:[%s21433_s1 + $0x7dc] ss:$136 sps:$4 sm:$0xff]  }
 0x435   :  { %7546 = vmatpush1.bf16.msra.mxu1 %v15037_v16  ;;  %v15108_v16 = vld [vmem:[%s21433_s1 + $0x7e4] ss:$136 sps:$4 sm:$0xff]  }
 0x436   :  { %7628 = vmatpush1.bf16.msra.mxu0 %v15040_v17  ;;  %7547 = vmatprep.subr.bf16.mxu1 %v15045_v18  ;;  %v15103_v17 = vld [vmem:[%s21433_s1 + $0x7d8] ss:$136 sps:$4 sm:$0xff]  }
 0x437   :  { %7629 = vmatprep.subr.bf16.mxu0 %v15048_v19  ;;  %v15106_v18 = vld [vmem:[%s21433_s1 + $0x7e0] ss:$136 sps:$4 sm:$0xff]   ;;  %v15111_v19 = vld [vmem:[%s21433_s1 + $0x8ec] ss:$136 sps:$4 sm:$0xff]  }
 0x439   :  { %7548 = vmatpush1.bf16.msra.mxu1 %v15043_v20  ;;  %v15114_v20 = vld [vmem:[%s21433_s1 + $0x8f4] ss:$136 sps:$4 sm:$0xff]  }
 0x43a   :  { %7630 = vmatpush1.bf16.msra.mxu0 %v15046_v21  ;;  %7549 = vmatprep.subr.bf16.mxu1 %v15051_v22  ;;  %v15109_v21 = vld [vmem:[%s21433_s1 + $0x8e8] ss:$136 sps:$4 sm:$0xff]  }
 0x43b   :  { %7631 = vmatprep.subr.bf16.mxu0 %v15054_v23  ;;  %v15112_v22 = vld [vmem:[%s21433_s1 + $0x8f0] ss:$136 sps:$4 sm:$0xff]   ;;  %v15117_v23 = vld [vmem:[%s21433_s1 + $0x9fc] ss:$136 sps:$4 sm:$0xff]  }
 0x43d   :  { %7550 = vmatpush1.bf16.msra.mxu1 %v15049_v24  ;;  %v15120_v24 = vld [vmem:[%s21433_s1 + $0xa04] ss:$136 sps:$4 sm:$0xff]  }
 0x43e   :  { %7632 = vmatpush1.bf16.msra.mxu0 %v15052_v25  ;;  %7551 = vmatprep.subr.bf16.mxu1 %v15057_v26  ;;  %v15115_v25 = vld [vmem:[%s21433_s1 + $0x9f8] ss:$136 sps:$4 sm:$0xff]  }
 0x43f   :  { %7633 = vmatprep.subr.bf16.mxu0 %v15060_v36  ;;  %v15118_v26 = vld [vmem:[%s21433_s1 + $0xa00] ss:$136 sps:$4 sm:$0xff]   ;;  %v15123_v36 = vld [vmem:[%s21433_s1 + $0xb0c] ss:$136 sps:$4 sm:$0xff]  }
 0x441   :  { %7552 = vmatpush1.bf16.msra.mxu1 %v15055_v39  ;;  %v15126_v39 = vld [vmem:[%s21433_s1 + $0xb14] ss:$136 sps:$4 sm:$0xff]  }
 0x442   :  { %7634 = vmatpush1.bf16.msra.mxu0 %v15058_v40  ;;  %7644 = vmatprep.subr.bf16.mxu1 %v15063_v42  ;;  %v15121_v40 = vld [vmem:[%s21433_s1 + $0xb08] ss:$136 sps:$4 sm:$0xff]  }
 0x443   :  { %7726 = vmatprep.subr.bf16.mxu0 %v15066_v46  ;;  %v15124_v42 = vld [vmem:[%s21433_s1 + $0xb10] ss:$136 sps:$4 sm:$0xff]   ;;  %v15129_v46 = vld [vmem:[%s21433_s1 + $0xc1c] ss:$136 sps:$4 sm:$0xff]  }
 0x444   :  { %7554 = vmatmul.mubr.bf16.vlgmr.msra.gmra.mrb[24].mxu1 %v16520_v34 }
 0x445   :  { %7636 = vmatmul.mubr.bf16.vlgmr.msra.gmra.mrb[24].mxu0 %v16520_v34  ;;  %7645 = vmatpush1.bf16.msra.mxu1 %v15061_v47  ;;  %v15132_v47 = vld [vmem:[%s21433_s1 + $0xc24] ss:$136 sps:$4 sm:$0xff]  }
 0x446   :  { %7676 = vmatprep.mubr.bf16.mxu1 %v16518_v33  ;;  %7727 = vmatpush1.bf16.msra.mxu0 %v15064_v48  ;;  %v15127_v48 = vld [vmem:[%s21433_s1 + $0xc18] ss:$136 sps:$4 sm:$0xff]  }
 0x447   :  { %7758 = vmatprep.mubr.bf16.mxu0 %v16518_v33  ;;  %7646 = vmatprep.subr.bf16.mxu1 %v15069_v49  ;;  %v15130_v49 = vld [vmem:[%s21433_s1 + $0xc20] ss:$136 sps:$4 sm:$0xff]  }
 0x448   :  { %7728 = vmatprep.subr.bf16.mxu0 %v15072_v50  ;;  %v15135_v50 = vld [vmem:[%s21433_s1 + $0xd2c] ss:$136 sps:$4 sm:$0xff]  }
 0x449   :  { %7647 = vmatpush1.bf16.msra.mxu1 %v15067_v51  ;;  %v15138_v51 = vld [vmem:[%s21433_s1 + $0xd34] ss:$136 sps:$4 sm:$0xff]  }
 0x44a   :  { %7729 = vmatpush1.bf16.msra.mxu0 %v15070_v52  ;;  %7648 = vmatprep.subr.bf16.mxu1 %v15075_v53  ;;  %v15133_v52 = vld [vmem:[%s21433_s1 + $0xd28] ss:$136 sps:$4 sm:$0xff]  }
 0x44b   :  { %7730 = vmatprep.subr.bf16.mxu0 %v15078_v54  ;;  %v15136_v53 = vld [vmem:[%s21433_s1 + $0xd30] ss:$136 sps:$4 sm:$0xff]   ;;  %v15141_v54 = vld [vmem:[%s21433_s1 + $0xe3c] ss:$136 sps:$4 sm:$0xff]  }
 0x44d   :  { %7649 = vmatpush1.bf16.msra.mxu1 %v15073_v55  ;;  %v15144_v55 = vld [vmem:[%s21433_s1 + $0xe44] ss:$136 sps:$4 sm:$0xff]  }
 0x44e   :  { %7731 = vmatpush1.bf16.msra.mxu0 %v15076_v56  ;;  %7650 = vmatprep.subr.bf16.mxu1 %v15081_v57  ;;  %v15139_v56 = vld [vmem:[%s21433_s1 + $0xe38] ss:$136 sps:$4 sm:$0xff]  }
 0x44f   :  { %7732 = vmatprep.subr.bf16.mxu0 %v15084_v58  ;;  %v15142_v57 = vld [vmem:[%s21433_s1 + $0xe40] ss:$136 sps:$4 sm:$0xff]   ;;  %v15147_v58 = vld [vmem:[%s21433_s1 + $0xf4c] ss:$136 sps:$4 sm:$0xff]  }
 0x451   :  { %7651 = vmatpush1.bf16.msra.mxu1 %v15079_v60  ;;  %v15150_v60 = vld [vmem:[%s21433_s1 + $0xf54] ss:$136 sps:$4 sm:$0xff]  }
 0x452   :  { %7733 = vmatpush1.bf16.msra.mxu0 %v15082_v3  ;;  %7652 = vmatprep.subr.bf16.mxu1 %v15087_v5  ;;  %v15145_v3 = vld [vmem:[%s21433_s1 + $0xf48] ss:$136 sps:$4 sm:$0xff]  }
 0x453   :  { %7734 = vmatprep.subr.bf16.mxu0 %v15090_v6  ;;  %v15148_v5 = vld [vmem:[%s21433_s1 + $0xf50] ss:$136 sps:$4 sm:$0xff]   ;;  %v15153_v6 = vld [vmem:[%s21433_s1 + $0x105c] ss:$136 sps:$4 sm:$0xff]  }
 0x455   :  { %7653 = vmatpush1.bf16.msra.mxu1 %v15085_v0  ;;  %v15156_v0 = vld [vmem:[%s21433_s1 + $0x1064] ss:$136 sps:$4 sm:$0xff]  }
 0x456   :  { %7735 = vmatpush1.bf16.msra.mxu0 %v15088_v1  ;;  %7654 = vmatprep.subr.bf16.mxu1 %v15093_v2  ;;  %v15151_v1 = vld [vmem:[%s21433_s1 + $0x1058] ss:$136 sps:$4 sm:$0xff]  }
 0x457   :  { %7736 = vmatprep.subr.bf16.mxu0 %v15096_v4  ;;  %v15154_v2 = vld [vmem:[%s21433_s1 + $0x1060] ss:$136 sps:$4 sm:$0xff]   ;;  %v15159_v4 = vld [vmem:[%s21433_s1 + $0x116c] ss:$136 sps:$4 sm:$0xff]  }
 0x459   :  { %7655 = vmatpush1.bf16.msra.mxu1 %v15091_v7  ;;  %v15162_v7 = vld [vmem:[%s21433_s1 + $0x1174] ss:$136 sps:$4 sm:$0xff]  }
 0x45a   :  { %7737 = vmatpush1.bf16.msra.mxu0 %v15094_v9  ;;  %7656 = vmatprep.subr.bf16.mxu1 %v15099_v10  ;;  %v15157_v9 = vld [vmem:[%s21433_s1 + $0x1168] ss:$136 sps:$4 sm:$0xff]  }
 0x45b   :  { %7738 = vmatprep.subr.bf16.mxu0 %v15102_v12  ;;  %v15160_v10 = vld [vmem:[%s21433_s1 + $0x1170] ss:$136 sps:$4 sm:$0xff]   ;;  %v15165_v12 = vld [vmem:[%s21433_s1 + $0x127c] ss:$136 sps:$4 sm:$0xff]  }
 0x45d   :  { %7657 = vmatpush1.bf16.msra.mxu1 %v15097_v13  ;;  %v15168_v13 = vld [vmem:[%s21433_s1 + $0x1284] ss:$136 sps:$4 sm:$0xff]  }
 0x45e   :  { %7739 = vmatpush1.bf16.msra.mxu0 %v15100_v14  ;;  %7658 = vmatprep.subr.bf16.mxu1 %v15105_v15  ;;  %v15163_v14 = vld [vmem:[%s21433_s1 + $0x1278] ss:$136 sps:$4 sm:$0xff]  }
 0x45f   :  { %7740 = vmatprep.subr.bf16.mxu0 %v15108_v16  ;;  %v15166_v15 = vld [vmem:[%s21433_s1 + $0x1280] ss:$136 sps:$4 sm:$0xff]   ;;  %v15171_v16 = vld [vmem:[%s21433_s1 + $0x138c] ss:$136 sps:$4 sm:$0xff]  }
 0x461   :  { %7659 = vmatpush1.bf16.msra.mxu1 %v15103_v17  ;;  %v15174_v17 = vld [vmem:[%s21433_s1 + $0x1394] ss:$136 sps:$4 sm:$0xff]  }
 0x462   :  { %7741 = vmatpush1.bf16.msra.mxu0 %v15106_v18  ;;  %7660 = vmatprep.subr.bf16.mxu1 %v15111_v19  ;;  %v15169_v18 = vld [vmem:[%s21433_s1 + $0x1388] ss:$136 sps:$4 sm:$0xff]  }
 0x463   :  { %7742 = vmatprep.subr.bf16.mxu0 %v15114_v20  ;;  %v15172_v19 = vld [vmem:[%s21433_s1 + $0x1390] ss:$136 sps:$4 sm:$0xff]   ;;  %v15177_v20 = vld [vmem:[%s21433_s1 + $0x149c] ss:$136 sps:$4 sm:$0xff]  }
 0x465   :  { %7661 = vmatpush1.bf16.msra.mxu1 %v15109_v21  ;;  %v15180_v21 = vld [vmem:[%s21433_s1 + $0x14a4] ss:$136 sps:$4 sm:$0xff]  }
 0x466   :  { %7743 = vmatpush1.bf16.msra.mxu0 %v15112_v22  ;;  %7662 = vmatprep.subr.bf16.mxu1 %v15117_v23  ;;  %v15175_v22 = vld [vmem:[%s21433_s1 + $0x1498] ss:$136 sps:$4 sm:$0xff]  }
 0x467   :  { %7744 = vmatprep.subr.bf16.mxu0 %v15120_v24  ;;  %v15178_v23 = vld [vmem:[%s21433_s1 + $0x14a0] ss:$136 sps:$4 sm:$0xff]   ;;  %v15183_v24 = vld [vmem:[%s21433_s1 + $0x15ac] ss:$136 sps:$4 sm:$0xff]  }
 0x469   :  { %7663 = vmatpush1.bf16.msra.mxu1 %v15115_v25  ;;  %v15186_v25 = vld [vmem:[%s21433_s1 + $0x15b4] ss:$136 sps:$4 sm:$0xff]  }
 0x46a   :  { %7745 = vmatpush1.bf16.msra.mxu0 %v15118_v26  ;;  %7664 = vmatprep.subr.bf16.mxu1 %v15123_v36  ;;  %v15181_v26 = vld [vmem:[%s21433_s1 + $0x15a8] ss:$136 sps:$4 sm:$0xff]  }
 0x46b   :  { %7746 = vmatprep.subr.bf16.mxu0 %v15126_v39  ;;  %v15184_v36 = vld [vmem:[%s21433_s1 + $0x15b0] ss:$136 sps:$4 sm:$0xff]   ;;  %v15189_v39 = vld [vmem:[%s21433_s1 + $0x16bc] ss:$136 sps:$4 sm:$0xff]  }
 0x46d   :  { %7665 = vmatpush1.bf16.msra.mxu1 %v15121_v40  ;;  %v15192_v40 = vld [vmem:[%s21433_s1 + $0x16c4] ss:$136 sps:$4 sm:$0xff]  }
 0x46e   :  { %7747 = vmatpush1.bf16.msra.mxu0 %v15124_v42  ;;  %7666 = vmatprep.subr.bf16.mxu1 %v15129_v46  ;;  %v15187_v42 = vld [vmem:[%s21433_s1 + $0x16b8] ss:$136 sps:$4 sm:$0xff]  }
 0x46f   :  { %7748 = vmatprep.subr.bf16.mxu0 %v15132_v47  ;;  %v15190_v46 = vld [vmem:[%s21433_s1 + $0x16c0] ss:$136 sps:$4 sm:$0xff]   ;;  %v15195_v47 = vld [vmem:[%s21433_s1 + $0x17cc] ss:$136 sps:$4 sm:$0xff]  }
 0x471   :  { %7667 = vmatpush1.bf16.msra.mxu1 %v15127_v48 }
 0x472   :  { %7749 = vmatpush1.bf16.msra.mxu0 %v15130_v49  ;;  %7668 = vmatprep.subr.bf16.mxu1 %v15135_v50  ;;  %v15198_v49 = vld [vmem:[%s21433_s1 + $0x17d4] ss:$136 sps:$4 sm:$0xff]   ;;  %v7973_v50 = vmul.f32 %v17186_v11, %v17186_v11  ;;  %v7976_v11 = vmul.f32 %v17582_v29, %v17582_v29 }
 0x473   :  { %7750 = vmatprep.subr.bf16.mxu0 %v15138_v51 }
 0x475   :  { %7669 = vmatpush1.bf16.msra.mxu1 %v15133_v52 }
 0x476   :  { %7751 = vmatpush1.bf16.msra.mxu0 %v15136_v53  ;;  %7670 = vmatprep.subr.bf16.mxu1 %v15141_v54  ;;  %v7974_v54 = vmul.f32 %v17577_v27, %v17577_v27 }
 0x477   :  { %7752 = vmatprep.subr.bf16.mxu0 %v15144_v55  ;;  %v7975_v55 = vmul.f32 %v17584_v30, %v17584_v30  ;;  %v15196_v30 = vld [vmem:[%s21433_s1 + $0x17d0] ss:$136 sps:$4 sm:$0xff]  }
 0x479   :  { %7671 = vmatpush1.bf16.msra.mxu1 %v15139_v56 }
 0x47a   :  { %7753 = vmatpush1.bf16.msra.mxu0 %v15142_v57  ;;  %7672 = vmatprep.subr.bf16.mxu1 %v15147_v58 }
 0x47b   :  { %7754 = vmatprep.subr.bf16.mxu0 %v15150_v60 }
 0x47d   :  { %7673 = vmatpush1.bf16.msra.mxu1 %v15145_v3  ;;  %v15193_v3 = vld [vmem:[%s21433_s1 + $0x17c8] ss:$136 sps:$4 sm:$0xff]  }
 0x47e   :  { %7755 = vmatpush1.bf16.msra.mxu0 %v15148_v5  ;;  %7674 = vmatprep.subr.bf16.mxu1 %v15153_v6 }
 0x47f   :  { %7756 = vmatprep.subr.bf16.mxu0 %v15156_v0 }
 0x481   :  { %7675 = vmatpush1.bf16.msra.mxu1 %v15151_v1  ;;  %v15201_v1 = vld [vmem:[%s21433_s1 + $0x18dc] ss:$136 sps:$4 sm:$0xff]  }
 0x482   :  { %7757 = vmatpush1.bf16.msra.mxu0 %v15154_v2  ;;  %7685 = vmatprep.subr.bf16.mxu1 %v15159_v4 }
 0x483   :  { %7767 = vmatprep.subr.bf16.mxu0 %v15162_v7  ;;  %v15204_v7 = vld [vmem:[%s21433_s1 + $0x18e4] ss:$136 sps:$4 sm:$0xff]  }
 0x484   :  { %7677 = vmatmul.mubr.bf16.vlgmr.msra.gmra.mrb[28].mxu1 %v16516_v32 }
 0x485   :  { %7759 = vmatmul.mubr.bf16.vlgmr.msra.gmra.mrb[28].mxu0 %v16516_v32  ;;  %7686 = vmatpush1.bf16.msra.mxu1 %v15157_v9 }
 0x486   :  { %7717 = vmatprep.mubr.bf16.mxu1 %v16522_v35  ;;  %7768 = vmatpush1.bf16.msra.mxu0 %v15160_v10  ;;  %v15199_v10 = vld [vmem:[%s21433_s1 + $0x18d8] ss:$136 sps:$4 sm:$0xff]  }
 0x487   :  { %7799 = vmatprep.mubr.bf16.mxu0 %v16522_v35  ;;  %7687 = vmatprep.subr.bf16.mxu1 %v15165_v12  ;;  %v15202_v12 = vld [vmem:[%s21433_s1 + $0x18e0] ss:$136 sps:$4 sm:$0xff]  }
 0x488   :  { %7769 = vmatprep.subr.bf16.mxu0 %v15168_v13  ;;  %v15207_v13 = vld [vmem:[%s21433_s1 + $0x19ec] ss:$136 sps:$4 sm:$0xff]  }
 0x489   :  { %7688 = vmatpush1.bf16.msra.mxu1 %v15163_v14  ;;  %v15210_v14 = vld [vmem:[%s21433_s1 + $0x19f4] ss:$136 sps:$4 sm:$0xff]  }
 0x48a   :  { %7770 = vmatpush1.bf16.msra.mxu0 %v15166_v15  ;;  %7689 = vmatprep.subr.bf16.mxu1 %v15171_v16  ;;  %v15205_v15 = vld [vmem:[%s21433_s1 + $0x19e8] ss:$136 sps:$4 sm:$0xff]  }
 0x48b   :  { %7771 = vmatprep.subr.bf16.mxu0 %v15174_v17  ;;  %v15208_v16 = vld [vmem:[%s21433_s1 + $0x19f0] ss:$136 sps:$4 sm:$0xff]   ;;  %v15213_v17 = vld [vmem:[%s21433_s1 + $0x1afc] ss:$136 sps:$4 sm:$0xff]  }
 0x48d   :  { %7690 = vmatpush1.bf16.msra.mxu1 %v15169_v18  ;;  %v15216_v18 = vld [vmem:[%s21433_s1 + $0x1b04] ss:$136 sps:$4 sm:$0xff]  }
 0x48e   :  { %7772 = vmatpush1.bf16.msra.mxu0 %v15172_v19  ;;  %7691 = vmatprep.subr.bf16.mxu1 %v15177_v20  ;;  %v15211_v19 = vld [vmem:[%s21433_s1 + $0x1af8] ss:$136 sps:$4 sm:$0xff]  }
 0x48f   :  { %7773 = vmatprep.subr.bf16.mxu0 %v15180_v21  ;;  %v15214_v20 = vld [vmem:[%s21433_s1 + $0x1b00] ss:$136 sps:$4 sm:$0xff]   ;;  %v15219_v21 = vld [vmem:[%s21433_s1 + $0x1c0c] ss:$136 sps:$4 sm:$0xff]  }
 0x491   :  { %7692 = vmatpush1.bf16.msra.mxu1 %v15175_v22  ;;  %v15222_v22 = vld [vmem:[%s21433_s1 + $0x1c14] ss:$136 sps:$4 sm:$0xff]  }
 0x492   :  { %7774 = vmatpush1.bf16.msra.mxu0 %v15178_v23  ;;  %7693 = vmatprep.subr.bf16.mxu1 %v15183_v24  ;;  %v15217_v23 = vld [vmem:[%s21433_s1 + $0x1c08] ss:$136 sps:$4 sm:$0xff]  }
 0x493   :  { %7775 = vmatprep.subr.bf16.mxu0 %v15186_v25  ;;  %v15220_v24 = vld [vmem:[%s21433_s1 + $0x1c10] ss:$136 sps:$4 sm:$0xff]   ;;  %v15225_v25 = vld [vmem:[%s21433_s1 + $0x1d1c] ss:$136 sps:$4 sm:$0xff]  }
 0x495   :  { %7694 = vmatpush1.bf16.msra.mxu1 %v15181_v26  ;;  %v15228_v26 = vld [vmem:[%s21433_s1 + $0x1d24] ss:$136 sps:$4 sm:$0xff]  }
 0x496   :  { %7776 = vmatpush1.bf16.msra.mxu0 %v15184_v36  ;;  %7695 = vmatprep.subr.bf16.mxu1 %v15189_v39  ;;  %v15223_v36 = vld [vmem:[%s21433_s1 + $0x1d18] ss:$136 sps:$4 sm:$0xff]  }
 0x497   :  { %v7391_v48 = vpop.f32.mrb[20].mxu1  ;;  %7777 = vmatprep.subr.bf16.mxu0 %v15192_v40  ;;  %v15226_v39 = vld [vmem:[%s21433_s1 + $0x1d20] ss:$136 sps:$4 sm:$0xff]   ;;  %v15231_v40 = vld [vmem:[%s21433_s1 + $0x1e2c] ss:$136 sps:$4 sm:$0xff]  }
 0x498   :  { %v7990_v51 = vmul.f32 %v7391_v48, %v7391_v48  ;;  %v7473_v52 = vpop.f32.mrb[20].mxu0  ;;  %v7393_v53 = vpop.f32.mrb[21].mxu1  ;;  %v15237_v48 = vld [vmem:[%s21433_s1 + $0x1f3c] ss:$136 sps:$4 sm:$0xff]  }
 0x499   :  { %v7992_v56 = vmul.f32 %v7473_v52, %v7473_v52  ;;  %v7991_v57 = vmul.f32 %v7393_v53, %v7393_v53  ;;  %v7475_v58 = vpop.f32.mrb[21].mxu0  ;;  %v7395_v60 = vpop.f32.mrb[22].mxu1  ;;  %7696 = vmatpush1.bf16.msra.mxu1 %v15187_v42  ;;  %v15234_v42 = vld [vmem:[%s21433_s1 + $0x1e34] ss:$136 sps:$4 sm:$0xff]  }
 0x49a   :  { %v19193_v5 = vadd.f32 %v7990_v51, %v7973_v50  ;;  %v7993_v6 = vmul.f32 %v7475_v58, %v7475_v58  ;;  %v7477_v0 = vpop.f32.mrb[22].mxu0  ;;  %7778 = vmatpush1.bf16.msra.mxu0 %v15190_v46  ;;  %v7396_v27 = vpop.f32.mrb[23].mxu1  ;;  %7697 = vmatprep.subr.bf16.mxu1 %v15195_v47  ;;  %v15229_v46 = vld [vmem:[%s21433_s1 + $0x1e28] ss:$136 sps:$4 sm:$0xff]   ;;  %v15235_v50 = vld [vmem:[%s21433_s1 + $0x1f38] ss:$136 sps:$4 sm:$0xff]  }
 0x49b   :  { %v19201_v2 = vadd.f32 %v7992_v56, %v7975_v55  ;;  %v19203_v4 = vadd.f32 %v7991_v57, %v7974_v54  ;;  %v7478_v29 = vpop.f32.mrb[23].mxu0  ;;  %7779 = vmatprep.subr.bf16.mxu0 %v15198_v49  ;;  %v15232_v47 = vld [vmem:[%s21433_s1 + $0x1e30] ss:$136 sps:$4 sm:$0xff]   ;;  %v15240_v49 = vld [vmem:[%s21433_s1 + $0x1f44] ss:$136 sps:$4 sm:$0xff]  }
 0x49c   :  { %v19208_v9 = vadd.f32 %v7993_v6, %v7976_v11  ;;  %v15238_v51 = vld [vmem:[%s21433_s1 + $0x1f40] ss:$136 sps:$4 sm:$0xff]   ;;  %v15243_v52 = vld [vmem:[%s21433_s1 + $0x204c] ss:$136 sps:$4 sm:$0xff]   ;;  %v15244_v55 = vld [vmem:[%s21433_s1 + $0x2050] ss:$136 sps:$4 sm:$0xff]  }
 0x49d   :  { %7698 = vmatpush1.bf16.msra.mxu1 %v15193_v3  ;;  %v15246_v53 = vld [vmem:[%s21433_s1 + $0x2054] ss:$136 sps:$4 sm:$0xff]   ;;  %v15241_v54 = vld [vmem:[%s21433_s1 + $0x2048] ss:$136 sps:$4 sm:$0xff]   ;;  %v15252_v57 = vld [vmem:[%s21433_s1 + $0x2164] ss:$136 sps:$4 sm:$0xff]  }
 0x49e   :  { %7780 = vmatpush1.bf16.msra.mxu0 %v15196_v30  ;;  %7699 = vmatprep.subr.bf16.mxu1 %v15201_v1  ;;  %v15249_v56 = vld [vmem:[%s21433_s1 + $0x215c] ss:$136 sps:$4 sm:$0xff]   ;;  %v15247_v58 = vld [vmem:[%s21433_s1 + $0x2158] ss:$136 sps:$4 sm:$0xff]   ;;  %v15261_v27 = vld [vmem:[%s21433_s1 + $0x18c] ss:$136 sps:$4 sm:$0xff]  }
 0x49f   :  { %7781 = vmatprep.subr.bf16.mxu0 %v15204_v7  ;;  %v15250_v60 = vld [vmem:[%s21433_s1 + $0x2160] ss:$136 sps:$4 sm:$0xff]   ;;  %v15255_v3 = vld [vmem:[%s21433_s1 + $0x7c] ss:$136 sps:$4 sm:$0xff]   ;;  %v15262_v29 = vld [vmem:[%s21433_s1 + $0x190] ss:$136 sps:$4 sm:$0xff]  }
 0x4a0   :  { %v15258_v11 = vld [vmem:[%s21433_s1 + $0x84] ss:$136 sps:$4 sm:$0xff]   ;;  %v15253_v6 = vld [vmem:[%s21433_s1 + $0x78] ss:$136 sps:$4 sm:$0xff]   ;;  %v15264_v30 = vld [vmem:[%s21433_s1 + $0x194] ss:$136 sps:$4 sm:$0xff]  }
 0x4a1   :  { %7700 = vmatpush1.bf16.msra.mxu1 %v15199_v10  ;;  %v15256_v0 = vld [vmem:[%s21433_s1 + $0x80] ss:$136 sps:$4 sm:$0xff]   ;;  %v15267_v7 = vld [vmem:[%s21433_s1 + $0x29c] ss:$136 sps:$4 sm:$0xff]  }
 0x4a2   :  { %7782 = vmatpush1.bf16.msra.mxu0 %v15202_v12  ;;  %7701 = vmatprep.subr.bf16.mxu1 %v15207_v13  ;;  %v15259_v1 = vld [vmem:[%s21433_s1 + $0x188] ss:$136 sps:$4 sm:$0xff]   ;;  %v15270_v10 = vld [vmem:[%s21433_s1 + $0x2a4] ss:$136 sps:$4 sm:$0xff]   ;;  %v15265_v12 = vld [vmem:[%s21433_s1 + $0x298] ss:$136 sps:$4 sm:$0xff]  }
 0x4a3   :  { %7783 = vmatprep.subr.bf16.mxu0 %v15210_v14  ;;  %v15268_v13 = vld [vmem:[%s21433_s1 + $0x2a0] ss:$136 sps:$4 sm:$0xff]  }
 0x4a4   :  { %v15271_v14 = vld [vmem:[%s21433_s1 + $0x3a8] ss:$136 sps:$4 sm:$0xff]  }
 0x4a5   :  { %7702 = vmatpush1.bf16.msra.mxu1 %v15205_v15  ;;  %v15276_v15 = vld [vmem:[%s21433_s1 + $0x3b4] ss:$136 sps:$4 sm:$0xff]  }
 0x4a6   :  { %7784 = vmatpush1.bf16.msra.mxu0 %v15208_v16  ;;  %7703 = vmatprep.subr.bf16.mxu1 %v15213_v17  ;;  %v15274_v16 = vld [vmem:[%s21433_s1 + $0x3b0] ss:$136 sps:$4 sm:$0xff]   ;;  %v15279_v17 = vld [vmem:[%s21433_s1 + $0x4bc] ss:$136 sps:$4 sm:$0xff]  }
 0x4a7   :  { %7785 = vmatprep.subr.bf16.mxu0 %v15216_v18  ;;  %v15277_v18 = vld [vmem:[%s21433_s1 + $0x4b8] ss:$136 sps:$4 sm:$0xff]  }
 0x4a9   :  { %7704 = vmatpush1.bf16.msra.mxu1 %v15211_v19  ;;  %v15282_v19 = vld [vmem:[%s21433_s1 + $0x4c4] ss:$136 sps:$4 sm:$0xff]  }
 0x4aa   :  { %7786 = vmatpush1.bf16.msra.mxu0 %v15214_v20  ;;  %7705 = vmatprep.subr.bf16.mxu1 %v15219_v21  ;;  %v15280_v20 = vld [vmem:[%s21433_s1 + $0x4c0] ss:$136 sps:$4 sm:$0xff]   ;;  %v15285_v21 = vld [vmem:[%s21433_s1 + $0x5cc] ss:$136 sps:$4 sm:$0xff]  }
 0x4ab   :  { %7787 = vmatprep.subr.bf16.mxu0 %v15222_v22  ;;  %v15283_v22 = vld [vmem:[%s21433_s1 + $0x5c8] ss:$136 sps:$4 sm:$0xff]  }
 0x4ad   :  { %7706 = vmatpush1.bf16.msra.mxu1 %v15217_v23  ;;  %v15288_v23 = vld [vmem:[%s21433_s1 + $0x5d4] ss:$136 sps:$4 sm:$0xff]  }
 0x4ae   :  { %7788 = vmatpush1.bf16.msra.mxu0 %v15220_v24  ;;  %7707 = vmatprep.subr.bf16.mxu1 %v15225_v25  ;;  %v15286_v24 = vld [vmem:[%s21433_s1 + $0x5d0] ss:$136 sps:$4 sm:$0xff]   ;;  %v15291_v25 = vld [vmem:[%s21433_s1 + $0x6dc] ss:$136 sps:$4 sm:$0xff]  }
 0x4af   :  { %7789 = vmatprep.subr.bf16.mxu0 %v15228_v26  ;;  %v15289_v26 = vld [vmem:[%s21433_s1 + $0x6d8] ss:$136 sps:$4 sm:$0xff]  }
 0x4b1   :  { %7708 = vmatpush1.bf16.msra.mxu1 %v15223_v36  ;;  %v15294_v36 = vld [vmem:[%s21433_s1 + $0x6e4] ss:$136 sps:$4 sm:$0xff]  }
 0x4b2   :  { %7790 = vmatpush1.bf16.msra.mxu0 %v15226_v39  ;;  %7709 = vmatprep.subr.bf16.mxu1 %v15231_v40  ;;  %v15292_v39 = vld [vmem:[%s21433_s1 + $0x6e0] ss:$136 sps:$4 sm:$0xff]   ;;  %v15297_v40 = vld [vmem:[%s21433_s1 + $0x7ec] ss:$136 sps:$4 sm:$0xff]  }
 0x4b3   :  { %7791 = vmatprep.subr.bf16.mxu0 %v15234_v42  ;;  %v15295_v42 = vld [vmem:[%s21433_s1 + $0x7e8] ss:$136 sps:$4 sm:$0xff]  }
 0x4b5   :  { %7710 = vmatpush1.bf16.msra.mxu1 %v15229_v46  ;;  %v15300_v46 = vld [vmem:[%s21433_s1 + $0x7f4] ss:$136 sps:$4 sm:$0xff]  }
 0x4b6   :  { %7792 = vmatpush1.bf16.msra.mxu0 %v15232_v47  ;;  %7711 = vmatprep.subr.bf16.mxu1 %v15237_v48  ;;  %v15298_v47 = vld [vmem:[%s21433_s1 + $0x7f0] ss:$136 sps:$4 sm:$0xff]   ;;  %v15303_v48 = vld [vmem:[%s21433_s1 + $0x8fc] ss:$136 sps:$4 sm:$0xff]  }
 0x4b7   :  { %7793 = vmatprep.subr.bf16.mxu0 %v15240_v49  ;;  %v15301_v49 = vld [vmem:[%s21433_s1 + $0x8f8] ss:$136 sps:$4 sm:$0xff]  }
 0x4b9   :  { %7712 = vmatpush1.bf16.msra.mxu1 %v15235_v50  ;;  %v15306_v50 = vld [vmem:[%s21433_s1 + $0x904] ss:$136 sps:$4 sm:$0xff]  }
 0x4ba   :  { %7794 = vmatpush1.bf16.msra.mxu0 %v15238_v51  ;;  %7713 = vmatprep.subr.bf16.mxu1 %v15243_v52  ;;  %v15304_v51 = vld [vmem:[%s21433_s1 + $0x900] ss:$136 sps:$4 sm:$0xff]   ;;  %v15309_v52 = vld [vmem:[%s21433_s1 + $0xa0c] ss:$136 sps:$4 sm:$0xff]  }
 0x4bb   :  { %7795 = vmatprep.subr.bf16.mxu0 %v15246_v53  ;;  %v15307_v53 = vld [vmem:[%s21433_s1 + $0xa08] ss:$136 sps:$4 sm:$0xff]  }
 0x4bd   :  { %7714 = vmatpush1.bf16.msra.mxu1 %v15241_v54  ;;  %v15312_v54 = vld [vmem:[%s21433_s1 + $0xa14] ss:$136 sps:$4 sm:$0xff]  }
 0x4be   :  { %7796 = vmatpush1.bf16.msra.mxu0 %v15244_v55  ;;  %7715 = vmatprep.subr.bf16.mxu1 %v15249_v56  ;;  %v15310_v55 = vld [vmem:[%s21433_s1 + $0xa10] ss:$136 sps:$4 sm:$0xff]   ;;  %v15315_v56 = vld [vmem:[%s21433_s1 + $0xb1c] ss:$136 sps:$4 sm:$0xff]  }
 0x4bf   :  { %7797 = vmatprep.subr.bf16.mxu0 %v15252_v57  ;;  %v15313_v57 = vld [vmem:[%s21433_s1 + $0xb18] ss:$136 sps:$4 sm:$0xff]  }
 0x4c1   :  { %7716 = vmatpush1.bf16.msra.mxu1 %v15247_v58  ;;  %v15318_v58 = vld [vmem:[%s21433_s1 + $0xb24] ss:$136 sps:$4 sm:$0xff]  }
 0x4c2   :  { %7798 = vmatpush1.bf16.msra.mxu0 %v15250_v60  ;;  %7808 = vmatprep.subr.bf16.mxu1 %v15255_v3  ;;  %v15316_v60 = vld [vmem:[%s21433_s1 + $0xb20] ss:$136 sps:$4 sm:$0xff]   ;;  %v15321_v3 = vld [vmem:[%s21433_s1 + $0xc2c] ss:$136 sps:$4 sm:$0xff]  }
 0x4c3   :  { %7890 = vmatprep.subr.bf16.mxu0 %v15258_v11  ;;  %v15319_v11 = vld [vmem:[%s21433_s1 + $0xc28] ss:$136 sps:$4 sm:$0xff]  }
 0x4c4   :  { %7718 = vmatmul.mubr.bf16.vlgmr.msra.gmra.mrb[28].mxu1 %v16520_v34 }
 0x4c5   :  { %7800 = vmatmul.mubr.bf16.vlgmr.msra.gmra.mrb[28].mxu0 %v16520_v34  ;;  %7809 = vmatpush1.bf16.msra.mxu1 %v15253_v6  ;;  %v15324_v6 = vld [vmem:[%s21433_s1 + $0xc34] ss:$136 sps:$4 sm:$0xff]  }
 0x4c6   :  { %7840 = vmatprep.mubr.bf16.mxu1 %v16518_v33  ;;  %7891 = vmatpush1.bf16.msra.mxu0 %v15256_v0  ;;  %v15322_v0 = vld [vmem:[%s21433_s1 + $0xc30] ss:$136 sps:$4 sm:$0xff]  }
 0x4c7   :  { %7922 = vmatprep.mubr.bf16.mxu0 %v16518_v33  ;;  %7810 = vmatprep.subr.bf16.mxu1 %v15261_v27  ;;  %v15273_v33 = vld [vmem:[%s21433_s1 + $0x3ac] ss:$136 sps:$4 sm:$0xff]   ;;  %v15327_v27 = vld [vmem:[%s21433_s1 + $0xd3c] ss:$136 sps:$4 sm:$0xff]  }
 0x4c8   :  { %7892 = vmatprep.subr.bf16.mxu0 %v15264_v30  ;;  %v15325_v30 = vld [vmem:[%s21433_s1 + $0xd38] ss:$136 sps:$4 sm:$0xff]  }
 0x4c9   :  { %7811 = vmatpush1.bf16.msra.mxu1 %v15259_v1  ;;  %v15330_v1 = vld [vmem:[%s21433_s1 + $0xd44] ss:$136 sps:$4 sm:$0xff]  }
 0x4ca   :  { %7893 = vmatpush1.bf16.msra.mxu0 %v15262_v29  ;;  %7812 = vmatprep.subr.bf16.mxu1 %v15267_v7  ;;  %v15328_v29 = vld [vmem:[%s21433_s1 + $0xd40] ss:$136 sps:$4 sm:$0xff]   ;;  %v15333_v7 = vld [vmem:[%s21433_s1 + $0xe4c] ss:$136 sps:$4 sm:$0xff]  }
 0x4cb   :  { %7894 = vmatprep.subr.bf16.mxu0 %v15270_v10  ;;  %v15331_v10 = vld [vmem:[%s21433_s1 + $0xe48] ss:$136 sps:$4 sm:$0xff]  }
 0x4cd   :  { %7813 = vmatpush1.bf16.msra.mxu1 %v15265_v12  ;;  %v15336_v12 = vld [vmem:[%s21433_s1 + $0xe54] ss:$136 sps:$4 sm:$0xff]  }
 0x4ce   :  { %7895 = vmatpush1.bf16.msra.mxu0 %v15268_v13  ;;  %7814 = vmatprep.subr.bf16.mxu1 %v15273_v33  ;;  %v15334_v13 = vld [vmem:[%s21433_s1 + $0xe50] ss:$136 sps:$4 sm:$0xff]   ;;  %v15339_v33 = vld [vmem:[%s21433_s1 + $0xf5c] ss:$136 sps:$4 sm:$0xff]  }
 0x4cf   :  { %7896 = vmatprep.subr.bf16.mxu0 %v15276_v15  ;;  %v15342_v15 = vld [vmem:[%s21433_s1 + $0xf64] ss:$136 sps:$4 sm:$0xff]  }
 0x4d1   :  { %7815 = vmatpush1.bf16.msra.mxu1 %v15271_v14  ;;  %v15337_v14 = vld [vmem:[%s21433_s1 + $0xf58] ss:$136 sps:$4 sm:$0xff]  }
 0x4d2   :  { %7897 = vmatpush1.bf16.msra.mxu0 %v15274_v16  ;;  %7816 = vmatprep.subr.bf16.mxu1 %v15279_v17  ;;  %v15340_v16 = vld [vmem:[%s21433_s1 + $0xf60] ss:$136 sps:$4 sm:$0xff]   ;;  %v15345_v17 = vld [vmem:[%s21433_s1 + $0x106c] ss:$136 sps:$4 sm:$0xff]  }
 0x4d3   :  { %7898 = vmatprep.subr.bf16.mxu0 %v15282_v19  ;;  %v15348_v19 = vld [vmem:[%s21433_s1 + $0x1074] ss:$136 sps:$4 sm:$0xff]  }
 0x4d5   :  { %7817 = vmatpush1.bf16.msra.mxu1 %v15277_v18  ;;  %v15343_v18 = vld [vmem:[%s21433_s1 + $0x1068] ss:$136 sps:$4 sm:$0xff]  }
 0x4d6   :  { %7899 = vmatpush1.bf16.msra.mxu0 %v15280_v20  ;;  %7818 = vmatprep.subr.bf16.mxu1 %v15285_v21  ;;  %v15346_v20 = vld [vmem:[%s21433_s1 + $0x1070] ss:$136 sps:$4 sm:$0xff]   ;;  %v15351_v21 = vld [vmem:[%s21433_s1 + $0x117c] ss:$136 sps:$4 sm:$0xff]  }
 0x4d7   :  { %7900 = vmatprep.subr.bf16.mxu0 %v15288_v23  ;;  %v15354_v23 = vld [vmem:[%s21433_s1 + $0x1184] ss:$136 sps:$4 sm:$0xff]  }
 0x4d9   :  { %7819 = vmatpush1.bf16.msra.mxu1 %v15283_v22  ;;  %v15349_v22 = vld [vmem:[%s21433_s1 + $0x1178] ss:$136 sps:$4 sm:$0xff]  }
 0x4da   :  { %7901 = vmatpush1.bf16.msra.mxu0 %v15286_v24  ;;  %7820 = vmatprep.subr.bf16.mxu1 %v15291_v25  ;;  %v15352_v24 = vld [vmem:[%s21433_s1 + $0x1180] ss:$136 sps:$4 sm:$0xff]   ;;  %v15357_v25 = vld [vmem:[%s21433_s1 + $0x128c] ss:$136 sps:$4 sm:$0xff]  }
 0x4db   :  { %7902 = vmatprep.subr.bf16.mxu0 %v15294_v36  ;;  %v15358_v36 = vld [vmem:[%s21433_s1 + $0x1290] ss:$136 sps:$4 sm:$0xff]  }
 0x4dd   :  { %7821 = vmatpush1.bf16.msra.mxu1 %v15289_v26  ;;  %v15355_v26 = vld [vmem:[%s21433_s1 + $0x1288] ss:$136 sps:$4 sm:$0xff]  }
 0x4de   :  { %7903 = vmatpush1.bf16.msra.mxu0 %v15292_v39  ;;  %7822 = vmatprep.subr.bf16.mxu1 %v15297_v40  ;;  %v15360_v39 = vld [vmem:[%s21433_s1 + $0x1294] ss:$136 sps:$4 sm:$0xff]  }
 0x4df   :  { %7904 = vmatprep.subr.bf16.mxu0 %v15300_v46  ;;  %v15363_v40 = vld [vmem:[%s21433_s1 + $0x139c] ss:$136 sps:$4 sm:$0xff]   ;;  %v15364_v46 = vld [vmem:[%s21433_s1 + $0x13a0] ss:$136 sps:$4 sm:$0xff]  }
 0x4e1   :  { %7823 = vmatpush1.bf16.msra.mxu1 %v15295_v42  ;;  %v15366_v42 = vld [vmem:[%s21433_s1 + $0x13a4] ss:$136 sps:$4 sm:$0xff]  }
 0x4e2   :  { %7905 = vmatpush1.bf16.msra.mxu0 %v15298_v47  ;;  %7824 = vmatprep.subr.bf16.mxu1 %v15303_v48  ;;  %v15367_v47 = vld [vmem:[%s21433_s1 + $0x14a8] ss:$136 sps:$4 sm:$0xff]   ;;  %v15372_v48 = vld [vmem:[%s21433_s1 + $0x14b4] ss:$136 sps:$4 sm:$0xff]  }
 0x4e3   :  { %7906 = vmatprep.subr.bf16.mxu0 %v15306_v50  ;;  %v15375_v50 = vld [vmem:[%s21433_s1 + $0x15bc] ss:$136 sps:$4 sm:$0xff]  }
 0x4e5   :  { %7825 = vmatpush1.bf16.msra.mxu1 %v15301_v49  ;;  %v15370_v49 = vld [vmem:[%s21433_s1 + $0x14b0] ss:$136 sps:$4 sm:$0xff]  }
 0x4e6   :  { %7907 = vmatpush1.bf16.msra.mxu0 %v15304_v51  ;;  %7826 = vmatprep.subr.bf16.mxu1 %v15309_v52  ;;  %v15373_v51 = vld [vmem:[%s21433_s1 + $0x15b8] ss:$136 sps:$4 sm:$0xff]   ;;  %v15378_v52 = vld [vmem:[%s21433_s1 + $0x15c4] ss:$136 sps:$4 sm:$0xff]  }
 0x4e7   :  { %7908 = vmatprep.subr.bf16.mxu0 %v15312_v54  ;;  %v15381_v54 = vld [vmem:[%s21433_s1 + $0x16cc] ss:$136 sps:$4 sm:$0xff]  }
 0x4e9   :  { %7827 = vmatpush1.bf16.msra.mxu1 %v15307_v53  ;;  %v15376_v53 = vld [vmem:[%s21433_s1 + $0x15c0] ss:$136 sps:$4 sm:$0xff]  }
 0x4ea   :  { %7909 = vmatpush1.bf16.msra.mxu0 %v15310_v55  ;;  %7828 = vmatprep.subr.bf16.mxu1 %v15315_v56  ;;  %v15384_v55 = vld [vmem:[%s21433_s1 + $0x16d4] ss:$136 sps:$4 sm:$0xff]   ;;  %v15379_v56 = vld [vmem:[%s21433_s1 + $0x16c8] ss:$136 sps:$4 sm:$0xff]  }
 0x4eb   :  { %7910 = vmatprep.subr.bf16.mxu0 %v15318_v58  ;;  %v15387_v58 = vld [vmem:[%s21433_s1 + $0x17dc] ss:$136 sps:$4 sm:$0xff]  }
 0x4ed   :  { %7829 = vmatpush1.bf16.msra.mxu1 %v15313_v57  ;;  %v15382_v57 = vld [vmem:[%s21433_s1 + $0x16d0] ss:$136 sps:$4 sm:$0xff]  }
 0x4ee   :  { %7911 = vmatpush1.bf16.msra.mxu0 %v15316_v60  ;;  %7830 = vmatprep.subr.bf16.mxu1 %v15321_v3  ;;  %v15390_v60 = vld [vmem:[%s21433_s1 + $0x17e4] ss:$136 sps:$4 sm:$0xff]  }
 0x4ef   :  { %7912 = vmatprep.subr.bf16.mxu0 %v15324_v6 }
 0x4f1   :  { %7831 = vmatpush1.bf16.msra.mxu1 %v15319_v11  ;;  %v7977_v11 = vmul.f32 %v17586_v31, %v17586_v31 }
 0x4f2   :  { %7913 = vmatpush1.bf16.msra.mxu0 %v15322_v0  ;;  %7832 = vmatprep.subr.bf16.mxu1 %v15327_v27 }
 0x4f3   :  { %7914 = vmatprep.subr.bf16.mxu0 %v15330_v1  ;;  %v15388_v1 = vld [vmem:[%s21433_s1 + $0x17e0] ss:$136 sps:$4 sm:$0xff]  }
 0x4f5   :  { %7833 = vmatpush1.bf16.msra.mxu1 %v15325_v30  ;;  %v15385_v30 = vld [vmem:[%s21433_s1 + $0x17d8] ss:$136 sps:$4 sm:$0xff]  }
 0x4f6   :  { %7915 = vmatpush1.bf16.msra.mxu0 %v15328_v29  ;;  %7834 = vmatprep.subr.bf16.mxu1 %v15333_v7  ;;  %v7978_v29 = vmul.f32 %v17977_v59, %v17977_v59  ;;  %v7979_v7 = vmul.f32 %v17984_v62, %v17984_v62 }
 0x4f7   :  { %7916 = vmatprep.subr.bf16.mxu0 %v15336_v12 }
 0x4f9   :  { %7835 = vmatpush1.bf16.msra.mxu1 %v15331_v10 }
 0x4fa   :  { %7917 = vmatpush1.bf16.msra.mxu0 %v15334_v13  ;;  %7836 = vmatprep.subr.bf16.mxu1 %v15339_v33  ;;  %v15393_v33 = vld [vmem:[%s21433_s1 + $0x18ec] ss:$136 sps:$4 sm:$0xff]  }
 0x4fb   :  { %7918 = vmatprep.subr.bf16.mxu0 %v15342_v15  ;;  %v7980_v15 = vmul.f32 %v17982_v61, %v17982_v61  ;;  %v15391_v61 = vld [vmem:[%s21433_s1 + $0x18e8] ss:$136 sps:$4 sm:$0xff]  }
 0x4fd   :  { %7837 = vmatpush1.bf16.msra.mxu1 %v15337_v14  ;;  %v15396_v14 = vld [vmem:[%s21433_s1 + $0x18f4] ss:$136 sps:$4 sm:$0xff]  }
 0x4fe   :  { %7919 = vmatpush1.bf16.msra.mxu0 %v15340_v16  ;;  %7838 = vmatprep.subr.bf16.mxu1 %v15345_v17 }
 0x4ff   :  { %7920 = vmatprep.subr.bf16.mxu0 %v15348_v19 }
 0x501   :  { %7839 = vmatpush1.bf16.msra.mxu1 %v15343_v18 }
 0x502   :  { %7921 = vmatpush1.bf16.msra.mxu0 %v15346_v20  ;;  %7849 = vmatprep.subr.bf16.mxu1 %v15351_v21 }
 0x503   :  { %7931 = vmatprep.subr.bf16.mxu0 %v15354_v23  ;;  %v15399_v23 = vld [vmem:[%s21433_s1 + $0x19fc] ss:$136 sps:$4 sm:$0xff]  }
 0x504   :  { %7841 = vmatmul.mubr.bf16.vlgmr.msra.gmra.mrb[32].mxu1 %v16516_v32 }
 0x505   :  { %7923 = vmatmul.mubr.bf16.vlgmr.msra.gmra.mrb[32].mxu0 %v16516_v32  ;;  %7850 = vmatpush1.bf16.msra.mxu1 %v15349_v22  ;;  %v15361_v32 = vld [vmem:[%s21433_s1 + $0x1398] ss:$136 sps:$4 sm:$0xff]  }
 0x506   :  { %7881 = vmatprep.mubr.bf16.mxu1 %v16522_v35  ;;  %7932 = vmatpush1.bf16.msra.mxu0 %v15352_v24  ;;  %v15394_v22 = vld [vmem:[%s21433_s1 + $0x18f0] ss:$136 sps:$4 sm:$0xff]  }
 0x507   :  { %7963 = vmatprep.mubr.bf16.mxu0 %v16522_v35  ;;  %7851 = vmatprep.subr.bf16.mxu1 %v15357_v25  ;;  %v15369_v35 = vld [vmem:[%s21433_s1 + $0x14ac] ss:$136 sps:$4 sm:$0xff]   ;;  %v15397_v24 = vld [vmem:[%s21433_s1 + $0x19f8] ss:$136 sps:$4 sm:$0xff]  }
 0x508   :  { %7933 = vmatprep.subr.bf16.mxu0 %v15360_v39  ;;  %v15402_v25 = vld [vmem:[%s21433_s1 + $0x1a04] ss:$136 sps:$4 sm:$0xff]   ;;  %v15403_v39 = vld [vmem:[%s21433_s1 + $0x1b08] ss:$136 sps:$4 sm:$0xff]  }
 0x509   :  { %7852 = vmatpush1.bf16.msra.mxu1 %v15355_v26  ;;  %v15400_v26 = vld [vmem:[%s21433_s1 + $0x1a00] ss:$136 sps:$4 sm:$0xff]  }
 0x50a   :  { %7934 = vmatpush1.bf16.msra.mxu0 %v15358_v36  ;;  %7853 = vmatprep.subr.bf16.mxu1 %v15363_v40  ;;  %v15405_v36 = vld [vmem:[%s21433_s1 + $0x1b0c] ss:$136 sps:$4 sm:$0xff]  }
 0x50b   :  { %7935 = vmatprep.subr.bf16.mxu0 %v15366_v42  ;;  %v15408_v40 = vld [vmem:[%s21433_s1 + $0x1b14] ss:$136 sps:$4 sm:$0xff]   ;;  %v15406_v42 = vld [vmem:[%s21433_s1 + $0x1b10] ss:$136 sps:$4 sm:$0xff]  }
 0x50d   :  { %7854 = vmatpush1.bf16.msra.mxu1 %v15361_v32  ;;  %v15411_v32 = vld [vmem:[%s21433_s1 + $0x1c1c] ss:$136 sps:$4 sm:$0xff]  }
 0x50e   :  { %7936 = vmatpush1.bf16.msra.mxu0 %v15364_v46  ;;  %7855 = vmatprep.subr.bf16.mxu1 %v15369_v35  ;;  %v15409_v46 = vld [vmem:[%s21433_s1 + $0x1c18] ss:$136 sps:$4 sm:$0xff]   ;;  %v15414_v35 = vld [vmem:[%s21433_s1 + $0x1c24] ss:$136 sps:$4 sm:$0xff]  }
 0x50f   :  { %7937 = vmatprep.subr.bf16.mxu0 %v15372_v48  ;;  %v15417_v48 = vld [vmem:[%s21433_s1 + $0x1d2c] ss:$136 sps:$4 sm:$0xff]  }
 0x511   :  { %7856 = vmatpush1.bf16.msra.mxu1 %v15367_v47  ;;  %v15412_v47 = vld [vmem:[%s21433_s1 + $0x1c20] ss:$136 sps:$4 sm:$0xff]  }
 0x512   :  { %7938 = vmatpush1.bf16.msra.mxu0 %v15370_v49  ;;  %7857 = vmatprep.subr.bf16.mxu1 %v15375_v50  ;;  %v15415_v49 = vld [vmem:[%s21433_s1 + $0x1d28] ss:$136 sps:$4 sm:$0xff]   ;;  %v15420_v50 = vld [vmem:[%s21433_s1 + $0x1d34] ss:$136 sps:$4 sm:$0xff]  }
 0x513   :  { %7939 = vmatprep.subr.bf16.mxu0 %v15378_v52  ;;  %v15423_v52 = vld [vmem:[%s21433_s1 + $0x1e3c] ss:$136 sps:$4 sm:$0xff]  }
 0x515   :  { %7858 = vmatpush1.bf16.msra.mxu1 %v15373_v51  ;;  %v15418_v51 = vld [vmem:[%s21433_s1 + $0x1d30] ss:$136 sps:$4 sm:$0xff]  }
 0x516   :  { %7940 = vmatpush1.bf16.msra.mxu0 %v15376_v53  ;;  %7859 = vmatprep.subr.bf16.mxu1 %v15381_v54  ;;  %v15421_v53 = vld [vmem:[%s21433_s1 + $0x1e38] ss:$136 sps:$4 sm:$0xff]   ;;  %v15426_v54 = vld [vmem:[%s21433_s1 + $0x1e44] ss:$136 sps:$4 sm:$0xff]  }
 0x517   :  { %v7555_v3 = vpop.f32.mrb[24].mxu1  ;;  %7941 = vmatprep.subr.bf16.mxu0 %v15384_v55  ;;  %v15424_v55 = vld [vmem:[%s21433_s1 + $0x1e40] ss:$136 sps:$4 sm:$0xff]  }
 0x518   :  { %v7994_v6 = vmul.f32 %v7555_v3, %v7555_v3  ;;  %v7637_v0 = vpop.f32.mrb[24].mxu0  ;;  %v7557_v27 = vpop.f32.mrb[25].mxu1  ;;  %v15435_v3 = vld [vmem:[%s21433_s1 + $0x205c] ss:$136 sps:$4 sm:$0xff]  }
 0x519   :  { %v7996_v10 = vmul.f32 %v7637_v0, %v7637_v0  ;;  %v7995_v12 = vmul.f32 %v7557_v27, %v7557_v27  ;;  %v7639_v31 = vpop.f32.mrb[25].mxu0  ;;  %v7559_v13 = vpop.f32.mrb[26].mxu1  ;;  %7860 = vmatpush1.bf16.msra.mxu1 %v15379_v56  ;;  %v15429_v56 = vld [vmem:[%s21433_s1 + $0x1f4c] ss:$136 sps:$4 sm:$0xff]   ;;  %v15436_v0 = vld [vmem:[%s21433_s1 + $0x2060] ss:$136 sps:$4 sm:$0xff]  }
 0x51a   :  { %v19610_v59 = vadd.f32 %v7994_v6, %v7977_v11  ;;  %v7997_v16 = vmul.f32 %v7639_v31, %v7639_v31  ;;  %v7641_v62 = vpop.f32.mrb[26].mxu0  ;;  %7942 = vmatpush1.bf16.msra.mxu0 %v15382_v57  ;;  %v7560_v17 = vpop.f32.mrb[27].mxu1  ;;  %7861 = vmatprep.subr.bf16.mxu1 %v15387_v58  ;;  %v15427_v57 = vld [vmem:[%s21433_s1 + $0x1f48] ss:$136 sps:$4 sm:$0xff]   ;;  %v15432_v58 = vld [vmem:[%s21433_s1 + $0x1f54] ss:$136 sps:$4 sm:$0xff]  }
 0x51b   :  { %v19612_v18 = vadd.f32 %v7996_v10, %v7979_v7  ;;  %v19614_v19 = vadd.f32 %v7995_v12, %v7978_v29  ;;  %v7642_v20 = vpop.f32.mrb[27].mxu0  ;;  %7943 = vmatprep.subr.bf16.mxu0 %v15390_v60  ;;  %v15430_v60 = vld [vmem:[%s21433_s1 + $0x1f50] ss:$136 sps:$4 sm:$0xff]   ;;  %v15438_v6 = vld [vmem:[%s21433_s1 + $0x2064] ss:$136 sps:$4 sm:$0xff]  }
 0x51c   :  { %v19616_v21 = vadd.f32 %v7997_v16, %v7980_v15  ;;  %v15433_v11 = vld [vmem:[%s21433_s1 + $0x2058] ss:$136 sps:$4 sm:$0xff]   ;;  %v15441_v27 = vld [vmem:[%s21433_s1 + $0x216c] ss:$136 sps:$4 sm:$0xff]  }
 0x51d   :  { %7862 = vmatpush1.bf16.msra.mxu1 %v15385_v30  ;;  %v15439_v30 = vld [vmem:[%s21433_s1 + $0x2168] ss:$136 sps:$4 sm:$0xff]   ;;  %v15447_v7 = vld [vmem:[%s21434_s2 + $0x4] ss:$16 sps:$4 sm:$0xff]   ;;  %v15450_v12 = vld [vmem:[%s21434_s2 + $0xc] ss:$16 sps:$4 sm:$0xff]  }
 0x51e   :  { %7944 = vmatpush1.bf16.msra.mxu0 %v15388_v1  ;;  %7863 = vmatprep.subr.bf16.mxu1 %v15393_v33  ;;  %v15444_v1 = vld [vmem:[%s21433_s1 + $0x2174] ss:$136 sps:$4 sm:$0xff]   ;;  %v15442_v29 = vld [vmem:[%s21433_s1 + $0x2170] ss:$136 sps:$4 sm:$0xff]   ;;  %v8024_v33 = vpack.c.bf16 %v19193_v5, %v19193_v5 }
 0x51f   :  { %7945 = vmatprep.subr.bf16.mxu0 %v15396_v14  ;;  %v15445_v10 = vld [vmem:[%s21434_s2] ss:$16 sps:$4 sm:$0xff]   ;;  %v15448_v31 = vld [vmem:[%s21434_s2 + $0x8] ss:$16 sps:$4 sm:$0xff]   ;;  %v15453_v13 = vld [vmem:[%s21434_s2 + $0x24] ss:$16 sps:$4 sm:$0xff]  }
 0x520   :  { %v15451_v14 = vld [vmem:[%s21434_s2 + $0x20] ss:$16 sps:$4 sm:$0xff]   ;;  %v15454_v15 = vld [vmem:[%s21434_s2 + $0x28] ss:$16 sps:$4 sm:$0xff]   ;;  %v15456_v16 = vld [vmem:[%s21434_s2 + $0x2c] ss:$16 sps:$4 sm:$0xff]  }
 0x521   :  { %7864 = vmatpush1.bf16.msra.mxu1 %v15391_v61  ;;  %v15459_v5 = vld [vmem:[%s21434_s2 + $0x44] ss:$16 sps:$4 sm:$0xff]   ;;  %v15462_v62 = vld [vmem:[%s21434_s2 + $0x4c] ss:$16 sps:$4 sm:$0xff]   ;;  %v15457_v17 = vld [vmem:[%s21434_s2 + $0x40] ss:$16 sps:$4 sm:$0xff]  }
 0x522   :  { %7946 = vmatpush1.bf16.msra.mxu0 %v15394_v22  ;;  %7865 = vmatprep.subr.bf16.mxu1 %v15399_v23  ;;  %v15465_v20 = vld [vmem:[%s21434_s2 + $0x64] ss:$16 sps:$4 sm:$0xff]   ;;  %v15463_v61 = vld [vmem:[%s21434_s2 + $0x60] ss:$16 sps:$4 sm:$0xff]   ;;  %v15468_v22 = vld [vmem:[%s21434_s2 + $0x6c] ss:$16 sps:$4 sm:$0xff]  }
 0x523   :  { %7947 = vmatprep.subr.bf16.mxu0 %v15402_v25  ;;  %v15466_v23 = vld [vmem:[%s21434_s2 + $0x68] ss:$16 sps:$4 sm:$0xff]   ;;  %v15469_v25 = vld [vmem:[%s21434_s2 + $0x80] ss:$16 sps:$4 sm:$0xff]  }
 0x525   :  { %7866 = vmatpush1.bf16.msra.mxu1 %v15397_v24  ;;  %v15471_v24 = vld [vmem:[%s21434_s2 + $0x84] ss:$16 sps:$4 sm:$0xff]  }
 0x526   :  { %7948 = vmatpush1.bf16.msra.mxu0 %v15400_v26  ;;  %7867 = vmatprep.subr.bf16.mxu1 %v15405_v36  ;;  %v15474_v26 = vld [vmem:[%s21434_s2 + $0x8c] ss:$16 sps:$4 sm:$0xff]   ;;  %v15472_v36 = vld [vmem:[%s21434_s2 + $0x88] ss:$16 sps:$4 sm:$0xff]  }
 0x527   :  { %7949 = vmatprep.subr.bf16.mxu0 %v15408_v40  ;;  %v15475_v40 = vld [vmem:[%s21434_s2 + $0xa0] ss:$16 sps:$4 sm:$0xff]  }
 0x529   :  { %7868 = vmatpush1.bf16.msra.mxu1 %v15403_v39  ;;  %v15477_v39 = vld [vmem:[%s21434_s2 + $0xa4] ss:$16 sps:$4 sm:$0xff]  }
 0x52a   :  { %7950 = vmatpush1.bf16.msra.mxu0 %v15406_v42  ;;  %7869 = vmatprep.subr.bf16.mxu1 %v15411_v32  ;;  %v15480_v42 = vld [vmem:[%s21434_s2 + $0xac] ss:$16 sps:$4 sm:$0xff]   ;;  %v15478_v32 = vld [vmem:[%s21434_s2 + $0xa8] ss:$16 sps:$4 sm:$0xff]  }
 0x52b   :  { %7951 = vmatprep.subr.bf16.mxu0 %v15414_v35  ;;  %v15481_v35 = vld [vmem:[%s21434_s2 + $0xc0] ss:$16 sps:$4 sm:$0xff]  }
 0x52d   :  { %7870 = vmatpush1.bf16.msra.mxu1 %v15409_v46  ;;  %v15483_v46 = vld [vmem:[%s21434_s2 + $0xc4] ss:$16 sps:$4 sm:$0xff]  }
 0x52e   :  { %7952 = vmatpush1.bf16.msra.mxu0 %v15412_v47  ;;  %7871 = vmatprep.subr.bf16.mxu1 %v15417_v48  ;;  %v15486_v47 = vld [vmem:[%s21434_s2 + $0xcc] ss:$16 sps:$4 sm:$0xff]   ;;  %v15484_v48 = vld [vmem:[%s21434_s2 + $0xc8] ss:$16 sps:$4 sm:$0xff]  }
 0x52f   :  { %7953 = vmatprep.subr.bf16.mxu0 %v15420_v50  ;;  %v15487_v50 = vld [vmem:[%s21434_s2 + $0xe0] ss:$16 sps:$4 sm:$0xff]  }
 0x531   :  { %7872 = vmatpush1.bf16.msra.mxu1 %v15415_v49  ;;  %v15489_v49 = vld [vmem:[%s21434_s2 + $0xe4] ss:$16 sps:$4 sm:$0xff]  }
 0x532   :  { %7954 = vmatpush1.bf16.msra.mxu0 %v15418_v51  ;;  %7873 = vmatprep.subr.bf16.mxu1 %v15423_v52  ;;  %v15492_v51 = vld [vmem:[%s21434_s2 + $0xec] ss:$16 sps:$4 sm:$0xff]   ;;  %v15490_v52 = vld [vmem:[%s21434_s2 + $0xe8] ss:$16 sps:$4 sm:$0xff]  }
 0x533   :  { %7955 = vmatprep.subr.bf16.mxu0 %v15426_v54  ;;  %v15493_v54 = vld [vmem:[%s21434_s2 + $0x100] ss:$16 sps:$4 sm:$0xff]  }
 0x535   :  { %7874 = vmatpush1.bf16.msra.mxu1 %v15421_v53  ;;  %v15495_v53 = vld [vmem:[%s21434_s2 + $0x104] ss:$16 sps:$4 sm:$0xff]  }
 0x536   :  { %7956 = vmatpush1.bf16.msra.mxu0 %v15424_v55  ;;  %7875 = vmatprep.subr.bf16.mxu1 %v15429_v56  ;;  %v15498_v55 = vld [vmem:[%s21434_s2 + $0x10c] ss:$16 sps:$4 sm:$0xff]   ;;  %v15496_v56 = vld [vmem:[%s21434_s2 + $0x108] ss:$16 sps:$4 sm:$0xff]  }
 0x537   :  { %7957 = vmatprep.subr.bf16.mxu0 %v15432_v58  ;;  %v15499_v58 = vld [vmem:[%s21434_s2 + $0x120] ss:$16 sps:$4 sm:$0xff]  }
 0x539   :  { %7876 = vmatpush1.bf16.msra.mxu1 %v15427_v57  ;;  %v15501_v57 = vld [vmem:[%s21434_s2 + $0x124] ss:$16 sps:$4 sm:$0xff]  }
 0x53a   :  { %7958 = vmatpush1.bf16.msra.mxu0 %v15430_v60  ;;  %7877 = vmatprep.subr.bf16.mxu1 %v15435_v3  ;;  %v15504_v60 = vld [vmem:[%s21434_s2 + $0x12c] ss:$16 sps:$4 sm:$0xff]   ;;  %v15502_v3 = vld [vmem:[%s21434_s2 + $0x128] ss:$16 sps:$4 sm:$0xff]  }
 0x53b   :  { %7959 = vmatprep.subr.bf16.mxu0 %v15438_v6  ;;  %v15505_v6 = vld [vmem:[%s21434_s2 + $0x140] ss:$16 sps:$4 sm:$0xff]  }
 0x53d   :  { %7878 = vmatpush1.bf16.msra.mxu1 %v15433_v11  ;;  %v15507_v11 = vld [vmem:[%s21434_s2 + $0x144] ss:$16 sps:$4 sm:$0xff]  }
 0x53e   :  { %7960 = vmatpush1.bf16.msra.mxu0 %v15436_v0  ;;  %7879 = vmatprep.subr.bf16.mxu1 %v15441_v27  ;;  %v15510_v0 = vld [vmem:[%s21434_s2 + $0x14c] ss:$16 sps:$4 sm:$0xff]   ;;  %v15508_v27 = vld [vmem:[%s21434_s2 + $0x148] ss:$16 sps:$4 sm:$0xff]  }
 0x53f   :  { %7961 = vmatprep.subr.bf16.mxu0 %v15444_v1  ;;  %v15511_v1 = vld [vmem:[%s21434_s2 + $0x160] ss:$16 sps:$4 sm:$0xff]  }
 0x541   :  { %7880 = vmatpush1.bf16.msra.mxu1 %v15439_v30  ;;  %v15513_v30 = vld [vmem:[%s21434_s2 + $0x164] ss:$16 sps:$4 sm:$0xff]  }
 0x542   :  { %7962 = vmatpush1.bf16.msra.mxu0 %v15442_v29  ;;  %11304 = vmatprep.subr.bf16.mxu1 %v15447_v7  ;;  %v15516_v29 = vld [vmem:[%s21434_s2 + $0x16c] ss:$16 sps:$4 sm:$0xff]   ;;  %v15514_v7 = vld [vmem:[%s21434_s2 + $0x168] ss:$16 sps:$4 sm:$0xff]  }
 0x543   :  { %11673 = vmatprep.subr.bf16.mxu0 %v15450_v12  ;;  %v15517_v12 = vld [vmem:[%s21434_s2 + $0x180] ss:$16 sps:$4 sm:$0xff]  }
 0x544   :  { %7882 = vmatmul.mubr.bf16.vlgmr.msra.gmra.mrb[32].mxu1 %v16520_v34 }
 0x545   :  { %7964 = vmatmul.mubr.bf16.vlgmr.msra.gmra.mrb[32].mxu0 %v16520_v34  ;;  %11305 = vmatpush1.bf16.msra.mxu1 %v15445_v10  ;;  %v15460_v34 = vld [vmem:[%s21434_s2 + $0x48] ss:$16 sps:$4 sm:$0xff]   ;;  %v15519_v10 = vld [vmem:[%s21434_s2 + $0x184] ss:$16 sps:$4 sm:$0xff]  }
 0x546   :  { %11336 = vmatprep.mubr.bf16.mxu1 %v8024_v33  ;;  %11674 = vmatpush1.bf16.msra.mxu0 %v15448_v31  ;;  %v15522_v31 = vld [vmem:[%s21434_s2 + $0x18c] ss:$16 sps:$4 sm:$0xff]  }
 0x547   :  { %11705 = vmatprep.mubr.bf16.mxu0 %v8024_v33  ;;  %11306 = vmatprep.subr.bf16.mxu1 %v15453_v13  ;;  %v15520_v13 = vld [vmem:[%s21434_s2 + $0x188] ss:$16 sps:$4 sm:$0xff]   ;;  %v15525_v33 = vld [vmem:[%s21434_s2 + $0x1a4] ss:$16 sps:$4 sm:$0xff]  }
 0x548   :  { %11675 = vmatprep.subr.bf16.mxu0 %v15456_v16  ;;  %v15526_v16 = vld [vmem:[%s21434_s2 + $0x1a8] ss:$16 sps:$4 sm:$0xff]  }
 0x549   :  { %11307 = vmatpush1.bf16.msra.mxu1 %v15451_v14  ;;  %v15523_v14 = vld [vmem:[%s21434_s2 + $0x1a0] ss:$16 sps:$4 sm:$0xff]  }
 0x54a   :  { %11676 = vmatpush1.bf16.msra.mxu0 %v15454_v15  ;;  %11308 = vmatprep.subr.bf16.mxu1 %v15459_v5  ;;  %v15528_v15 = vld [vmem:[%s21434_s2 + $0x1ac] ss:$16 sps:$4 sm:$0xff]   ;;  %v15531_v5 = vld [vmem:[%s21434_s2 + $0x1c4] ss:$16 sps:$4 sm:$0xff]  }
 0x54b   :  { %11677 = vmatprep.subr.bf16.mxu0 %v15462_v62  ;;  %v15529_v62 = vld [vmem:[%s21434_s2 + $0x1c0] ss:$16 sps:$4 sm:$0xff]  }
 0x54d   :  { %11309 = vmatpush1.bf16.msra.mxu1 %v15457_v17  ;;  %v15534_v17 = vld [vmem:[%s21434_s2 + $0x1cc] ss:$16 sps:$4 sm:$0xff]  }
 0x54e   :  { %11678 = vmatpush1.bf16.msra.mxu0 %v15460_v34  ;;  %11310 = vmatprep.subr.bf16.mxu1 %v15465_v20  ;;  %v15532_v34 = vld [vmem:[%s21434_s2 + $0x1c8] ss:$16 sps:$4 sm:$0xff]   ;;  %v15537_v20 = vld [vmem:[%s21434_s2 + $0x1e4] ss:$16 sps:$4 sm:$0xff]  }
 0x54f   :  { %11679 = vmatprep.subr.bf16.mxu0 %v15468_v22  ;;  %v15540_v22 = vld [vmem:[%s21434_s2 + $0x1ec] ss:$16 sps:$4 sm:$0xff]  }
 0x551   :  { %11311 = vmatpush1.bf16.msra.mxu1 %v15463_v61  ;;  %v15535_v61 = vld [vmem:[%s21434_s2 + $0x1e0] ss:$16 sps:$4 sm:$0xff]  }
 0x552   :  { %11680 = vmatpush1.bf16.msra.mxu0 %v15466_v23  ;;  %11312 = vmatprep.subr.bf16.mxu1 %v15471_v24  ;;  %v15538_v23 = vld [vmem:[%s21434_s2 + $0x1e8] ss:$16 sps:$4 sm:$0xff]   ;;  %v15543_v24 = vld [vmem:[%s21434_s2 + $0x204] ss:$16 sps:$4 sm:$0xff]  }
 0x553   :  { %11681 = vmatprep.subr.bf16.mxu0 %v15474_v26  ;;  %v15546_v26 = vld [vmem:[%s21434_s2 + $0x20c] ss:$16 sps:$4 sm:$0xff]  }
 0x555   :  { %11313 = vmatpush1.bf16.msra.mxu1 %v15469_v25  ;;  %v15541_v25 = vld [vmem:[%s21434_s2 + $0x200] ss:$16 sps:$4 sm:$0xff]  }
 0x556   :  { %11682 = vmatpush1.bf16.msra.mxu0 %v15472_v36  ;;  %11314 = vmatprep.subr.bf16.mxu1 %v15477_v39  ;;  %v15544_v36 = vld [vmem:[%s21434_s2 + $0x208] ss:$16 sps:$4 sm:$0xff]   ;;  %v15549_v39 = vld [vmem:[%s21434_s2 + $0x224] ss:$16 sps:$4 sm:$0xff]  }
 0x557   :  { %11683 = vmatprep.subr.bf16.mxu0 %v15480_v42  ;;  %v8026_v42 = vpack.c.bf16 %v19201_v2, %v19201_v2  ;;  %v15558_v2 = vld [vmem:[%s21434_s2 + $0x24c] ss:$16 sps:$4 sm:$0xff]  }
 0x559   :  { %11315 = vmatpush1.bf16.msra.mxu1 %v15475_v40  ;;  %v8023_v40 = vpack.c.bf16 %v18800_v8, %v18800_v8  ;;  %v15555_v8 = vld [vmem:[%s21434_s2 + $0x244] ss:$16 sps:$4 sm:$0xff]  }
 0x55a   :  { %11684 = vmatpush1.bf16.msra.mxu0 %v15478_v32  ;;  %11316 = vmatprep.subr.bf16.mxu1 %v15483_v46  ;;  %v15547_v32 = vld [vmem:[%s21434_s2 + $0x220] ss:$16 sps:$4 sm:$0xff]   ;;  %v15550_v46 = vld [vmem:[%s21434_s2 + $0x228] ss:$16 sps:$4 sm:$0xff]  }
 0x55b   :  { %11685 = vmatprep.subr.bf16.mxu0 %v15486_v47  ;;  %v15553_v47 = vld [vmem:[%s21434_s2 + $0x240] ss:$16 sps:$4 sm:$0xff]  }
 0x55d   :  { %11317 = vmatpush1.bf16.msra.mxu1 %v15481_v35  ;;  %v15552_v35 = vld [vmem:[%s21434_s2 + $0x22c] ss:$16 sps:$4 sm:$0xff]  }
 0x55e   :  { %11686 = vmatpush1.bf16.msra.mxu0 %v15484_v48  ;;  %11318 = vmatprep.subr.bf16.mxu1 %v15489_v49  ;;  %v15556_v48 = vld [vmem:[%s21434_s2 + $0x248] ss:$16 sps:$4 sm:$0xff]   ;;  %v15561_v49 = vld [vmem:[%s21434_s2 + $0x264] ss:$16 sps:$4 sm:$0xff]  }
 0x55f   :  { %11687 = vmatprep.subr.bf16.mxu0 %v15492_v51  ;;  %v15564_v51 = vld [vmem:[%s21434_s2 + $0x26c] ss:$16 sps:$4 sm:$0xff]  }
 0x561   :  { %11319 = vmatpush1.bf16.msra.mxu1 %v15487_v50  ;;  %v15559_v50 = vld [vmem:[%s21434_s2 + $0x260] ss:$16 sps:$4 sm:$0xff]  }
 0x562   :  { %11688 = vmatpush1.bf16.msra.mxu0 %v15490_v52  ;;  %11320 = vmatprep.subr.bf16.mxu1 %v15495_v53  ;;  %v15562_v52 = vld [vmem:[%s21434_s2 + $0x268] ss:$16 sps:$4 sm:$0xff]   ;;  %v15567_v53 = vld [vmem:[%s21434_s2 + $0x284] ss:$16 sps:$4 sm:$0xff]  }
 0x563   :  { %11689 = vmatprep.subr.bf16.mxu0 %v15498_v55  ;;  %v15570_v55 = vld [vmem:[%s21434_s2 + $0x28c] ss:$16 sps:$4 sm:$0xff]  }
 0x565   :  { %11321 = vmatpush1.bf16.msra.mxu1 %v15493_v54  ;;  %v15565_v54 = vld [vmem:[%s21434_s2 + $0x280] ss:$16 sps:$4 sm:$0xff]  }
 0x566   :  { %11690 = vmatpush1.bf16.msra.mxu0 %v15496_v56  ;;  %11322 = vmatprep.subr.bf16.mxu1 %v15501_v57  ;;  %v15568_v56 = vld [vmem:[%s21434_s2 + $0x288] ss:$16 sps:$4 sm:$0xff]   ;;  %v15573_v57 = vld [vmem:[%s21434_s2 + $0x2a4] ss:$16 sps:$4 sm:$0xff]  }
 0x567   :  { %11691 = vmatprep.subr.bf16.mxu0 %v15504_v60  ;;  %v15571_v60 = vld [vmem:[%s21434_s2 + $0x2a0] ss:$16 sps:$4 sm:$0xff]  }
 0x569   :  { %11323 = vmatpush1.bf16.msra.mxu1 %v15499_v58  ;;  %v15576_v58 = vld [vmem:[%s21434_s2 + $0x2ac] ss:$16 sps:$4 sm:$0xff]  }
 0x56a   :  { %11692 = vmatpush1.bf16.msra.mxu0 %v15502_v3  ;;  %11324 = vmatprep.subr.bf16.mxu1 %v15507_v11  ;;  %v15574_v3 = vld [vmem:[%s21434_s2 + $0x2a8] ss:$16 sps:$4 sm:$0xff]   ;;  %v15579_v11 = vld [vmem:[%s21434_s2 + $0x2c4] ss:$16 sps:$4 sm:$0xff]  }
 0x56b   :  { %11693 = vmatprep.subr.bf16.mxu0 %v15510_v0 }
 0x56d   :  { %11325 = vmatpush1.bf16.msra.mxu1 %v15505_v6  ;;  %v15582_v6 = vld [vmem:[%s21434_s2 + $0x2cc] ss:$16 sps:$4 sm:$0xff]  }
 0x56e   :  { %11694 = vmatpush1.bf16.msra.mxu0 %v15508_v27  ;;  %11326 = vmatprep.subr.bf16.mxu1 %v15513_v30  ;;  %v7981_v27 = vmul.f32 %v17986_v63, %v17986_v63 }
 0x56f   :  { %11695 = vmatprep.subr.bf16.mxu0 %v15516_v29 }
 0x571   :  { %11327 = vmatpush1.bf16.msra.mxu1 %v15511_v1 }
 0x572   :  { %11696 = vmatpush1.bf16.msra.mxu0 %v15514_v7  ;;  %11328 = vmatprep.subr.bf16.mxu1 %v15519_v10  ;;  %v15577_v7 = vld [vmem:[%s21434_s2 + $0x2c0] ss:$16 sps:$4 sm:$0xff]   ;;  %v15580_v10 = vld [vmem:[%s21434_s2 + $0x2c8] ss:$16 sps:$4 sm:$0xff]  }
 0x573   :  { %11697 = vmatprep.subr.bf16.mxu0 %v15522_v31  ;;  %v7983_v31 = vmul.f32 %v18384_v44, %v18384_v44 }
 0x575   :  { %11329 = vmatpush1.bf16.msra.mxu1 %v15517_v12  ;;  %v7982_v12 = vmul.f32 %v18377_v41, %v18377_v41 }
 0x576   :  { %11698 = vmatpush1.bf16.msra.mxu0 %v15520_v13  ;;  %11330 = vmatprep.subr.bf16.mxu1 %v15525_v33 }
 0x577   :  { %11699 = vmatprep.subr.bf16.mxu0 %v15528_v15  ;;  %v15585_v15 = vld [vmem:[%s21434_s2 + $0x2e4] ss:$16 sps:$4 sm:$0xff]  }
 0x579   :  { %11331 = vmatpush1.bf16.msra.mxu1 %v15523_v14 }
 0x57a   :  { %11700 = vmatpush1.bf16.msra.mxu0 %v15526_v16  ;;  %11332 = vmatprep.subr.bf16.mxu1 %v15531_v5  ;;  %v15588_v16 = vld [vmem:[%s21434_s2 + $0x2ec] ss:$16 sps:$4 sm:$0xff]   ;;  %v7984_v5 = vmul.f32 %v18382_v43, %v18382_v43  ;;  %v15583_v43 = vld [vmem:[%s21434_s2 + $0x2e0] ss:$16 sps:$4 sm:$0xff]  }
 0x57b   :  { %11701 = vmatprep.subr.bf16.mxu0 %v15534_v17 }
 0x57d   :  { %11333 = vmatpush1.bf16.msra.mxu1 %v15529_v62 }
 0x57e   :  { %11702 = vmatpush1.bf16.msra.mxu0 %v15532_v34  ;;  %11334 = vmatprep.subr.bf16.mxu1 %v15537_v20 }
 0x57f   :  { %11703 = vmatprep.subr.bf16.mxu0 %v15540_v22 }
 0x581   :  { %11335 = vmatpush1.bf16.msra.mxu1 %v15535_v61 }
 0x582   :  { %11704 = vmatpush1.bf16.msra.mxu0 %v15538_v23  ;;  %11345 = vmatprep.subr.bf16.mxu1 %v15543_v24  ;;  %v15586_v23 = vld [vmem:[%s21434_s2 + $0x2e8] ss:$16 sps:$4 sm:$0xff]   ;;  %v15591_v24 = vld [vmem:[%s21434_s2 + $0x304] ss:$16 sps:$4 sm:$0xff]  }
 0x583   :  { %11714 = vmatprep.subr.bf16.mxu0 %v15546_v26  ;;  %v15594_v26 = vld [vmem:[%s21434_s2 + $0x30c] ss:$16 sps:$4 sm:$0xff]  }
 0x584   :  { %11337 = vmatmul.mubr.bf16.vlgmr.msra.gmra.mrb[36].mxu1 %v8023_v40 }
 0x585   :  { %11706 = vmatmul.mubr.bf16.vlgmr.msra.gmra.mrb[36].mxu0 %v8023_v40  ;;  %11346 = vmatpush1.bf16.msra.mxu1 %v15541_v25  ;;  %v15589_v25 = vld [vmem:[%s21434_s2 + $0x300] ss:$16 sps:$4 sm:$0xff]  }
 0x586   :  { %11377 = vmatprep.mubr.bf16.mxu1 %v8026_v42  ;;  %11715 = vmatpush1.bf16.msra.mxu0 %v15544_v36  ;;  %v15592_v36 = vld [vmem:[%s21434_s2 + $0x308] ss:$16 sps:$4 sm:$0xff]   ;;  %v15595_v40 = vld [vmem:[%s21434_s2 + $0x320] ss:$16 sps:$4 sm:$0xff]  }
 0x587   :  { %11746 = vmatprep.mubr.bf16.mxu0 %v8026_v42  ;;  %11347 = vmatprep.subr.bf16.mxu1 %v15549_v39  ;;  %v15597_v39 = vld [vmem:[%s21434_s2 + $0x324] ss:$16 sps:$4 sm:$0xff]   ;;  %v15600_v42 = vld [vmem:[%s21434_s2 + $0x32c] ss:$16 sps:$4 sm:$0xff]  }
 0x588   :  { %11716 = vmatprep.subr.bf16.mxu0 %v15552_v35  ;;  %v15601_v35 = vld [vmem:[%s21434_s2 + $0x340] ss:$16 sps:$4 sm:$0xff]  }
 0x589   :  { %11348 = vmatpush1.bf16.msra.mxu1 %v15547_v32  ;;  %v15598_v32 = vld [vmem:[%s21434_s2 + $0x328] ss:$16 sps:$4 sm:$0xff]  }
 0x58a   :  { %11717 = vmatpush1.bf16.msra.mxu0 %v15550_v46  ;;  %11349 = vmatprep.subr.bf16.mxu1 %v15555_v8  ;;  %v15603_v46 = vld [vmem:[%s21434_s2 + $0x344] ss:$16 sps:$4 sm:$0xff]   ;;  %v15606_v8 = vld [vmem:[%s21434_s2 + $0x34c] ss:$16 sps:$4 sm:$0xff]  }
 0x58b   :  { %11718 = vmatprep.subr.bf16.mxu0 %v15558_v2  ;;  %v15604_v2 = vld [vmem:[%s21434_s2 + $0x348] ss:$16 sps:$4 sm:$0xff]  }
 0x58d   :  { %11350 = vmatpush1.bf16.msra.mxu1 %v15553_v47  ;;  %v15609_v47 = vld [vmem:[%s21434_s2 + $0x364] ss:$16 sps:$4 sm:$0xff]  }
 0x58e   :  { %11719 = vmatpush1.bf16.msra.mxu0 %v15556_v48  ;;  %11351 = vmatprep.subr.bf16.mxu1 %v15561_v49  ;;  %v15607_v48 = vld [vmem:[%s21434_s2 + $0x360] ss:$16 sps:$4 sm:$0xff]   ;;  %v15612_v49 = vld [vmem:[%s21434_s2 + $0x36c] ss:$16 sps:$4 sm:$0xff]  }
 0x58f   :  { %11720 = vmatprep.subr.bf16.mxu0 %v15564_v51  ;;  %v15615_v51 = vld [vmem:[%s21434_s2 + $0x384] ss:$16 sps:$4 sm:$0xff]  }
 0x591   :  { %11352 = vmatpush1.bf16.msra.mxu1 %v15559_v50  ;;  %v15610_v50 = vld [vmem:[%s21434_s2 + $0x368] ss:$16 sps:$4 sm:$0xff]  }
 0x592   :  { %11721 = vmatpush1.bf16.msra.mxu0 %v15562_v52  ;;  %11353 = vmatprep.subr.bf16.mxu1 %v15567_v53  ;;  %v15613_v52 = vld [vmem:[%s21434_s2 + $0x380] ss:$16 sps:$4 sm:$0xff]   ;;  %v15618_v53 = vld [vmem:[%s21434_s2 + $0x38c] ss:$16 sps:$4 sm:$0xff]  }
 0x593   :  { %11722 = vmatprep.subr.bf16.mxu0 %v15570_v55  ;;  %v15621_v55 = vld [vmem:[%s21434_s2 + $0x3a4] ss:$16 sps:$4 sm:$0xff]  }
 0x595   :  { %11354 = vmatpush1.bf16.msra.mxu1 %v15565_v54  ;;  %v15616_v54 = vld [vmem:[%s21434_s2 + $0x388] ss:$16 sps:$4 sm:$0xff]  }
 0x596   :  { %11723 = vmatpush1.bf16.msra.mxu0 %v15568_v56  ;;  %11355 = vmatprep.subr.bf16.mxu1 %v15573_v57  ;;  %v15619_v56 = vld [vmem:[%s21434_s2 + $0x3a0] ss:$16 sps:$4 sm:$0xff]   ;;  %v15624_v57 = vld [vmem:[%s21434_s2 + $0x3ac] ss:$16 sps:$4 sm:$0xff]  }
 0x597   :  { %v7719_v0 = vpop.f32.mrb[28].mxu1  ;;  %11724 = vmatprep.subr.bf16.mxu0 %v15576_v58  ;;  %v15622_v58 = vld [vmem:[%s21434_s2 + $0x3a8] ss:$16 sps:$4 sm:$0xff]  }
 0x598   :  { %v7998_v30 = vmul.f32 %v7719_v0, %v7719_v0  ;;  %v7801_v1 = vpop.f32.mrb[28].mxu0  ;;  %v7721_v29 = vpop.f32.mrb[29].mxu1  ;;  %v15633_v0 = vld [vmem:[%s21434_s2 + $0x3e4] ss:$16 sps:$4 sm:$0xff]  }
 0x599   :  { %v8000_v13 = vmul.f32 %v7801_v1, %v7801_v1  ;;  %v7999_v33 = vmul.f32 %v7721_v29, %v7721_v29  ;;  %v7803_v63 = vpop.f32.mrb[29].mxu0  ;;  %v7723_v14 = vpop.f32.mrb[30].mxu1  ;;  %11356 = vmatpush1.bf16.msra.mxu1 %v15571_v60  ;;  %v15627_v60 = vld [vmem:[%s21434_s2 + $0x3c4] ss:$16 sps:$4 sm:$0xff]   ;;  %v15634_v1 = vld [vmem:[%s21434_s2 + $0x3e8] ss:$16 sps:$4 sm:$0xff]  }
 0x59a   :  { %v20018_v41 = vadd.f32 %v7998_v30, %v7981_v27  ;;  %v8001_v62 = vmul.f32 %v7803_v63, %v7803_v63  ;;  %v7805_v44 = vpop.f32.mrb[30].mxu0  ;;  %11725 = vmatpush1.bf16.msra.mxu0 %v15574_v3  ;;  %v7724_v17 = vpop.f32.mrb[31].mxu1  ;;  %11357 = vmatprep.subr.bf16.mxu1 %v15579_v11  ;;  %v15625_v3 = vld [vmem:[%s21434_s2 + $0x3c0] ss:$16 sps:$4 sm:$0xff]   ;;  %v15630_v11 = vld [vmem:[%s21434_s2 + $0x3cc] ss:$16 sps:$4 sm:$0xff]  }
 0x59b   :  { %v20020_v34 = vadd.f32 %v8000_v13, %v7983_v31  ;;  %v20022_v20 = vadd.f32 %v7999_v33, %v7982_v12  ;;  %v7806_v61 = vpop.f32.mrb[31].mxu0  ;;  %11726 = vmatprep.subr.bf16.mxu0 %v15582_v6  ;;  %v15628_v6 = vld [vmem:[%s21434_s2 + $0x3c8] ss:$16 sps:$4 sm:$0xff]   ;;  %v15631_v27 = vld [vmem:[%s21434_s2 + $0x3e0] ss:$16 sps:$4 sm:$0xff]   ;;  %v8025_v13 = vpack.c.bf16 %v19203_v4, %v19203_v4  ;;  %v8028_v33 = vpack.c.bf16 %v19610_v59, %v19610_v59 }
 0x59c   :  { %v20024_v22 = vadd.f32 %v8001_v62, %v7984_v5  ;;  %v15636_v30 = vld [vmem:[%s21434_s2 + $0x3ec] ss:$16 sps:$4 sm:$0xff]   ;;  %v15639_v29 = vld [vmem:[%s21434_s2 + $0x404] ss:$16 sps:$4 sm:$0xff]   ;;  %v15640_v12 = vld [vmem:[%s21434_s2 + $0x408] ss:$16 sps:$4 sm:$0xff]  }
 0x59d   :  { %11358 = vmatpush1.bf16.msra.mxu1 %v15577_v7  ;;  %v15637_v7 = vld [vmem:[%s21434_s2 + $0x400] ss:$16 sps:$4 sm:$0xff]   ;;  %v15645_v31 = vld [vmem:[%s21434_s2 + $0x424] ss:$16 sps:$4 sm:$0xff]   ;;  %v15646_v14 = vld [vmem:[%s21434_s2 + $0x428] ss:$16 sps:$4 sm:$0xff]  }
 0x59e   :  { %11727 = vmatpush1.bf16.msra.mxu0 %v15580_v10  ;;  %11359 = vmatprep.subr.bf16.mxu1 %v15585_v15  ;;  %v15642_v10 = vld [vmem:[%s21434_s2 + $0x40c] ss:$16 sps:$4 sm:$0xff]   ;;  %v15643_v63 = vld [vmem:[%s21434_s2 + $0x420] ss:$16 sps:$4 sm:$0xff]   ;;  %v15651_v4 = vld [vmem:[%s21434_s2 + $0x444] ss:$16 sps:$4 sm:$0xff]  }
 0x59f   :  { %11728 = vmatprep.subr.bf16.mxu0 %v15588_v16  ;;  %v15648_v15 = vld [vmem:[%s21434_s2 + $0x42c] ss:$16 sps:$4 sm:$0xff]   ;;  %v15649_v16 = vld [vmem:[%s21434_s2 + $0x440] ss:$16 sps:$4 sm:$0xff]   ;;  %v15652_v5 = vld [vmem:[%s21434_s2 + $0x448] ss:$16 sps:$4 sm:$0xff]  }
 0x5a0   :  { %v15654_v59 = vld [vmem:[%s21434_s2 + $0x44c] ss:$16 sps:$4 sm:$0xff]   ;;  %v15657_v62 = vld [vmem:[%s21434_s2 + $0x464] ss:$16 sps:$4 sm:$0xff]   ;;  %v15655_v44 = vld [vmem:[%s21434_s2 + $0x460] ss:$16 sps:$4 sm:$0xff]  }
 0x5a1   :  { %11360 = vmatpush1.bf16.msra.mxu1 %v15583_v43  ;;  %v15660_v17 = vld [vmem:[%s21434_s2 + $0x46c] ss:$16 sps:$4 sm:$0xff]   ;;  %v15658_v61 = vld [vmem:[%s21434_s2 + $0x468] ss:$16 sps:$4 sm:$0xff]   ;;  %v15663_v43 = vld [vmem:[%s21434_s2 + $0x484] ss:$16 sps:$4 sm:$0xff]  }
 0x5a2   :  { %11729 = vmatpush1.bf16.msra.mxu0 %v15586_v23  ;;  %11361 = vmatprep.subr.bf16.mxu1 %v15591_v24  ;;  %v15661_v23 = vld [vmem:[%s21434_s2 + $0x480] ss:$16 sps:$4 sm:$0xff]   ;;  %v15666_v24 = vld [vmem:[%s21434_s2 + $0x48c] ss:$16 sps:$4 sm:$0xff]  }
 0x5a3   :  { %11730 = vmatprep.subr.bf16.mxu0 %v15594_v26  ;;  %v15669_v26 = vld [vmem:[%s21434_s2 + $0x4a4] ss:$16 sps:$4 sm:$0xff]  }
 0x5a5   :  { %11362 = vmatpush1.bf16.msra.mxu1 %v15589_v25  ;;  %v15664_v25 = vld [vmem:[%s21434_s2 + $0x488] ss:$16 sps:$4 sm:$0xff]  }
 0x5a6   :  { %11731 = vmatpush1.bf16.msra.mxu0 %v15592_v36  ;;  %11363 = vmatprep.subr.bf16.mxu1 %v15597_v39  ;;  %v15667_v36 = vld [vmem:[%s21434_s2 + $0x4a0] ss:$16 sps:$4 sm:$0xff]   ;;  %v15672_v39 = vld [vmem:[%s21434_s2 + $0x4ac] ss:$16 sps:$4 sm:$0xff]  }
 0x5a7   :  { %11732 = vmatprep.subr.bf16.mxu0 %v15600_v42  ;;  %v15675_v42 = vld [vmem:[%s21434_s2 + $0x4c4] ss:$16 sps:$4 sm:$0xff]  }
 0x5a9   :  { %11364 = vmatpush1.bf16.msra.mxu1 %v15595_v40  ;;  %v15670_v40 = vld [vmem:[%s21434_s2 + $0x4a8] ss:$16 sps:$4 sm:$0xff]  }
 0x5aa   :  { %11733 = vmatpush1.bf16.msra.mxu0 %v15598_v32  ;;  %11365 = vmatprep.subr.bf16.mxu1 %v15603_v46  ;;  %v15678_v32 = vld [vmem:[%s21434_s2 + $0x4cc] ss:$16 sps:$4 sm:$0xff]   ;;  %v15673_v46 = vld [vmem:[%s21434_s2 + $0x4c0] ss:$16 sps:$4 sm:$0xff]  }
 0x5ab   :  { %11734 = vmatprep.subr.bf16.mxu0 %v15606_v8  ;;  %v15681_v8 = vld [vmem:[%s21434_s2 + $0x4e4] ss:$16 sps:$4 sm:$0xff]  }
 0x5ad   :  { %11366 = vmatpush1.bf16.msra.mxu1 %v15601_v35  ;;  %v15676_v35 = vld [vmem:[%s21434_s2 + $0x4c8] ss:$16 sps:$4 sm:$0xff]  }
 0x5ae   :  { %11735 = vmatpush1.bf16.msra.mxu0 %v15604_v2  ;;  %11367 = vmatprep.subr.bf16.mxu1 %v15609_v47  ;;  %v15684_v2 = vld [vmem:[%s21434_s2 + $0x4ec] ss:$16 sps:$4 sm:$0xff]   ;;  %v15679_v47 = vld [vmem:[%s21434_s2 + $0x4e0] ss:$16 sps:$4 sm:$0xff]  }
 0x5af   :  { %11736 = vmatprep.subr.bf16.mxu0 %v15612_v49  ;;  %v15687_v49 = vld [vmem:[%s21434_s2 + $0x504] ss:$16 sps:$4 sm:$0xff]  }
 0x5b1   :  { %11368 = vmatpush1.bf16.msra.mxu1 %v15607_v48  ;;  %v15682_v48 = vld [vmem:[%s21434_s2 + $0x4e8] ss:$16 sps:$4 sm:$0xff]  }
 0x5b2   :  { %11737 = vmatpush1.bf16.msra.mxu0 %v15610_v50  ;;  %11369 = vmatprep.subr.bf16.mxu1 %v15615_v51  ;;  %v15690_v50 = vld [vmem:[%s21434_s2 + $0x50c] ss:$16 sps:$4 sm:$0xff]   ;;  %v15685_v51 = vld [vmem:[%s21434_s2 + $0x500] ss:$16 sps:$4 sm:$0xff]  }
 0x5b3   :  { %11738 = vmatprep.subr.bf16.mxu0 %v15618_v53  ;;  %v15693_v53 = vld [vmem:[%s21434_s2 + $0x524] ss:$16 sps:$4 sm:$0xff]  }
 0x5b5   :  { %11370 = vmatpush1.bf16.msra.mxu1 %v15613_v52  ;;  %v15688_v52 = vld [vmem:[%s21434_s2 + $0x508] ss:$16 sps:$4 sm:$0xff]  }
 0x5b6   :  { %11739 = vmatpush1.bf16.msra.mxu0 %v15616_v54  ;;  %11371 = vmatprep.subr.bf16.mxu1 %v15621_v55  ;;  %v15696_v54 = vld [vmem:[%s21434_s2 + $0x52c] ss:$16 sps:$4 sm:$0xff]   ;;  %v15691_v55 = vld [vmem:[%s21434_s2 + $0x520] ss:$16 sps:$4 sm:$0xff]  }
 0x5b7   :  { %11740 = vmatprep.subr.bf16.mxu0 %v15624_v57  ;;  %v15699_v57 = vld [vmem:[%s21434_s2 + $0x544] ss:$16 sps:$4 sm:$0xff]  }
 0x5b9   :  { %11372 = vmatpush1.bf16.msra.mxu1 %v15619_v56  ;;  %v15694_v56 = vld [vmem:[%s21434_s2 + $0x528] ss:$16 sps:$4 sm:$0xff]  }
 0x5ba   :  { %11741 = vmatpush1.bf16.msra.mxu0 %v15622_v58  ;;  %11373 = vmatprep.subr.bf16.mxu1 %v15627_v60  ;;  %v15702_v58 = vld [vmem:[%s21434_s2 + $0x54c] ss:$16 sps:$4 sm:$0xff]   ;;  %v15697_v60 = vld [vmem:[%s21434_s2 + $0x540] ss:$16 sps:$4 sm:$0xff]  }
 0x5bb   :  { %11742 = vmatprep.subr.bf16.mxu0 %v15630_v11  ;;  %v15705_v11 = vld [vmem:[%s21434_s2 + $0x564] ss:$16 sps:$4 sm:$0xff]  }
 0x5bd   :  { %11374 = vmatpush1.bf16.msra.mxu1 %v15625_v3  ;;  %v15700_v3 = vld [vmem:[%s21434_s2 + $0x548] ss:$16 sps:$4 sm:$0xff]  }
 0x5be   :  { %11743 = vmatpush1.bf16.msra.mxu0 %v15628_v6  ;;  %11375 = vmatprep.subr.bf16.mxu1 %v15633_v0  ;;  %v15708_v6 = vld [vmem:[%s21434_s2 + $0x56c] ss:$16 sps:$4 sm:$0xff]   ;;  %v15703_v0 = vld [vmem:[%s21434_s2 + $0x560] ss:$16 sps:$4 sm:$0xff]  }
 0x5bf   :  { %11744 = vmatprep.subr.bf16.mxu0 %v15636_v30  ;;  %v15711_v30 = vld [vmem:[%s21434_s2 + $0x584] ss:$16 sps:$4 sm:$0xff]  }
 0x5c1   :  { %11376 = vmatpush1.bf16.msra.mxu1 %v15631_v27  ;;  %v15706_v27 = vld [vmem:[%s21434_s2 + $0x568] ss:$16 sps:$4 sm:$0xff]  }
 0x5c2   :  { %11745 = vmatpush1.bf16.msra.mxu0 %v15634_v1  ;;  %11386 = vmatprep.subr.bf16.mxu1 %v15639_v29  ;;  %v15714_v1 = vld [vmem:[%s21434_s2 + $0x58c] ss:$16 sps:$4 sm:$0xff]   ;;  %v15709_v29 = vld [vmem:[%s21434_s2 + $0x580] ss:$16 sps:$4 sm:$0xff]  }
 0x5c3   :  { %11755 = vmatprep.subr.bf16.mxu0 %v15642_v10  ;;  %v15717_v10 = vld [vmem:[%s21434_s2 + $0x5a4] ss:$16 sps:$4 sm:$0xff]  }
 0x5c4   :  { %11378 = vmatmul.mubr.bf16.vlgmr.msra.gmra.mrb[36].mxu1 %v8025_v13 }
 0x5c5   :  { %11747 = vmatmul.mubr.bf16.vlgmr.msra.gmra.mrb[36].mxu0 %v8025_v13  ;;  %11387 = vmatpush1.bf16.msra.mxu1 %v15637_v7  ;;  %v15712_v7 = vld [vmem:[%s21434_s2 + $0x588] ss:$16 sps:$4 sm:$0xff]  }
 0x5c6   :  { %11418 = vmatprep.mubr.bf16.mxu1 %v8028_v33  ;;  %11756 = vmatpush1.bf16.msra.mxu0 %v15640_v12  ;;  %v15720_v12 = vld [vmem:[%s21434_s2 + $0x5ac] ss:$16 sps:$4 sm:$0xff]   ;;  %v15718_v13 = vld [vmem:[%s21434_s2 + $0x5a8] ss:$16 sps:$4 sm:$0xff]  }
 0x5c7   :  { %11787 = vmatprep.mubr.bf16.mxu0 %v8028_v33  ;;  %11388 = vmatprep.subr.bf16.mxu1 %v15645_v31  ;;  %v15715_v31 = vld [vmem:[%s21434_s2 + $0x5a0] ss:$16 sps:$4 sm:$0xff]   ;;  %v15723_v33 = vld [vmem:[%s21434_s2 + $0x5c4] ss:$16 sps:$4 sm:$0xff]  }
 0x5c8   :  { %11757 = vmatprep.subr.bf16.mxu0 %v15648_v15  ;;  %v15724_v15 = vld [vmem:[%s21434_s2 + $0x5c8] ss:$16 sps:$4 sm:$0xff]  }
 0x5c9   :  { %11389 = vmatpush1.bf16.msra.mxu1 %v15643_v63  ;;  %v15726_v63 = vld [vmem:[%s21434_s2 + $0x5cc] ss:$16 sps:$4 sm:$0xff]  }
 0x5ca   :  { %11758 = vmatpush1.bf16.msra.mxu0 %v15646_v14  ;;  %11390 = vmatprep.subr.bf16.mxu1 %v15651_v4  ;;  %v15721_v14 = vld [vmem:[%s21434_s2 + $0x5c0] ss:$16 sps:$4 sm:$0xff]   ;;  %v15729_v4 = vld [vmem:[%s21434_s2 + $0x5e4] ss:$16 sps:$4 sm:$0xff]  }
 0x5cb   :  { %11759 = vmatprep.subr.bf16.mxu0 %v15654_v59  ;;  %v15732_v59 = vld [vmem:[%s21434_s2 + $0x5ec] ss:$16 sps:$4 sm:$0xff]  }
 0x5cd   :  { %11391 = vmatpush1.bf16.msra.mxu1 %v15649_v16  ;;  %v15727_v16 = vld [vmem:[%s21434_s2 + $0x5e0] ss:$16 sps:$4 sm:$0xff]  }
 0x5ce   :  { %11760 = vmatpush1.bf16.msra.mxu0 %v15652_v5  ;;  %11392 = vmatprep.subr.bf16.mxu1 %v15657_v62  ;;  %v15730_v5 = vld [vmem:[%s21434_s2 + $0x5e8] ss:$16 sps:$4 sm:$0xff]   ;;  %v15735_v62 = vld [vmem:[%s21434_s2 + $0x604] ss:$16 sps:$4 sm:$0xff]  }
 0x5cf   :  { %11761 = vmatprep.subr.bf16.mxu0 %v15660_v17  ;;  %v15733_v17 = vld [vmem:[%s21434_s2 + $0x600] ss:$16 sps:$4 sm:$0xff]  }
 0x5d1   :  { %11393 = vmatpush1.bf16.msra.mxu1 %v15655_v44  ;;  %v15738_v44 = vld [vmem:[%s21434_s2 + $0x60c] ss:$16 sps:$4 sm:$0xff]  }
 0x5d2   :  { %11762 = vmatpush1.bf16.msra.mxu0 %v15658_v61  ;;  %11394 = vmatprep.subr.bf16.mxu1 %v15663_v43  ;;  %v8027_v61 = vpack.c.bf16 %v19208_v9, %v19208_v9  ;;  %v15736_v43 = vld [vmem:[%s21434_s2 + $0x608] ss:$16 sps:$4 sm:$0xff]   ;;  %v15739_v9 = vld [vmem:[%s21434_s2 + $0x620] ss:$16 sps:$4 sm:$0xff]  }
 0x5d3   :  { %11763 = vmatprep.subr.bf16.mxu0 %v15666_v24  ;;  %v8030_v24 = vpack.c.bf16 %v19612_v18, %v19612_v18  ;;  %v15747_v18 = vld [vmem:[%s21434_s2 + $0x644] ss:$16 sps:$4 sm:$0xff]  }
 0x5d5   :  { %11395 = vmatpush1.bf16.msra.mxu1 %v15661_v23  ;;  %v15741_v23 = vld [vmem:[%s21434_s2 + $0x624] ss:$16 sps:$4 sm:$0xff]  }
 0x5d6   :  { %11764 = vmatpush1.bf16.msra.mxu0 %v15664_v25  ;;  %11396 = vmatprep.subr.bf16.mxu1 %v15669_v26  ;;  %v15744_v25 = vld [vmem:[%s21434_s2 + $0x62c] ss:$16 sps:$4 sm:$0xff]   ;;  %v15742_v26 = vld [vmem:[%s21434_s2 + $0x628] ss:$16 sps:$4 sm:$0xff]  }
 0x5d7   :  { %11765 = vmatprep.subr.bf16.mxu0 %v15672_v39  ;;  %v15745_v39 = vld [vmem:[%s21434_s2 + $0x640] ss:$16 sps:$4 sm:$0xff]  }
 0x5d9   :  { %11397 = vmatpush1.bf16.msra.mxu1 %v15667_v36  ;;  %v15750_v36 = vld [vmem:[%s21434_s2 + $0x64c] ss:$16 sps:$4 sm:$0xff]  }
 0x5da   :  { %11766 = vmatpush1.bf16.msra.mxu0 %v15670_v40  ;;  %11398 = vmatprep.subr.bf16.mxu1 %v15675_v42  ;;  %v15748_v40 = vld [vmem:[%s21434_s2 + $0x648] ss:$16 sps:$4 sm:$0xff]   ;;  %v15753_v42 = vld [vmem:[%s21434_s2 + $0x664] ss:$16 sps:$4 sm:$0xff]  }
 0x5db   :  { %11767 = vmatprep.subr.bf16.mxu0 %v15678_v32  ;;  %v15756_v32 = vld [vmem:[%s21434_s2 + $0x66c] ss:$16 sps:$4 sm:$0xff]  }
 0x5dd   :  { %11399 = vmatpush1.bf16.msra.mxu1 %v15673_v46  ;;  %v15751_v46 = vld [vmem:[%s21434_s2 + $0x660] ss:$16 sps:$4 sm:$0xff]  }
 0x5de   :  { %11768 = vmatpush1.bf16.msra.mxu0 %v15676_v35  ;;  %11400 = vmatprep.subr.bf16.mxu1 %v15681_v8  ;;  %v15754_v35 = vld [vmem:[%s21434_s2 + $0x668] ss:$16 sps:$4 sm:$0xff]   ;;  %v15759_v8 = vld [vmem:[%s21434_s2 + $0x684] ss:$16 sps:$4 sm:$0xff]  }
 0x5df   :  { %11769 = vmatprep.subr.bf16.mxu0 %v15684_v2  ;;  %v15762_v2 = vld [vmem:[%s21434_s2 + $0x68c] ss:$16 sps:$4 sm:$0xff]  }
 0x5e1   :  { %11401 = vmatpush1.bf16.msra.mxu1 %v15679_v47  ;;  %v15757_v47 = vld [vmem:[%s21434_s2 + $0x680] ss:$16 sps:$4 sm:$0xff]  }
 0x5e2   :  { %11770 = vmatpush1.bf16.msra.mxu0 %v15682_v48  ;;  %11402 = vmatprep.subr.bf16.mxu1 %v15687_v49  ;;  %v15760_v48 = vld [vmem:[%s21434_s2 + $0x688] ss:$16 sps:$4 sm:$0xff]   ;;  %v15765_v49 = vld [vmem:[%s21434_s2 + $0x6a4] ss:$16 sps:$4 sm:$0xff]  }
 0x5e3   :  { %11771 = vmatprep.subr.bf16.mxu0 %v15690_v50  ;;  %v15768_v50 = vld [vmem:[%s21434_s2 + $0x6ac] ss:$16 sps:$4 sm:$0xff]  }
 0x5e5   :  { %11403 = vmatpush1.bf16.msra.mxu1 %v15685_v51  ;;  %v15763_v51 = vld [vmem:[%s21434_s2 + $0x6a0] ss:$16 sps:$4 sm:$0xff]  }
 0x5e6   :  { %11772 = vmatpush1.bf16.msra.mxu0 %v15688_v52  ;;  %11404 = vmatprep.subr.bf16.mxu1 %v15693_v53  ;;  %v15766_v52 = vld [vmem:[%s21434_s2 + $0x6a8] ss:$16 sps:$4 sm:$0xff]   ;;  %v15771_v53 = vld [vmem:[%s21434_s2 + $0x6c4] ss:$16 sps:$4 sm:$0xff]  }
 0x5e7   :  { %11773 = vmatprep.subr.bf16.mxu0 %v15696_v54 }
 0x5e9   :  { %11405 = vmatpush1.bf16.msra.mxu1 %v15691_v55  ;;  %v15774_v55 = vld [vmem:[%s21434_s2 + $0x6cc] ss:$16 sps:$4 sm:$0xff]  }
 0x5ea   :  { %11774 = vmatpush1.bf16.msra.mxu0 %v15694_v56  ;;  %11406 = vmatprep.subr.bf16.mxu1 %v15699_v57  ;;  %v7985_v56 = vmul.f32 %v18386_v45, %v18386_v45  ;;  %v7988_v45 = vmul.f32 %v18782_v37, %v18782_v37 }
 0x5eb   :  { %11775 = vmatprep.subr.bf16.mxu0 %v15702_v58 }
 0x5ed   :  { %11407 = vmatpush1.bf16.msra.mxu1 %v15697_v60 }
 0x5ee   :  { %11776 = vmatpush1.bf16.msra.mxu0 %v15700_v3  ;;  %11408 = vmatprep.subr.bf16.mxu1 %v15705_v11  ;;  %v7986_v3 = vmul.f32 %v18777_v28, %v18777_v28  ;;  %v7987_v11 = vmul.f32 %v18784_v38, %v18784_v38  ;;  %v15772_v38 = vld [vmem:[%s21434_s2 + $0x6c8] ss:$16 sps:$4 sm:$0xff]  }
 0x5ef   :  { %11777 = vmatprep.subr.bf16.mxu0 %v15708_v6 }
 0x5f1   :  { %11409 = vmatpush1.bf16.msra.mxu1 %v15703_v0 }
 0x5f2   :  { %11778 = vmatpush1.bf16.msra.mxu0 %v15706_v27  ;;  %11410 = vmatprep.subr.bf16.mxu1 %v15711_v30 }
 0x5f3   :  { %11779 = vmatprep.subr.bf16.mxu0 %v15714_v1  ;;  %v15769_v1 = vld [vmem:[%s21434_s2 + $0x6c0] ss:$16 sps:$4 sm:$0xff]  }
 0x5f5   :  { %11411 = vmatpush1.bf16.msra.mxu1 %v15709_v29 }
 0x5f6   :  { %11780 = vmatpush1.bf16.msra.mxu0 %v15712_v7  ;;  %11412 = vmatprep.subr.bf16.mxu1 %v15717_v10 }
 0x5f7   :  { %11781 = vmatprep.subr.bf16.mxu0 %v15720_v12  ;;  %v15777_v12 = vld [vmem:[%s21434_s2 + $0x6e4] ss:$16 sps:$4 sm:$0xff]  }
 0x5f9   :  { %11413 = vmatpush1.bf16.msra.mxu1 %v15715_v31 }
 0x5fa   :  { %11782 = vmatpush1.bf16.msra.mxu0 %v15718_v13  ;;  %11414 = vmatprep.subr.bf16.mxu1 %v15723_v33  ;;  %v15780_v33 = vld [vmem:[%s21434_s2 + $0x6ec] ss:$16 sps:$4 sm:$0xff]  }
 0x5fb   :  { %11783 = vmatprep.subr.bf16.mxu0 %v15726_v63 }
 0x5fd   :  { %11415 = vmatpush1.bf16.msra.mxu1 %v15721_v14  ;;  %v15775_v14 = vld [vmem:[%s21434_s2 + $0x6e0] ss:$16 sps:$4 sm:$0xff]  }
 0x5fe   :  { %11784 = vmatpush1.bf16.msra.mxu0 %v15724_v15  ;;  %11416 = vmatprep.subr.bf16.mxu1 %v15729_v4  ;;  %v15778_v15 = vld [vmem:[%s21434_s2 + $0x6e8] ss:$16 sps:$4 sm:$0xff]   ;;  %v15783_v4 = vld [vmem:[%s21434_s2 + $0x704] ss:$16 sps:$4 sm:$0xff]  }
 0x5ff   :  { %11785 = vmatprep.subr.bf16.mxu0 %v15732_v59  ;;  %v15786_v59 = vld [vmem:[%s21434_s2 + $0x70c] ss:$16 sps:$4 sm:$0xff]  }
 0x601   :  { %11417 = vmatpush1.bf16.msra.mxu1 %v15727_v16  ;;  %v15781_v16 = vld [vmem:[%s21434_s2 + $0x700] ss:$16 sps:$4 sm:$0xff]  }
 0x602   :  { %11786 = vmatpush1.bf16.msra.mxu0 %v15730_v5  ;;  %11427 = vmatprep.subr.bf16.mxu1 %v15735_v62  ;;  %v15784_v5 = vld [vmem:[%s21434_s2 + $0x708] ss:$16 sps:$4 sm:$0xff]   ;;  %v15789_v62 = vld [vmem:[%s21434_s2 + $0x724] ss:$16 sps:$4 sm:$0xff]  }
 0x603   :  { %11796 = vmatprep.subr.bf16.mxu0 %v15738_v44  ;;  %v15792_v44 = vld [vmem:[%s21434_s2 + $0x72c] ss:$16 sps:$4 sm:$0xff]  }
 0x604   :  { %11419 = vmatmul.mubr.bf16.vlgmr.msra.gmra.mrb[36].mxu1 %v8027_v61 }
 0x605   :  { %11788 = vmatmul.mubr.bf16.vlgmr.msra.gmra.mrb[36].mxu0 %v8027_v61  ;;  %11428 = vmatpush1.bf16.msra.mxu1 %v15733_v17  ;;  %v15787_v17 = vld [vmem:[%s21434_s2 + $0x720] ss:$16 sps:$4 sm:$0xff]   ;;  %v15790_v61 = vld [vmem:[%s21434_s2 + $0x728] ss:$16 sps:$4 sm:$0xff]  }
 0x606   :  { %11459 = vmatprep.mubr.bf16.mxu1 %v8030_v24  ;;  %11797 = vmatpush1.bf16.msra.mxu0 %v15736_v43  ;;  %v15795_v43 = vld [vmem:[%s21434_s2 + $0x744] ss:$16 sps:$4 sm:$0xff]  }
 0x607   :  { %11828 = vmatprep.mubr.bf16.mxu0 %v8030_v24  ;;  %11429 = vmatprep.subr.bf16.mxu1 %v15741_v23  ;;  %v15798_v23 = vld [vmem:[%s21434_s2 + $0x74c] ss:$16 sps:$4 sm:$0xff]   ;;  %v15793_v24 = vld [vmem:[%s21434_s2 + $0x740] ss:$16 sps:$4 sm:$0xff]  }
 0x608   :  { %11798 = vmatprep.subr.bf16.mxu0 %v15744_v25  ;;  %v15796_v25 = vld [vmem:[%s21434_s2 + $0x748] ss:$16 sps:$4 sm:$0xff]  }
 0x609   :  { %11430 = vmatpush1.bf16.msra.mxu1 %v15739_v9  ;;  %v15801_v9 = vld [vmem:[%s21434_s2 + $0x764] ss:$16 sps:$4 sm:$0xff]  }
 0x60a   :  { %11799 = vmatpush1.bf16.msra.mxu0 %v15742_v26  ;;  %11431 = vmatprep.subr.bf16.mxu1 %v15747_v18  ;;  %v15804_v26 = vld [vmem:[%s21434_s2 + $0x76c] ss:$16 sps:$4 sm:$0xff]   ;;  %v15799_v18 = vld [vmem:[%s21434_s2 + $0x760] ss:$16 sps:$4 sm:$0xff]  }
 0x60b   :  { %11800 = vmatprep.subr.bf16.mxu0 %v15750_v36  ;;  %v15802_v36 = vld [vmem:[%s21434_s2 + $0x768] ss:$16 sps:$4 sm:$0xff]  }
 0x60d   :  { %11432 = vmatpush1.bf16.msra.mxu1 %v15745_v39  ;;  %v15807_v39 = vld [vmem:[%s21434_s2 + $0x784] ss:$16 sps:$4 sm:$0xff]  }
 0x60e   :  { %11801 = vmatpush1.bf16.msra.mxu0 %v15748_v40  ;;  %11433 = vmatprep.subr.bf16.mxu1 %v15753_v42  ;;  %v15810_v40 = vld [vmem:[%s21434_s2 + $0x78c] ss:$16 sps:$4 sm:$0xff]   ;;  %v15805_v42 = vld [vmem:[%s21434_s2 + $0x780] ss:$16 sps:$4 sm:$0xff]  }
 0x60f   :  { %11802 = vmatprep.subr.bf16.mxu0 %v15756_v32  ;;  %v15808_v32 = vld [vmem:[%s21434_s2 + $0x788] ss:$16 sps:$4 sm:$0xff]  }
 0x611   :  { %11434 = vmatpush1.bf16.msra.mxu1 %v15751_v46  ;;  %v15813_v46 = vld [vmem:[%s21434_s2 + $0x7a4] ss:$16 sps:$4 sm:$0xff]  }
 0x612   :  { %11803 = vmatpush1.bf16.msra.mxu0 %v15754_v35  ;;  %11435 = vmatprep.subr.bf16.mxu1 %v15759_v8  ;;  %v15816_v35 = vld [vmem:[%s21434_s2 + $0x7ac] ss:$16 sps:$4 sm:$0xff]   ;;  %v15811_v8 = vld [vmem:[%s21434_s2 + $0x7a0] ss:$16 sps:$4 sm:$0xff]  }
 0x613   :  { %11804 = vmatprep.subr.bf16.mxu0 %v15762_v2  ;;  %v15814_v2 = vld [vmem:[%s21434_s2 + $0x7a8] ss:$16 sps:$4 sm:$0xff]  }
 0x615   :  { %11436 = vmatpush1.bf16.msra.mxu1 %v15757_v47  ;;  %v15819_v47 = vld [vmem:[%s21434_s2 + $0x7c4] ss:$16 sps:$4 sm:$0xff]  }
 0x616   :  { %11805 = vmatpush1.bf16.msra.mxu0 %v15760_v48  ;;  %11437 = vmatprep.subr.bf16.mxu1 %v15765_v49  ;;  %v15822_v48 = vld [vmem:[%s21434_s2 + $0x7cc] ss:$16 sps:$4 sm:$0xff]   ;;  %v15817_v49 = vld [vmem:[%s21434_s2 + $0x7c0] ss:$16 sps:$4 sm:$0xff]  }
 0x617   :  { %v7883_v54 = vpop.f32.mrb[32].mxu1  ;;  %11806 = vmatprep.subr.bf16.mxu0 %v15768_v50  ;;  %v15820_v50 = vld [vmem:[%s21434_s2 + $0x7c8] ss:$16 sps:$4 sm:$0xff]  }
 0x618   :  { %v8002_v57 = vmul.f32 %v7883_v54, %v7883_v54  ;;  %v7965_v58 = vpop.f32.mrb[32].mxu0  ;;  %v7885_v60 = vpop.f32.mrb[33].mxu1  ;;  %v15826_v54 = vld [vmem:[%s21434_s2 + $0x7e8] ss:$16 sps:$4 sm:$0xff]  }
 0x619   :  { %v8004_v6 = vmul.f32 %v7965_v58, %v7965_v58  ;;  %v8003_v0 = vmul.f32 %v7885_v60, %v7885_v60  ;;  %v7967_v27 = vpop.f32.mrb[33].mxu0  ;;  %v7887_v30 = vpop.f32.mrb[34].mxu1  ;;  %11438 = vmatpush1.bf16.msra.mxu1 %v15763_v51  ;;  %v15825_v51 = vld [vmem:[%s21434_s2 + $0x7e4] ss:$16 sps:$4 sm:$0xff]   ;;  %v8029_v58 = vpack.c.bf16 %v19614_v19, %v19614_v19  ;;  %v15832_v60 = vld [vmem:[%s21434_s2 + $0x808] ss:$16 sps:$4 sm:$0xff]  }
 0x61a   :  { %v20417_v29 = vadd.f32 %v8002_v57, %v7985_v56  ;;  %v8005_v7 = vmul.f32 %v7967_v27, %v7967_v27  ;;  %v7969_v10 = vpop.f32.mrb[34].mxu0  ;;  %11807 = vmatpush1.bf16.msra.mxu0 %v15766_v52  ;;  %v7888_v28 = vpop.f32.mrb[35].mxu1  ;;  %11439 = vmatprep.subr.bf16.mxu1 %v15771_v53  ;;  %v15828_v52 = vld [vmem:[%s21434_s2 + $0x7ec] ss:$16 sps:$4 sm:$0xff]   ;;  %v15823_v53 = vld [vmem:[%s21434_s2 + $0x7e0] ss:$16 sps:$4 sm:$0xff]  }
 0x61b   :  { %v20425_v31 = vadd.f32 %v8004_v6, %v7987_v11  ;;  %v20427_v13 = vadd.f32 %v8003_v0, %v7986_v3  ;;  %v7970_v37 = vpop.f32.mrb[35].mxu0  ;;  %11808 = vmatprep.subr.bf16.mxu0 %v15774_v55  ;;  %v15831_v55 = vld [vmem:[%s21434_s2 + $0x804] ss:$16 sps:$4 sm:$0xff]   ;;  %v15834_v56 = vld [vmem:[%s21434_s2 + $0x80c] ss:$16 sps:$4 sm:$0xff]   ;;  %v8032_v11 = vpack.c.bf16 %v20018_v41, %v20018_v41 }
 0x61c   :  { %v20432_v63 = vadd.f32 %v8005_v7, %v7988_v45  ;;  %v15829_v57 = vld [vmem:[%s21434_s2 + $0x800] ss:$16 sps:$4 sm:$0xff]   ;;  %v15837_v3 = vld [vmem:[%s21434_s2 + $0x824] ss:$16 sps:$4 sm:$0xff]   ;;  %v15840_v6 = vld [vmem:[%s21434_s2 + $0x82c] ss:$16 sps:$4 sm:$0xff]  }
 0x61d   :  { %11440 = vmatpush1.bf16.msra.mxu1 %v15769_v1  ;;  %v15835_v19 = vld [vmem:[%s21434_s2 + $0x820] ss:$16 sps:$4 sm:$0xff]   ;;  %v15838_v0 = vld [vmem:[%s21434_s2 + $0x828] ss:$16 sps:$4 sm:$0xff]   ;;  %v15843_v41 = vld [vmem:[%s21434_s2 + $0x844] ss:$16 sps:$4 sm:$0xff]  }
 0x61e   :  { %11809 = vmatpush1.bf16.msra.mxu0 %v15772_v38  ;;  %11441 = vmatprep.subr.bf16.mxu1 %v15777_v12  ;;  %v15846_v27 = vld [vmem:[%s21434_s2 + $0x84c] ss:$16 sps:$4 sm:$0xff]   ;;  %v15841_v30 = vld [vmem:[%s21434_s2 + $0x840] ss:$16 sps:$4 sm:$0xff]   ;;  %v15844_v1 = vld [vmem:[%s21434_s2 + $0x848] ss:$16 sps:$4 sm:$0xff]  }
 0x61f   :  { %11810 = vmatprep.subr.bf16.mxu0 %v15780_v33  ;;  %v15849_v45 = vld [vmem:[%s21434_s2 + $0x864] ss:$16 sps:$4 sm:$0xff]   ;;  %v15852_v7 = vld [vmem:[%s21434_s2 + $0x86c] ss:$16 sps:$4 sm:$0xff]   ;;  %v15847_v10 = vld [vmem:[%s21434_s2 + $0x860] ss:$16 sps:$4 sm:$0xff]  }
 0x620   :  { %v15850_v28 = vld [vmem:[%s21434_s2 + $0x868] ss:$16 sps:$4 sm:$0xff]   ;;  %v15855_v38 = vld [vmem:[%s21434_s2 + $0x884] ss:$16 sps:$4 sm:$0xff]   ;;  %v15858_v12 = vld [vmem:[%s21434_s2 + $0x88c] ss:$16 sps:$4 sm:$0xff]  }
 0x621   :  { %11442 = vmatpush1.bf16.msra.mxu1 %v15775_v14  ;;  %v15853_v37 = vld [vmem:[%s21434_s2 + $0x880] ss:$16 sps:$4 sm:$0xff]   ;;  %v15856_v33 = vld [vmem:[%s21434_s2 + $0x888] ss:$16 sps:$4 sm:$0xff]   ;;  %v15861_v14 = vld [vmem:[%s21434_s2 + $0x8a4] ss:$16 sps:$4 sm:$0xff]  }
 0x622   :  { %11811 = vmatpush1.bf16.msra.mxu0 %v15778_v15  ;;  %11443 = vmatprep.subr.bf16.mxu1 %v15783_v4  ;;  %v15864_v15 = vld [vmem:[%s21434_s2 + $0x8ac] ss:$16 sps:$4 sm:$0xff]   ;;  %v15859_v4 = vld [vmem:[%s21434_s2 + $0x8a0] ss:$16 sps:$4 sm:$0xff]  }
 0x623   :  { %11812 = vmatprep.subr.bf16.mxu0 %v15786_v59  ;;  %v15862_v59 = vld [vmem:[%s21434_s2 + $0x8a8] ss:$16 sps:$4 sm:$0xff]  }
 0x625   :  { %11444 = vmatpush1.bf16.msra.mxu1 %v15781_v16  ;;  %v15867_v16 = vld [vmem:[%s21434_s2 + $0x8c4] ss:$16 sps:$4 sm:$0xff]  }
 0x626   :  { %11813 = vmatpush1.bf16.msra.mxu0 %v15784_v5  ;;  %11445 = vmatprep.subr.bf16.mxu1 %v15789_v62  ;;  %v15870_v5 = vld [vmem:[%s21434_s2 + $0x8cc] ss:$16 sps:$4 sm:$0xff]   ;;  %v15865_v62 = vld [vmem:[%s21434_s2 + $0x8c0] ss:$16 sps:$4 sm:$0xff]  }
 0x627   :  { %11814 = vmatprep.subr.bf16.mxu0 %v15792_v44  ;;  %v15868_v44 = vld [vmem:[%s21434_s2 + $0x8c8] ss:$16 sps:$4 sm:$0xff]  }
 0x629   :  { %11446 = vmatpush1.bf16.msra.mxu1 %v15787_v17  ;;  %v15873_v17 = vld [vmem:[%s21434_s2 + $0x8e4] ss:$16 sps:$4 sm:$0xff]  }
 0x62a   :  { %11815 = vmatpush1.bf16.msra.mxu0 %v15790_v61  ;;  %11447 = vmatprep.subr.bf16.mxu1 %v15795_v43  ;;  %v15876_v61 = vld [vmem:[%s21434_s2 + $0x8ec] ss:$16 sps:$4 sm:$0xff]   ;;  %v15871_v43 = vld [vmem:[%s21434_s2 + $0x8e0] ss:$16 sps:$4 sm:$0xff]  }
 0x62b   :  { %11816 = vmatprep.subr.bf16.mxu0 %v15798_v23  ;;  %v15874_v23 = vld [vmem:[%s21434_s2 + $0x8e8] ss:$16 sps:$4 sm:$0xff]  }
 0x62d   :  { %11448 = vmatpush1.bf16.msra.mxu1 %v15793_v24  ;;  %v15879_v24 = vld [vmem:[%s21434_s2 + $0x904] ss:$16 sps:$4 sm:$0xff]  }
 0x62e   :  { %11817 = vmatpush1.bf16.msra.mxu0 %v15796_v25  ;;  %11449 = vmatprep.subr.bf16.mxu1 %v15801_v9  ;;  %v15882_v25 = vld [vmem:[%s21434_s2 + $0x90c] ss:$16 sps:$4 sm:$0xff]   ;;  %v15877_v9 = vld [vmem:[%s21434_s2 + $0x900] ss:$16 sps:$4 sm:$0xff]  }
 0x62f   :  { %11818 = vmatprep.subr.bf16.mxu0 %v15804_v26  ;;  %v15880_v26 = vld [vmem:[%s21434_s2 + $0x908] ss:$16 sps:$4 sm:$0xff]  }
 0x631   :  { %11450 = vmatpush1.bf16.msra.mxu1 %v15799_v18  ;;  %v15885_v18 = vld [vmem:[%s21434_s2 + $0x924] ss:$16 sps:$4 sm:$0xff]  }
 0x632   :  { %11819 = vmatpush1.bf16.msra.mxu0 %v15802_v36  ;;  %11451 = vmatprep.subr.bf16.mxu1 %v15807_v39  ;;  %v15888_v36 = vld [vmem:[%s21434_s2 + $0x92c] ss:$16 sps:$4 sm:$0xff]   ;;  %v15883_v39 = vld [vmem:[%s21434_s2 + $0x920] ss:$16 sps:$4 sm:$0xff]  }
 0x633   :  { %11820 = vmatprep.subr.bf16.mxu0 %v15810_v40  ;;  %v15886_v40 = vld [vmem:[%s21434_s2 + $0x928] ss:$16 sps:$4 sm:$0xff]  }
 0x635   :  { %11452 = vmatpush1.bf16.msra.mxu1 %v15805_v42  ;;  %v15891_v42 = vld [vmem:[%s21434_s2 + $0x944] ss:$16 sps:$4 sm:$0xff]  }
 0x636   :  { %11821 = vmatpush1.bf16.msra.mxu0 %v15808_v32  ;;  %11453 = vmatprep.subr.bf16.mxu1 %v15813_v46  ;;  %v15894_v32 = vld [vmem:[%s21434_s2 + $0x94c] ss:$16 sps:$4 sm:$0xff]   ;;  %v15889_v46 = vld [vmem:[%s21434_s2 + $0x940] ss:$16 sps:$4 sm:$0xff]  }
 0x637   :  { %11822 = vmatprep.subr.bf16.mxu0 %v15816_v35  ;;  %v15892_v35 = vld [vmem:[%s21434_s2 + $0x948] ss:$16 sps:$4 sm:$0xff]  }
 0x639   :  { %11454 = vmatpush1.bf16.msra.mxu1 %v15811_v8  ;;  %v15897_v8 = vld [vmem:[%s21434_s2 + $0x964] ss:$16 sps:$4 sm:$0xff]  }
 0x63a   :  { %11823 = vmatpush1.bf16.msra.mxu0 %v15814_v2  ;;  %11455 = vmatprep.subr.bf16.mxu1 %v15819_v47  ;;  %v15900_v2 = vld [vmem:[%s21434_s2 + $0x96c] ss:$16 sps:$4 sm:$0xff]   ;;  %v15895_v47 = vld [vmem:[%s21434_s2 + $0x960] ss:$16 sps:$4 sm:$0xff]  }
 0x63b   :  { %11824 = vmatprep.subr.bf16.mxu0 %v15822_v48  ;;  %v15898_v48 = vld [vmem:[%s21434_s2 + $0x968] ss:$16 sps:$4 sm:$0xff]  }
 0x63d   :  { %11456 = vmatpush1.bf16.msra.mxu1 %v15817_v49  ;;  %v15903_v49 = vld [vmem:[%s21434_s2 + $0x984] ss:$16 sps:$4 sm:$0xff]  }
 0x63e   :  { %11825 = vmatpush1.bf16.msra.mxu0 %v15820_v50  ;;  %11457 = vmatprep.subr.bf16.mxu1 %v15825_v51  ;;  %v15906_v50 = vld [vmem:[%s21434_s2 + $0x98c] ss:$16 sps:$4 sm:$0xff]   ;;  %v15901_v51 = vld [vmem:[%s21434_s2 + $0x980] ss:$16 sps:$4 sm:$0xff]  }
 0x63f   :  { %11826 = vmatprep.subr.bf16.mxu0 %v15828_v52  ;;  %v15904_v52 = vld [vmem:[%s21434_s2 + $0x988] ss:$16 sps:$4 sm:$0xff]  }
 0x641   :  { %11458 = vmatpush1.bf16.msra.mxu1 %v15823_v53  ;;  %v15909_v53 = vld [vmem:[%s21434_s2 + $0x9a4] ss:$16 sps:$4 sm:$0xff]  }
 0x642   :  { %11827 = vmatpush1.bf16.msra.mxu0 %v15826_v54  ;;  %11468 = vmatprep.subr.bf16.mxu1 %v15831_v55  ;;  %v15912_v54 = vld [vmem:[%s21434_s2 + $0x9ac] ss:$16 sps:$4 sm:$0xff]   ;;  %v15907_v55 = vld [vmem:[%s21434_s2 + $0x9a0] ss:$16 sps:$4 sm:$0xff]  }
 0x643   :  { %11837 = vmatprep.subr.bf16.mxu0 %v15834_v56  ;;  %v15910_v56 = vld [vmem:[%s21434_s2 + $0x9a8] ss:$16 sps:$4 sm:$0xff]  }
 0x644   :  { %11460 = vmatmul.mubr.bf16.vlgmr.msra.gmra.mrb[36].mxu1 %v8029_v58 }
 0x645   :  { %11829 = vmatmul.mubr.bf16.vlgmr.msra.gmra.mrb[36].mxu0 %v8029_v58  ;;  %11469 = vmatpush1.bf16.msra.mxu1 %v15829_v57  ;;  %v15915_v57 = vld [vmem:[%s21434_s2 + $0x9c4] ss:$16 sps:$4 sm:$0xff]   ;;  %v15918_v58 = vld [vmem:[%s21434_s2 + $0x9cc] ss:$16 sps:$4 sm:$0xff]  }
 0x646   :  { %11500 = vmatprep.mubr.bf16.mxu1 %v8032_v11  ;;  %11838 = vmatpush1.bf16.msra.mxu0 %v15832_v60  ;;  %v15913_v60 = vld [vmem:[%s21434_s2 + $0x9c0] ss:$16 sps:$4 sm:$0xff]  }
 0x647   :  { %11869 = vmatprep.mubr.bf16.mxu0 %v8032_v11  ;;  %11470 = vmatprep.subr.bf16.mxu1 %v15837_v3  ;;  %v15916_v3 = vld [vmem:[%s21434_s2 + $0x9c8] ss:$16 sps:$4 sm:$0xff]   ;;  %v15921_v11 = vld [vmem:[%s21434_s2 + $0x9e4] ss:$16 sps:$4 sm:$0xff]  }
 0x648   :  { %11839 = vmatprep.subr.bf16.mxu0 %v15840_v6  ;;  %v15924_v6 = vld [vmem:[%s21434_s2 + $0x9ec] ss:$16 sps:$4 sm:$0xff]  }
 0x649   :  { %11471 = vmatpush1.bf16.msra.mxu1 %v15835_v19  ;;  %v15919_v19 = vld [vmem:[%s21434_s2 + $0x9e0] ss:$16 sps:$4 sm:$0xff]  }
 0x64a   :  { %11840 = vmatpush1.bf16.msra.mxu0 %v15838_v0  ;;  %11472 = vmatprep.subr.bf16.mxu1 %v15843_v41  ;;  %v15922_v0 = vld [vmem:[%s21434_s2 + $0x9e8] ss:$16 sps:$4 sm:$0xff]   ;;  %v15927_v41 = vld [vmem:[%s21434_s2 + $0xa04] ss:$16 sps:$4 sm:$0xff]  }
 0x64b   :  { %11841 = vmatprep.subr.bf16.mxu0 %v15846_v27  ;;  %v15930_v27 = vld [vmem:[%s21434_s2 + $0xa0c] ss:$16 sps:$4 sm:$0xff]  }
 0x64d   :  { %11473 = vmatpush1.bf16.msra.mxu1 %v15841_v30  ;;  %v15925_v30 = vld [vmem:[%s21434_s2 + $0xa00] ss:$16 sps:$4 sm:$0xff]  }
 0x64e   :  { %11842 = vmatpush1.bf16.msra.mxu0 %v15844_v1  ;;  %11474 = vmatprep.subr.bf16.mxu1 %v15849_v45  ;;  %v8031_v1 = vpack.c.bf16 %v19616_v21, %v19616_v21  ;;  %v15928_v45 = vld [vmem:[%s21434_s2 + $0xa08] ss:$16 sps:$4 sm:$0xff]   ;;  %v15931_v21 = vld [vmem:[%s21434_s2 + $0xa20] ss:$16 sps:$4 sm:$0xff]  }
 0x64f   :  { %11843 = vmatprep.subr.bf16.mxu0 %v15852_v7  ;;  %v15933_v7 = vld [vmem:[%s21434_s2 + $0xa24] ss:$16 sps:$4 sm:$0xff]  }
 0x651   :  { %11475 = vmatpush1.bf16.msra.mxu1 %v15847_v10  ;;  %v8034_v10 = vpack.c.bf16 %v20020_v34, %v20020_v34  ;;  %v15939_v34 = vld [vmem:[%s21434_s2 + $0xa44] ss:$16 sps:$4 sm:$0xff]  }
 0x652   :  { %11844 = vmatpush1.bf16.msra.mxu0 %v15850_v28  ;;  %11476 = vmatprep.subr.bf16.mxu1 %v15855_v38  ;;  %v15936_v28 = vld [vmem:[%s21434_s2 + $0xa2c] ss:$16 sps:$4 sm:$0xff]   ;;  %v15934_v38 = vld [vmem:[%s21434_s2 + $0xa28] ss:$16 sps:$4 sm:$0xff]  }
 0x653   :  { %11845 = vmatprep.subr.bf16.mxu0 %v15858_v12  ;;  %v15942_v12 = vld [vmem:[%s21434_s2 + $0xa4c] ss:$16 sps:$4 sm:$0xff]  }
 0x655   :  { %11477 = vmatpush1.bf16.msra.mxu1 %v15853_v37  ;;  %v15937_v37 = vld [vmem:[%s21434_s2 + $0xa40] ss:$16 sps:$4 sm:$0xff]  }
 0x656   :  { %11846 = vmatpush1.bf16.msra.mxu0 %v15856_v33  ;;  %11478 = vmatprep.subr.bf16.mxu1 %v15861_v14  ;;  %v15940_v33 = vld [vmem:[%s21434_s2 + $0xa48] ss:$16 sps:$4 sm:$0xff]   ;;  %v15945_v14 = vld [vmem:[%s21434_s2 + $0xa64] ss:$16 sps:$4 sm:$0xff]  }
 0x657   :  { %11847 = vmatprep.subr.bf16.mxu0 %v15864_v15  ;;  %v15948_v15 = vld [vmem:[%s21434_s2 + $0xa6c] ss:$16 sps:$4 sm:$0xff]  }
 0x659   :  { %11479 = vmatpush1.bf16.msra.mxu1 %v15859_v4  ;;  %v15943_v4 = vld [vmem:[%s21434_s2 + $0xa60] ss:$16 sps:$4 sm:$0xff]  }
 0x65a   :  { %11848 = vmatpush1.bf16.msra.mxu0 %v15862_v59  ;;  %11480 = vmatprep.subr.bf16.mxu1 %v15867_v16  ;;  %v15946_v59 = vld [vmem:[%s21434_s2 + $0xa68] ss:$16 sps:$4 sm:$0xff]   ;;  %v15951_v16 = vld [vmem:[%s21434_s2 + $0xa84] ss:$16 sps:$4 sm:$0xff]  }
 0x65b   :  { %11849 = vmatprep.subr.bf16.mxu0 %v15870_v5  ;;  %v15954_v5 = vld [vmem:[%s21434_s2 + $0xa8c] ss:$16 sps:$4 sm:$0xff]  }
 0x65d   :  { %11481 = vmatpush1.bf16.msra.mxu1 %v15865_v62  ;;  %v15949_v62 = vld [vmem:[%s21434_s2 + $0xa80] ss:$16 sps:$4 sm:$0xff]  }
 0x65e   :  { %11850 = vmatpush1.bf16.msra.mxu0 %v15868_v44  ;;  %11482 = vmatprep.subr.bf16.mxu1 %v15873_v17  ;;  %v15952_v44 = vld [vmem:[%s21434_s2 + $0xa88] ss:$16 sps:$4 sm:$0xff]   ;;  %v15957_v17 = vld [vmem:[%s21434_s2 + $0xaa4] ss:$16 sps:$4 sm:$0xff]  }
 0x65f   :  { %11851 = vmatprep.subr.bf16.mxu0 %v15876_v61  ;;  %v15960_v61 = vld [vmem:[%s21434_s2 + $0xaac] ss:$16 sps:$4 sm:$0xff]  }
 0x661   :  { %11483 = vmatpush1.bf16.msra.mxu1 %v15871_v43  ;;  %v15955_v43 = vld [vmem:[%s21434_s2 + $0xaa0] ss:$16 sps:$4 sm:$0xff]  }
 0x662   :  { %11852 = vmatpush1.bf16.msra.mxu0 %v15874_v23  ;;  %11484 = vmatprep.subr.bf16.mxu1 %v15879_v24  ;;  %v15958_v23 = vld [vmem:[%s21434_s2 + $0xaa8] ss:$16 sps:$4 sm:$0xff]   ;;  %v15963_v24 = vld [vmem:[%s21434_s2 + $0xac4] ss:$16 sps:$4 sm:$0xff]  }
 0x663   :  { %11853 = vmatprep.subr.bf16.mxu0 %v15882_v25  ;;  %v15966_v25 = vld [vmem:[%s21434_s2 + $0xacc] ss:$16 sps:$4 sm:$0xff]  }
 0x665   :  { %11485 = vmatpush1.bf16.msra.mxu1 %v15877_v9  ;;  %v15961_v9 = vld [vmem:[%s21434_s2 + $0xac0] ss:$16 sps:$4 sm:$0xff]  }
 0x666   :  { %11854 = vmatpush1.bf16.msra.mxu0 %v15880_v26  ;;  %11486 = vmatprep.subr.bf16.mxu1 %v15885_v18  ;;  %v15964_v26 = vld [vmem:[%s21434_s2 + $0xac8] ss:$16 sps:$4 sm:$0xff]   ;;  %v15969_v18 = vld [vmem:[%s21434_s2 + $0xae4] ss:$16 sps:$4 sm:$0xff]  }
 0x667   :  { %11855 = vmatprep.subr.bf16.mxu0 %v15888_v36  ;;  %v15972_v36 = vld [vmem:[%s21434_s2 + $0xaec] ss:$16 sps:$4 sm:$0xff]  }
 0x669   :  { %11487 = vmatpush1.bf16.msra.mxu1 %v15883_v39  ;;  %v15967_v39 = vld [vmem:[%s21434_s2 + $0xae0] ss:$16 sps:$4 sm:$0xff]  }
 0x66a   :  { %11856 = vmatpush1.bf16.msra.mxu0 %v15886_v40  ;;  %11488 = vmatprep.subr.bf16.mxu1 %v15891_v42  ;;  %v15970_v40 = vld [vmem:[%s21434_s2 + $0xae8] ss:$16 sps:$4 sm:$0xff]   ;;  %v15975_v42 = vld [vmem:[%s21434_s2 + $0xb04] ss:$16 sps:$4 sm:$0xff]  }
 0x66b   :  { %11857 = vmatprep.subr.bf16.mxu0 %v15894_v32  ;;  %v15978_v32 = vld [vmem:[%s21434_s2 + $0xb0c] ss:$16 sps:$4 sm:$0xff]  }
 0x66d   :  { %11489 = vmatpush1.bf16.msra.mxu1 %v15889_v46  ;;  %v15973_v46 = vld [vmem:[%s21434_s2 + $0xb00] ss:$16 sps:$4 sm:$0xff]  }
 0x66e   :  { %11858 = vmatpush1.bf16.msra.mxu0 %v15892_v35  ;;  %11490 = vmatprep.subr.bf16.mxu1 %v15897_v8  ;;  %v15976_v35 = vld [vmem:[%s21434_s2 + $0xb08] ss:$16 sps:$4 sm:$0xff]   ;;  %v15981_v8 = vld [vmem:[%s21434_s2 + $0xb24] ss:$16 sps:$4 sm:$0xff]  }
 0x66f   :  { %11859 = vmatprep.subr.bf16.mxu0 %v15900_v2  ;;  %v15984_v2 = vld [vmem:[%s21434_s2 + $0xb2c] ss:$16 sps:$4 sm:$0xff]  }
 0x671   :  { %11491 = vmatpush1.bf16.msra.mxu1 %v15895_v47  ;;  %v15979_v47 = vld [vmem:[%s21434_s2 + $0xb20] ss:$16 sps:$4 sm:$0xff]  }
 0x672   :  { %11860 = vmatpush1.bf16.msra.mxu0 %v15898_v48  ;;  %11492 = vmatprep.subr.bf16.mxu1 %v15903_v49  ;;  %v15982_v48 = vld [vmem:[%s21434_s2 + $0xb28] ss:$16 sps:$4 sm:$0xff]   ;;  %v15987_v49 = vld [vmem:[%s21434_s2 + $0xb44] ss:$16 sps:$4 sm:$0xff]  }
 0x673   :  { %11861 = vmatprep.subr.bf16.mxu0 %v15906_v50  ;;  %v15990_v50 = vld [vmem:[%s21434_s2 + $0xb4c] ss:$16 sps:$4 sm:$0xff]  }
 0x675   :  { %11493 = vmatpush1.bf16.msra.mxu1 %v15901_v51  ;;  %v15985_v51 = vld [vmem:[%s21434_s2 + $0xb40] ss:$16 sps:$4 sm:$0xff]  }
 0x676   :  { %11862 = vmatpush1.bf16.msra.mxu0 %v15904_v52  ;;  %11494 = vmatprep.subr.bf16.mxu1 %v15909_v53  ;;  %v15988_v52 = vld [vmem:[%s21434_s2 + $0xb48] ss:$16 sps:$4 sm:$0xff]   ;;  %v15993_v53 = vld [vmem:[%s21434_s2 + $0xb64] ss:$16 sps:$4 sm:$0xff]  }
 0x677   :  { %11863 = vmatprep.subr.bf16.mxu0 %v15912_v54  ;;  %v15996_v54 = vld [vmem:[%s21434_s2 + $0xb6c] ss:$16 sps:$4 sm:$0xff]  }
 0x679   :  { %11495 = vmatpush1.bf16.msra.mxu1 %v15907_v55  ;;  %v15991_v55 = vld [vmem:[%s21434_s2 + $0xb60] ss:$16 sps:$4 sm:$0xff]  }
 0x67a   :  { %11864 = vmatpush1.bf16.msra.mxu0 %v15910_v56  ;;  %11496 = vmatprep.subr.bf16.mxu1 %v15915_v57  ;;  %v15994_v56 = vld [vmem:[%s21434_s2 + $0xb68] ss:$16 sps:$4 sm:$0xff]   ;;  %v15999_v57 = vld [vmem:[%s21434_s2 + $0xb84] ss:$16 sps:$4 sm:$0xff]  }
 0x67b   :  { %11865 = vmatprep.subr.bf16.mxu0 %v15918_v58  ;;  %v16002_v58 = vld [vmem:[%s21434_s2 + $0xb8c] ss:$16 sps:$4 sm:$0xff]  }
 0x67d   :  { %11497 = vmatpush1.bf16.msra.mxu1 %v15913_v60  ;;  %v15997_v60 = vld [vmem:[%s21434_s2 + $0xb80] ss:$16 sps:$4 sm:$0xff]  }
 0x67e   :  { %11866 = vmatpush1.bf16.msra.mxu0 %v15916_v3  ;;  %11498 = vmatprep.subr.bf16.mxu1 %v15921_v11  ;;  %v16000_v3 = vld [vmem:[%s21434_s2 + $0xb88] ss:$16 sps:$4 sm:$0xff]   ;;  %v16005_v11 = vld [vmem:[%s21434_s2 + $0xba4] ss:$16 sps:$4 sm:$0xff]  }
 0x67f   :  { %11867 = vmatprep.subr.bf16.mxu0 %v15924_v6  ;;  %v16008_v6 = vld [vmem:[%s21434_s2 + $0xbac] ss:$16 sps:$4 sm:$0xff]  }
 0x681   :  { %11499 = vmatpush1.bf16.msra.mxu1 %v15919_v19  ;;  %v16003_v19 = vld [vmem:[%s21434_s2 + $0xba0] ss:$16 sps:$4 sm:$0xff]  }
 0x682   :  { %11868 = vmatpush1.bf16.msra.mxu0 %v15922_v0  ;;  %11509 = vmatprep.subr.bf16.mxu1 %v15927_v41  ;;  %v16006_v0 = vld [vmem:[%s21434_s2 + $0xba8] ss:$16 sps:$4 sm:$0xff]   ;;  %v16011_v41 = vld [vmem:[%s21434_s2 + $0xbc4] ss:$16 sps:$4 sm:$0xff]  }
 0x683   :  { %11878 = vmatprep.subr.bf16.mxu0 %v15930_v27  ;;  %v16014_v27 = vld [vmem:[%s21434_s2 + $0xbcc] ss:$16 sps:$4 sm:$0xff]  }
 0x684   :  { %11501 = vmatmul.mubr.bf16.vlgmr.msra.gmra.mrb[36].mxu1 %v8031_v1 }
 0x685   :  { %11870 = vmatmul.mubr.bf16.vlgmr.msra.gmra.mrb[36].mxu0 %v8031_v1  ;;  %11510 = vmatpush1.bf16.msra.mxu1 %v15925_v30  ;;  %v16009_v30 = vld [vmem:[%s21434_s2 + $0xbc0] ss:$16 sps:$4 sm:$0xff]   ;;  %v16012_v1 = vld [vmem:[%s21434_s2 + $0xbc8] ss:$16 sps:$4 sm:$0xff]  }
 0x686   :  { %11541 = vmatprep.mubr.bf16.mxu1 %v8034_v10  ;;  %11879 = vmatpush1.bf16.msra.mxu0 %v15928_v45  ;;  %v16017_v45 = vld [vmem:[%s21434_s2 + $0xbe4] ss:$16 sps:$4 sm:$0xff]  }
 0x687   :  { %11910 = vmatprep.mubr.bf16.mxu0 %v8034_v10  ;;  %11511 = vmatprep.subr.bf16.mxu1 %v15933_v7  ;;  %v16020_v7 = vld [vmem:[%s21434_s2 + $0xbec] ss:$16 sps:$4 sm:$0xff]   ;;  %v16015_v10 = vld [vmem:[%s21434_s2 + $0xbe0] ss:$16 sps:$4 sm:$0xff]  }
 0x688   :  { %11880 = vmatprep.subr.bf16.mxu0 %v15936_v28  ;;  %v16018_v28 = vld [vmem:[%s21434_s2 + $0xbe8] ss:$16 sps:$4 sm:$0xff]  }
 0x689   :  { %11512 = vmatpush1.bf16.msra.mxu1 %v15931_v21  ;;  %v16023_v21 = vld [vmem:[%s21434_s2 + $0xc04] ss:$16 sps:$4 sm:$0xff]  }
 0x68a   :  { %11881 = vmatpush1.bf16.msra.mxu0 %v15934_v38  ;;  %11513 = vmatprep.subr.bf16.mxu1 %v15939_v34  ;;  %v16026_v38 = vld [vmem:[%s21434_s2 + $0xc0c] ss:$16 sps:$4 sm:$0xff]   ;;  %v16021_v34 = vld [vmem:[%s21434_s2 + $0xc00] ss:$16 sps:$4 sm:$0xff]  }
 0x68b   :  { %11882 = vmatprep.subr.bf16.mxu0 %v15942_v12  ;;  %v8033_v12 = vpack.c.bf16 %v20022_v20, %v20022_v20  ;;  %v16027_v20 = vld [vmem:[%s21434_s2 + $0xc20] ss:$16 sps:$4 sm:$0xff]  }
 0x68d   :  { %11514 = vmatpush1.bf16.msra.mxu1 %v15937_v37  ;;  %v16024_v37 = vld [vmem:[%s21434_s2 + $0xc08] ss:$16 sps:$4 sm:$0xff]  }
 0x68e   :  { %11883 = vmatpush1.bf16.msra.mxu0 %v15940_v33  ;;  %11515 = vmatprep.subr.bf16.mxu1 %v15945_v14  ;;  %v16029_v33 = vld [vmem:[%s21434_s2 + $0xc24] ss:$16 sps:$4 sm:$0xff]   ;;  %v8036_v14 = vpack.c.bf16 %v20417_v29, %v20417_v29 }
 0x68f   :  { %11884 = vmatprep.subr.bf16.mxu0 %v15948_v15  ;;  %v16032_v15 = vld [vmem:[%s21434_s2 + $0xc2c] ss:$16 sps:$4 sm:$0xff]   ;;  %v16035_v29 = vld [vmem:[%s21434_s2 + $0xc44] ss:$16 sps:$4 sm:$0xff]  }
 0x691   :  { %11516 = vmatpush1.bf16.msra.mxu1 %v15943_v4  ;;  %v16030_v4 = vld [vmem:[%s21434_s2 + $0xc28] ss:$16 sps:$4 sm:$0xff]  }
 0x692   :  { %11885 = vmatpush1.bf16.msra.mxu0 %v15946_v59  ;;  %11517 = vmatprep.subr.bf16.mxu1 %v15951_v16  ;;  %v16038_v59 = vld [vmem:[%s21434_s2 + $0xc4c] ss:$16 sps:$4 sm:$0xff]   ;;  %v16033_v16 = vld [vmem:[%s21434_s2 + $0xc40] ss:$16 sps:$4 sm:$0xff]  }
 0x693   :  { %11886 = vmatprep.subr.bf16.mxu0 %v15954_v5  ;;  %v16036_v5 = vld [vmem:[%s21434_s2 + $0xc48] ss:$16 sps:$4 sm:$0xff]  }
 0x695   :  { %11518 = vmatpush1.bf16.msra.mxu1 %v15949_v62  ;;  %v16041_v62 = vld [vmem:[%s21434_s2 + $0xc64] ss:$16 sps:$4 sm:$0xff]  }
 0x696   :  { %11887 = vmatpush1.bf16.msra.mxu0 %v15952_v44  ;;  %11519 = vmatprep.subr.bf16.mxu1 %v15957_v17  ;;  %v16044_v44 = vld [vmem:[%s21434_s2 + $0xc6c] ss:$16 sps:$4 sm:$0xff]   ;;  %v16039_v17 = vld [vmem:[%s21434_s2 + $0xc60] ss:$16 sps:$4 sm:$0xff]  }
 0x697   :  { %11888 = vmatprep.subr.bf16.mxu0 %v15960_v61  ;;  %v16042_v61 = vld [vmem:[%s21434_s2 + $0xc68] ss:$16 sps:$4 sm:$0xff]  }
 0x699   :  { %11520 = vmatpush1.bf16.msra.mxu1 %v15955_v43  ;;  %v16047_v43 = vld [vmem:[%s21434_s2 + $0xc84] ss:$16 sps:$4 sm:$0xff]  }
 0x69a   :  { %11889 = vmatpush1.bf16.msra.mxu0 %v15958_v23  ;;  %11521 = vmatprep.subr.bf16.mxu1 %v15963_v24  ;;  %v16050_v23 = vld [vmem:[%s21434_s2 + $0xc8c] ss:$16 sps:$4 sm:$0xff]   ;;  %v16045_v24 = vld [vmem:[%s21434_s2 + $0xc80] ss:$16 sps:$4 sm:$0xff]  }
 0x69b   :  { %11890 = vmatprep.subr.bf16.mxu0 %v15966_v25  ;;  %v16048_v25 = vld [vmem:[%s21434_s2 + $0xc88] ss:$16 sps:$4 sm:$0xff]  }
 0x69d   :  { %11522 = vmatpush1.bf16.msra.mxu1 %v15961_v9  ;;  %v16053_v9 = vld [vmem:[%s21434_s2 + $0xca4] ss:$16 sps:$4 sm:$0xff]  }
 0x69e   :  { %11891 = vmatpush1.bf16.msra.mxu0 %v15964_v26  ;;  %11523 = vmatprep.subr.bf16.mxu1 %v15969_v18  ;;  %v16056_v26 = vld [vmem:[%s21434_s2 + $0xcac] ss:$16 sps:$4 sm:$0xff]   ;;  %v16051_v18 = vld [vmem:[%s21434_s2 + $0xca0] ss:$16 sps:$4 sm:$0xff]  }
 0x69f   :  { %11892 = vmatprep.subr.bf16.mxu0 %v15972_v36  ;;  %v16054_v36 = vld [vmem:[%s21434_s2 + $0xca8] ss:$16 sps:$4 sm:$0xff]  }
 0x6a1   :  { %11524 = vmatpush1.bf16.msra.mxu1 %v15967_v39  ;;  %v16059_v39 = vld [vmem:[%s21434_s2 + $0xcc4] ss:$16 sps:$4 sm:$0xff]  }
 0x6a2   :  { %11893 = vmatpush1.bf16.msra.mxu0 %v15970_v40  ;;  %11525 = vmatprep.subr.bf16.mxu1 %v15975_v42  ;;  %v16062_v40 = vld [vmem:[%s21434_s2 + $0xccc] ss:$16 sps:$4 sm:$0xff]   ;;  %v16057_v42 = vld [vmem:[%s21434_s2 + $0xcc0] ss:$16 sps:$4 sm:$0xff]  }
 0x6a3   :  { %11894 = vmatprep.subr.bf16.mxu0 %v15978_v32  ;;  %v16060_v32 = vld [vmem:[%s21434_s2 + $0xcc8] ss:$16 sps:$4 sm:$0xff]  }
 0x6a5   :  { %11526 = vmatpush1.bf16.msra.mxu1 %v15973_v46  ;;  %v16065_v46 = vld [vmem:[%s21434_s2 + $0xce4] ss:$16 sps:$4 sm:$0xff]  }
 0x6a6   :  { %11895 = vmatpush1.bf16.msra.mxu0 %v15976_v35  ;;  %11527 = vmatprep.subr.bf16.mxu1 %v15981_v8  ;;  %v16068_v35 = vld [vmem:[%s21434_s2 + $0xcec] ss:$16 sps:$4 sm:$0xff]   ;;  %v16063_v8 = vld [vmem:[%s21434_s2 + $0xce0] ss:$16 sps:$4 sm:$0xff]  }
 0x6a7   :  { %11896 = vmatprep.subr.bf16.mxu0 %v15984_v2  ;;  %v16066_v2 = vld [vmem:[%s21434_s2 + $0xce8] ss:$16 sps:$4 sm:$0xff]  }
 0x6a9   :  { %11528 = vmatpush1.bf16.msra.mxu1 %v15979_v47  ;;  %v16071_v47 = vld [vmem:[%s21434_s2 + $0xd04] ss:$16 sps:$4 sm:$0xff]  }
 0x6aa   :  { %11897 = vmatpush1.bf16.msra.mxu0 %v15982_v48  ;;  %11529 = vmatprep.subr.bf16.mxu1 %v15987_v49  ;;  %v16074_v48 = vld [vmem:[%s21434_s2 + $0xd0c] ss:$16 sps:$4 sm:$0xff]   ;;  %v16069_v49 = vld [vmem:[%s21434_s2 + $0xd00] ss:$16 sps:$4 sm:$0xff]  }
 0x6ab   :  { %11898 = vmatprep.subr.bf16.mxu0 %v15990_v50  ;;  %v16072_v50 = vld [vmem:[%s21434_s2 + $0xd08] ss:$16 sps:$4 sm:$0xff]  }
 0x6ad   :  { %11530 = vmatpush1.bf16.msra.mxu1 %v15985_v51  ;;  %v16077_v51 = vld [vmem:[%s21434_s2 + $0xd24] ss:$16 sps:$4 sm:$0xff]  }
 0x6ae   :  { %11899 = vmatpush1.bf16.msra.mxu0 %v15988_v52  ;;  %11531 = vmatprep.subr.bf16.mxu1 %v15993_v53  ;;  %v16080_v52 = vld [vmem:[%s21434_s2 + $0xd2c] ss:$16 sps:$4 sm:$0xff]   ;;  %v16075_v53 = vld [vmem:[%s21434_s2 + $0xd20] ss:$16 sps:$4 sm:$0xff]  }
 0x6af   :  { %11900 = vmatprep.subr.bf16.mxu0 %v15996_v54  ;;  %v16078_v54 = vld [vmem:[%s21434_s2 + $0xd28] ss:$16 sps:$4 sm:$0xff]  }
 0x6b1   :  { %11532 = vmatpush1.bf16.msra.mxu1 %v15991_v55  ;;  %v16083_v55 = vld [vmem:[%s21434_s2 + $0xd44] ss:$16 sps:$4 sm:$0xff]  }
 0x6b2   :  { %11901 = vmatpush1.bf16.msra.mxu0 %v15994_v56  ;;  %11533 = vmatprep.subr.bf16.mxu1 %v15999_v57  ;;  %v16086_v56 = vld [vmem:[%s21434_s2 + $0xd4c] ss:$16 sps:$4 sm:$0xff]   ;;  %v16081_v57 = vld [vmem:[%s21434_s2 + $0xd40] ss:$16 sps:$4 sm:$0xff]  }
 0x6b3   :  { %11902 = vmatprep.subr.bf16.mxu0 %v16002_v58  ;;  %v16084_v58 = vld [vmem:[%s21434_s2 + $0xd48] ss:$16 sps:$4 sm:$0xff]  }
 0x6b5   :  { %11534 = vmatpush1.bf16.msra.mxu1 %v15997_v60  ;;  %v16089_v60 = vld [vmem:[%s21434_s2 + $0xd64] ss:$16 sps:$4 sm:$0xff]  }
 0x6b6   :  { %11903 = vmatpush1.bf16.msra.mxu0 %v16000_v3  ;;  %11535 = vmatprep.subr.bf16.mxu1 %v16005_v11  ;;  %v16092_v3 = vld [vmem:[%s21434_s2 + $0xd6c] ss:$16 sps:$4 sm:$0xff]   ;;  %v16087_v11 = vld [vmem:[%s21434_s2 + $0xd60] ss:$16 sps:$4 sm:$0xff]  }
 0x6b7   :  { %11904 = vmatprep.subr.bf16.mxu0 %v16008_v6  ;;  %v16090_v6 = vld [vmem:[%s21434_s2 + $0xd68] ss:$16 sps:$4 sm:$0xff]  }
 0x6b9   :  { %11536 = vmatpush1.bf16.msra.mxu1 %v16003_v19  ;;  %v16095_v19 = vld [vmem:[%s21434_s2 + $0xd84] ss:$16 sps:$4 sm:$0xff]  }
 0x6ba   :  { %11905 = vmatpush1.bf16.msra.mxu0 %v16006_v0  ;;  %11537 = vmatprep.subr.bf16.mxu1 %v16011_v41  ;;  %v16098_v0 = vld [vmem:[%s21434_s2 + $0xd8c] ss:$16 sps:$4 sm:$0xff]   ;;  %v16093_v41 = vld [vmem:[%s21434_s2 + $0xd80] ss:$16 sps:$4 sm:$0xff]  }
 0x6bb   :  { %11906 = vmatprep.subr.bf16.mxu0 %v16014_v27  ;;  %v16096_v27 = vld [vmem:[%s21434_s2 + $0xd88] ss:$16 sps:$4 sm:$0xff]  }
 0x6bd   :  { %11538 = vmatpush1.bf16.msra.mxu1 %v16009_v30  ;;  %v16101_v30 = vld [vmem:[%s21434_s2 + $0xda4] ss:$16 sps:$4 sm:$0xff]  }
 0x6be   :  { %11907 = vmatpush1.bf16.msra.mxu0 %v16012_v1  ;;  %11539 = vmatprep.subr.bf16.mxu1 %v16017_v45  ;;  %v16104_v1 = vld [vmem:[%s21434_s2 + $0xdac] ss:$16 sps:$4 sm:$0xff]   ;;  %v16099_v45 = vld [vmem:[%s21434_s2 + $0xda0] ss:$16 sps:$4 sm:$0xff]  }
 0x6bf   :  { %11908 = vmatprep.subr.bf16.mxu0 %v16020_v7  ;;  %v16102_v7 = vld [vmem:[%s21434_s2 + $0xda8] ss:$16 sps:$4 sm:$0xff]  }
 0x6c1   :  { %11540 = vmatpush1.bf16.msra.mxu1 %v16015_v10  ;;  %v16107_v10 = vld [vmem:[%s21434_s2 + $0xdc4] ss:$16 sps:$4 sm:$0xff]  }
 0x6c2   :  { %11909 = vmatpush1.bf16.msra.mxu0 %v16018_v28  ;;  %11550 = vmatprep.subr.bf16.mxu1 %v16023_v21  ;;  %v16110_v28 = vld [vmem:[%s21434_s2 + $0xdcc] ss:$16 sps:$4 sm:$0xff]   ;;  %v16105_v21 = vld [vmem:[%s21434_s2 + $0xdc0] ss:$16 sps:$4 sm:$0xff]  }
 0x6c3   :  { %11919 = vmatprep.subr.bf16.mxu0 %v16026_v38  ;;  %v16108_v38 = vld [vmem:[%s21434_s2 + $0xdc8] ss:$16 sps:$4 sm:$0xff]  }
 0x6c4   :  { %11542 = vmatmul.mubr.bf16.vlgmr.msra.gmra.mrb[36].mxu1 %v8033_v12 }
 0x6c5   :  { %11911 = vmatmul.mubr.bf16.vlgmr.msra.gmra.mrb[36].mxu0 %v8033_v12  ;;  %11551 = vmatpush1.bf16.msra.mxu1 %v16021_v34  ;;  %v16113_v34 = vld [vmem:[%s21434_s2 + $0xde4] ss:$16 sps:$4 sm:$0xff]   ;;  %v16116_v12 = vld [vmem:[%s21434_s2 + $0xdec] ss:$16 sps:$4 sm:$0xff]  }
 0x6c6   :  { %11582 = vmatprep.mubr.bf16.mxu1 %v8036_v14  ;;  %11920 = vmatpush1.bf16.msra.mxu0 %v16024_v37  ;;  %v16111_v37 = vld [vmem:[%s21434_s2 + $0xde0] ss:$16 sps:$4 sm:$0xff]  }
 0x6c7   :  { %11951 = vmatprep.mubr.bf16.mxu0 %v8036_v14  ;;  %11552 = vmatprep.subr.bf16.mxu1 %v16029_v33  ;;  %v16114_v33 = vld [vmem:[%s21434_s2 + $0xde8] ss:$16 sps:$4 sm:$0xff]   ;;  %v16119_v14 = vld [vmem:[%s21434_s2 + $0xe04] ss:$16 sps:$4 sm:$0xff]  }
 0x6c8   :  { %11921 = vmatprep.subr.bf16.mxu0 %v16032_v15  ;;  %v16122_v15 = vld [vmem:[%s21434_s2 + $0xe0c] ss:$16 sps:$4 sm:$0xff]  }
 0x6c9   :  { %11553 = vmatpush1.bf16.msra.mxu1 %v16027_v20  ;;  %v16117_v20 = vld [vmem:[%s21434_s2 + $0xe00] ss:$16 sps:$4 sm:$0xff]  }
 0x6ca   :  { %11922 = vmatpush1.bf16.msra.mxu0 %v16030_v4  ;;  %11554 = vmatprep.subr.bf16.mxu1 %v16035_v29  ;;  %v8035_v4 = vpack.c.bf16 %v20024_v22, %v20024_v22  ;;  %v16120_v29 = vld [vmem:[%s21434_s2 + $0xe08] ss:$16 sps:$4 sm:$0xff]   ;;  %v16123_v22 = vld [vmem:[%s21434_s2 + $0xe20] ss:$16 sps:$4 sm:$0xff]  }
 0x6cb   :  { %11923 = vmatprep.subr.bf16.mxu0 %v16038_v59  ;;  %v16125_v59 = vld [vmem:[%s21434_s2 + $0xe24] ss:$16 sps:$4 sm:$0xff]  }
 0x6cd   :  { %11555 = vmatpush1.bf16.msra.mxu1 %v16033_v16  ;;  %v8038_v16 = vpack.c.bf16 %v20425_v31, %v20425_v31  ;;  %v16131_v31 = vld [vmem:[%s21434_s2 + $0xe44] ss:$16 sps:$4 sm:$0xff]  }
 0x6ce   :  { %11924 = vmatpush1.bf16.msra.mxu0 %v16036_v5  ;;  %11556 = vmatprep.subr.bf16.mxu1 %v16041_v62  ;;  %v16128_v5 = vld [vmem:[%s21434_s2 + $0xe2c] ss:$16 sps:$4 sm:$0xff]   ;;  %v16126_v62 = vld [vmem:[%s21434_s2 + $0xe28] ss:$16 sps:$4 sm:$0xff]  }
 0x6cf   :  { %11925 = vmatprep.subr.bf16.mxu0 %v16044_v44  ;;  %v16134_v44 = vld [vmem:[%s21434_s2 + $0xe4c] ss:$16 sps:$4 sm:$0xff]  }
 0x6d1   :  { %11557 = vmatpush1.bf16.msra.mxu1 %v16039_v17  ;;  %v16129_v17 = vld [vmem:[%s21434_s2 + $0xe40] ss:$16 sps:$4 sm:$0xff]  }
 0x6d2   :  { %11926 = vmatpush1.bf16.msra.mxu0 %v16042_v61  ;;  %11558 = vmatprep.subr.bf16.mxu1 %v16047_v43  ;;  %v16132_v61 = vld [vmem:[%s21434_s2 + $0xe48] ss:$16 sps:$4 sm:$0xff]   ;;  %v16137_v43 = vld [vmem:[%s21434_s2 + $0xe64] ss:$16 sps:$4 sm:$0xff]  }
 0x6d3   :  { %11927 = vmatprep.subr.bf16.mxu0 %v16050_v23  ;;  %v16140_v23 = vld [vmem:[%s21434_s2 + $0xe6c] ss:$16 sps:$4 sm:$0xff]  }
 0x6d5   :  { %11559 = vmatpush1.bf16.msra.mxu1 %v16045_v24  ;;  %v16135_v24 = vld [vmem:[%s21434_s2 + $0xe60] ss:$16 sps:$4 sm:$0xff]  }
 0x6d6   :  { %11928 = vmatpush1.bf16.msra.mxu0 %v16048_v25  ;;  %11560 = vmatprep.subr.bf16.mxu1 %v16053_v9  ;;  %v16138_v25 = vld [vmem:[%s21434_s2 + $0xe68] ss:$16 sps:$4 sm:$0xff]   ;;  %v16143_v9 = vld [vmem:[%s21434_s2 + $0xe84] ss:$16 sps:$4 sm:$0xff]  }
 0x6d7   :  { %11929 = vmatprep.subr.bf16.mxu0 %v16056_v26  ;;  %v16146_v26 = vld [vmem:[%s21434_s2 + $0xe8c] ss:$16 sps:$4 sm:$0xff]  }
 0x6d9   :  { %11561 = vmatpush1.bf16.msra.mxu1 %v16051_v18  ;;  %v16141_v18 = vld [vmem:[%s21434_s2 + $0xe80] ss:$16 sps:$4 sm:$0xff]  }
 0x6da   :  { %11930 = vmatpush1.bf16.msra.mxu0 %v16054_v36  ;;  %11562 = vmatprep.subr.bf16.mxu1 %v16059_v39  ;;  %v16144_v36 = vld [vmem:[%s21434_s2 + $0xe88] ss:$16 sps:$4 sm:$0xff]   ;;  %v16149_v39 = vld [vmem:[%s21434_s2 + $0xea4] ss:$16 sps:$4 sm:$0xff]  }
 0x6db   :  { %11931 = vmatprep.subr.bf16.mxu0 %v16062_v40  ;;  %v16152_v40 = vld [vmem:[%s21434_s2 + $0xeac] ss:$16 sps:$4 sm:$0xff]  }
 0x6dd   :  { %11563 = vmatpush1.bf16.msra.mxu1 %v16057_v42  ;;  %v16147_v42 = vld [vmem:[%s21434_s2 + $0xea0] ss:$16 sps:$4 sm:$0xff]  }
 0x6de   :  { %11932 = vmatpush1.bf16.msra.mxu0 %v16060_v32  ;;  %11564 = vmatprep.subr.bf16.mxu1 %v16065_v46  ;;  %v16150_v32 = vld [vmem:[%s21434_s2 + $0xea8] ss:$16 sps:$4 sm:$0xff]   ;;  %v16155_v46 = vld [vmem:[%s21434_s2 + $0xec4] ss:$16 sps:$4 sm:$0xff]  }
 0x6df   :  { %11933 = vmatprep.subr.bf16.mxu0 %v16068_v35  ;;  %v16158_v35 = vld [vmem:[%s21434_s2 + $0xecc] ss:$16 sps:$4 sm:$0xff]  }
 0x6e1   :  { %11565 = vmatpush1.bf16.msra.mxu1 %v16063_v8  ;;  %v16153_v8 = vld [vmem:[%s21434_s2 + $0xec0] ss:$16 sps:$4 sm:$0xff]  }
 0x6e2   :  { %11934 = vmatpush1.bf16.msra.mxu0 %v16066_v2  ;;  %11566 = vmatprep.subr.bf16.mxu1 %v16071_v47  ;;  %v16156_v2 = vld [vmem:[%s21434_s2 + $0xec8] ss:$16 sps:$4 sm:$0xff]   ;;  %v16161_v47 = vld [vmem:[%s21434_s2 + $0xee4] ss:$16 sps:$4 sm:$0xff]  }
 0x6e3   :  { %11935 = vmatprep.subr.bf16.mxu0 %v16074_v48  ;;  %v16164_v48 = vld [vmem:[%s21434_s2 + $0xeec] ss:$16 sps:$4 sm:$0xff]  }
 0x6e5   :  { %11567 = vmatpush1.bf16.msra.mxu1 %v16069_v49  ;;  %v16159_v49 = vld [vmem:[%s21434_s2 + $0xee0] ss:$16 sps:$4 sm:$0xff]  }
 0x6e6   :  { %11936 = vmatpush1.bf16.msra.mxu0 %v16072_v50  ;;  %11568 = vmatprep.subr.bf16.mxu1 %v16077_v51  ;;  %v16162_v50 = vld [vmem:[%s21434_s2 + $0xee8] ss:$16 sps:$4 sm:$0xff]   ;;  %v16167_v51 = vld [vmem:[%s21434_s2 + $0xf04] ss:$16 sps:$4 sm:$0xff]  }
 0x6e7   :  { %11937 = vmatprep.subr.bf16.mxu0 %v16080_v52  ;;  %v16170_v52 = vld [vmem:[%s21434_s2 + $0xf0c] ss:$16 sps:$4 sm:$0xff]  }
 0x6e9   :  { %11569 = vmatpush1.bf16.msra.mxu1 %v16075_v53  ;;  %v16165_v53 = vld [vmem:[%s21434_s2 + $0xf00] ss:$16 sps:$4 sm:$0xff]  }
 0x6ea   :  { %11938 = vmatpush1.bf16.msra.mxu0 %v16078_v54  ;;  %11570 = vmatprep.subr.bf16.mxu1 %v16083_v55  ;;  %v16168_v54 = vld [vmem:[%s21434_s2 + $0xf08] ss:$16 sps:$4 sm:$0xff]   ;;  %v16173_v55 = vld [vmem:[%s21434_s2 + $0xf24] ss:$16 sps:$4 sm:$0xff]  }
 0x6eb   :  { %11939 = vmatprep.subr.bf16.mxu0 %v16086_v56  ;;  %v16176_v56 = vld [vmem:[%s21434_s2 + $0xf2c] ss:$16 sps:$4 sm:$0xff]  }
 0x6ed   :  { %11571 = vmatpush1.bf16.msra.mxu1 %v16081_v57  ;;  %v16171_v57 = vld [vmem:[%s21434_s2 + $0xf20] ss:$16 sps:$4 sm:$0xff]  }
 0x6ee   :  { %11940 = vmatpush1.bf16.msra.mxu0 %v16084_v58  ;;  %11572 = vmatprep.subr.bf16.mxu1 %v16089_v60  ;;  %v16174_v58 = vld [vmem:[%s21434_s2 + $0xf28] ss:$16 sps:$4 sm:$0xff]   ;;  %v16179_v60 = vld [vmem:[%s21434_s2 + $0xf44] ss:$16 sps:$4 sm:$0xff]  }
 0x6ef   :  { %11941 = vmatprep.subr.bf16.mxu0 %v16092_v3  ;;  %v16182_v3 = vld [vmem:[%s21434_s2 + $0xf4c] ss:$16 sps:$4 sm:$0xff]  }
 0x6f1   :  { %11573 = vmatpush1.bf16.msra.mxu1 %v16087_v11  ;;  %v16177_v11 = vld [vmem:[%s21434_s2 + $0xf40] ss:$16 sps:$4 sm:$0xff]  }
 0x6f2   :  { %11942 = vmatpush1.bf16.msra.mxu0 %v16090_v6  ;;  %11574 = vmatprep.subr.bf16.mxu1 %v16095_v19  ;;  %v16180_v6 = vld [vmem:[%s21434_s2 + $0xf48] ss:$16 sps:$4 sm:$0xff]   ;;  %v16185_v19 = vld [vmem:[%s21434_s2 + $0xf64] ss:$16 sps:$4 sm:$0xff]  }
 0x6f3   :  { %11943 = vmatprep.subr.bf16.mxu0 %v16098_v0  ;;  %v16188_v0 = vld [vmem:[%s21434_s2 + $0xf6c] ss:$16 sps:$4 sm:$0xff]  }
 0x6f5   :  { %11575 = vmatpush1.bf16.msra.mxu1 %v16093_v41  ;;  %v16183_v41 = vld [vmem:[%s21434_s2 + $0xf60] ss:$16 sps:$4 sm:$0xff]  }
 0x6f6   :  { %11944 = vmatpush1.bf16.msra.mxu0 %v16096_v27  ;;  %11576 = vmatprep.subr.bf16.mxu1 %v16101_v30  ;;  %v16186_v27 = vld [vmem:[%s21434_s2 + $0xf68] ss:$16 sps:$4 sm:$0xff]   ;;  %v16191_v30 = vld [vmem:[%s21434_s2 + $0xf84] ss:$16 sps:$4 sm:$0xff]  }
 0x6f7   :  { %11945 = vmatprep.subr.bf16.mxu0 %v16104_v1  ;;  %v16194_v1 = vld [vmem:[%s21434_s2 + $0xf8c] ss:$16 sps:$4 sm:$0xff]  }
 0x6f9   :  { %11577 = vmatpush1.bf16.msra.mxu1 %v16099_v45  ;;  %v16189_v45 = vld [vmem:[%s21434_s2 + $0xf80] ss:$16 sps:$4 sm:$0xff]  }
 0x6fa   :  { %11946 = vmatpush1.bf16.msra.mxu0 %v16102_v7  ;;  %11578 = vmatprep.subr.bf16.mxu1 %v16107_v10  ;;  %v16192_v7 = vld [vmem:[%s21434_s2 + $0xf88] ss:$16 sps:$4 sm:$0xff]   ;;  %v16197_v10 = vld [vmem:[%s21434_s2 + $0xfa4] ss:$16 sps:$4 sm:$0xff]  }
 0x6fb   :  { %11947 = vmatprep.subr.bf16.mxu0 %v16110_v28  ;;  %v16200_v28 = vld [vmem:[%s21434_s2 + $0xfac] ss:$16 sps:$4 sm:$0xff]  }
 0x6fd   :  { %11579 = vmatpush1.bf16.msra.mxu1 %v16105_v21  ;;  %v16195_v21 = vld [vmem:[%s21434_s2 + $0xfa0] ss:$16 sps:$4 sm:$0xff]  }
 0x6fe   :  { %11948 = vmatpush1.bf16.msra.mxu0 %v16108_v38  ;;  %11580 = vmatprep.subr.bf16.mxu1 %v16113_v34  ;;  %v16198_v38 = vld [vmem:[%s21434_s2 + $0xfa8] ss:$16 sps:$4 sm:$0xff]   ;;  %v16203_v34 = vld [vmem:[%s21434_s2 + $0xfc4] ss:$16 sps:$4 sm:$0xff]  }
 0x6ff   :  { %11949 = vmatprep.subr.bf16.mxu0 %v16116_v12  ;;  %v16206_v12 = vld [vmem:[%s21434_s2 + $0xfcc] ss:$16 sps:$4 sm:$0xff]  }
 0x701   :  { %11581 = vmatpush1.bf16.msra.mxu1 %v16111_v37  ;;  %v16201_v37 = vld [vmem:[%s21434_s2 + $0xfc0] ss:$16 sps:$4 sm:$0xff]  }
 0x702   :  { %11950 = vmatpush1.bf16.msra.mxu0 %v16114_v33  ;;  %11591 = vmatprep.subr.bf16.mxu1 %v16119_v14  ;;  %v16204_v33 = vld [vmem:[%s21434_s2 + $0xfc8] ss:$16 sps:$4 sm:$0xff]   ;;  %v16209_v14 = vld [vmem:[%s21434_s2 + $0xfe4] ss:$16 sps:$4 sm:$0xff]  }
 0x703   :  { %11960 = vmatprep.subr.bf16.mxu0 %v16122_v15  ;;  %v16212_v15 = vld [vmem:[%s21434_s2 + $0xfec] ss:$16 sps:$4 sm:$0xff]  }
 0x704   :  { %11583 = vmatmul.mubr.bf16.vlgmr.msra.gmra.mrb[36].mxu1 %v8035_v4 }
 0x705   :  { %11952 = vmatmul.mubr.bf16.vlgmr.msra.gmra.mrb[36].mxu0 %v8035_v4  ;;  %11592 = vmatpush1.bf16.msra.mxu1 %v16117_v20  ;;  %v16207_v20 = vld [vmem:[%s21434_s2 + $0xfe0] ss:$16 sps:$4 sm:$0xff]   ;;  %v16210_v4 = vld [vmem:[%s21434_s2 + $0xfe8] ss:$16 sps:$4 sm:$0xff]  }
 0x706   :  { %11623 = vmatprep.mubr.bf16.mxu1 %v8038_v16  ;;  %11961 = vmatpush1.bf16.msra.mxu0 %v16120_v29  ;;  %v16215_v29 = vld [vmem:[%s21434_s2 + $0x1004] ss:$16 sps:$4 sm:$0xff]  }
 0x707   :  { %11992 = vmatprep.mubr.bf16.mxu0 %v8038_v16  ;;  %11593 = vmatprep.subr.bf16.mxu1 %v16125_v59  ;;  %v16218_v59 = vld [vmem:[%s21434_s2 + $0x100c] ss:$16 sps:$4 sm:$0xff]   ;;  %v16213_v16 = vld [vmem:[%s21434_s2 + $0x1000] ss:$16 sps:$4 sm:$0xff]  }
 0x708   :  { %11962 = vmatprep.subr.bf16.mxu0 %v16128_v5  ;;  %v8037_v5 = vpack.c.bf16 %v20427_v13, %v20427_v13  ;;  %v16219_v13 = vld [vmem:[%s21434_s2 + $0x1020] ss:$16 sps:$4 sm:$0xff]  }
 0x709   :  { %11594 = vmatpush1.bf16.msra.mxu1 %v16123_v22  ;;  %v16216_v22 = vld [vmem:[%s21434_s2 + $0x1008] ss:$16 sps:$4 sm:$0xff]  }
 0x70a   :  { %11963 = vmatpush1.bf16.msra.mxu0 %v16126_v62  ;;  %11595 = vmatprep.subr.bf16.mxu1 %v16131_v31  ;;  %v16221_v62 = vld [vmem:[%s21434_s2 + $0x1024] ss:$16 sps:$4 sm:$0xff]   ;;  %v16224_v31 = vld [vmem:[%s21434_s2 + $0x102c] ss:$16 sps:$4 sm:$0xff]  }
 0x70b   :  { %11964 = vmatprep.subr.bf16.mxu0 %v16134_v44  ;;  %v16222_v44 = vld [vmem:[%s21434_s2 + $0x1028] ss:$16 sps:$4 sm:$0xff]  }
 0x70d   :  { %11596 = vmatpush1.bf16.msra.mxu1 %v16129_v17  ;;  %v16227_v17 = vld [vmem:[%s21434_s2 + $0x1044] ss:$16 sps:$4 sm:$0xff]  }
 0x70e   :  { %11965 = vmatpush1.bf16.msra.mxu0 %v16132_v61  ;;  %11597 = vmatprep.subr.bf16.mxu1 %v16137_v43  ;;  %v16230_v61 = vld [vmem:[%s21434_s2 + $0x104c] ss:$16 sps:$4 sm:$0xff]   ;;  %v16263_v43 = vmov 0  }
 0x70f   :  { %11966 = vmatprep.subr.bf16.mxu0 %v16140_v23  ;;  %v16225_v23 = vld [vmem:[%s21434_s2 + $0x1040] ss:$16 sps:$4 sm:$0xff]  }
 0x711   :  { %11598 = vmatpush1.bf16.msra.mxu1 %v16135_v24  ;;  %v16228_v24 = vld [vmem:[%s21434_s2 + $0x1048] ss:$16 sps:$4 sm:$0xff]  }
 0x712   :  { %11967 = vmatpush1.bf16.msra.mxu0 %v16138_v25  ;;  %11599 = vmatprep.subr.bf16.mxu1 %v16143_v9  ;;  %v16233_v25 = vld [vmem:[%s21434_s2 + $0x1064] ss:$16 sps:$4 sm:$0xff]   ;;  %v16236_v9 = vld [vmem:[%s21434_s2 + $0x106c] ss:$16 sps:$4 sm:$0xff]  }
 0x713   :  { %11968 = vmatprep.subr.bf16.mxu0 %v16146_v26  ;;  %v16231_v26 = vld [vmem:[%s21434_s2 + $0x1060] ss:$16 sps:$4 sm:$0xff]  }
 0x715   :  { %11600 = vmatpush1.bf16.msra.mxu1 %v16141_v18  ;;  %v16234_v18 = vld [vmem:[%s21434_s2 + $0x1068] ss:$16 sps:$4 sm:$0xff]  }
 0x716   :  { %11969 = vmatpush1.bf16.msra.mxu0 %v16144_v36  ;;  %11601 = vmatprep.subr.bf16.mxu1 %v16149_v39  ;;  %v16239_v36 = vld [vmem:[%s21434_s2 + $0x1084] ss:$16 sps:$4 sm:$0xff]   ;;  %v16242_v39 = vld [vmem:[%s21434_s2 + $0x108c] ss:$16 sps:$4 sm:$0xff]  }
 0x717   :  { %11970 = vmatprep.subr.bf16.mxu0 %v16152_v40  ;;  %v16237_v40 = vld [vmem:[%s21434_s2 + $0x1080] ss:$16 sps:$4 sm:$0xff]  }
 0x719   :  { %11602 = vmatpush1.bf16.msra.mxu1 %v16147_v42  ;;  %v16240_v42 = vld [vmem:[%s21434_s2 + $0x1088] ss:$16 sps:$4 sm:$0xff]  }
 0x71a   :  { %11971 = vmatpush1.bf16.msra.mxu0 %v16150_v32  ;;  %11603 = vmatprep.subr.bf16.mxu1 %v16155_v46  ;;  %v16245_v32 = vld [vmem:[%s21434_s2 + $0x10a4] ss:$16 sps:$4 sm:$0xff]   ;;  %v16248_v46 = vld [vmem:[%s21434_s2 + $0x10ac] ss:$16 sps:$4 sm:$0xff]  }
 0x71b   :  { %11972 = vmatprep.subr.bf16.mxu0 %v16158_v35  ;;  %v16243_v35 = vld [vmem:[%s21434_s2 + $0x10a0] ss:$16 sps:$4 sm:$0xff]  }
 0x71d   :  { %11604 = vmatpush1.bf16.msra.mxu1 %v16153_v8  ;;  %v16246_v8 = vld [vmem:[%s21434_s2 + $0x10a8] ss:$16 sps:$4 sm:$0xff]  }
 0x71e   :  { %11973 = vmatpush1.bf16.msra.mxu0 %v16156_v2  ;;  %11605 = vmatprep.subr.bf16.mxu1 %v16161_v47  ;;  %v16251_v2 = vld [vmem:[%s21434_s2 + $0x10c4] ss:$16 sps:$4 sm:$0xff]   ;;  %v16254_v47 = vld [vmem:[%s21434_s2 + $0x10cc] ss:$16 sps:$4 sm:$0xff]  }
 0x71f   :  { %11974 = vmatprep.subr.bf16.mxu0 %v16164_v48  ;;  %v16249_v48 = vld [vmem:[%s21434_s2 + $0x10c0] ss:$16 sps:$4 sm:$0xff]  }
 0x721   :  { %11606 = vmatpush1.bf16.msra.mxu1 %v16159_v49  ;;  %v16252_v49 = vld [vmem:[%s21434_s2 + $0x10c8] ss:$16 sps:$4 sm:$0xff]  }
 0x722   :  { %11975 = vmatpush1.bf16.msra.mxu0 %v16162_v50  ;;  %11607 = vmatprep.subr.bf16.mxu1 %v16167_v51  ;;  %v16257_v50 = vld [vmem:[%s21434_s2 + $0x10e4] ss:$16 sps:$4 sm:$0xff]   ;;  %v16260_v51 = vld [vmem:[%s21434_s2 + $0x10ec] ss:$16 sps:$4 sm:$0xff]  }
 0x723   :  { %11976 = vmatprep.subr.bf16.mxu0 %v16170_v52  ;;  %v16255_v52 = vld [vmem:[%s21434_s2 + $0x10e0] ss:$16 sps:$4 sm:$0xff]  }
 0x725   :  { %11608 = vmatpush1.bf16.msra.mxu1 %v16165_v53  ;;  %v16258_v53 = vld [vmem:[%s21434_s2 + $0x10e8] ss:$16 sps:$4 sm:$0xff]  }
 0x726   :  { %11977 = vmatpush1.bf16.msra.mxu0 %v16168_v54  ;;  %11609 = vmatprep.subr.bf16.mxu1 %v16173_v55  ;;  %v8039_v54 = vpack.c.bf16 %v20432_v63, %v20432_v63 }
 0x727   :  { %11978 = vmatprep.subr.bf16.mxu0 %v16176_v56 }
 0x729   :  { %11610 = vmatpush1.bf16.msra.mxu1 %v16171_v57 }
 0x72a   :  { %11979 = vmatpush1.bf16.msra.mxu0 %v16174_v58  ;;  %11611 = vmatprep.subr.bf16.mxu1 %v16179_v60 }
 0x72b   :  { %11980 = vmatprep.subr.bf16.mxu0 %v16182_v3 }
 0x72d   :  { %11612 = vmatpush1.bf16.msra.mxu1 %v16177_v11 }
 0x72e   :  { %11981 = vmatpush1.bf16.msra.mxu0 %v16180_v6  ;;  %11613 = vmatprep.subr.bf16.mxu1 %v16185_v19 }
 0x72f   :  { %11982 = vmatprep.subr.bf16.mxu0 %v16188_v0 }
 0x731   :  { %11614 = vmatpush1.bf16.msra.mxu1 %v16183_v41 }
 0x732   :  { %11983 = vmatpush1.bf16.msra.mxu0 %v16186_v27  ;;  %11615 = vmatprep.subr.bf16.mxu1 %v16191_v30 }
 0x733   :  { %11984 = vmatprep.subr.bf16.mxu0 %v16194_v1 }
 0x735   :  { %11616 = vmatpush1.bf16.msra.mxu1 %v16189_v45 }
 0x736   :  { %11985 = vmatpush1.bf16.msra.mxu0 %v16192_v7  ;;  %11617 = vmatprep.subr.bf16.mxu1 %v16197_v10 }
 0x737   :  { %11986 = vmatprep.subr.bf16.mxu0 %v16200_v28 }
 0x739   :  { %11618 = vmatpush1.bf16.msra.mxu1 %v16195_v21 }
 0x73a   :  { %11987 = vmatpush1.bf16.msra.mxu0 %v16198_v38  ;;  %11619 = vmatprep.subr.bf16.mxu1 %v16203_v34 }
 0x73b   :  { %11988 = vmatprep.subr.bf16.mxu0 %v16206_v12 }
 0x73d   :  { %11620 = vmatpush1.bf16.msra.mxu1 %v16201_v37 }
 0x73e   :  { %11989 = vmatpush1.bf16.msra.mxu0 %v16204_v33  ;;  %11621 = vmatprep.subr.bf16.mxu1 %v16209_v14 }
 0x73f   :  { %11990 = vmatprep.subr.bf16.mxu0 %v16212_v15 }
 0x741   :  { %11622 = vmatpush1.bf16.msra.mxu1 %v16207_v20 }
 0x742   :  { %11991 = vmatpush1.bf16.msra.mxu0 %v16210_v4  ;;  %11632 = vmatprep.subr.bf16.mxu1 %v16215_v29 }
 0x743   :  { %12001 = vmatprep.subr.bf16.mxu0 %v16218_v59 }
 0x744   :  { %11624 = vmatmul.mubr.bf16.vlgmr.msra.gmra.mrb[36].mxu1 %v8037_v5 }
 0x745   :  { %11993 = vmatmul.mubr.bf16.vlgmr.msra.gmra.mrb[36].mxu0 %v8037_v5  ;;  %11633 = vmatpush1.bf16.msra.mxu1 %v16213_v16 }
 0x746   :  { %12002 = vmatpush1.bf16.msra.mxu0 %v16216_v22  ;;  %11634 = vmatprep.subr.bf16.mxu1 %v16221_v62 }
 0x747   :  { %12003 = vmatprep.subr.bf16.mxu0 %v16224_v31  ;;  %11664 = vmatprep.mubr.bf16.mxu1 %v16263_v43 }
 0x748   :  { %12033 = vmatprep.mubr.bf16.mxu0 %v16263_v43 }
 0x749   :  { %11635 = vmatpush1.bf16.msra.mxu1 %v16219_v13 }
 0x74a   :  { %12004 = vmatpush1.bf16.msra.mxu0 %v16222_v44  ;;  %11636 = vmatprep.subr.bf16.mxu1 %v16227_v17 }
 0x74b   :  { %12005 = vmatprep.subr.bf16.mxu0 %v16230_v61 }
 0x74d   :  { %11637 = vmatpush1.bf16.msra.mxu1 %v16225_v23 }
 0x74e   :  { %12006 = vmatpush1.bf16.msra.mxu0 %v16228_v24  ;;  %11638 = vmatprep.subr.bf16.mxu1 %v16233_v25 }
 0x74f   :  { %12007 = vmatprep.subr.bf16.mxu0 %v16236_v9 }
 0x751   :  { %11639 = vmatpush1.bf16.msra.mxu1 %v16231_v26 }
 0x752   :  { %12008 = vmatpush1.bf16.msra.mxu0 %v16234_v18  ;;  %11640 = vmatprep.subr.bf16.mxu1 %v16239_v36 }
 0x753   :  { %12009 = vmatprep.subr.bf16.mxu0 %v16242_v39 }
 0x755   :  { %11641 = vmatpush1.bf16.msra.mxu1 %v16237_v40 }
 0x756   :  { %12010 = vmatpush1.bf16.msra.mxu0 %v16240_v42  ;;  %11642 = vmatprep.subr.bf16.mxu1 %v16245_v32 }
 0x757   :  { %12011 = vmatprep.subr.bf16.mxu0 %v16248_v46 }
 0x759   :  { %11643 = vmatpush1.bf16.msra.mxu1 %v16243_v35 }
 0x75a   :  { %12012 = vmatpush1.bf16.msra.mxu0 %v16246_v8  ;;  %11644 = vmatprep.subr.bf16.mxu1 %v16251_v2 }
 0x75b   :  { %12013 = vmatprep.subr.bf16.mxu0 %v16254_v47 }
 0x75d   :  { %11645 = vmatpush1.bf16.msra.mxu1 %v16249_v48 }
 0x75e   :  { %12014 = vmatpush1.bf16.msra.mxu0 %v16252_v49  ;;  %11646 = vmatprep.subr.bf16.mxu1 %v16257_v50 }
 0x75f   :  { %12015 = vmatprep.subr.bf16.mxu0 %v16260_v51 }
 0x761   :  { %11647 = vmatpush1.bf16.msra.mxu1 %v16255_v52 }
 0x762   :  { %12016 = vmatpush1.bf16.msra.mxu0 %v16258_v53 }
 0x764   :  { %11665 = vmatmul.mubr.bf16.vlgmr.msra.gmra.mrb[36].mxu1 %v8039_v54 }
 0x765   :  { %12034 = vmatmul.mubr.bf16.vlgmr.msra.gmra.mrb[36].mxu0 %v8039_v54 }
 0x837   :  { %v11666_v55 = vpop.f32.mrb[36].mxu1 }
 0x838   :  { %12042 = vst [vmem:[%s21435_s3] sm:$0xff] %v11666_v55  ;;  %v12035_v56 = vpop.f32.mrb[36].mxu0  ;;  %v11668_v57 = vpop.f32.mrb[37].mxu1 }
 0x839   :  { %12044 = vst [vmem:[%s21435_s3 + $0x10] sm:$0xff] %v12035_v56  ;;  %12043 = vst [vmem:[%s21435_s3 + $0x8] sm:$0xff] %v11668_v57  ;;  %v12037_v58 = vpop.f32.mrb[37].mxu0  ;;  %v11670_v63 = vpop.f32.mrb[38].mxu1 }
 0x83a   :  { %12045 = vst [vmem:[%s21435_s3 + $0x18] sm:$0xff] %v12037_v58  ;;  %v12039_v60 = vpop.f32.mrb[38].mxu0  ;;  %v11671_v3 = vpop.f32.mrb[39].mxu1 }
 0x83b   :  { %v12040_v11 = vpop.f32.mrb[39].mxu0 }

</bundles_post_ra>
